<compile_context>
chip_gen: v7x
topology: tpu7x:2x2x1
jax: 0.10.0
libtpu: 0.0.40
codegen_flags: <defaults>
</compile_context>

<pallas_src>
import math

import jax
import jax.numpy as jnp
from jax.experimental import pallas as pl
from jax.experimental.pallas import tpu as pltpu

H = 64                 # LSTM hidden size (per direction)
D_MODEL = 2 * H        # 128, bidirectional feature size
N_ACTIONS = 22
IN_FEAT = 7
OUT_PAD = 128          # lane-dense padded output width
G4 = 4 * H             # 256 gate pre-activations per direction
G8 = 8 * H             # 512 fused fwd|bwd gate pre-activations

# bf16 MXU operands (f32 accumulation): ~3x MXU throughput on the serialized
# recurrent matmuls vs emulated f32 matmuls.  Only matmul operands are
# narrowed; all elementwise math stays f32.
MATMUL_DTYPE = jnp.bfloat16


def _round_up(n, m):
    return ((n + m - 1) // m) * m


def _sigmoid(z):
    # tanh-based sigmoid: one EUP tanh instead of exp + exact divide.
    return 0.5 * jnp.tanh(0.5 * z) + 0.5


def _mxu(a, b):
    """MXU matmul with f32 accumulation (operands narrowed to MATMUL_DTYPE)."""
    return jnp.dot(a.astype(MATMUL_DTYPE), b.astype(MATMUL_DTYPE),
                   preferred_element_type=jnp.float32)


def _bilstm(xp_ref, w_hh_ref, seq_ref, Bt, T):
    """Interleaved fwd/bwd LSTM over precomputed input projections.

    xp_ref:   (T*Bt, 8H) gate pre-activations; lanes [0:4H) fwd, [4H:8H) bwd,
              per-direction gate order [i | f | o | g].
    w_hh_ref: (2H, 8H) block-diagonal fused recurrent weight
              [[W_hh_f, 0], [0, W_hh_b]]  (bf16).
    seq_ref:  (T*Bt, 2H) output; lanes [0:H) fwd hidden, [H:2H) bwd hidden.
    """
    w_hh = w_hh_ref[...]                       # hoisted out of the loop
    hf = jnp.zeros((Bt, H), jnp.float32)
    cf = jnp.zeros((Bt, H), jnp.float32)
    hb = jnp.zeros((Bt, H), jnp.float32)
    cb = jnp.zeros((Bt, H), jnp.float32)
    for t in range(T):                          # T small & static -> unrolled
        tb = T - 1 - t
        # fwd step t and bwd step T-1-t share one fused recurrent matmul.
        xp_pair = jnp.concatenate(
            [xp_ref[pl.ds(t * Bt, Bt), 0:G4],
             xp_ref[pl.ds(tb * Bt, Bt), G4:G8]], axis=-1)       # (Bt, 8H)
        h_pair = jnp.concatenate([hf, hb], axis=-1)             # (Bt, 2H)
        z = xp_pair + _mxu(h_pair, w_hh)                        # (Bt, 8H)
        sf = _sigmoid(z[:, 0:3 * H])            # fwd [i|f|o]
        gf = jnp.tanh(z[:, 3 * H:G4])           # fwd g
        sb = _sigmoid(z[:, G4:G4 + 3 * H])      # bwd [i|f|o]
        gb = jnp.tanh(z[:, G4 + 3 * H:G8])      # bwd g
        cf = sf[:, H:2 * H] * cf + sf[:, 0:H] * gf
        hf = sf[:, 2 * H:3 * H] * jnp.tanh(cf)
        cb = sb[:, H:2 * H] * cb + sb[:, 0:H] * gb
        hb = sb[:, 2 * H:3 * H] * jnp.tanh(cb)
        seq_ref[pl.ds(t * Bt, Bt), 0:H] = hf
        seq_ref[pl.ds(tb * Bt, Bt), H:2 * H] = hb


def weather_kernel(x_ref, tw_ref,
                   w_ih1_ref, w_hh1_ref, b1_ref,
                   w_ih2_ref, w_hh2_ref, b2_ref,
                   w_qkv_ref, b_qkv_ref,
                   w_fc1_ref, b_fc1_ref, w_fc2_ref, b_fc2_ref,
                   w_out_ref, b_out_ref,
                   out_ref,
                   xp_ref, seq1_ref, seq2_ref, qkv_ref):
    T, Bt, F = x_ref.shape
    TB = T * Bt

    # ---- biLSTM 1: ONE fused (T*Bt, 7) @ (7, 512) input projection.
    x_flat = x_ref[...].reshape(TB, F)
    xp_ref[...] = _mxu(x_flat, w_ih1_ref[...]) + b1_ref[...]
    _bilstm(xp_ref, w_hh1_ref, seq1_ref, Bt, T)

    # ---- time-weight gating + biLSTM 2: ONE (T*Bt, 128) @ (128, 512).
    # xp_ref is reused: layer-1 gate pre-activations are fully consumed
    # (program order of ref effects) before being overwritten here.
    gated = seq1_ref[...] * tw_ref[...].reshape(TB, 1)
    xp_ref[...] = _mxu(gated, w_ih2_ref[...]) + b2_ref[...]
    _bilstm(xp_ref, w_hh2_ref, seq2_ref, Bt, T)

    # ---- self-attention: ONE fused (T*Bt, 128) @ (128, 384) Q|K|V
    # projection (1/sqrt(d_model) folded into the Q columns at wrapper time).
    qkv_ref[...] = _mxu(seq2_ref[...], w_qkv_ref[...]) + b_qkv_ref[...]

    # Softmax over keys: the T logits for each query step are packed into one
    # (Bt, T) lane slab (single max/exp/sum along lanes, small vreg
    # footprint).  The mean pool over query steps is folded into per-key
    # pooled weights so V is weighted exactly once at the end.
    pw = jnp.zeros((Bt, T), jnp.float32)
    for t in range(T):
        q_t = qkv_ref[pl.ds(t * Bt, Bt), 0:D_MODEL]               # (Bt, 128)
        logits = jnp.concatenate(
            [jnp.sum(q_t * qkv_ref[pl.ds(s * Bt, Bt), D_MODEL:2 * D_MODEL],
                     axis=-1, keepdims=True) for s in range(T)],
            axis=-1)                                              # (Bt, T)
        m = jnp.max(logits, axis=-1, keepdims=True)
        p = jnp.exp(logits - m)
        denom = jnp.sum(p, axis=-1, keepdims=True)
        pw = pw + p * pl.reciprocal(denom, approx=True)           # EUP slot
    pooled = jnp.zeros((Bt, D_MODEL), jnp.float32)
    for s in range(T):
        pooled = pooled + pw[:, s:s + 1] * \
            qkv_ref[pl.ds(s * Bt, Bt), 2 * D_MODEL:3 * D_MODEL]
    pooled = pooled * (1.0 / T)                                   # mean pool

    # ---- MLP head (output padded to 128 lanes -> unmasked lane-dense store).
    s1 = jnp.maximum(_mxu(pooled, w_fc1_ref[...]) + b_fc1_ref[...], 0.0)
    s2 = jnp.maximum(_mxu(s1, w_fc2_ref[...]) + b_fc2_ref[...], 0.0)
    out_ref[...] = _mxu(s2, w_out_ref[...]) + b_out_ref[...]


def _reorder_gates(w):
    """Permute gate blocks [i|f|g|o] -> [i|f|o|g] along the last axis."""
    return jnp.concatenate([w[..., 0:2 * H], w[..., 3 * H:4 * H],
                            w[..., 2 * H:3 * H]], axis=-1)


def _fuse_recurrent(w_f, w_b):
    """Block-diagonal (2H, 8H) fused fwd/bwd recurrent weight."""
    z = jnp.zeros((H, G4), jnp.float32)
    top = jnp.concatenate([_reorder_gates(w_f), z], axis=1)
    bot = jnp.concatenate([z, _reorder_gates(w_b)], axis=1)
    return jnp.concatenate([top, bot], axis=0)


def _prepare_params(params):
    """Fuse / reorder / pad the raw per-direction parameters for the kernel."""
    inv_scale = 1.0 / math.sqrt(float(D_MODEL))
    mm = MATMUL_DTYPE
    w_ih1 = jnp.concatenate([_reorder_gates(params["W_ih_l1f"]),
                             _reorder_gates(params["W_ih_l1b"])], axis=1)
    b1 = jnp.concatenate([_reorder_gates(params["b_l1f"]),
                          _reorder_gates(params["b_l1b"])], axis=1)
    w_hh1 = _fuse_recurrent(params["W_hh_l1f"], params["W_hh_l1b"])
    w_ih2 = jnp.concatenate([_reorder_gates(params["W_ih_l2f"]),
                             _reorder_gates(params["W_ih_l2b"])], axis=1)
    b2 = jnp.concatenate([_reorder_gates(params["b_l2f"]),
                          _reorder_gates(params["b_l2b"])], axis=1)
    w_hh2 = _fuse_recurrent(params["W_hh_l2f"], params["W_hh_l2b"])
    w_qkv = jnp.concatenate(
        [params["W_q"] * inv_scale, params["W_k"], params["W_v"]], axis=1)
    b_qkv = jnp.concatenate(
        [params["b_q"] * inv_scale, params["b_k"], params["b_v"]], axis=1)
    w_out = jnp.pad(params["W_out"], ((0, 0), (0, OUT_PAD - N_ACTIONS)))
    b_out = jnp.pad(params["b_out"], ((0, 0), (0, OUT_PAD - N_ACTIONS)))
    # Weights (MXU operands) are cast to bf16 once here; biases stay f32
    # because they are added to f32 accumulations.
    return [
        w_ih1.astype(mm), w_hh1.astype(mm), b1,
        w_ih2.astype(mm), w_hh2.astype(mm), b2,
        w_qkv.astype(mm), b_qkv,
        params["W_fc1"].astype(mm), params["b_fc1"],
        params["W_fc2"].astype(mm), params["b_fc2"],
        w_out.astype(mm), b_out,
    ]


def _cores_per_chip():
    """TensorCores sharing the 'parallel' grid axis on one device (v7x: 2)."""
    try:
        dev = jax.devices()[0]
        n = getattr(dev, "num_cores", None)
        if isinstance(n, int) and n > 0:
            return n
        kind = str(getattr(dev, "device_kind", "")).lower()
        if "v7" in kind:
            return 2
    except Exception:
        pass
    return 1


def weather_dqn(x, time_weight, params, *, b_tile_max=256):
    """x: (B, T, 7) f32, time_weight: (B, T) f32 -> (B, 22) f32."""
    B, T, F = x.shape
    assert F == IN_FEAT
    x = x.astype(jnp.float32)
    tw = time_weight.astype(jnp.float32)

    # Batch tile: multiple of 8 sublanes, capped at b_tile_max.  On chips
    # with 2 TensorCores the batch is split into >=2 tiles so the "parallel"
    # grid axis can be sharded across both cores.  Padded rows are benign
    # (zero input / zero time-weight) and are sliced off at the end.
    n_cores = _cores_per_chip()
    pB0 = _round_up(B, 8)
    b_tile = min(b_tile_max, _round_up(max(1, -(-pB0 // n_cores)), 8))
    pB = _round_up(pB0, b_tile)
    if pB != B:
        x = jnp.pad(x, ((0, pB - B), (0, 0), (0, 0)))
        tw = jnp.pad(tw, ((0, pB - B), (0, 0)))

    # Time-major layout: each LSTM step reads/writes one contiguous
    # (b_tile, lanes) slab; (T, Bt) merges into T*Bt rows for the fused
    # projection matmuls (a free sublane merge since b_tile % 8 == 0).
    x_tm = jnp.transpose(x, (1, 0, 2))                 # (T, pB, F)
    tw_tm = jnp.transpose(tw, (1, 0))[:, :, None]      # (T, pB, 1)

    plist = _prepare_params(params)

    grid = (pB // b_tile,)
    in_specs = [
        pl.BlockSpec((T, b_tile, F), lambda b: (0, b, 0)),
        pl.BlockSpec((T, b_tile, 1), lambda b: (0, b, 0)),
    ]
    for p in plist:
        in_specs.append(
            pl.BlockSpec(p.shape, lambda b, nd=p.ndim: (0,) * nd))
    out_specs = pl.BlockSpec((b_tile, OUT_PAD), lambda b: (b, 0))

    TB = T * b_tile
    scratch_shapes = [
        pltpu.VMEM((TB, G8), jnp.float32),             # fused gate pre-acts
        pltpu.VMEM((TB, D_MODEL), jnp.float32),        # biLSTM-1 output
        pltpu.VMEM((TB, D_MODEL), jnp.float32),        # biLSTM-2 output
        pltpu.VMEM((TB, 3 * D_MODEL), jnp.float32),    # fused Q|K|V
    ]

    out = pl.pallas_call(
        weather_kernel,
        out_shape=jax.ShapeDtypeStruct((pB, OUT_PAD), jnp.float32),
        grid=grid,
        in_specs=in_specs,
        out_specs=out_specs,
        scratch_shapes=scratch_shapes,
        compiler_params=pltpu.CompilerParams(
            dimension_semantics=("parallel",),
            vmem_limit_bytes=48 * 1024 * 1024),
    )(x_tm, tw_tm, *plist)
    return out[:B, :N_ACTIONS]


def init_params(key):
    """Deterministic synthetic parameters (shapes match the PyTorch module).

    Weight matrices are stored transposed as (in_features, out_features);
    per-direction LSTM bias is b_ih + b_hh combined; gate order is [i,f,g,o].
    """
    keys = iter(jax.random.split(key, 64))

    def w(shape, scale=0.1):
        return jax.random.normal(next(keys), shape, jnp.float32) * scale

    params = {}
    for tag, in_dim in [("l1f", IN_FEAT), ("l1b", IN_FEAT),
                        ("l2f", D_MODEL), ("l2b", D_MODEL)]:
        params[f"W_ih_{tag}"] = w((in_dim, 4 * H))
        params[f"W_hh_{tag}"] = w((H, 4 * H))
        params[f"b_{tag}"] = w((1, 4 * H))
    for tag in ["q", "k", "v", "fc1", "fc2"]:
        params[f"W_{tag}"] = w((D_MODEL, D_MODEL))
        params[f"b_{tag}"] = w((1, D_MODEL))
    params["W_out"] = w((D_MODEL, N_ACTIONS))
    params["b_out"] = w((1, N_ACTIONS))
    return params


def reference(x, time_weight, params):
    """Pure-JAX (non-Pallas) batch-major f32 implementation of the module."""
    x = x.astype(jnp.float32)
    tw = time_weight.astype(jnp.float32)

    def lstm_dir(inp, w_ih, w_hh, b, reverse):
        Bb, Tt, _ = inp.shape
        xp = jnp.einsum("bti,ig->btg", inp, w_ih) + b
        h = jnp.zeros((Bb, H), jnp.float32)
        c = jnp.zeros((Bb, H), jnp.float32)
        outs = [None] * Tt
        order = range(Tt - 1, -1, -1) if reverse else range(Tt)
        for t in order:
            z = xp[:, t, :] + jnp.dot(h, w_hh)
            i = jax.nn.sigmoid(z[:, 0:H])
            f = jax.nn.sigmoid(z[:, H:2 * H])
            g = jnp.tanh(z[:, 2 * H:3 * H])
            o = jax.nn.sigmoid(z[:, 3 * H:4 * H])
            c = f * c + i * g
            h = o * jnp.tanh(c)
            outs[t] = h
        return jnp.stack(outs, axis=1)

    def bilstm(inp, tag):
        hf = lstm_dir(inp, params[f"W_ih_{tag}f"], params[f"W_hh_{tag}f"],
                      params[f"b_{tag}f"], reverse=False)
        hb = lstm_dir(inp, params[f"W_ih_{tag}b"], params[f"W_hh_{tag}b"],
                      params[f"b_{tag}b"], reverse=True)
        return jnp.concatenate([hf, hb], axis=-1)

    l1 = bilstm(x, "l1")
    gated = l1 * tw[:, :, None]
    l2 = bilstm(gated, "l2")

    q = jnp.dot(l2, params["W_q"]) + params["b_q"]
    k = jnp.dot(l2, params["W_k"]) + params["b_k"]
    v = jnp.dot(l2, params["W_v"]) + params["b_v"]
    scores = jnp.einsum("btd,bsd->bts", q, k) / math.sqrt(float(D_MODEL))
    w = jax.nn.softmax(scores, axis=-1)
    attn = jnp.einsum("bts,bsd->btd", w, v)
    pooled = jnp.mean(attn, axis=1)

    s = jax.nn.relu(jnp.dot(pooled, params["W_fc1"]) + params["b_fc1"])
    s = jax.nn.relu(jnp.dot(s, params["W_fc2"]) + params["b_fc2"])
    return jnp.dot(s, params["W_out"]) + params["b_out"]


if __name__ == "__main__":
    key = jax.random.PRNGKey(0)
    k_x, k_t, k_p, k_x2, k_t2 = jax.random.split(key, 5)

    T = 8
    params = init_params(k_p)

    # Tolerance: bf16 MXU operands + the EUP approximate reciprocal in the
    # softmax loosen the match vs the f32 reference.
    tol = 2e-2 if MATMUL_DTYPE == jnp.bfloat16 else 2e-3

    # Small smoke test (batch is internally padded to a multiple of 8).
    B = 2
    x = jax.random.normal(k_x, (B, T, IN_FEAT), jnp.float32)
    tw = jax.random.uniform(k_t, (B, T), jnp.float32)
    q_vals = jax.block_until_ready(weather_dqn(x, tw, params))
    q_ref = jax.block_until_ready(reference(x, tw, params))
    assert q_vals.shape == (B, N_ACTIONS), q_vals.shape
    assert jnp.allclose(q_vals, q_ref, rtol=tol, atol=tol), (
        "max abs err", float(jnp.max(jnp.abs(q_vals - q_ref))))

    # Larger batch exercising zero-padding and (on multi-core chips) a
    # multi-tile grid.
    B2 = 130
    x2 = jax.random.normal(k_x2, (B2, T, IN_FEAT), jnp.float32)
    tw2 = jax.random.uniform(k_t2, (B2, T), jnp.float32)
    q2 = jax.block_until_ready(weather_dqn(x2, tw2, params))
    q2_ref = jax.block_until_ready(reference(x2, tw2, params))
    assert q2.shape == (B2, N_ACTIONS), q2.shape
    assert jnp.allclose(q2, q2_ref, rtol=tol, atol=tol), (
        "max abs err", float(jnp.max(jnp.abs(q2 - q2_ref))))

    print("KERNEL_OK")
</pallas_src>

<mosaic_0001>
module attributes {stable_mosaic.version = 11 : i64} {
  func.func @weather_kernel(%arg0: i32, %arg1: memref<8x8x7xf32, #tpu.memory_space<vmem>>, %arg2: memref<8x8x1xf32, #tpu.memory_space<vmem>>, %arg3: memref<7x512xbf16, #tpu.memory_space<vmem>>, %arg4: memref<128x512xbf16, #tpu.memory_space<vmem>>, %arg5: memref<1x512xf32, #tpu.memory_space<vmem>>, %arg6: memref<128x512xbf16, #tpu.memory_space<vmem>>, %arg7: memref<128x512xbf16, #tpu.memory_space<vmem>>, %arg8: memref<1x512xf32, #tpu.memory_space<vmem>>, %arg9: memref<128x384xbf16, #tpu.memory_space<vmem>>, %arg10: memref<1x384xf32, #tpu.memory_space<vmem>>, %arg11: memref<128x128xbf16, #tpu.memory_space<vmem>>, %arg12: memref<1x128xf32, #tpu.memory_space<vmem>>, %arg13: memref<128x128xbf16, #tpu.memory_space<vmem>>, %arg14: memref<1x128xf32, #tpu.memory_space<vmem>>, %arg15: memref<128x128xbf16, #tpu.memory_space<vmem>>, %arg16: memref<1x128xf32, #tpu.memory_space<vmem>>, %arg17: memref<8x128xf32, #tpu.memory_space<vmem>>, %arg18: memref<64x512xf32, #tpu.memory_space<vmem>>, %arg19: memref<64x128xf32, #tpu.memory_space<vmem>>, %arg20: memref<64x128xf32, #tpu.memory_space<vmem>>, %arg21: memref<64x384xf32, #tpu.memory_space<vmem>>) attributes {dimension_semantics = [#tpu.dimension_semantics<parallel>], iteration_bounds = array<i64: 1>, scalar_prefetch = 0 : i64, scratch_operands = 4 : i64, tpu.core_type = #tpu.core_type<tc>, window_params = [{transform_indices = @transform_0, window_bounds = array<i64: 8, 8, 7>}, {transform_indices = @transform_1, window_bounds = array<i64: 8, 8, 1>}, {pipeline_mode = #tpu.pipeline_mode<synchronous>, transform_indices = @transform_2, window_bounds = array<i64: 7, 512>}, {pipeline_mode = #tpu.pipeline_mode<synchronous>, transform_indices = @transform_3, window_bounds = array<i64: 128, 512>}, {pipeline_mode = #tpu.pipeline_mode<synchronous>, transform_indices = @transform_4, window_bounds = array<i64: 1, 512>}, {pipeline_mode = #tpu.pipeline_mode<synchronous>, transform_indices = @transform_5, window_bounds = array<i64: 128, 512>}, {pipeline_mode = #tpu.pipeline_mode<synchronous>, transform_indices = @transform_6, window_bounds = array<i64: 128, 512>}, {pipeline_mode = #tpu.pipeline_mode<synchronous>, transform_indices = @transform_7, window_bounds = array<i64: 1, 512>}, {pipeline_mode = #tpu.pipeline_mode<synchronous>, transform_indices = @transform_8, window_bounds = array<i64: 128, 384>}, {pipeline_mode = #tpu.pipeline_mode<synchronous>, transform_indices = @transform_9, window_bounds = array<i64: 1, 384>}, {pipeline_mode = #tpu.pipeline_mode<synchronous>, transform_indices = @transform_10, window_bounds = array<i64: 128, 128>}, {pipeline_mode = #tpu.pipeline_mode<synchronous>, transform_indices = @transform_11, window_bounds = array<i64: 1, 128>}, {pipeline_mode = #tpu.pipeline_mode<synchronous>, transform_indices = @transform_12, window_bounds = array<i64: 128, 128>}, {pipeline_mode = #tpu.pipeline_mode<synchronous>, transform_indices = @transform_13, window_bounds = array<i64: 1, 128>}, {pipeline_mode = #tpu.pipeline_mode<synchronous>, transform_indices = @transform_14, window_bounds = array<i64: 128, 128>}, {pipeline_mode = #tpu.pipeline_mode<synchronous>, transform_indices = @transform_15, window_bounds = array<i64: 1, 128>}, {transform_indices = @transform_16, window_bounds = array<i64: 8, 128>}]} {
    %c0 = arith.constant 0 : index
    %c0_0 = arith.constant 0 : index
    %c0_1 = arith.constant 0 : index
    %0 = vector.load %arg1[%c0, %c0_0, %c0_1] : memref<8x8x7xf32, #tpu.memory_space<vmem>>, vector<8x8x7xf32>
    %1 = vector.shape_cast %0 : vector<8x8x7xf32> to vector<64x7xf32>
    %c0_2 = arith.constant 0 : index
    %c0_3 = arith.constant 0 : index
    %2 = vector.load %arg3[%c0_2, %c0_3] : memref<7x512xbf16, #tpu.memory_space<vmem>>, vector<7x512xbf16>
    %3 = arith.truncf %1 : vector<64x7xf32> to vector<64x7xbf16>
    %cst = arith.constant dense<0.000000e+00> : vector<64x512xf32>
    %4 = tpu.matmul %3, %2, %cst {dimension_numbers = #tpu.dot_dimension_numbers<[1], [0], [0], [1], [0, 0, 1, 1], [], []>} : vector<64x7xbf16>, vector<7x512xbf16>, vector<64x512xf32> -> vector<64x512xf32>
    %c0_4 = arith.constant 0 : index
    %c0_5 = arith.constant 0 : index
    %5 = vector.load %arg5[%c0_4, %c0_5] : memref<1x512xf32, #tpu.memory_space<vmem>>, vector<1x512xf32>
    %6 = vector.broadcast %5 : vector<1x512xf32> to vector<64x512xf32>
    %7 = arith.addf %4, %6 : vector<64x512xf32>
    %c0_6 = arith.constant 0 : index
    %c0_7 = arith.constant 0 : index
    %8 = vector.load %arg18[%c0_6, %c0_7] : memref<64x512xf32, #tpu.memory_space<vmem>>, vector<64x512xf32>
    tpu.vector_store %arg18[%c0_6, %c0_7], %7 {strides = array<i32>} : memref<64x512xf32, #tpu.memory_space<vmem>>, vector<64x512xf32>,
    %c0_8 = arith.constant 0 : index
    %c0_9 = arith.constant 0 : index
    %9 = vector.load %arg4[%c0_8, %c0_9] : memref<128x512xbf16, #tpu.memory_space<vmem>>, vector<128x512xbf16>
    %cst_10 = arith.constant 0.000000e+00 : f32
    %10 = vector.broadcast %cst_10 : f32 to vector<8x64xf32>
    %cst_11 = arith.constant 0.000000e+00 : f32
    %11 = vector.broadcast %cst_11 : f32 to vector<8x64xf32>
    %cst_12 = arith.constant 0.000000e+00 : f32
    %12 = vector.broadcast %cst_12 : f32 to vector<8x64xf32>
    %cst_13 = arith.constant 0.000000e+00 : f32
    %13 = vector.broadcast %cst_13 : f32 to vector<8x64xf32>
    %c0_14 = arith.constant 0 : index
    %c0_15 = arith.constant 0 : index
    %14 = vector.load %arg18[%c0_14, %c0_15] : memref<64x512xf32, #tpu.memory_space<vmem>>, vector<8x256xf32>
    %c56 = arith.constant 56 : index
    %c256 = arith.constant 256 : index
    %15 = vector.load %arg18[%c56, %c256] : memref<64x512xf32, #tpu.memory_space<vmem>>, vector<8x256xf32>
    %16 = tpu.concatenate %14, %15 in 1 : vector<8x256xf32>, vector<8x256xf32> -> vector<8x512xf32>
    %17 = tpu.concatenate %10, %12 in 1 : vector<8x64xf32>, vector<8x64xf32> -> vector<8x128xf32>
    %18 = arith.truncf %17 : vector<8x128xf32> to vector<8x128xbf16>
    %cst_16 = arith.constant dense<0.000000e+00> : vector<8x512xf32>
    %19 = tpu.matmul %18, %9, %cst_16 {dimension_numbers = #tpu.dot_dimension_numbers<[1], [0], [0], [1], [0, 0, 1, 1], [], []>} : vector<8x128xbf16>, vector<128x512xbf16>, vector<8x512xf32> -> vector<8x512xf32>
    %20 = arith.addf %16, %19 : vector<8x512xf32>
    %21 = vector.extract_strided_slice %20 {offsets = [0, 0], sizes = [8, 192], strides = [1, 1]} : vector<8x512xf32> to vector<8x192xf32>
    %cst_17 = arith.constant 5.000000e-01 : f32
    %22 = vector.broadcast %cst_17 : f32 to vector<8x192xf32>
    %23 = arith.mulf %22, %21 : vector<8x192xf32>
    %24 = math.tanh %23 : vector<8x192xf32>
    %cst_18 = arith.constant 5.000000e-01 : f32
    %25 = vector.broadcast %cst_18 : f32 to vector<8x192xf32>
    %26 = arith.mulf %25, %24 : vector<8x192xf32>
    %cst_19 = arith.constant 5.000000e-01 : f32
    %27 = vector.broadcast %cst_19 : f32 to vector<8x192xf32>
    %28 = arith.addf %26, %27 : vector<8x192xf32>
    %29 = vector.extract_strided_slice %20 {offsets = [0, 192], sizes = [8, 64], strides = [1, 1]} : vector<8x512xf32> to vector<8x64xf32>
    %30 = math.tanh %29 : vector<8x64xf32>
    %31 = vector.extract_strided_slice %20 {offsets = [0, 256], sizes = [8, 192], strides = [1, 1]} : vector<8x512xf32> to vector<8x192xf32>
    %cst_20 = arith.constant 5.000000e-01 : f32
    %32 = vector.broadcast %cst_20 : f32 to vector<8x192xf32>
    %33 = arith.mulf %32, %31 : vector<8x192xf32>
    %34 = math.tanh %33 : vector<8x192xf32>
    %cst_21 = arith.constant 5.000000e-01 : f32
    %35 = vector.broadcast %cst_21 : f32 to vector<8x192xf32>
    %36 = arith.mulf %35, %34 : vector<8x192xf32>
    %cst_22 = arith.constant 5.000000e-01 : f32
    %37 = vector.broadcast %cst_22 : f32 to vector<8x192xf32>
    %38 = arith.addf %36, %37 : vector<8x192xf32>
    %39 = vector.extract_strided_slice %20 {offsets = [0, 448], sizes = [8, 64], strides = [1, 1]} : vector<8x512xf32> to vector<8x64xf32>
    %40 = math.tanh %39 : vector<8x64xf32>
    %41 = vector.extract_strided_slice %28 {offsets = [0, 64], sizes = [8, 64], strides = [1, 1]} : vector<8x192xf32> to vector<8x64xf32>
    %42 = arith.mulf %41, %11 : vector<8x64xf32>
    %43 = vector.extract_strided_slice %28 {offsets = [0, 0], sizes = [8, 64], strides = [1, 1]} : vector<8x192xf32> to vector<8x64xf32>
    %44 = arith.mulf %43, %30 : vector<8x64xf32>
    %45 = arith.addf %42, %44 : vector<8x64xf32>
    %46 = vector.extract_strided_slice %28 {offsets = [0, 128], sizes = [8, 64], strides = [1, 1]} : vector<8x192xf32> to vector<8x64xf32>
    %47 = math.tanh %45 : vector<8x64xf32>
    %48 = arith.mulf %46, %47 : vector<8x64xf32>
    %49 = vector.extract_strided_slice %38 {offsets = [0, 64], sizes = [8, 64], strides = [1, 1]} : vector<8x192xf32> to vector<8x64xf32>
    %50 = arith.mulf %49, %13 : vector<8x64xf32>
    %51 = vector.extract_strided_slice %38 {offsets = [0, 0], sizes = [8, 64], strides = [1, 1]} : vector<8x192xf32> to vector<8x64xf32>
    %52 = arith.mulf %51, %40 : vector<8x64xf32>
    %53 = arith.addf %50, %52 : vector<8x64xf32>
    %54 = vector.extract_strided_slice %38 {offsets = [0, 128], sizes = [8, 64], strides = [1, 1]} : vector<8x192xf32> to vector<8x64xf32>
    %55 = math.tanh %53 : vector<8x64xf32>
    %56 = arith.mulf %54, %55 : vector<8x64xf32>
    %c0_23 = arith.constant 0 : index
    %c0_24 = arith.constant 0 : index
    %57 = vector.load %arg19[%c0_23, %c0_24] : memref<64x128xf32, #tpu.memory_space<vmem>>, vector<8x64xf32>
    tpu.vector_store %arg19[%c0_23, %c0_24], %48 {strides = array<i32>} : memref<64x128xf32, #tpu.memory_space<vmem>>, vector<8x64xf32>,
    %c56_25 = arith.constant 56 : index
    %c64 = arith.constant 64 : index
    %58 = vector.load %arg19[%c56_25, %c64] : memref<64x128xf32, #tpu.memory_space<vmem>>, vector<8x64xf32>
    tpu.vector_store %arg19[%c56_25, %c64], %56 {strides = array<i32>} : memref<64x128xf32, #tpu.memory_space<vmem>>, vector<8x64xf32>,
    %c8 = arith.constant 8 : index
    %c0_26 = arith.constant 0 : index
    %59 = vector.load %arg18[%c8, %c0_26] : memref<64x512xf32, #tpu.memory_space<vmem>>, vector<8x256xf32>
    %c48 = arith.constant 48 : index
    %c256_27 = arith.constant 256 : index
    %60 = vector.load %arg18[%c48, %c256_27] : memref<64x512xf32, #tpu.memory_space<vmem>>, vector<8x256xf32>
    %61 = tpu.concatenate %59, %60 in 1 : vector<8x256xf32>, vector<8x256xf32> -> vector<8x512xf32>
    %62 = tpu.concatenate %48, %56 in 1 : vector<8x64xf32>, vector<8x64xf32> -> vector<8x128xf32>
    %63 = arith.truncf %62 : vector<8x128xf32> to vector<8x128xbf16>
    %cst_28 = arith.constant dense<0.000000e+00> : vector<8x512xf32>
    %64 = tpu.matmul %63, %9, %cst_28 {dimension_numbers = #tpu.dot_dimension_numbers<[1], [0], [0], [1], [0, 0, 1, 1], [], []>} : vector<8x128xbf16>, vector<128x512xbf16>, vector<8x512xf32> -> vector<8x512xf32>
    %65 = arith.addf %61, %64 : vector<8x512xf32>
    %66 = vector.extract_strided_slice %65 {offsets = [0, 0], sizes = [8, 192], strides = [1, 1]} : vector<8x512xf32> to vector<8x192xf32>
    %cst_29 = arith.constant 5.000000e-01 : f32
    %67 = vector.broadcast %cst_29 : f32 to vector<8x192xf32>
    %68 = arith.mulf %67, %66 : vector<8x192xf32>
    %69 = math.tanh %68 : vector<8x192xf32>
    %cst_30 = arith.constant 5.000000e-01 : f32
    %70 = vector.broadcast %cst_30 : f32 to vector<8x192xf32>
    %71 = arith.mulf %70, %69 : vector<8x192xf32>
    %cst_31 = arith.constant 5.000000e-01 : f32
    %72 = vector.broadcast %cst_31 : f32 to vector<8x192xf32>
    %73 = arith.addf %71, %72 : vector<8x192xf32>
    %74 = vector.extract_strided_slice %65 {offsets = [0, 192], sizes = [8, 64], strides = [1, 1]} : vector<8x512xf32> to vector<8x64xf32>
    %75 = math.tanh %74 : vector<8x64xf32>
    %76 = vector.extract_strided_slice %65 {offsets = [0, 256], sizes = [8, 192], strides = [1, 1]} : vector<8x512xf32> to vector<8x192xf32>
    %cst_32 = arith.constant 5.000000e-01 : f32
    %77 = vector.broadcast %cst_32 : f32 to vector<8x192xf32>
    %78 = arith.mulf %77, %76 : vector<8x192xf32>
    %79 = math.tanh %78 : vector<8x192xf32>
    %cst_33 = arith.constant 5.000000e-01 : f32
    %80 = vector.broadcast %cst_33 : f32 to vector<8x192xf32>
    %81 = arith.mulf %80, %79 : vector<8x192xf32>
    %cst_34 = arith.constant 5.000000e-01 : f32
    %82 = vector.broadcast %cst_34 : f32 to vector<8x192xf32>
    %83 = arith.addf %81, %82 : vector<8x192xf32>
    %84 = vector.extract_strided_slice %65 {offsets = [0, 448], sizes = [8, 64], strides = [1, 1]} : vector<8x512xf32> to vector<8x64xf32>
    %85 = math.tanh %84 : vector<8x64xf32>
    %86 = vector.extract_strided_slice %73 {offsets = [0, 64], sizes = [8, 64], strides = [1, 1]} : vector<8x192xf32> to vector<8x64xf32>
    %87 = arith.mulf %86, %45 : vector<8x64xf32>
    %88 = vector.extract_strided_slice %73 {offsets = [0, 0], sizes = [8, 64], strides = [1, 1]} : vector<8x192xf32> to vector<8x64xf32>
    %89 = arith.mulf %88, %75 : vector<8x64xf32>
    %90 = arith.addf %87, %89 : vector<8x64xf32>
    %91 = vector.extract_strided_slice %73 {offsets = [0, 128], sizes = [8, 64], strides = [1, 1]} : vector<8x192xf32> to vector<8x64xf32>
    %92 = math.tanh %90 : vector<8x64xf32>
    %93 = arith.mulf %91, %92 : vector<8x64xf32>
    %94 = vector.extract_strided_slice %83 {offsets = [0, 64], sizes = [8, 64], strides = [1, 1]} : vector<8x192xf32> to vector<8x64xf32>
    %95 = arith.mulf %94, %53 : vector<8x64xf32>
    %96 = vector.extract_strided_slice %83 {offsets = [0, 0], sizes = [8, 64], strides = [1, 1]} : vector<8x192xf32> to vector<8x64xf32>
    %97 = arith.mulf %96, %85 : vector<8x64xf32>
    %98 = arith.addf %95, %97 : vector<8x64xf32>
    %99 = vector.extract_strided_slice %83 {offsets = [0, 128], sizes = [8, 64], strides = [1, 1]} : vector<8x192xf32> to vector<8x64xf32>
    %100 = math.tanh %98 : vector<8x64xf32>
    %101 = arith.mulf %99, %100 : vector<8x64xf32>
    %c8_35 = arith.constant 8 : index
    %c0_36 = arith.constant 0 : index
    %102 = vector.load %arg19[%c8_35, %c0_36] : memref<64x128xf32, #tpu.memory_space<vmem>>, vector<8x64xf32>
    tpu.vector_store %arg19[%c8_35, %c0_36], %93 {strides = array<i32>} : memref<64x128xf32, #tpu.memory_space<vmem>>, vector<8x64xf32>,
    %c48_37 = arith.constant 48 : index
    %c64_38 = arith.constant 64 : index
    %103 = vector.load %arg19[%c48_37, %c64_38] : memref<64x128xf32, #tpu.memory_space<vmem>>, vector<8x64xf32>
    tpu.vector_store %arg19[%c48_37, %c64_38], %101 {strides = array<i32>} : memref<64x128xf32, #tpu.memory_space<vmem>>, vector<8x64xf32>,
    %c16 = arith.constant 16 : index
    %c0_39 = arith.constant 0 : index
    %104 = vector.load %arg18[%c16, %c0_39] : memref<64x512xf32, #tpu.memory_space<vmem>>, vector<8x256xf32>
    %c40 = arith.constant 40 : index
    %c256_40 = arith.constant 256 : index
    %105 = vector.load %arg18[%c40, %c256_40] : memref<64x512xf32, #tpu.memory_space<vmem>>, vector<8x256xf32>
    %106 = tpu.concatenate %104, %105 in 1 : vector<8x256xf32>, vector<8x256xf32> -> vector<8x512xf32>
    %107 = tpu.concatenate %93, %101 in 1 : vector<8x64xf32>, vector<8x64xf32> -> vector<8x128xf32>
    %108 = arith.truncf %107 : vector<8x128xf32> to vector<8x128xbf16>
    %cst_41 = arith.constant dense<0.000000e+00> : vector<8x512xf32>
    %109 = tpu.matmul %108, %9, %cst_41 {dimension_numbers = #tpu.dot_dimension_numbers<[1], [0], [0], [1], [0, 0, 1, 1], [], []>} : vector<8x128xbf16>, vector<128x512xbf16>, vector<8x512xf32> -> vector<8x512xf32>
    %110 = arith.addf %106, %109 : vector<8x512xf32>
    %111 = vector.extract_strided_slice %110 {offsets = [0, 0], sizes = [8, 192], strides = [1, 1]} : vector<8x512xf32> to vector<8x192xf32>
    %cst_42 = arith.constant 5.000000e-01 : f32
    %112 = vector.broadcast %cst_42 : f32 to vector<8x192xf32>
    %113 = arith.mulf %112, %111 : vector<8x192xf32>
    %114 = math.tanh %113 : vector<8x192xf32>
    %cst_43 = arith.constant 5.000000e-01 : f32
    %115 = vector.broadcast %cst_43 : f32 to vector<8x192xf32>
    %116 = arith.mulf %115, %114 : vector<8x192xf32>
    %cst_44 = arith.constant 5.000000e-01 : f32
    %117 = vector.broadcast %cst_44 : f32 to vector<8x192xf32>
    %118 = arith.addf %116, %117 : vector<8x192xf32>
    %119 = vector.extract_strided_slice %110 {offsets = [0, 192], sizes = [8, 64], strides = [1, 1]} : vector<8x512xf32> to vector<8x64xf32>
    %120 = math.tanh %119 : vector<8x64xf32>
    %121 = vector.extract_strided_slice %110 {offsets = [0, 256], sizes = [8, 192], strides = [1, 1]} : vector<8x512xf32> to vector<8x192xf32>
    %cst_45 = arith.constant 5.000000e-01 : f32
    %122 = vector.broadcast %cst_45 : f32 to vector<8x192xf32>
    %123 = arith.mulf %122, %121 : vector<8x192xf32>
    %124 = math.tanh %123 : vector<8x192xf32>
    %cst_46 = arith.constant 5.000000e-01 : f32
    %125 = vector.broadcast %cst_46 : f32 to vector<8x192xf32>
    %126 = arith.mulf %125, %124 : vector<8x192xf32>
    %cst_47 = arith.constant 5.000000e-01 : f32
    %127 = vector.broadcast %cst_47 : f32 to vector<8x192xf32>
    %128 = arith.addf %126, %127 : vector<8x192xf32>
    %129 = vector.extract_strided_slice %110 {offsets = [0, 448], sizes = [8, 64], strides = [1, 1]} : vector<8x512xf32> to vector<8x64xf32>
    %130 = math.tanh %129 : vector<8x64xf32>
    %131 = vector.extract_strided_slice %118 {offsets = [0, 64], sizes = [8, 64], strides = [1, 1]} : vector<8x192xf32> to vector<8x64xf32>
    %132 = arith.mulf %131, %90 : vector<8x64xf32>
    %133 = vector.extract_strided_slice %118 {offsets = [0, 0], sizes = [8, 64], strides = [1, 1]} : vector<8x192xf32> to vector<8x64xf32>
    %134 = arith.mulf %133, %120 : vector<8x64xf32>
    %135 = arith.addf %132, %134 : vector<8x64xf32>
    %136 = vector.extract_strided_slice %118 {offsets = [0, 128], sizes = [8, 64], strides = [1, 1]} : vector<8x192xf32> to vector<8x64xf32>
    %137 = math.tanh %135 : vector<8x64xf32>
    %138 = arith.mulf %136, %137 : vector<8x64xf32>
    %139 = vector.extract_strided_slice %128 {offsets = [0, 64], sizes = [8, 64], strides = [1, 1]} : vector<8x192xf32> to vector<8x64xf32>
    %140 = arith.mulf %139, %98 : vector<8x64xf32>
    %141 = vector.extract_strided_slice %128 {offsets = [0, 0], sizes = [8, 64], strides = [1, 1]} : vector<8x192xf32> to vector<8x64xf32>
    %142 = arith.mulf %141, %130 : vector<8x64xf32>
    %143 = arith.addf %140, %142 : vector<8x64xf32>
    %144 = vector.extract_strided_slice %128 {offsets = [0, 128], sizes = [8, 64], strides = [1, 1]} : vector<8x192xf32> to vector<8x64xf32>
    %145 = math.tanh %143 : vector<8x64xf32>
    %146 = arith.mulf %144, %145 : vector<8x64xf32>
    %c16_48 = arith.constant 16 : index
    %c0_49 = arith.constant 0 : index
    %147 = vector.load %arg19[%c16_48, %c0_49] : memref<64x128xf32, #tpu.memory_space<vmem>>, vector<8x64xf32>
    tpu.vector_store %arg19[%c16_48, %c0_49], %138 {strides = array<i32>} : memref<64x128xf32, #tpu.memory_space<vmem>>, vector<8x64xf32>,
    %c40_50 = arith.constant 40 : index
    %c64_51 = arith.constant 64 : index
    %148 = vector.load %arg19[%c40_50, %c64_51] : memref<64x128xf32, #tpu.memory_space<vmem>>, vector<8x64xf32>
    tpu.vector_store %arg19[%c40_50, %c64_51], %146 {strides = array<i32>} : memref<64x128xf32, #tpu.memory_space<vmem>>, vector<8x64xf32>,
    %c24 = arith.constant 24 : index
    %c0_52 = arith.constant 0 : index
    %149 = vector.load %arg18[%c24, %c0_52] : memref<64x512xf32, #tpu.memory_space<vmem>>, vector<8x256xf32>
    %c32 = arith.constant 32 : index
    %c256_53 = arith.constant 256 : index
    %150 = vector.load %arg18[%c32, %c256_53] : memref<64x512xf32, #tpu.memory_space<vmem>>, vector<8x256xf32>
    %151 = tpu.concatenate %149, %150 in 1 : vector<8x256xf32>, vector<8x256xf32> -> vector<8x512xf32>
    %152 = tpu.concatenate %138, %146 in 1 : vector<8x64xf32>, vector<8x64xf32> -> vector<8x128xf32>
    %153 = arith.truncf %152 : vector<8x128xf32> to vector<8x128xbf16>
    %cst_54 = arith.constant dense<0.000000e+00> : vector<8x512xf32>
    %154 = tpu.matmul %153, %9, %cst_54 {dimension_numbers = #tpu.dot_dimension_numbers<[1], [0], [0], [1], [0, 0, 1, 1], [], []>} : vector<8x128xbf16>, vector<128x512xbf16>, vector<8x512xf32> -> vector<8x512xf32>
    %155 = arith.addf %151, %154 : vector<8x512xf32>
    %156 = vector.extract_strided_slice %155 {offsets = [0, 0], sizes = [8, 192], strides = [1, 1]} : vector<8x512xf32> to vector<8x192xf32>
    %cst_55 = arith.constant 5.000000e-01 : f32
    %157 = vector.broadcast %cst_55 : f32 to vector<8x192xf32>
    %158 = arith.mulf %157, %156 : vector<8x192xf32>
    %159 = math.tanh %158 : vector<8x192xf32>
    %cst_56 = arith.constant 5.000000e-01 : f32
    %160 = vector.broadcast %cst_56 : f32 to vector<8x192xf32>
    %161 = arith.mulf %160, %159 : vector<8x192xf32>
    %cst_57 = arith.constant 5.000000e-01 : f32
    %162 = vector.broadcast %cst_57 : f32 to vector<8x192xf32>
    %163 = arith.addf %161, %162 : vector<8x192xf32>
    %164 = vector.extract_strided_slice %155 {offsets = [0, 192], sizes = [8, 64], strides = [1, 1]} : vector<8x512xf32> to vector<8x64xf32>
    %165 = math.tanh %164 : vector<8x64xf32>
    %166 = vector.extract_strided_slice %155 {offsets = [0, 256], sizes = [8, 192], strides = [1, 1]} : vector<8x512xf32> to vector<8x192xf32>
    %cst_58 = arith.constant 5.000000e-01 : f32
    %167 = vector.broadcast %cst_58 : f32 to vector<8x192xf32>
    %168 = arith.mulf %167, %166 : vector<8x192xf32>
    %169 = math.tanh %168 : vector<8x192xf32>
    %cst_59 = arith.constant 5.000000e-01 : f32
    %170 = vector.broadcast %cst_59 : f32 to vector<8x192xf32>
    %171 = arith.mulf %170, %169 : vector<8x192xf32>
    %cst_60 = arith.constant 5.000000e-01 : f32
    %172 = vector.broadcast %cst_60 : f32 to vector<8x192xf32>
    %173 = arith.addf %171, %172 : vector<8x192xf32>
    %174 = vector.extract_strided_slice %155 {offsets = [0, 448], sizes = [8, 64], strides = [1, 1]} : vector<8x512xf32> to vector<8x64xf32>
    %175 = math.tanh %174 : vector<8x64xf32>
    %176 = vector.extract_strided_slice %163 {offsets = [0, 64], sizes = [8, 64], strides = [1, 1]} : vector<8x192xf32> to vector<8x64xf32>
    %177 = arith.mulf %176, %135 : vector<8x64xf32>
    %178 = vector.extract_strided_slice %163 {offsets = [0, 0], sizes = [8, 64], strides = [1, 1]} : vector<8x192xf32> to vector<8x64xf32>
    %179 = arith.mulf %178, %165 : vector<8x64xf32>
    %180 = arith.addf %177, %179 : vector<8x64xf32>
    %181 = vector.extract_strided_slice %163 {offsets = [0, 128], sizes = [8, 64], strides = [1, 1]} : vector<8x192xf32> to vector<8x64xf32>
    %182 = math.tanh %180 : vector<8x64xf32>
    %183 = arith.mulf %181, %182 : vector<8x64xf32>
    %184 = vector.extract_strided_slice %173 {offsets = [0, 64], sizes = [8, 64], strides = [1, 1]} : vector<8x192xf32> to vector<8x64xf32>
    %185 = arith.mulf %184, %143 : vector<8x64xf32>
    %186 = vector.extract_strided_slice %173 {offsets = [0, 0], sizes = [8, 64], strides = [1, 1]} : vector<8x192xf32> to vector<8x64xf32>
    %187 = arith.mulf %186, %175 : vector<8x64xf32>
    %188 = arith.addf %185, %187 : vector<8x64xf32>
    %189 = vector.extract_strided_slice %173 {offsets = [0, 128], sizes = [8, 64], strides = [1, 1]} : vector<8x192xf32> to vector<8x64xf32>
    %190 = math.tanh %188 : vector<8x64xf32>
    %191 = arith.mulf %189, %190 : vector<8x64xf32>
    %c24_61 = arith.constant 24 : index
    %c0_62 = arith.constant 0 : index
    %192 = vector.load %arg19[%c24_61, %c0_62] : memref<64x128xf32, #tpu.memory_space<vmem>>, vector<8x64xf32>
    tpu.vector_store %arg19[%c24_61, %c0_62], %183 {strides = array<i32>} : memref<64x128xf32, #tpu.memory_space<vmem>>, vector<8x64xf32>,
    %c32_63 = arith.constant 32 : index
    %c64_64 = arith.constant 64 : index
    %193 = vector.load %arg19[%c32_63, %c64_64] : memref<64x128xf32, #tpu.memory_space<vmem>>, vector<8x64xf32>
    tpu.vector_store %arg19[%c32_63, %c64_64], %191 {strides = array<i32>} : memref<64x128xf32, #tpu.memory_space<vmem>>, vector<8x64xf32>,
    %c32_65 = arith.constant 32 : index
    %c0_66 = arith.constant 0 : index
    %194 = vector.load %arg18[%c32_65, %c0_66] : memref<64x512xf32, #tpu.memory_space<vmem>>, vector<8x256xf32>
    %c24_67 = arith.constant 24 : index
    %c256_68 = arith.constant 256 : index
    %195 = vector.load %arg18[%c24_67, %c256_68] : memref<64x512xf32, #tpu.memory_space<vmem>>, vector<8x256xf32>
    %196 = tpu.concatenate %194, %195 in 1 : vector<8x256xf32>, vector<8x256xf32> -> vector<8x512xf32>
    %197 = tpu.concatenate %183, %191 in 1 : vector<8x64xf32>, vector<8x64xf32> -> vector<8x128xf32>
    %198 = arith.truncf %197 : vector<8x128xf32> to vector<8x128xbf16>
    %cst_69 = arith.constant dense<0.000000e+00> : vector<8x512xf32>
    %199 = tpu.matmul %198, %9, %cst_69 {dimension_numbers = #tpu.dot_dimension_numbers<[1], [0], [0], [1], [0, 0, 1, 1], [], []>} : vector<8x128xbf16>, vector<128x512xbf16>, vector<8x512xf32> -> vector<8x512xf32>
    %200 = arith.addf %196, %199 : vector<8x512xf32>
    %201 = vector.extract_strided_slice %200 {offsets = [0, 0], sizes = [8, 192], strides = [1, 1]} : vector<8x512xf32> to vector<8x192xf32>
    %cst_70 = arith.constant 5.000000e-01 : f32
    %202 = vector.broadcast %cst_70 : f32 to vector<8x192xf32>
    %203 = arith.mulf %202, %201 : vector<8x192xf32>
    %204 = math.tanh %203 : vector<8x192xf32>
    %cst_71 = arith.constant 5.000000e-01 : f32
    %205 = vector.broadcast %cst_71 : f32 to vector<8x192xf32>
    %206 = arith.mulf %205, %204 : vector<8x192xf32>
    %cst_72 = arith.constant 5.000000e-01 : f32
    %207 = vector.broadcast %cst_72 : f32 to vector<8x192xf32>
    %208 = arith.addf %206, %207 : vector<8x192xf32>
    %209 = vector.extract_strided_slice %200 {offsets = [0, 192], sizes = [8, 64], strides = [1, 1]} : vector<8x512xf32> to vector<8x64xf32>
    %210 = math.tanh %209 : vector<8x64xf32>
    %211 = vector.extract_strided_slice %200 {offsets = [0, 256], sizes = [8, 192], strides = [1, 1]} : vector<8x512xf32> to vector<8x192xf32>
    %cst_73 = arith.constant 5.000000e-01 : f32
    %212 = vector.broadcast %cst_73 : f32 to vector<8x192xf32>
    %213 = arith.mulf %212, %211 : vector<8x192xf32>
    %214 = math.tanh %213 : vector<8x192xf32>
    %cst_74 = arith.constant 5.000000e-01 : f32
    %215 = vector.broadcast %cst_74 : f32 to vector<8x192xf32>
    %216 = arith.mulf %215, %214 : vector<8x192xf32>
    %cst_75 = arith.constant 5.000000e-01 : f32
    %217 = vector.broadcast %cst_75 : f32 to vector<8x192xf32>
    %218 = arith.addf %216, %217 : vector<8x192xf32>
    %219 = vector.extract_strided_slice %200 {offsets = [0, 448], sizes = [8, 64], strides = [1, 1]} : vector<8x512xf32> to vector<8x64xf32>
    %220 = math.tanh %219 : vector<8x64xf32>
    %221 = vector.extract_strided_slice %208 {offsets = [0, 64], sizes = [8, 64], strides = [1, 1]} : vector<8x192xf32> to vector<8x64xf32>
    %222 = arith.mulf %221, %180 : vector<8x64xf32>
    %223 = vector.extract_strided_slice %208 {offsets = [0, 0], sizes = [8, 64], strides = [1, 1]} : vector<8x192xf32> to vector<8x64xf32>
    %224 = arith.mulf %223, %210 : vector<8x64xf32>
    %225 = arith.addf %222, %224 : vector<8x64xf32>
    %226 = vector.extract_strided_slice %208 {offsets = [0, 128], sizes = [8, 64], strides = [1, 1]} : vector<8x192xf32> to vector<8x64xf32>
    %227 = math.tanh %225 : vector<8x64xf32>
    %228 = arith.mulf %226, %227 : vector<8x64xf32>
    %229 = vector.extract_strided_slice %218 {offsets = [0, 64], sizes = [8, 64], strides = [1, 1]} : vector<8x192xf32> to vector<8x64xf32>
    %230 = arith.mulf %229, %188 : vector<8x64xf32>
    %231 = vector.extract_strided_slice %218 {offsets = [0, 0], sizes = [8, 64], strides = [1, 1]} : vector<8x192xf32> to vector<8x64xf32>
    %232 = arith.mulf %231, %220 : vector<8x64xf32>
    %233 = arith.addf %230, %232 : vector<8x64xf32>
    %234 = vector.extract_strided_slice %218 {offsets = [0, 128], sizes = [8, 64], strides = [1, 1]} : vector<8x192xf32> to vector<8x64xf32>
    %235 = math.tanh %233 : vector<8x64xf32>
    %236 = arith.mulf %234, %235 : vector<8x64xf32>
    %c32_76 = arith.constant 32 : index
    %c0_77 = arith.constant 0 : index
    %237 = vector.load %arg19[%c32_76, %c0_77] : memref<64x128xf32, #tpu.memory_space<vmem>>, vector<8x64xf32>
    tpu.vector_store %arg19[%c32_76, %c0_77], %228 {strides = array<i32>} : memref<64x128xf32, #tpu.memory_space<vmem>>, vector<8x64xf32>,
    %c24_78 = arith.constant 24 : index
    %c64_79 = arith.constant 64 : index
    %238 = vector.load %arg19[%c24_78, %c64_79] : memref<64x128xf32, #tpu.memory_space<vmem>>, vector<8x64xf32>
    tpu.vector_store %arg19[%c24_78, %c64_79], %236 {strides = array<i32>} : memref<64x128xf32, #tpu.memory_space<vmem>>, vector<8x64xf32>,
    %c40_80 = arith.constant 40 : index
    %c0_81 = arith.constant 0 : index
    %239 = vector.load %arg18[%c40_80, %c0_81] : memref<64x512xf32, #tpu.memory_space<vmem>>, vector<8x256xf32>
    %c16_82 = arith.constant 16 : index
    %c256_83 = arith.constant 256 : index
    %240 = vector.load %arg18[%c16_82, %c256_83] : memref<64x512xf32, #tpu.memory_space<vmem>>, vector<8x256xf32>
    %241 = tpu.concatenate %239, %240 in 1 : vector<8x256xf32>, vector<8x256xf32> -> vector<8x512xf32>
    %242 = tpu.concatenate %228, %236 in 1 : vector<8x64xf32>, vector<8x64xf32> -> vector<8x128xf32>
    %243 = arith.truncf %242 : vector<8x128xf32> to vector<8x128xbf16>
    %cst_84 = arith.constant dense<0.000000e+00> : vector<8x512xf32>
    %244 = tpu.matmul %243, %9, %cst_84 {dimension_numbers = #tpu.dot_dimension_numbers<[1], [0], [0], [1], [0, 0, 1, 1], [], []>} : vector<8x128xbf16>, vector<128x512xbf16>, vector<8x512xf32> -> vector<8x512xf32>
    %245 = arith.addf %241, %244 : vector<8x512xf32>
    %246 = vector.extract_strided_slice %245 {offsets = [0, 0], sizes = [8, 192], strides = [1, 1]} : vector<8x512xf32> to vector<8x192xf32>
    %cst_85 = arith.constant 5.000000e-01 : f32
    %247 = vector.broadcast %cst_85 : f32 to vector<8x192xf32>
    %248 = arith.mulf %247, %246 : vector<8x192xf32>
    %249 = math.tanh %248 : vector<8x192xf32>
    %cst_86 = arith.constant 5.000000e-01 : f32
    %250 = vector.broadcast %cst_86 : f32 to vector<8x192xf32>
    %251 = arith.mulf %250, %249 : vector<8x192xf32>
    %cst_87 = arith.constant 5.000000e-01 : f32
    %252 = vector.broadcast %cst_87 : f32 to vector<8x192xf32>
    %253 = arith.addf %251, %252 : vector<8x192xf32>
    %254 = vector.extract_strided_slice %245 {offsets = [0, 192], sizes = [8, 64], strides = [1, 1]} : vector<8x512xf32> to vector<8x64xf32>
    %255 = math.tanh %254 : vector<8x64xf32>
    %256 = vector.extract_strided_slice %245 {offsets = [0, 256], sizes = [8, 192], strides = [1, 1]} : vector<8x512xf32> to vector<8x192xf32>
    %cst_88 = arith.constant 5.000000e-01 : f32
    %257 = vector.broadcast %cst_88 : f32 to vector<8x192xf32>
    %258 = arith.mulf %257, %256 : vector<8x192xf32>
    %259 = math.tanh %258 : vector<8x192xf32>
    %cst_89 = arith.constant 5.000000e-01 : f32
    %260 = vector.broadcast %cst_89 : f32 to vector<8x192xf32>
    %261 = arith.mulf %260, %259 : vector<8x192xf32>
    %cst_90 = arith.constant 5.000000e-01 : f32
    %262 = vector.broadcast %cst_90 : f32 to vector<8x192xf32>
    %263 = arith.addf %261, %262 : vector<8x192xf32>
    %264 = vector.extract_strided_slice %245 {offsets = [0, 448], sizes = [8, 64], strides = [1, 1]} : vector<8x512xf32> to vector<8x64xf32>
    %265 = math.tanh %264 : vector<8x64xf32>
    %266 = vector.extract_strided_slice %253 {offsets = [0, 64], sizes = [8, 64], strides = [1, 1]} : vector<8x192xf32> to vector<8x64xf32>
    %267 = arith.mulf %266, %225 : vector<8x64xf32>
    %268 = vector.extract_strided_slice %253 {offsets = [0, 0], sizes = [8, 64], strides = [1, 1]} : vector<8x192xf32> to vector<8x64xf32>
    %269 = arith.mulf %268, %255 : vector<8x64xf32>
    %270 = arith.addf %267, %269 : vector<8x64xf32>
    %271 = vector.extract_strided_slice %253 {offsets = [0, 128], sizes = [8, 64], strides = [1, 1]} : vector<8x192xf32> to vector<8x64xf32>
    %272 = math.tanh %270 : vector<8x64xf32>
    %273 = arith.mulf %271, %272 : vector<8x64xf32>
    %274 = vector.extract_strided_slice %263 {offsets = [0, 64], sizes = [8, 64], strides = [1, 1]} : vector<8x192xf32> to vector<8x64xf32>
    %275 = arith.mulf %274, %233 : vector<8x64xf32>
    %276 = vector.extract_strided_slice %263 {offsets = [0, 0], sizes = [8, 64], strides = [1, 1]} : vector<8x192xf32> to vector<8x64xf32>
    %277 = arith.mulf %276, %265 : vector<8x64xf32>
    %278 = arith.addf %275, %277 : vector<8x64xf32>
    %279 = vector.extract_strided_slice %263 {offsets = [0, 128], sizes = [8, 64], strides = [1, 1]} : vector<8x192xf32> to vector<8x64xf32>
    %280 = math.tanh %278 : vector<8x64xf32>
    %281 = arith.mulf %279, %280 : vector<8x64xf32>
    %c40_91 = arith.constant 40 : index
    %c0_92 = arith.constant 0 : index
    %282 = vector.load %arg19[%c40_91, %c0_92] : memref<64x128xf32, #tpu.memory_space<vmem>>, vector<8x64xf32>
    tpu.vector_store %arg19[%c40_91, %c0_92], %273 {strides = array<i32>} : memref<64x128xf32, #tpu.memory_space<vmem>>, vector<8x64xf32>,
    %c16_93 = arith.constant 16 : index
    %c64_94 = arith.constant 64 : index
    %283 = vector.load %arg19[%c16_93, %c64_94] : memref<64x128xf32, #tpu.memory_space<vmem>>, vector<8x64xf32>
    tpu.vector_store %arg19[%c16_93, %c64_94], %281 {strides = array<i32>} : memref<64x128xf32, #tpu.memory_space<vmem>>, vector<8x64xf32>,
    %c48_95 = arith.constant 48 : index
    %c0_96 = arith.constant 0 : index
    %284 = vector.load %arg18[%c48_95, %c0_96] : memref<64x512xf32, #tpu.memory_space<vmem>>, vector<8x256xf32>
    %c8_97 = arith.constant 8 : index
    %c256_98 = arith.constant 256 : index
    %285 = vector.load %arg18[%c8_97, %c256_98] : memref<64x512xf32, #tpu.memory_space<vmem>>, vector<8x256xf32>
    %286 = tpu.concatenate %284, %285 in 1 : vector<8x256xf32>, vector<8x256xf32> -> vector<8x512xf32>
    %287 = tpu.concatenate %273, %281 in 1 : vector<8x64xf32>, vector<8x64xf32> -> vector<8x128xf32>
    %288 = arith.truncf %287 : vector<8x128xf32> to vector<8x128xbf16>
    %cst_99 = arith.constant dense<0.000000e+00> : vector<8x512xf32>
    %289 = tpu.matmul %288, %9, %cst_99 {dimension_numbers = #tpu.dot_dimension_numbers<[1], [0], [0], [1], [0, 0, 1, 1], [], []>} : vector<8x128xbf16>, vector<128x512xbf16>, vector<8x512xf32> -> vector<8x512xf32>
    %290 = arith.addf %286, %289 : vector<8x512xf32>
    %291 = vector.extract_strided_slice %290 {offsets = [0, 0], sizes = [8, 192], strides = [1, 1]} : vector<8x512xf32> to vector<8x192xf32>
    %cst_100 = arith.constant 5.000000e-01 : f32
    %292 = vector.broadcast %cst_100 : f32 to vector<8x192xf32>
    %293 = arith.mulf %292, %291 : vector<8x192xf32>
    %294 = math.tanh %293 : vector<8x192xf32>
    %cst_101 = arith.constant 5.000000e-01 : f32
    %295 = vector.broadcast %cst_101 : f32 to vector<8x192xf32>
    %296 = arith.mulf %295, %294 : vector<8x192xf32>
    %cst_102 = arith.constant 5.000000e-01 : f32
    %297 = vector.broadcast %cst_102 : f32 to vector<8x192xf32>
    %298 = arith.addf %296, %297 : vector<8x192xf32>
    %299 = vector.extract_strided_slice %290 {offsets = [0, 192], sizes = [8, 64], strides = [1, 1]} : vector<8x512xf32> to vector<8x64xf32>
    %300 = math.tanh %299 : vector<8x64xf32>
    %301 = vector.extract_strided_slice %290 {offsets = [0, 256], sizes = [8, 192], strides = [1, 1]} : vector<8x512xf32> to vector<8x192xf32>
    %cst_103 = arith.constant 5.000000e-01 : f32
    %302 = vector.broadcast %cst_103 : f32 to vector<8x192xf32>
    %303 = arith.mulf %302, %301 : vector<8x192xf32>
    %304 = math.tanh %303 : vector<8x192xf32>
    %cst_104 = arith.constant 5.000000e-01 : f32
    %305 = vector.broadcast %cst_104 : f32 to vector<8x192xf32>
    %306 = arith.mulf %305, %304 : vector<8x192xf32>
    %cst_105 = arith.constant 5.000000e-01 : f32
    %307 = vector.broadcast %cst_105 : f32 to vector<8x192xf32>
    %308 = arith.addf %306, %307 : vector<8x192xf32>
    %309 = vector.extract_strided_slice %290 {offsets = [0, 448], sizes = [8, 64], strides = [1, 1]} : vector<8x512xf32> to vector<8x64xf32>
    %310 = math.tanh %309 : vector<8x64xf32>
    %311 = vector.extract_strided_slice %298 {offsets = [0, 64], sizes = [8, 64], strides = [1, 1]} : vector<8x192xf32> to vector<8x64xf32>
    %312 = arith.mulf %311, %270 : vector<8x64xf32>
    %313 = vector.extract_strided_slice %298 {offsets = [0, 0], sizes = [8, 64], strides = [1, 1]} : vector<8x192xf32> to vector<8x64xf32>
    %314 = arith.mulf %313, %300 : vector<8x64xf32>
    %315 = arith.addf %312, %314 : vector<8x64xf32>
    %316 = vector.extract_strided_slice %298 {offsets = [0, 128], sizes = [8, 64], strides = [1, 1]} : vector<8x192xf32> to vector<8x64xf32>
    %317 = math.tanh %315 : vector<8x64xf32>
    %318 = arith.mulf %316, %317 : vector<8x64xf32>
    %319 = vector.extract_strided_slice %308 {offsets = [0, 64], sizes = [8, 64], strides = [1, 1]} : vector<8x192xf32> to vector<8x64xf32>
    %320 = arith.mulf %319, %278 : vector<8x64xf32>
    %321 = vector.extract_strided_slice %308 {offsets = [0, 0], sizes = [8, 64], strides = [1, 1]} : vector<8x192xf32> to vector<8x64xf32>
    %322 = arith.mulf %321, %310 : vector<8x64xf32>
    %323 = arith.addf %320, %322 : vector<8x64xf32>
    %324 = vector.extract_strided_slice %308 {offsets = [0, 128], sizes = [8, 64], strides = [1, 1]} : vector<8x192xf32> to vector<8x64xf32>
    %325 = math.tanh %323 : vector<8x64xf32>
    %326 = arith.mulf %324, %325 : vector<8x64xf32>
    %c48_106 = arith.constant 48 : index
    %c0_107 = arith.constant 0 : index
    %327 = vector.load %arg19[%c48_106, %c0_107] : memref<64x128xf32, #tpu.memory_space<vmem>>, vector<8x64xf32>
    tpu.vector_store %arg19[%c48_106, %c0_107], %318 {strides = array<i32>} : memref<64x128xf32, #tpu.memory_space<vmem>>, vector<8x64xf32>,
    %c8_108 = arith.constant 8 : index
    %c64_109 = arith.constant 64 : index
    %328 = vector.load %arg19[%c8_108, %c64_109] : memref<64x128xf32, #tpu.memory_space<vmem>>, vector<8x64xf32>
    tpu.vector_store %arg19[%c8_108, %c64_109], %326 {strides = array<i32>} : memref<64x128xf32, #tpu.memory_space<vmem>>, vector<8x64xf32>,
    %c56_110 = arith.constant 56 : index
    %c0_111 = arith.constant 0 : index
    %329 = vector.load %arg18[%c56_110, %c0_111] : memref<64x512xf32, #tpu.memory_space<vmem>>, vector<8x256xf32>
    %c0_112 = arith.constant 0 : index
    %c256_113 = arith.constant 256 : index
    %330 = vector.load %arg18[%c0_112, %c256_113] : memref<64x512xf32, #tpu.memory_space<vmem>>, vector<8x256xf32>
    %331 = tpu.concatenate %329, %330 in 1 : vector<8x256xf32>, vector<8x256xf32> -> vector<8x512xf32>
    %332 = tpu.concatenate %318, %326 in 1 : vector<8x64xf32>, vector<8x64xf32> -> vector<8x128xf32>
    %333 = arith.truncf %332 : vector<8x128xf32> to vector<8x128xbf16>
    %cst_114 = arith.constant dense<0.000000e+00> : vector<8x512xf32>
    %334 = tpu.matmul %333, %9, %cst_114 {dimension_numbers = #tpu.dot_dimension_numbers<[1], [0], [0], [1], [0, 0, 1, 1], [], []>} : vector<8x128xbf16>, vector<128x512xbf16>, vector<8x512xf32> -> vector<8x512xf32>
    %335 = arith.addf %331, %334 : vector<8x512xf32>
    %336 = vector.extract_strided_slice %335 {offsets = [0, 0], sizes = [8, 192], strides = [1, 1]} : vector<8x512xf32> to vector<8x192xf32>
    %cst_115 = arith.constant 5.000000e-01 : f32
    %337 = vector.broadcast %cst_115 : f32 to vector<8x192xf32>
    %338 = arith.mulf %337, %336 : vector<8x192xf32>
    %339 = math.tanh %338 : vector<8x192xf32>
    %cst_116 = arith.constant 5.000000e-01 : f32
    %340 = vector.broadcast %cst_116 : f32 to vector<8x192xf32>
    %341 = arith.mulf %340, %339 : vector<8x192xf32>
    %cst_117 = arith.constant 5.000000e-01 : f32
    %342 = vector.broadcast %cst_117 : f32 to vector<8x192xf32>
    %343 = arith.addf %341, %342 : vector<8x192xf32>
    %344 = vector.extract_strided_slice %335 {offsets = [0, 192], sizes = [8, 64], strides = [1, 1]} : vector<8x512xf32> to vector<8x64xf32>
    %345 = math.tanh %344 : vector<8x64xf32>
    %346 = vector.extract_strided_slice %335 {offsets = [0, 256], sizes = [8, 192], strides = [1, 1]} : vector<8x512xf32> to vector<8x192xf32>
    %cst_118 = arith.constant 5.000000e-01 : f32
    %347 = vector.broadcast %cst_118 : f32 to vector<8x192xf32>
    %348 = arith.mulf %347, %346 : vector<8x192xf32>
    %349 = math.tanh %348 : vector<8x192xf32>
    %cst_119 = arith.constant 5.000000e-01 : f32
    %350 = vector.broadcast %cst_119 : f32 to vector<8x192xf32>
    %351 = arith.mulf %350, %349 : vector<8x192xf32>
    %cst_120 = arith.constant 5.000000e-01 : f32
    %352 = vector.broadcast %cst_120 : f32 to vector<8x192xf32>
    %353 = arith.addf %351, %352 : vector<8x192xf32>
    %354 = vector.extract_strided_slice %335 {offsets = [0, 448], sizes = [8, 64], strides = [1, 1]} : vector<8x512xf32> to vector<8x64xf32>
    %355 = math.tanh %354 : vector<8x64xf32>
    %356 = vector.extract_strided_slice %343 {offsets = [0, 64], sizes = [8, 64], strides = [1, 1]} : vector<8x192xf32> to vector<8x64xf32>
    %357 = arith.mulf %356, %315 : vector<8x64xf32>
    %358 = vector.extract_strided_slice %343 {offsets = [0, 0], sizes = [8, 64], strides = [1, 1]} : vector<8x192xf32> to vector<8x64xf32>
    %359 = arith.mulf %358, %345 : vector<8x64xf32>
    %360 = arith.addf %357, %359 : vector<8x64xf32>
    %361 = vector.extract_strided_slice %343 {offsets = [0, 128], sizes = [8, 64], strides = [1, 1]} : vector<8x192xf32> to vector<8x64xf32>
    %362 = math.tanh %360 : vector<8x64xf32>
    %363 = arith.mulf %361, %362 : vector<8x64xf32>
    %364 = vector.extract_strided_slice %353 {offsets = [0, 64], sizes = [8, 64], strides = [1, 1]} : vector<8x192xf32> to vector<8x64xf32>
    %365 = arith.mulf %364, %323 : vector<8x64xf32>
    %366 = vector.extract_strided_slice %353 {offsets = [0, 0], sizes = [8, 64], strides = [1, 1]} : vector<8x192xf32> to vector<8x64xf32>
    %367 = arith.mulf %366, %355 : vector<8x64xf32>
    %368 = arith.addf %365, %367 : vector<8x64xf32>
    %369 = vector.extract_strided_slice %353 {offsets = [0, 128], sizes = [8, 64], strides = [1, 1]} : vector<8x192xf32> to vector<8x64xf32>
    %370 = math.tanh %368 : vector<8x64xf32>
    %371 = arith.mulf %369, %370 : vector<8x64xf32>
    %c56_121 = arith.constant 56 : index
    %c0_122 = arith.constant 0 : index
    %372 = vector.load %arg19[%c56_121, %c0_122] : memref<64x128xf32, #tpu.memory_space<vmem>>, vector<8x64xf32>
    tpu.vector_store %arg19[%c56_121, %c0_122], %363 {strides = array<i32>} : memref<64x128xf32, #tpu.memory_space<vmem>>, vector<8x64xf32>,
    %c0_123 = arith.constant 0 : index
    %c64_124 = arith.constant 64 : index
    %373 = vector.load %arg19[%c0_123, %c64_124] : memref<64x128xf32, #tpu.memory_space<vmem>>, vector<8x64xf32>
    tpu.vector_store %arg19[%c0_123, %c64_124], %371 {strides = array<i32>} : memref<64x128xf32, #tpu.memory_space<vmem>>, vector<8x64xf32>,
    %c0_125 = arith.constant 0 : index
    %c0_126 = arith.constant 0 : index
    %374 = vector.load %arg19[%c0_125, %c0_126] : memref<64x128xf32, #tpu.memory_space<vmem>>, vector<64x128xf32>
    %c0_127 = arith.constant 0 : index
    %c0_128 = arith.constant 0 : index
    %c0_129 = arith.constant 0 : index
    %375 = vector.load %arg2[%c0_127, %c0_128, %c0_129] : memref<8x8x1xf32, #tpu.memory_space<vmem>>, vector<8x8x1xf32>
    %376 = vector.shape_cast %375 : vector<8x8x1xf32> to vector<64x1xf32>
    %377 = vector.broadcast %376 : vector<64x1xf32> to vector<64x128xf32>
    %378 = arith.mulf %374, %377 : vector<64x128xf32>
    %c0_130 = arith.constant 0 : index
    %c0_131 = arith.constant 0 : index
    %379 = vector.load %arg6[%c0_130, %c0_131] : memref<128x512xbf16, #tpu.memory_space<vmem>>, vector<128x512xbf16>
    %380 = arith.truncf %378 : vector<64x128xf32> to vector<64x128xbf16>
    %cst_132 = arith.constant dense<0.000000e+00> : vector<64x512xf32>
    %381 = tpu.matmul %380, %379, %cst_132 {dimension_numbers = #tpu.dot_dimension_numbers<[1], [0], [0], [1], [0, 0, 1, 1], [], []>} : vector<64x128xbf16>, vector<128x512xbf16>, vector<64x512xf32> -> vector<64x512xf32>
    %c0_133 = arith.constant 0 : index
    %c0_134 = arith.constant 0 : index
    %382 = vector.load %arg8[%c0_133, %c0_134] : memref<1x512xf32, #tpu.memory_space<vmem>>, vector<1x512xf32>
    %383 = vector.broadcast %382 : vector<1x512xf32> to vector<64x512xf32>
    %384 = arith.addf %381, %383 : vector<64x512xf32>
    %c0_135 = arith.constant 0 : index
    %c0_136 = arith.constant 0 : index
    %385 = vector.load %arg18[%c0_135, %c0_136] : memref<64x512xf32, #tpu.memory_space<vmem>>, vector<64x512xf32>
    tpu.vector_store %arg18[%c0_135, %c0_136], %384 {strides = array<i32>} : memref<64x512xf32, #tpu.memory_space<vmem>>, vector<64x512xf32>,
    %c0_137 = arith.constant 0 : index
    %c0_138 = arith.constant 0 : index
    %386 = vector.load %arg7[%c0_137, %c0_138] : memref<128x512xbf16, #tpu.memory_space<vmem>>, vector<128x512xbf16>
    %cst_139 = arith.constant 0.000000e+00 : f32
    %387 = vector.broadcast %cst_139 : f32 to vector<8x64xf32>
    %cst_140 = arith.constant 0.000000e+00 : f32
    %388 = vector.broadcast %cst_140 : f32 to vector<8x64xf32>
    %cst_141 = arith.constant 0.000000e+00 : f32
    %389 = vector.broadcast %cst_141 : f32 to vector<8x64xf32>
    %cst_142 = arith.constant 0.000000e+00 : f32
    %390 = vector.broadcast %cst_142 : f32 to vector<8x64xf32>
    %c0_143 = arith.constant 0 : index
    %c0_144 = arith.constant 0 : index
    %391 = vector.load %arg18[%c0_143, %c0_144] : memref<64x512xf32, #tpu.memory_space<vmem>>, vector<8x256xf32>
    %c56_145 = arith.constant 56 : index
    %c256_146 = arith.constant 256 : index
    %392 = vector.load %arg18[%c56_145, %c256_146] : memref<64x512xf32, #tpu.memory_space<vmem>>, vector<8x256xf32>
    %393 = tpu.concatenate %391, %392 in 1 : vector<8x256xf32>, vector<8x256xf32> -> vector<8x512xf32>
    %394 = tpu.concatenate %387, %389 in 1 : vector<8x64xf32>, vector<8x64xf32> -> vector<8x128xf32>
    %395 = arith.truncf %394 : vector<8x128xf32> to vector<8x128xbf16>
    %cst_147 = arith.constant dense<0.000000e+00> : vector<8x512xf32>
    %396 = tpu.matmul %395, %386, %cst_147 {dimension_numbers = #tpu.dot_dimension_numbers<[1], [0], [0], [1], [0, 0, 1, 1], [], []>} : vector<8x128xbf16>, vector<128x512xbf16>, vector<8x512xf32> -> vector<8x512xf32>
    %397 = arith.addf %393, %396 : vector<8x512xf32>
    %398 = vector.extract_strided_slice %397 {offsets = [0, 0], sizes = [8, 192], strides = [1, 1]} : vector<8x512xf32> to vector<8x192xf32>
    %cst_148 = arith.constant 5.000000e-01 : f32
    %399 = vector.broadcast %cst_148 : f32 to vector<8x192xf32>
    %400 = arith.mulf %399, %398 : vector<8x192xf32>
    %401 = math.tanh %400 : vector<8x192xf32>
    %cst_149 = arith.constant 5.000000e-01 : f32
    %402 = vector.broadcast %cst_149 : f32 to vector<8x192xf32>
    %403 = arith.mulf %402, %401 : vector<8x192xf32>
    %cst_150 = arith.constant 5.000000e-01 : f32
    %404 = vector.broadcast %cst_150 : f32 to vector<8x192xf32>
    %405 = arith.addf %403, %404 : vector<8x192xf32>
    %406 = vector.extract_strided_slice %397 {offsets = [0, 192], sizes = [8, 64], strides = [1, 1]} : vector<8x512xf32> to vector<8x64xf32>
    %407 = math.tanh %406 : vector<8x64xf32>
    %408 = vector.extract_strided_slice %397 {offsets = [0, 256], sizes = [8, 192], strides = [1, 1]} : vector<8x512xf32> to vector<8x192xf32>
    %cst_151 = arith.constant 5.000000e-01 : f32
    %409 = vector.broadcast %cst_151 : f32 to vector<8x192xf32>
    %410 = arith.mulf %409, %408 : vector<8x192xf32>
    %411 = math.tanh %410 : vector<8x192xf32>
    %cst_152 = arith.constant 5.000000e-01 : f32
    %412 = vector.broadcast %cst_152 : f32 to vector<8x192xf32>
    %413 = arith.mulf %412, %411 : vector<8x192xf32>
    %cst_153 = arith.constant 5.000000e-01 : f32
    %414 = vector.broadcast %cst_153 : f32 to vector<8x192xf32>
    %415 = arith.addf %413, %414 : vector<8x192xf32>
    %416 = vector.extract_strided_slice %397 {offsets = [0, 448], sizes = [8, 64], strides = [1, 1]} : vector<8x512xf32> to vector<8x64xf32>
    %417 = math.tanh %416 : vector<8x64xf32>
    %418 = vector.extract_strided_slice %405 {offsets = [0, 64], sizes = [8, 64], strides = [1, 1]} : vector<8x192xf32> to vector<8x64xf32>
    %419 = arith.mulf %418, %388 : vector<8x64xf32>
    %420 = vector.extract_strided_slice %405 {offsets = [0, 0], sizes = [8, 64], strides = [1, 1]} : vector<8x192xf32> to vector<8x64xf32>
    %421 = arith.mulf %420, %407 : vector<8x64xf32>
    %422 = arith.addf %419, %421 : vector<8x64xf32>
    %423 = vector.extract_strided_slice %405 {offsets = [0, 128], sizes = [8, 64], strides = [1, 1]} : vector<8x192xf32> to vector<8x64xf32>
    %424 = math.tanh %422 : vector<8x64xf32>
    %425 = arith.mulf %423, %424 : vector<8x64xf32>
    %426 = vector.extract_strided_slice %415 {offsets = [0, 64], sizes = [8, 64], strides = [1, 1]} : vector<8x192xf32> to vector<8x64xf32>
    %427 = arith.mulf %426, %390 : vector<8x64xf32>
    %428 = vector.extract_strided_slice %415 {offsets = [0, 0], sizes = [8, 64], strides = [1, 1]} : vector<8x192xf32> to vector<8x64xf32>
    %429 = arith.mulf %428, %417 : vector<8x64xf32>
    %430 = arith.addf %427, %429 : vector<8x64xf32>
    %431 = vector.extract_strided_slice %415 {offsets = [0, 128], sizes = [8, 64], strides = [1, 1]} : vector<8x192xf32> to vector<8x64xf32>
    %432 = math.tanh %430 : vector<8x64xf32>
    %433 = arith.mulf %431, %432 : vector<8x64xf32>
    %c0_154 = arith.constant 0 : index
    %c0_155 = arith.constant 0 : index
    %434 = vector.load %arg20[%c0_154, %c0_155] : memref<64x128xf32, #tpu.memory_space<vmem>>, vector<8x64xf32>
    tpu.vector_store %arg20[%c0_154, %c0_155], %425 {strides = array<i32>} : memref<64x128xf32, #tpu.memory_space<vmem>>, vector<8x64xf32>,
    %c56_156 = arith.constant 56 : index
    %c64_157 = arith.constant 64 : index
    %435 = vector.load %arg20[%c56_156, %c64_157] : memref<64x128xf32, #tpu.memory_space<vmem>>, vector<8x64xf32>
    tpu.vector_store %arg20[%c56_156, %c64_157], %433 {strides = array<i32>} : memref<64x128xf32, #tpu.memory_space<vmem>>, vector<8x64xf32>,
    %c8_158 = arith.constant 8 : index
    %c0_159 = arith.constant 0 : index
    %436 = vector.load %arg18[%c8_158, %c0_159] : memref<64x512xf32, #tpu.memory_space<vmem>>, vector<8x256xf32>
    %c48_160 = arith.constant 48 : index
    %c256_161 = arith.constant 256 : index
    %437 = vector.load %arg18[%c48_160, %c256_161] : memref<64x512xf32, #tpu.memory_space<vmem>>, vector<8x256xf32>
    %438 = tpu.concatenate %436, %437 in 1 : vector<8x256xf32>, vector<8x256xf32> -> vector<8x512xf32>
    %439 = tpu.concatenate %425, %433 in 1 : vector<8x64xf32>, vector<8x64xf32> -> vector<8x128xf32>
    %440 = arith.truncf %439 : vector<8x128xf32> to vector<8x128xbf16>
    %cst_162 = arith.constant dense<0.000000e+00> : vector<8x512xf32>
    %441 = tpu.matmul %440, %386, %cst_162 {dimension_numbers = #tpu.dot_dimension_numbers<[1], [0], [0], [1], [0, 0, 1, 1], [], []>} : vector<8x128xbf16>, vector<128x512xbf16>, vector<8x512xf32> -> vector<8x512xf32>
    %442 = arith.addf %438, %441 : vector<8x512xf32>
    %443 = vector.extract_strided_slice %442 {offsets = [0, 0], sizes = [8, 192], strides = [1, 1]} : vector<8x512xf32> to vector<8x192xf32>
    %cst_163 = arith.constant 5.000000e-01 : f32
    %444 = vector.broadcast %cst_163 : f32 to vector<8x192xf32>
    %445 = arith.mulf %444, %443 : vector<8x192xf32>
    %446 = math.tanh %445 : vector<8x192xf32>
    %cst_164 = arith.constant 5.000000e-01 : f32
    %447 = vector.broadcast %cst_164 : f32 to vector<8x192xf32>
    %448 = arith.mulf %447, %446 : vector<8x192xf32>
    %cst_165 = arith.constant 5.000000e-01 : f32
    %449 = vector.broadcast %cst_165 : f32 to vector<8x192xf32>
    %450 = arith.addf %448, %449 : vector<8x192xf32>
    %451 = vector.extract_strided_slice %442 {offsets = [0, 192], sizes = [8, 64], strides = [1, 1]} : vector<8x512xf32> to vector<8x64xf32>
    %452 = math.tanh %451 : vector<8x64xf32>
    %453 = vector.extract_strided_slice %442 {offsets = [0, 256], sizes = [8, 192], strides = [1, 1]} : vector<8x512xf32> to vector<8x192xf32>
    %cst_166 = arith.constant 5.000000e-01 : f32
    %454 = vector.broadcast %cst_166 : f32 to vector<8x192xf32>
    %455 = arith.mulf %454, %453 : vector<8x192xf32>
    %456 = math.tanh %455 : vector<8x192xf32>
    %cst_167 = arith.constant 5.000000e-01 : f32
    %457 = vector.broadcast %cst_167 : f32 to vector<8x192xf32>
    %458 = arith.mulf %457, %456 : vector<8x192xf32>
    %cst_168 = arith.constant 5.000000e-01 : f32
    %459 = vector.broadcast %cst_168 : f32 to vector<8x192xf32>
    %460 = arith.addf %458, %459 : vector<8x192xf32>
    %461 = vector.extract_strided_slice %442 {offsets = [0, 448], sizes = [8, 64], strides = [1, 1]} : vector<8x512xf32> to vector<8x64xf32>
    %462 = math.tanh %461 : vector<8x64xf32>
    %463 = vector.extract_strided_slice %450 {offsets = [0, 64], sizes = [8, 64], strides = [1, 1]} : vector<8x192xf32> to vector<8x64xf32>
    %464 = arith.mulf %463, %422 : vector<8x64xf32>
    %465 = vector.extract_strided_slice %450 {offsets = [0, 0], sizes = [8, 64], strides = [1, 1]} : vector<8x192xf32> to vector<8x64xf32>
    %466 = arith.mulf %465, %452 : vector<8x64xf32>
    %467 = arith.addf %464, %466 : vector<8x64xf32>
    %468 = vector.extract_strided_slice %450 {offsets = [0, 128], sizes = [8, 64], strides = [1, 1]} : vector<8x192xf32> to vector<8x64xf32>
    %469 = math.tanh %467 : vector<8x64xf32>
    %470 = arith.mulf %468, %469 : vector<8x64xf32>
    %471 = vector.extract_strided_slice %460 {offsets = [0, 64], sizes = [8, 64], strides = [1, 1]} : vector<8x192xf32> to vector<8x64xf32>
    %472 = arith.mulf %471, %430 : vector<8x64xf32>
    %473 = vector.extract_strided_slice %460 {offsets = [0, 0], sizes = [8, 64], strides = [1, 1]} : vector<8x192xf32> to vector<8x64xf32>
    %474 = arith.mulf %473, %462 : vector<8x64xf32>
    %475 = arith.addf %472, %474 : vector<8x64xf32>
    %476 = vector.extract_strided_slice %460 {offsets = [0, 128], sizes = [8, 64], strides = [1, 1]} : vector<8x192xf32> to vector<8x64xf32>
    %477 = math.tanh %475 : vector<8x64xf32>
    %478 = arith.mulf %476, %477 : vector<8x64xf32>
    %c8_169 = arith.constant 8 : index
    %c0_170 = arith.constant 0 : index
    %479 = vector.load %arg20[%c8_169, %c0_170] : memref<64x128xf32, #tpu.memory_space<vmem>>, vector<8x64xf32>
    tpu.vector_store %arg20[%c8_169, %c0_170], %470 {strides = array<i32>} : memref<64x128xf32, #tpu.memory_space<vmem>>, vector<8x64xf32>,
    %c48_171 = arith.constant 48 : index
    %c64_172 = arith.constant 64 : index
    %480 = vector.load %arg20[%c48_171, %c64_172] : memref<64x128xf32, #tpu.memory_space<vmem>>, vector<8x64xf32>
    tpu.vector_store %arg20[%c48_171, %c64_172], %478 {strides = array<i32>} : memref<64x128xf32, #tpu.memory_space<vmem>>, vector<8x64xf32>,
    %c16_173 = arith.constant 16 : index
    %c0_174 = arith.constant 0 : index
    %481 = vector.load %arg18[%c16_173, %c0_174] : memref<64x512xf32, #tpu.memory_space<vmem>>, vector<8x256xf32>
    %c40_175 = arith.constant 40 : index
    %c256_176 = arith.constant 256 : index
    %482 = vector.load %arg18[%c40_175, %c256_176] : memref<64x512xf32, #tpu.memory_space<vmem>>, vector<8x256xf32>
    %483 = tpu.concatenate %481, %482 in 1 : vector<8x256xf32>, vector<8x256xf32> -> vector<8x512xf32>
    %484 = tpu.concatenate %470, %478 in 1 : vector<8x64xf32>, vector<8x64xf32> -> vector<8x128xf32>
    %485 = arith.truncf %484 : vector<8x128xf32> to vector<8x128xbf16>
    %cst_177 = arith.constant dense<0.000000e+00> : vector<8x512xf32>
    %486 = tpu.matmul %485, %386, %cst_177 {dimension_numbers = #tpu.dot_dimension_numbers<[1], [0], [0], [1], [0, 0, 1, 1], [], []>} : vector<8x128xbf16>, vector<128x512xbf16>, vector<8x512xf32> -> vector<8x512xf32>
    %487 = arith.addf %483, %486 : vector<8x512xf32>
    %488 = vector.extract_strided_slice %487 {offsets = [0, 0], sizes = [8, 192], strides = [1, 1]} : vector<8x512xf32> to vector<8x192xf32>
    %cst_178 = arith.constant 5.000000e-01 : f32
    %489 = vector.broadcast %cst_178 : f32 to vector<8x192xf32>
    %490 = arith.mulf %489, %488 : vector<8x192xf32>
    %491 = math.tanh %490 : vector<8x192xf32>
    %cst_179 = arith.constant 5.000000e-01 : f32
    %492 = vector.broadcast %cst_179 : f32 to vector<8x192xf32>
    %493 = arith.mulf %492, %491 : vector<8x192xf32>
    %cst_180 = arith.constant 5.000000e-01 : f32
    %494 = vector.broadcast %cst_180 : f32 to vector<8x192xf32>
    %495 = arith.addf %493, %494 : vector<8x192xf32>
    %496 = vector.extract_strided_slice %487 {offsets = [0, 192], sizes = [8, 64], strides = [1, 1]} : vector<8x512xf32> to vector<8x64xf32>
    %497 = math.tanh %496 : vector<8x64xf32>
    %498 = vector.extract_strided_slice %487 {offsets = [0, 256], sizes = [8, 192], strides = [1, 1]} : vector<8x512xf32> to vector<8x192xf32>
    %cst_181 = arith.constant 5.000000e-01 : f32
    %499 = vector.broadcast %cst_181 : f32 to vector<8x192xf32>
    %500 = arith.mulf %499, %498 : vector<8x192xf32>
    %501 = math.tanh %500 : vector<8x192xf32>
    %cst_182 = arith.constant 5.000000e-01 : f32
    %502 = vector.broadcast %cst_182 : f32 to vector<8x192xf32>
    %503 = arith.mulf %502, %501 : vector<8x192xf32>
    %cst_183 = arith.constant 5.000000e-01 : f32
    %504 = vector.broadcast %cst_183 : f32 to vector<8x192xf32>
    %505 = arith.addf %503, %504 : vector<8x192xf32>
    %506 = vector.extract_strided_slice %487 {offsets = [0, 448], sizes = [8, 64], strides = [1, 1]} : vector<8x512xf32> to vector<8x64xf32>
    %507 = math.tanh %506 : vector<8x64xf32>
    %508 = vector.extract_strided_slice %495 {offsets = [0, 64], sizes = [8, 64], strides = [1, 1]} : vector<8x192xf32> to vector<8x64xf32>
    %509 = arith.mulf %508, %467 : vector<8x64xf32>
    %510 = vector.extract_strided_slice %495 {offsets = [0, 0], sizes = [8, 64], strides = [1, 1]} : vector<8x192xf32> to vector<8x64xf32>
    %511 = arith.mulf %510, %497 : vector<8x64xf32>
    %512 = arith.addf %509, %511 : vector<8x64xf32>
    %513 = vector.extract_strided_slice %495 {offsets = [0, 128], sizes = [8, 64], strides = [1, 1]} : vector<8x192xf32> to vector<8x64xf32>
    %514 = math.tanh %512 : vector<8x64xf32>
    %515 = arith.mulf %513, %514 : vector<8x64xf32>
    %516 = vector.extract_strided_slice %505 {offsets = [0, 64], sizes = [8, 64], strides = [1, 1]} : vector<8x192xf32> to vector<8x64xf32>
    %517 = arith.mulf %516, %475 : vector<8x64xf32>
    %518 = vector.extract_strided_slice %505 {offsets = [0, 0], sizes = [8, 64], strides = [1, 1]} : vector<8x192xf32> to vector<8x64xf32>
    %519 = arith.mulf %518, %507 : vector<8x64xf32>
    %520 = arith.addf %517, %519 : vector<8x64xf32>
    %521 = vector.extract_strided_slice %505 {offsets = [0, 128], sizes = [8, 64], strides = [1, 1]} : vector<8x192xf32> to vector<8x64xf32>
    %522 = math.tanh %520 : vector<8x64xf32>
    %523 = arith.mulf %521, %522 : vector<8x64xf32>
    %c16_184 = arith.constant 16 : index
    %c0_185 = arith.constant 0 : index
    %524 = vector.load %arg20[%c16_184, %c0_185] : memref<64x128xf32, #tpu.memory_space<vmem>>, vector<8x64xf32>
    tpu.vector_store %arg20[%c16_184, %c0_185], %515 {strides = array<i32>} : memref<64x128xf32, #tpu.memory_space<vmem>>, vector<8x64xf32>,
    %c40_186 = arith.constant 40 : index
    %c64_187 = arith.constant 64 : index
    %525 = vector.load %arg20[%c40_186, %c64_187] : memref<64x128xf32, #tpu.memory_space<vmem>>, vector<8x64xf32>
    tpu.vector_store %arg20[%c40_186, %c64_187], %523 {strides = array<i32>} : memref<64x128xf32, #tpu.memory_space<vmem>>, vector<8x64xf32>,
    %c24_188 = arith.constant 24 : index
    %c0_189 = arith.constant 0 : index
    %526 = vector.load %arg18[%c24_188, %c0_189] : memref<64x512xf32, #tpu.memory_space<vmem>>, vector<8x256xf32>
    %c32_190 = arith.constant 32 : index
    %c256_191 = arith.constant 256 : index
    %527 = vector.load %arg18[%c32_190, %c256_191] : memref<64x512xf32, #tpu.memory_space<vmem>>, vector<8x256xf32>
    %528 = tpu.concatenate %526, %527 in 1 : vector<8x256xf32>, vector<8x256xf32> -> vector<8x512xf32>
    %529 = tpu.concatenate %515, %523 in 1 : vector<8x64xf32>, vector<8x64xf32> -> vector<8x128xf32>
    %530 = arith.truncf %529 : vector<8x128xf32> to vector<8x128xbf16>
    %cst_192 = arith.constant dense<0.000000e+00> : vector<8x512xf32>
    %531 = tpu.matmul %530, %386, %cst_192 {dimension_numbers = #tpu.dot_dimension_numbers<[1], [0], [0], [1], [0, 0, 1, 1], [], []>} : vector<8x128xbf16>, vector<128x512xbf16>, vector<8x512xf32> -> vector<8x512xf32>
    %532 = arith.addf %528, %531 : vector<8x512xf32>
    %533 = vector.extract_strided_slice %532 {offsets = [0, 0], sizes = [8, 192], strides = [1, 1]} : vector<8x512xf32> to vector<8x192xf32>
    %cst_193 = arith.constant 5.000000e-01 : f32
    %534 = vector.broadcast %cst_193 : f32 to vector<8x192xf32>
    %535 = arith.mulf %534, %533 : vector<8x192xf32>
    %536 = math.tanh %535 : vector<8x192xf32>
    %cst_194 = arith.constant 5.000000e-01 : f32
    %537 = vector.broadcast %cst_194 : f32 to vector<8x192xf32>
    %538 = arith.mulf %537, %536 : vector<8x192xf32>
    %cst_195 = arith.constant 5.000000e-01 : f32
    %539 = vector.broadcast %cst_195 : f32 to vector<8x192xf32>
    %540 = arith.addf %538, %539 : vector<8x192xf32>
    %541 = vector.extract_strided_slice %532 {offsets = [0, 192], sizes = [8, 64], strides = [1, 1]} : vector<8x512xf32> to vector<8x64xf32>
    %542 = math.tanh %541 : vector<8x64xf32>
    %543 = vector.extract_strided_slice %532 {offsets = [0, 256], sizes = [8, 192], strides = [1, 1]} : vector<8x512xf32> to vector<8x192xf32>
    %cst_196 = arith.constant 5.000000e-01 : f32
    %544 = vector.broadcast %cst_196 : f32 to vector<8x192xf32>
    %545 = arith.mulf %544, %543 : vector<8x192xf32>
    %546 = math.tanh %545 : vector<8x192xf32>
    %cst_197 = arith.constant 5.000000e-01 : f32
    %547 = vector.broadcast %cst_197 : f32 to vector<8x192xf32>
    %548 = arith.mulf %547, %546 : vector<8x192xf32>
    %cst_198 = arith.constant 5.000000e-01 : f32
    %549 = vector.broadcast %cst_198 : f32 to vector<8x192xf32>
    %550 = arith.addf %548, %549 : vector<8x192xf32>
    %551 = vector.extract_strided_slice %532 {offsets = [0, 448], sizes = [8, 64], strides = [1, 1]} : vector<8x512xf32> to vector<8x64xf32>
    %552 = math.tanh %551 : vector<8x64xf32>
    %553 = vector.extract_strided_slice %540 {offsets = [0, 64], sizes = [8, 64], strides = [1, 1]} : vector<8x192xf32> to vector<8x64xf32>
    %554 = arith.mulf %553, %512 : vector<8x64xf32>
    %555 = vector.extract_strided_slice %540 {offsets = [0, 0], sizes = [8, 64], strides = [1, 1]} : vector<8x192xf32> to vector<8x64xf32>
    %556 = arith.mulf %555, %542 : vector<8x64xf32>
    %557 = arith.addf %554, %556 : vector<8x64xf32>
    %558 = vector.extract_strided_slice %540 {offsets = [0, 128], sizes = [8, 64], strides = [1, 1]} : vector<8x192xf32> to vector<8x64xf32>
    %559 = math.tanh %557 : vector<8x64xf32>
    %560 = arith.mulf %558, %559 : vector<8x64xf32>
    %561 = vector.extract_strided_slice %550 {offsets = [0, 64], sizes = [8, 64], strides = [1, 1]} : vector<8x192xf32> to vector<8x64xf32>
    %562 = arith.mulf %561, %520 : vector<8x64xf32>
    %563 = vector.extract_strided_slice %550 {offsets = [0, 0], sizes = [8, 64], strides = [1, 1]} : vector<8x192xf32> to vector<8x64xf32>
    %564 = arith.mulf %563, %552 : vector<8x64xf32>
    %565 = arith.addf %562, %564 : vector<8x64xf32>
    %566 = vector.extract_strided_slice %550 {offsets = [0, 128], sizes = [8, 64], strides = [1, 1]} : vector<8x192xf32> to vector<8x64xf32>
    %567 = math.tanh %565 : vector<8x64xf32>
    %568 = arith.mulf %566, %567 : vector<8x64xf32>
    %c24_199 = arith.constant 24 : index
    %c0_200 = arith.constant 0 : index
    %569 = vector.load %arg20[%c24_199, %c0_200] : memref<64x128xf32, #tpu.memory_space<vmem>>, vector<8x64xf32>
    tpu.vector_store %arg20[%c24_199, %c0_200], %560 {strides = array<i32>} : memref<64x128xf32, #tpu.memory_space<vmem>>, vector<8x64xf32>,
    %c32_201 = arith.constant 32 : index
    %c64_202 = arith.constant 64 : index
    %570 = vector.load %arg20[%c32_201, %c64_202] : memref<64x128xf32, #tpu.memory_space<vmem>>, vector<8x64xf32>
    tpu.vector_store %arg20[%c32_201, %c64_202], %568 {strides = array<i32>} : memref<64x128xf32, #tpu.memory_space<vmem>>, vector<8x64xf32>,
    %c32_203 = arith.constant 32 : index
    %c0_204 = arith.constant 0 : index
    %571 = vector.load %arg18[%c32_203, %c0_204] : memref<64x512xf32, #tpu.memory_space<vmem>>, vector<8x256xf32>
    %c24_205 = arith.constant 24 : index
    %c256_206 = arith.constant 256 : index
    %572 = vector.load %arg18[%c24_205, %c256_206] : memref<64x512xf32, #tpu.memory_space<vmem>>, vector<8x256xf32>
    %573 = tpu.concatenate %571, %572 in 1 : vector<8x256xf32>, vector<8x256xf32> -> vector<8x512xf32>
    %574 = tpu.concatenate %560, %568 in 1 : vector<8x64xf32>, vector<8x64xf32> -> vector<8x128xf32>
    %575 = arith.truncf %574 : vector<8x128xf32> to vector<8x128xbf16>
    %cst_207 = arith.constant dense<0.000000e+00> : vector<8x512xf32>
    %576 = tpu.matmul %575, %386, %cst_207 {dimension_numbers = #tpu.dot_dimension_numbers<[1], [0], [0], [1], [0, 0, 1, 1], [], []>} : vector<8x128xbf16>, vector<128x512xbf16>, vector<8x512xf32> -> vector<8x512xf32>
    %577 = arith.addf %573, %576 : vector<8x512xf32>
    %578 = vector.extract_strided_slice %577 {offsets = [0, 0], sizes = [8, 192], strides = [1, 1]} : vector<8x512xf32> to vector<8x192xf32>
    %cst_208 = arith.constant 5.000000e-01 : f32
    %579 = vector.broadcast %cst_208 : f32 to vector<8x192xf32>
    %580 = arith.mulf %579, %578 : vector<8x192xf32>
    %581 = math.tanh %580 : vector<8x192xf32>
    %cst_209 = arith.constant 5.000000e-01 : f32
    %582 = vector.broadcast %cst_209 : f32 to vector<8x192xf32>
    %583 = arith.mulf %582, %581 : vector<8x192xf32>
    %cst_210 = arith.constant 5.000000e-01 : f32
    %584 = vector.broadcast %cst_210 : f32 to vector<8x192xf32>
    %585 = arith.addf %583, %584 : vector<8x192xf32>
    %586 = vector.extract_strided_slice %577 {offsets = [0, 192], sizes = [8, 64], strides = [1, 1]} : vector<8x512xf32> to vector<8x64xf32>
    %587 = math.tanh %586 : vector<8x64xf32>
    %588 = vector.extract_strided_slice %577 {offsets = [0, 256], sizes = [8, 192], strides = [1, 1]} : vector<8x512xf32> to vector<8x192xf32>
    %cst_211 = arith.constant 5.000000e-01 : f32
    %589 = vector.broadcast %cst_211 : f32 to vector<8x192xf32>
    %590 = arith.mulf %589, %588 : vector<8x192xf32>
    %591 = math.tanh %590 : vector<8x192xf32>
    %cst_212 = arith.constant 5.000000e-01 : f32
    %592 = vector.broadcast %cst_212 : f32 to vector<8x192xf32>
    %593 = arith.mulf %592, %591 : vector<8x192xf32>
    %cst_213 = arith.constant 5.000000e-01 : f32
    %594 = vector.broadcast %cst_213 : f32 to vector<8x192xf32>
    %595 = arith.addf %593, %594 : vector<8x192xf32>
    %596 = vector.extract_strided_slice %577 {offsets = [0, 448], sizes = [8, 64], strides = [1, 1]} : vector<8x512xf32> to vector<8x64xf32>
    %597 = math.tanh %596 : vector<8x64xf32>
    %598 = vector.extract_strided_slice %585 {offsets = [0, 64], sizes = [8, 64], strides = [1, 1]} : vector<8x192xf32> to vector<8x64xf32>
    %599 = arith.mulf %598, %557 : vector<8x64xf32>
    %600 = vector.extract_strided_slice %585 {offsets = [0, 0], sizes = [8, 64], strides = [1, 1]} : vector<8x192xf32> to vector<8x64xf32>
    %601 = arith.mulf %600, %587 : vector<8x64xf32>
    %602 = arith.addf %599, %601 : vector<8x64xf32>
    %603 = vector.extract_strided_slice %585 {offsets = [0, 128], sizes = [8, 64], strides = [1, 1]} : vector<8x192xf32> to vector<8x64xf32>
    %604 = math.tanh %602 : vector<8x64xf32>
    %605 = arith.mulf %603, %604 : vector<8x64xf32>
    %606 = vector.extract_strided_slice %595 {offsets = [0, 64], sizes = [8, 64], strides = [1, 1]} : vector<8x192xf32> to vector<8x64xf32>
    %607 = arith.mulf %606, %565 : vector<8x64xf32>
    %608 = vector.extract_strided_slice %595 {offsets = [0, 0], sizes = [8, 64], strides = [1, 1]} : vector<8x192xf32> to vector<8x64xf32>
    %609 = arith.mulf %608, %597 : vector<8x64xf32>
    %610 = arith.addf %607, %609 : vector<8x64xf32>
    %611 = vector.extract_strided_slice %595 {offsets = [0, 128], sizes = [8, 64], strides = [1, 1]} : vector<8x192xf32> to vector<8x64xf32>
    %612 = math.tanh %610 : vector<8x64xf32>
    %613 = arith.mulf %611, %612 : vector<8x64xf32>
    %c32_214 = arith.constant 32 : index
    %c0_215 = arith.constant 0 : index
    %614 = vector.load %arg20[%c32_214, %c0_215] : memref<64x128xf32, #tpu.memory_space<vmem>>, vector<8x64xf32>
    tpu.vector_store %arg20[%c32_214, %c0_215], %605 {strides = array<i32>} : memref<64x128xf32, #tpu.memory_space<vmem>>, vector<8x64xf32>,
    %c24_216 = arith.constant 24 : index
    %c64_217 = arith.constant 64 : index
    %615 = vector.load %arg20[%c24_216, %c64_217] : memref<64x128xf32, #tpu.memory_space<vmem>>, vector<8x64xf32>
    tpu.vector_store %arg20[%c24_216, %c64_217], %613 {strides = array<i32>} : memref<64x128xf32, #tpu.memory_space<vmem>>, vector<8x64xf32>,
    %c40_218 = arith.constant 40 : index
    %c0_219 = arith.constant 0 : index
    %616 = vector.load %arg18[%c40_218, %c0_219] : memref<64x512xf32, #tpu.memory_space<vmem>>, vector<8x256xf32>
    %c16_220 = arith.constant 16 : index
    %c256_221 = arith.constant 256 : index
    %617 = vector.load %arg18[%c16_220, %c256_221] : memref<64x512xf32, #tpu.memory_space<vmem>>, vector<8x256xf32>
    %618 = tpu.concatenate %616, %617 in 1 : vector<8x256xf32>, vector<8x256xf32> -> vector<8x512xf32>
    %619 = tpu.concatenate %605, %613 in 1 : vector<8x64xf32>, vector<8x64xf32> -> vector<8x128xf32>
    %620 = arith.truncf %619 : vector<8x128xf32> to vector<8x128xbf16>
    %cst_222 = arith.constant dense<0.000000e+00> : vector<8x512xf32>
    %621 = tpu.matmul %620, %386, %cst_222 {dimension_numbers = #tpu.dot_dimension_numbers<[1], [0], [0], [1], [0, 0, 1, 1], [], []>} : vector<8x128xbf16>, vector<128x512xbf16>, vector<8x512xf32> -> vector<8x512xf32>
    %622 = arith.addf %618, %621 : vector<8x512xf32>
    %623 = vector.extract_strided_slice %622 {offsets = [0, 0], sizes = [8, 192], strides = [1, 1]} : vector<8x512xf32> to vector<8x192xf32>
    %cst_223 = arith.constant 5.000000e-01 : f32
    %624 = vector.broadcast %cst_223 : f32 to vector<8x192xf32>
    %625 = arith.mulf %624, %623 : vector<8x192xf32>
    %626 = math.tanh %625 : vector<8x192xf32>
    %cst_224 = arith.constant 5.000000e-01 : f32
    %627 = vector.broadcast %cst_224 : f32 to vector<8x192xf32>
    %628 = arith.mulf %627, %626 : vector<8x192xf32>
    %cst_225 = arith.constant 5.000000e-01 : f32
    %629 = vector.broadcast %cst_225 : f32 to vector<8x192xf32>
    %630 = arith.addf %628, %629 : vector<8x192xf32>
    %631 = vector.extract_strided_slice %622 {offsets = [0, 192], sizes = [8, 64], strides = [1, 1]} : vector<8x512xf32> to vector<8x64xf32>
    %632 = math.tanh %631 : vector<8x64xf32>
    %633 = vector.extract_strided_slice %622 {offsets = [0, 256], sizes = [8, 192], strides = [1, 1]} : vector<8x512xf32> to vector<8x192xf32>
    %cst_226 = arith.constant 5.000000e-01 : f32
    %634 = vector.broadcast %cst_226 : f32 to vector<8x192xf32>
    %635 = arith.mulf %634, %633 : vector<8x192xf32>
    %636 = math.tanh %635 : vector<8x192xf32>
    %cst_227 = arith.constant 5.000000e-01 : f32
    %637 = vector.broadcast %cst_227 : f32 to vector<8x192xf32>
    %638 = arith.mulf %637, %636 : vector<8x192xf32>
    %cst_228 = arith.constant 5.000000e-01 : f32
    %639 = vector.broadcast %cst_228 : f32 to vector<8x192xf32>
    %640 = arith.addf %638, %639 : vector<8x192xf32>
    %641 = vector.extract_strided_slice %622 {offsets = [0, 448], sizes = [8, 64], strides = [1, 1]} : vector<8x512xf32> to vector<8x64xf32>
    %642 = math.tanh %641 : vector<8x64xf32>
    %643 = vector.extract_strided_slice %630 {offsets = [0, 64], sizes = [8, 64], strides = [1, 1]} : vector<8x192xf32> to vector<8x64xf32>
    %644 = arith.mulf %643, %602 : vector<8x64xf32>
    %645 = vector.extract_strided_slice %630 {offsets = [0, 0], sizes = [8, 64], strides = [1, 1]} : vector<8x192xf32> to vector<8x64xf32>
    %646 = arith.mulf %645, %632 : vector<8x64xf32>
    %647 = arith.addf %644, %646 : vector<8x64xf32>
    %648 = vector.extract_strided_slice %630 {offsets = [0, 128], sizes = [8, 64], strides = [1, 1]} : vector<8x192xf32> to vector<8x64xf32>
    %649 = math.tanh %647 : vector<8x64xf32>
    %650 = arith.mulf %648, %649 : vector<8x64xf32>
    %651 = vector.extract_strided_slice %640 {offsets = [0, 64], sizes = [8, 64], strides = [1, 1]} : vector<8x192xf32> to vector<8x64xf32>
    %652 = arith.mulf %651, %610 : vector<8x64xf32>
    %653 = vector.extract_strided_slice %640 {offsets = [0, 0], sizes = [8, 64], strides = [1, 1]} : vector<8x192xf32> to vector<8x64xf32>
    %654 = arith.mulf %653, %642 : vector<8x64xf32>
    %655 = arith.addf %652, %654 : vector<8x64xf32>
    %656 = vector.extract_strided_slice %640 {offsets = [0, 128], sizes = [8, 64], strides = [1, 1]} : vector<8x192xf32> to vector<8x64xf32>
    %657 = math.tanh %655 : vector<8x64xf32>
    %658 = arith.mulf %656, %657 : vector<8x64xf32>
    %c40_229 = arith.constant 40 : index
    %c0_230 = arith.constant 0 : index
    %659 = vector.load %arg20[%c40_229, %c0_230] : memref<64x128xf32, #tpu.memory_space<vmem>>, vector<8x64xf32>
    tpu.vector_store %arg20[%c40_229, %c0_230], %650 {strides = array<i32>} : memref<64x128xf32, #tpu.memory_space<vmem>>, vector<8x64xf32>,
    %c16_231 = arith.constant 16 : index
    %c64_232 = arith.constant 64 : index
    %660 = vector.load %arg20[%c16_231, %c64_232] : memref<64x128xf32, #tpu.memory_space<vmem>>, vector<8x64xf32>
    tpu.vector_store %arg20[%c16_231, %c64_232], %658 {strides = array<i32>} : memref<64x128xf32, #tpu.memory_space<vmem>>, vector<8x64xf32>,
    %c48_233 = arith.constant 48 : index
    %c0_234 = arith.constant 0 : index
    %661 = vector.load %arg18[%c48_233, %c0_234] : memref<64x512xf32, #tpu.memory_space<vmem>>, vector<8x256xf32>
    %c8_235 = arith.constant 8 : index
    %c256_236 = arith.constant 256 : index
    %662 = vector.load %arg18[%c8_235, %c256_236] : memref<64x512xf32, #tpu.memory_space<vmem>>, vector<8x256xf32>
    %663 = tpu.concatenate %661, %662 in 1 : vector<8x256xf32>, vector<8x256xf32> -> vector<8x512xf32>
    %664 = tpu.concatenate %650, %658 in 1 : vector<8x64xf32>, vector<8x64xf32> -> vector<8x128xf32>
    %665 = arith.truncf %664 : vector<8x128xf32> to vector<8x128xbf16>
    %cst_237 = arith.constant dense<0.000000e+00> : vector<8x512xf32>
    %666 = tpu.matmul %665, %386, %cst_237 {dimension_numbers = #tpu.dot_dimension_numbers<[1], [0], [0], [1], [0, 0, 1, 1], [], []>} : vector<8x128xbf16>, vector<128x512xbf16>, vector<8x512xf32> -> vector<8x512xf32>
    %667 = arith.addf %663, %666 : vector<8x512xf32>
    %668 = vector.extract_strided_slice %667 {offsets = [0, 0], sizes = [8, 192], strides = [1, 1]} : vector<8x512xf32> to vector<8x192xf32>
    %cst_238 = arith.constant 5.000000e-01 : f32
    %669 = vector.broadcast %cst_238 : f32 to vector<8x192xf32>
    %670 = arith.mulf %669, %668 : vector<8x192xf32>
    %671 = math.tanh %670 : vector<8x192xf32>
    %cst_239 = arith.constant 5.000000e-01 : f32
    %672 = vector.broadcast %cst_239 : f32 to vector<8x192xf32>
    %673 = arith.mulf %672, %671 : vector<8x192xf32>
    %cst_240 = arith.constant 5.000000e-01 : f32
    %674 = vector.broadcast %cst_240 : f32 to vector<8x192xf32>
    %675 = arith.addf %673, %674 : vector<8x192xf32>
    %676 = vector.extract_strided_slice %667 {offsets = [0, 192], sizes = [8, 64], strides = [1, 1]} : vector<8x512xf32> to vector<8x64xf32>
    %677 = math.tanh %676 : vector<8x64xf32>
    %678 = vector.extract_strided_slice %667 {offsets = [0, 256], sizes = [8, 192], strides = [1, 1]} : vector<8x512xf32> to vector<8x192xf32>
    %cst_241 = arith.constant 5.000000e-01 : f32
    %679 = vector.broadcast %cst_241 : f32 to vector<8x192xf32>
    %680 = arith.mulf %679, %678 : vector<8x192xf32>
    %681 = math.tanh %680 : vector<8x192xf32>
    %cst_242 = arith.constant 5.000000e-01 : f32
    %682 = vector.broadcast %cst_242 : f32 to vector<8x192xf32>
    %683 = arith.mulf %682, %681 : vector<8x192xf32>
    %cst_243 = arith.constant 5.000000e-01 : f32
    %684 = vector.broadcast %cst_243 : f32 to vector<8x192xf32>
    %685 = arith.addf %683, %684 : vector<8x192xf32>
    %686 = vector.extract_strided_slice %667 {offsets = [0, 448], sizes = [8, 64], strides = [1, 1]} : vector<8x512xf32> to vector<8x64xf32>
    %687 = math.tanh %686 : vector<8x64xf32>
    %688 = vector.extract_strided_slice %675 {offsets = [0, 64], sizes = [8, 64], strides = [1, 1]} : vector<8x192xf32> to vector<8x64xf32>
    %689 = arith.mulf %688, %647 : vector<8x64xf32>
    %690 = vector.extract_strided_slice %675 {offsets = [0, 0], sizes = [8, 64], strides = [1, 1]} : vector<8x192xf32> to vector<8x64xf32>
    %691 = arith.mulf %690, %677 : vector<8x64xf32>
    %692 = arith.addf %689, %691 : vector<8x64xf32>
    %693 = vector.extract_strided_slice %675 {offsets = [0, 128], sizes = [8, 64], strides = [1, 1]} : vector<8x192xf32> to vector<8x64xf32>
    %694 = math.tanh %692 : vector<8x64xf32>
    %695 = arith.mulf %693, %694 : vector<8x64xf32>
    %696 = vector.extract_strided_slice %685 {offsets = [0, 64], sizes = [8, 64], strides = [1, 1]} : vector<8x192xf32> to vector<8x64xf32>
    %697 = arith.mulf %696, %655 : vector<8x64xf32>
    %698 = vector.extract_strided_slice %685 {offsets = [0, 0], sizes = [8, 64], strides = [1, 1]} : vector<8x192xf32> to vector<8x64xf32>
    %699 = arith.mulf %698, %687 : vector<8x64xf32>
    %700 = arith.addf %697, %699 : vector<8x64xf32>
    %701 = vector.extract_strided_slice %685 {offsets = [0, 128], sizes = [8, 64], strides = [1, 1]} : vector<8x192xf32> to vector<8x64xf32>
    %702 = math.tanh %700 : vector<8x64xf32>
    %703 = arith.mulf %701, %702 : vector<8x64xf32>
    %c48_244 = arith.constant 48 : index
    %c0_245 = arith.constant 0 : index
    %704 = vector.load %arg20[%c48_244, %c0_245] : memref<64x128xf32, #tpu.memory_space<vmem>>, vector<8x64xf32>
    tpu.vector_store %arg20[%c48_244, %c0_245], %695 {strides = array<i32>} : memref<64x128xf32, #tpu.memory_space<vmem>>, vector<8x64xf32>,
    %c8_246 = arith.constant 8 : index
    %c64_247 = arith.constant 64 : index
    %705 = vector.load %arg20[%c8_246, %c64_247] : memref<64x128xf32, #tpu.memory_space<vmem>>, vector<8x64xf32>
    tpu.vector_store %arg20[%c8_246, %c64_247], %703 {strides = array<i32>} : memref<64x128xf32, #tpu.memory_space<vmem>>, vector<8x64xf32>,
    %c56_248 = arith.constant 56 : index
    %c0_249 = arith.constant 0 : index
    %706 = vector.load %arg18[%c56_248, %c0_249] : memref<64x512xf32, #tpu.memory_space<vmem>>, vector<8x256xf32>
    %c0_250 = arith.constant 0 : index
    %c256_251 = arith.constant 256 : index
    %707 = vector.load %arg18[%c0_250, %c256_251] : memref<64x512xf32, #tpu.memory_space<vmem>>, vector<8x256xf32>
    %708 = tpu.concatenate %706, %707 in 1 : vector<8x256xf32>, vector<8x256xf32> -> vector<8x512xf32>
    %709 = tpu.concatenate %695, %703 in 1 : vector<8x64xf32>, vector<8x64xf32> -> vector<8x128xf32>
    %710 = arith.truncf %709 : vector<8x128xf32> to vector<8x128xbf16>
    %cst_252 = arith.constant dense<0.000000e+00> : vector<8x512xf32>
    %711 = tpu.matmul %710, %386, %cst_252 {dimension_numbers = #tpu.dot_dimension_numbers<[1], [0], [0], [1], [0, 0, 1, 1], [], []>} : vector<8x128xbf16>, vector<128x512xbf16>, vector<8x512xf32> -> vector<8x512xf32>
    %712 = arith.addf %708, %711 : vector<8x512xf32>
    %713 = vector.extract_strided_slice %712 {offsets = [0, 0], sizes = [8, 192], strides = [1, 1]} : vector<8x512xf32> to vector<8x192xf32>
    %cst_253 = arith.constant 5.000000e-01 : f32
    %714 = vector.broadcast %cst_253 : f32 to vector<8x192xf32>
    %715 = arith.mulf %714, %713 : vector<8x192xf32>
    %716 = math.tanh %715 : vector<8x192xf32>
    %cst_254 = arith.constant 5.000000e-01 : f32
    %717 = vector.broadcast %cst_254 : f32 to vector<8x192xf32>
    %718 = arith.mulf %717, %716 : vector<8x192xf32>
    %cst_255 = arith.constant 5.000000e-01 : f32
    %719 = vector.broadcast %cst_255 : f32 to vector<8x192xf32>
    %720 = arith.addf %718, %719 : vector<8x192xf32>
    %721 = vector.extract_strided_slice %712 {offsets = [0, 192], sizes = [8, 64], strides = [1, 1]} : vector<8x512xf32> to vector<8x64xf32>
    %722 = math.tanh %721 : vector<8x64xf32>
    %723 = vector.extract_strided_slice %712 {offsets = [0, 256], sizes = [8, 192], strides = [1, 1]} : vector<8x512xf32> to vector<8x192xf32>
    %cst_256 = arith.constant 5.000000e-01 : f32
    %724 = vector.broadcast %cst_256 : f32 to vector<8x192xf32>
    %725 = arith.mulf %724, %723 : vector<8x192xf32>
    %726 = math.tanh %725 : vector<8x192xf32>
    %cst_257 = arith.constant 5.000000e-01 : f32
    %727 = vector.broadcast %cst_257 : f32 to vector<8x192xf32>
    %728 = arith.mulf %727, %726 : vector<8x192xf32>
    %cst_258 = arith.constant 5.000000e-01 : f32
    %729 = vector.broadcast %cst_258 : f32 to vector<8x192xf32>
    %730 = arith.addf %728, %729 : vector<8x192xf32>
    %731 = vector.extract_strided_slice %712 {offsets = [0, 448], sizes = [8, 64], strides = [1, 1]} : vector<8x512xf32> to vector<8x64xf32>
    %732 = math.tanh %731 : vector<8x64xf32>
    %733 = vector.extract_strided_slice %720 {offsets = [0, 64], sizes = [8, 64], strides = [1, 1]} : vector<8x192xf32> to vector<8x64xf32>
    %734 = arith.mulf %733, %692 : vector<8x64xf32>
    %735 = vector.extract_strided_slice %720 {offsets = [0, 0], sizes = [8, 64], strides = [1, 1]} : vector<8x192xf32> to vector<8x64xf32>
    %736 = arith.mulf %735, %722 : vector<8x64xf32>
    %737 = arith.addf %734, %736 : vector<8x64xf32>
    %738 = vector.extract_strided_slice %720 {offsets = [0, 128], sizes = [8, 64], strides = [1, 1]} : vector<8x192xf32> to vector<8x64xf32>
    %739 = math.tanh %737 : vector<8x64xf32>
    %740 = arith.mulf %738, %739 : vector<8x64xf32>
    %741 = vector.extract_strided_slice %730 {offsets = [0, 64], sizes = [8, 64], strides = [1, 1]} : vector<8x192xf32> to vector<8x64xf32>
    %742 = arith.mulf %741, %700 : vector<8x64xf32>
    %743 = vector.extract_strided_slice %730 {offsets = [0, 0], sizes = [8, 64], strides = [1, 1]} : vector<8x192xf32> to vector<8x64xf32>
    %744 = arith.mulf %743, %732 : vector<8x64xf32>
    %745 = arith.addf %742, %744 : vector<8x64xf32>
    %746 = vector.extract_strided_slice %730 {offsets = [0, 128], sizes = [8, 64], strides = [1, 1]} : vector<8x192xf32> to vector<8x64xf32>
    %747 = math.tanh %745 : vector<8x64xf32>
    %748 = arith.mulf %746, %747 : vector<8x64xf32>
    %c56_259 = arith.constant 56 : index
    %c0_260 = arith.constant 0 : index
    %749 = vector.load %arg20[%c56_259, %c0_260] : memref<64x128xf32, #tpu.memory_space<vmem>>, vector<8x64xf32>
    tpu.vector_store %arg20[%c56_259, %c0_260], %740 {strides = array<i32>} : memref<64x128xf32, #tpu.memory_space<vmem>>, vector<8x64xf32>,
    %c0_261 = arith.constant 0 : index
    %c64_262 = arith.constant 64 : index
    %750 = vector.load %arg20[%c0_261, %c64_262] : memref<64x128xf32, #tpu.memory_space<vmem>>, vector<8x64xf32>
    tpu.vector_store %arg20[%c0_261, %c64_262], %748 {strides = array<i32>} : memref<64x128xf32, #tpu.memory_space<vmem>>, vector<8x64xf32>,
    %c0_263 = arith.constant 0 : index
    %c0_264 = arith.constant 0 : index
    %751 = vector.load %arg20[%c0_263, %c0_264] : memref<64x128xf32, #tpu.memory_space<vmem>>, vector<64x128xf32>
    %c0_265 = arith.constant 0 : index
    %c0_266 = arith.constant 0 : index
    %752 = vector.load %arg9[%c0_265, %c0_266] : memref<128x384xbf16, #tpu.memory_space<vmem>>, vector<128x384xbf16>
    %753 = arith.truncf %751 : vector<64x128xf32> to vector<64x128xbf16>
    %cst_267 = arith.constant dense<0.000000e+00> : vector<64x384xf32>
    %754 = tpu.matmul %753, %752, %cst_267 {dimension_numbers = #tpu.dot_dimension_numbers<[1], [0], [0], [1], [0, 0, 1, 1], [], []>} : vector<64x128xbf16>, vector<128x384xbf16>, vector<64x384xf32> -> vector<64x384xf32>
    %c0_268 = arith.constant 0 : index
    %c0_269 = arith.constant 0 : index
    %755 = vector.load %arg10[%c0_268, %c0_269] : memref<1x384xf32, #tpu.memory_space<vmem>>, vector<1x384xf32>
    %756 = vector.broadcast %755 : vector<1x384xf32> to vector<64x384xf32>
    %757 = arith.addf %754, %756 : vector<64x384xf32>
    %c0_270 = arith.constant 0 : index
    %c0_271 = arith.constant 0 : index
    %758 = vector.load %arg21[%c0_270, %c0_271] : memref<64x384xf32, #tpu.memory_space<vmem>>, vector<64x384xf32>
    tpu.vector_store %arg21[%c0_270, %c0_271], %757 {strides = array<i32>} : memref<64x384xf32, #tpu.memory_space<vmem>>, vector<64x384xf32>,
    %cst_272 = arith.constant 0.000000e+00 : f32
    %759 = vector.broadcast %cst_272 : f32 to vector<8x8xf32>
    %c0_273 = arith.constant 0 : index
    %c0_274 = arith.constant 0 : index
    %760 = vector.load %arg21[%c0_273, %c0_274] : memref<64x384xf32, #tpu.memory_space<vmem>>, vector<8x128xf32>
    %c0_275 = arith.constant 0 : index
    %c128 = arith.constant 128 : index
    %761 = vector.load %arg21[%c0_275, %c128] : memref<64x384xf32, #tpu.memory_space<vmem>>, vector<8x128xf32>
    %762 = arith.mulf %760, %761 : vector<8x128xf32>
    %cst_276 = arith.constant dense<0.000000e+00> : vector<8xf32>
    %763 = vector.multi_reduction <add>, %762, %cst_276 [1] : vector<8x128xf32> to vector<8xf32>
    %764 = vector.shape_cast %763 : vector<8xf32> to vector<8x1xf32>
    %c8_277 = arith.constant 8 : index
    %c128_278 = arith.constant 128 : index
    %765 = vector.load %arg21[%c8_277, %c128_278] : memref<64x384xf32, #tpu.memory_space<vmem>>, vector<8x128xf32>
    %766 = arith.mulf %760, %765 : vector<8x128xf32>
    %cst_279 = arith.constant dense<0.000000e+00> : vector<8xf32>
    %767 = vector.multi_reduction <add>, %766, %cst_279 [1] : vector<8x128xf32> to vector<8xf32>
    %768 = vector.shape_cast %767 : vector<8xf32> to vector<8x1xf32>
    %c16_280 = arith.constant 16 : index
    %c128_281 = arith.constant 128 : index
    %769 = vector.load %arg21[%c16_280, %c128_281] : memref<64x384xf32, #tpu.memory_space<vmem>>, vector<8x128xf32>
    %770 = arith.mulf %760, %769 : vector<8x128xf32>
    %cst_282 = arith.constant dense<0.000000e+00> : vector<8xf32>
    %771 = vector.multi_reduction <add>, %770, %cst_282 [1] : vector<8x128xf32> to vector<8xf32>
    %772 = vector.shape_cast %771 : vector<8xf32> to vector<8x1xf32>
    %c24_283 = arith.constant 24 : index
    %c128_284 = arith.constant 128 : index
    %773 = vector.load %arg21[%c24_283, %c128_284] : memref<64x384xf32, #tpu.memory_space<vmem>>, vector<8x128xf32>
    %774 = arith.mulf %760, %773 : vector<8x128xf32>
    %cst_285 = arith.constant dense<0.000000e+00> : vector<8xf32>
    %775 = vector.multi_reduction <add>, %774, %cst_285 [1] : vector<8x128xf32> to vector<8xf32>
    %776 = vector.shape_cast %775 : vector<8xf32> to vector<8x1xf32>
    %c32_286 = arith.constant 32 : index
    %c128_287 = arith.constant 128 : index
    %777 = vector.load %arg21[%c32_286, %c128_287] : memref<64x384xf32, #tpu.memory_space<vmem>>, vector<8x128xf32>
    %778 = arith.mulf %760, %777 : vector<8x128xf32>
    %cst_288 = arith.constant dense<0.000000e+00> : vector<8xf32>
    %779 = vector.multi_reduction <add>, %778, %cst_288 [1] : vector<8x128xf32> to vector<8xf32>
    %780 = vector.shape_cast %779 : vector<8xf32> to vector<8x1xf32>
    %c40_289 = arith.constant 40 : index
    %c128_290 = arith.constant 128 : index
    %781 = vector.load %arg21[%c40_289, %c128_290] : memref<64x384xf32, #tpu.memory_space<vmem>>, vector<8x128xf32>
    %782 = arith.mulf %760, %781 : vector<8x128xf32>
    %cst_291 = arith.constant dense<0.000000e+00> : vector<8xf32>
    %783 = vector.multi_reduction <add>, %782, %cst_291 [1] : vector<8x128xf32> to vector<8xf32>
    %784 = vector.shape_cast %783 : vector<8xf32> to vector<8x1xf32>
    %c48_292 = arith.constant 48 : index
    %c128_293 = arith.constant 128 : index
    %785 = vector.load %arg21[%c48_292, %c128_293] : memref<64x384xf32, #tpu.memory_space<vmem>>, vector<8x128xf32>
    %786 = arith.mulf %760, %785 : vector<8x128xf32>
    %cst_294 = arith.constant dense<0.000000e+00> : vector<8xf32>
    %787 = vector.multi_reduction <add>, %786, %cst_294 [1] : vector<8x128xf32> to vector<8xf32>
    %788 = vector.shape_cast %787 : vector<8xf32> to vector<8x1xf32>
    %c56_295 = arith.constant 56 : index
    %c128_296 = arith.constant 128 : index
    %789 = vector.load %arg21[%c56_295, %c128_296] : memref<64x384xf32, #tpu.memory_space<vmem>>, vector<8x128xf32>
    %790 = arith.mulf %760, %789 : vector<8x128xf32>
    %cst_297 = arith.constant dense<0.000000e+00> : vector<8xf32>
    %791 = vector.multi_reduction <add>, %790, %cst_297 [1] : vector<8x128xf32> to vector<8xf32>
    %792 = vector.shape_cast %791 : vector<8xf32> to vector<8x1xf32>
    %793 = tpu.concatenate %764, %768, %772, %776, %780, %784, %788, %792 in 1 : vector<8x1xf32>, vector<8x1xf32>, vector<8x1xf32>, vector<8x1xf32>, vector<8x1xf32>, vector<8x1xf32>, vector<8x1xf32>, vector<8x1xf32> -> vector<8x8xf32>
    %cst_298 = arith.constant dense<0xFF800000> : vector<8xf32>
    %794 = vector.multi_reduction <maximumf>, %793, %cst_298 [1] : vector<8x8xf32> to vector<8xf32>
    %795 = vector.shape_cast %794 : vector<8xf32> to vector<8x1xf32>
    %796 = vector.broadcast %795 : vector<8x1xf32> to vector<8x8xf32>
    %797 = arith.subf %793, %796 : vector<8x8xf32>
    %798 = math.exp %797 : vector<8x8xf32>
    %cst_299 = arith.constant dense<0.000000e+00> : vector<8xf32>
    %799 = vector.multi_reduction <add>, %798, %cst_299 [1] : vector<8x8xf32> to vector<8xf32>
    %800 = vector.shape_cast %799 : vector<8xf32> to vector<8x1xf32>
    %801 = tpu.reciprocal %800 {approx = true} : vector<8x1xf32> -> vector<8x1xf32>
    %802 = vector.broadcast %801 : vector<8x1xf32> to vector<8x8xf32>
    %803 = arith.mulf %798, %802 : vector<8x8xf32>
    %804 = arith.addf %759, %803 : vector<8x8xf32>
    %c8_300 = arith.constant 8 : index
    %c0_301 = arith.constant 0 : index
    %805 = vector.load %arg21[%c8_300, %c0_301] : memref<64x384xf32, #tpu.memory_space<vmem>>, vector<8x128xf32>
    %c0_302 = arith.constant 0 : index
    %c128_303 = arith.constant 128 : index
    %806 = vector.load %arg21[%c0_302, %c128_303] : memref<64x384xf32, #tpu.memory_space<vmem>>, vector<8x128xf32>
    %807 = arith.mulf %805, %806 : vector<8x128xf32>
    %cst_304 = arith.constant dense<0.000000e+00> : vector<8xf32>
    %808 = vector.multi_reduction <add>, %807, %cst_304 [1] : vector<8x128xf32> to vector<8xf32>
    %809 = vector.shape_cast %808 : vector<8xf32> to vector<8x1xf32>
    %c8_305 = arith.constant 8 : index
    %c128_306 = arith.constant 128 : index
    %810 = vector.load %arg21[%c8_305, %c128_306] : memref<64x384xf32, #tpu.memory_space<vmem>>, vector<8x128xf32>
    %811 = arith.mulf %805, %810 : vector<8x128xf32>
    %cst_307 = arith.constant dense<0.000000e+00> : vector<8xf32>
    %812 = vector.multi_reduction <add>, %811, %cst_307 [1] : vector<8x128xf32> to vector<8xf32>
    %813 = vector.shape_cast %812 : vector<8xf32> to vector<8x1xf32>
    %c16_308 = arith.constant 16 : index
    %c128_309 = arith.constant 128 : index
    %814 = vector.load %arg21[%c16_308, %c128_309] : memref<64x384xf32, #tpu.memory_space<vmem>>, vector<8x128xf32>
    %815 = arith.mulf %805, %814 : vector<8x128xf32>
    %cst_310 = arith.constant dense<0.000000e+00> : vector<8xf32>
    %816 = vector.multi_reduction <add>, %815, %cst_310 [1] : vector<8x128xf32> to vector<8xf32>
    %817 = vector.shape_cast %816 : vector<8xf32> to vector<8x1xf32>
    %c24_311 = arith.constant 24 : index
    %c128_312 = arith.constant 128 : index
    %818 = vector.load %arg21[%c24_311, %c128_312] : memref<64x384xf32, #tpu.memory_space<vmem>>, vector<8x128xf32>
    %819 = arith.mulf %805, %818 : vector<8x128xf32>
    %cst_313 = arith.constant dense<0.000000e+00> : vector<8xf32>
    %820 = vector.multi_reduction <add>, %819, %cst_313 [1] : vector<8x128xf32> to vector<8xf32>
    %821 = vector.shape_cast %820 : vector<8xf32> to vector<8x1xf32>
    %c32_314 = arith.constant 32 : index
    %c128_315 = arith.constant 128 : index
    %822 = vector.load %arg21[%c32_314, %c128_315] : memref<64x384xf32, #tpu.memory_space<vmem>>, vector<8x128xf32>
    %823 = arith.mulf %805, %822 : vector<8x128xf32>
    %cst_316 = arith.constant dense<0.000000e+00> : vector<8xf32>
    %824 = vector.multi_reduction <add>, %823, %cst_316 [1] : vector<8x128xf32> to vector<8xf32>
    %825 = vector.shape_cast %824 : vector<8xf32> to vector<8x1xf32>
    %c40_317 = arith.constant 40 : index
    %c128_318 = arith.constant 128 : index
    %826 = vector.load %arg21[%c40_317, %c128_318] : memref<64x384xf32, #tpu.memory_space<vmem>>, vector<8x128xf32>
    %827 = arith.mulf %805, %826 : vector<8x128xf32>
    %cst_319 = arith.constant dense<0.000000e+00> : vector<8xf32>
    %828 = vector.multi_reduction <add>, %827, %cst_319 [1] : vector<8x128xf32> to vector<8xf32>
    %829 = vector.shape_cast %828 : vector<8xf32> to vector<8x1xf32>
    %c48_320 = arith.constant 48 : index
    %c128_321 = arith.constant 128 : index
    %830 = vector.load %arg21[%c48_320, %c128_321] : memref<64x384xf32, #tpu.memory_space<vmem>>, vector<8x128xf32>
    %831 = arith.mulf %805, %830 : vector<8x128xf32>
    %cst_322 = arith.constant dense<0.000000e+00> : vector<8xf32>
    %832 = vector.multi_reduction <add>, %831, %cst_322 [1] : vector<8x128xf32> to vector<8xf32>
    %833 = vector.shape_cast %832 : vector<8xf32> to vector<8x1xf32>
    %c56_323 = arith.constant 56 : index
    %c128_324 = arith.constant 128 : index
    %834 = vector.load %arg21[%c56_323, %c128_324] : memref<64x384xf32, #tpu.memory_space<vmem>>, vector<8x128xf32>
    %835 = arith.mulf %805, %834 : vector<8x128xf32>
    %cst_325 = arith.constant dense<0.000000e+00> : vector<8xf32>
    %836 = vector.multi_reduction <add>, %835, %cst_325 [1] : vector<8x128xf32> to vector<8xf32>
    %837 = vector.shape_cast %836 : vector<8xf32> to vector<8x1xf32>
    %838 = tpu.concatenate %809, %813, %817, %821, %825, %829, %833, %837 in 1 : vector<8x1xf32>, vector<8x1xf32>, vector<8x1xf32>, vector<8x1xf32>, vector<8x1xf32>, vector<8x1xf32>, vector<8x1xf32>, vector<8x1xf32> -> vector<8x8xf32>
    %cst_326 = arith.constant dense<0xFF800000> : vector<8xf32>
    %839 = vector.multi_reduction <maximumf>, %838, %cst_326 [1] : vector<8x8xf32> to vector<8xf32>
    %840 = vector.shape_cast %839 : vector<8xf32> to vector<8x1xf32>
    %841 = vector.broadcast %840 : vector<8x1xf32> to vector<8x8xf32>
    %842 = arith.subf %838, %841 : vector<8x8xf32>
    %843 = math.exp %842 : vector<8x8xf32>
    %cst_327 = arith.constant dense<0.000000e+00> : vector<8xf32>
    %844 = vector.multi_reduction <add>, %843, %cst_327 [1] : vector<8x8xf32> to vector<8xf32>
    %845 = vector.shape_cast %844 : vector<8xf32> to vector<8x1xf32>
    %846 = tpu.reciprocal %845 {approx = true} : vector<8x1xf32> -> vector<8x1xf32>
    %847 = vector.broadcast %846 : vector<8x1xf32> to vector<8x8xf32>
    %848 = arith.mulf %843, %847 : vector<8x8xf32>
    %849 = arith.addf %804, %848 : vector<8x8xf32>
    %c16_328 = arith.constant 16 : index
    %c0_329 = arith.constant 0 : index
    %850 = vector.load %arg21[%c16_328, %c0_329] : memref<64x384xf32, #tpu.memory_space<vmem>>, vector<8x128xf32>
    %c0_330 = arith.constant 0 : index
    %c128_331 = arith.constant 128 : index
    %851 = vector.load %arg21[%c0_330, %c128_331] : memref<64x384xf32, #tpu.memory_space<vmem>>, vector<8x128xf32>
    %852 = arith.mulf %850, %851 : vector<8x128xf32>
    %cst_332 = arith.constant dense<0.000000e+00> : vector<8xf32>
    %853 = vector.multi_reduction <add>, %852, %cst_332 [1] : vector<8x128xf32> to vector<8xf32>
    %854 = vector.shape_cast %853 : vector<8xf32> to vector<8x1xf32>
    %c8_333 = arith.constant 8 : index
    %c128_334 = arith.constant 128 : index
    %855 = vector.load %arg21[%c8_333, %c128_334] : memref<64x384xf32, #tpu.memory_space<vmem>>, vector<8x128xf32>
    %856 = arith.mulf %850, %855 : vector<8x128xf32>
    %cst_335 = arith.constant dense<0.000000e+00> : vector<8xf32>
    %857 = vector.multi_reduction <add>, %856, %cst_335 [1] : vector<8x128xf32> to vector<8xf32>
    %858 = vector.shape_cast %857 : vector<8xf32> to vector<8x1xf32>
    %c16_336 = arith.constant 16 : index
    %c128_337 = arith.constant 128 : index
    %859 = vector.load %arg21[%c16_336, %c128_337] : memref<64x384xf32, #tpu.memory_space<vmem>>, vector<8x128xf32>
    %860 = arith.mulf %850, %859 : vector<8x128xf32>
    %cst_338 = arith.constant dense<0.000000e+00> : vector<8xf32>
    %861 = vector.multi_reduction <add>, %860, %cst_338 [1] : vector<8x128xf32> to vector<8xf32>
    %862 = vector.shape_cast %861 : vector<8xf32> to vector<8x1xf32>
    %c24_339 = arith.constant 24 : index
    %c128_340 = arith.constant 128 : index
    %863 = vector.load %arg21[%c24_339, %c128_340] : memref<64x384xf32, #tpu.memory_space<vmem>>, vector<8x128xf32>
    %864 = arith.mulf %850, %863 : vector<8x128xf32>
    %cst_341 = arith.constant dense<0.000000e+00> : vector<8xf32>
    %865 = vector.multi_reduction <add>, %864, %cst_341 [1] : vector<8x128xf32> to vector<8xf32>
    %866 = vector.shape_cast %865 : vector<8xf32> to vector<8x1xf32>
    %c32_342 = arith.constant 32 : index
    %c128_343 = arith.constant 128 : index
    %867 = vector.load %arg21[%c32_342, %c128_343] : memref<64x384xf32, #tpu.memory_space<vmem>>, vector<8x128xf32>
    %868 = arith.mulf %850, %867 : vector<8x128xf32>
    %cst_344 = arith.constant dense<0.000000e+00> : vector<8xf32>
    %869 = vector.multi_reduction <add>, %868, %cst_344 [1] : vector<8x128xf32> to vector<8xf32>
    %870 = vector.shape_cast %869 : vector<8xf32> to vector<8x1xf32>
    %c40_345 = arith.constant 40 : index
    %c128_346 = arith.constant 128 : index
    %871 = vector.load %arg21[%c40_345, %c128_346] : memref<64x384xf32, #tpu.memory_space<vmem>>, vector<8x128xf32>
    %872 = arith.mulf %850, %871 : vector<8x128xf32>
    %cst_347 = arith.constant dense<0.000000e+00> : vector<8xf32>
    %873 = vector.multi_reduction <add>, %872, %cst_347 [1] : vector<8x128xf32> to vector<8xf32>
    %874 = vector.shape_cast %873 : vector<8xf32> to vector<8x1xf32>
    %c48_348 = arith.constant 48 : index
    %c128_349 = arith.constant 128 : index
    %875 = vector.load %arg21[%c48_348, %c128_349] : memref<64x384xf32, #tpu.memory_space<vmem>>, vector<8x128xf32>
    %876 = arith.mulf %850, %875 : vector<8x128xf32>
    %cst_350 = arith.constant dense<0.000000e+00> : vector<8xf32>
    %877 = vector.multi_reduction <add>, %876, %cst_350 [1] : vector<8x128xf32> to vector<8xf32>
    %878 = vector.shape_cast %877 : vector<8xf32> to vector<8x1xf32>
    %c56_351 = arith.constant 56 : index
    %c128_352 = arith.constant 128 : index
    %879 = vector.load %arg21[%c56_351, %c128_352] : memref<64x384xf32, #tpu.memory_space<vmem>>, vector<8x128xf32>
    %880 = arith.mulf %850, %879 : vector<8x128xf32>
    %cst_353 = arith.constant dense<0.000000e+00> : vector<8xf32>
    %881 = vector.multi_reduction <add>, %880, %cst_353 [1] : vector<8x128xf32> to vector<8xf32>
    %882 = vector.shape_cast %881 : vector<8xf32> to vector<8x1xf32>
    %883 = tpu.concatenate %854, %858, %862, %866, %870, %874, %878, %882 in 1 : vector<8x1xf32>, vector<8x1xf32>, vector<8x1xf32>, vector<8x1xf32>, vector<8x1xf32>, vector<8x1xf32>, vector<8x1xf32>, vector<8x1xf32> -> vector<8x8xf32>
    %cst_354 = arith.constant dense<0xFF800000> : vector<8xf32>
    %884 = vector.multi_reduction <maximumf>, %883, %cst_354 [1] : vector<8x8xf32> to vector<8xf32>
    %885 = vector.shape_cast %884 : vector<8xf32> to vector<8x1xf32>
    %886 = vector.broadcast %885 : vector<8x1xf32> to vector<8x8xf32>
    %887 = arith.subf %883, %886 : vector<8x8xf32>
    %888 = math.exp %887 : vector<8x8xf32>
    %cst_355 = arith.constant dense<0.000000e+00> : vector<8xf32>
    %889 = vector.multi_reduction <add>, %888, %cst_355 [1] : vector<8x8xf32> to vector<8xf32>
    %890 = vector.shape_cast %889 : vector<8xf32> to vector<8x1xf32>
    %891 = tpu.reciprocal %890 {approx = true} : vector<8x1xf32> -> vector<8x1xf32>
    %892 = vector.broadcast %891 : vector<8x1xf32> to vector<8x8xf32>
    %893 = arith.mulf %888, %892 : vector<8x8xf32>
    %894 = arith.addf %849, %893 : vector<8x8xf32>
    %c24_356 = arith.constant 24 : index
    %c0_357 = arith.constant 0 : index
    %895 = vector.load %arg21[%c24_356, %c0_357] : memref<64x384xf32, #tpu.memory_space<vmem>>, vector<8x128xf32>
    %c0_358 = arith.constant 0 : index
    %c128_359 = arith.constant 128 : index
    %896 = vector.load %arg21[%c0_358, %c128_359] : memref<64x384xf32, #tpu.memory_space<vmem>>, vector<8x128xf32>
    %897 = arith.mulf %895, %896 : vector<8x128xf32>
    %cst_360 = arith.constant dense<0.000000e+00> : vector<8xf32>
    %898 = vector.multi_reduction <add>, %897, %cst_360 [1] : vector<8x128xf32> to vector<8xf32>
    %899 = vector.shape_cast %898 : vector<8xf32> to vector<8x1xf32>
    %c8_361 = arith.constant 8 : index
    %c128_362 = arith.constant 128 : index
    %900 = vector.load %arg21[%c8_361, %c128_362] : memref<64x384xf32, #tpu.memory_space<vmem>>, vector<8x128xf32>
    %901 = arith.mulf %895, %900 : vector<8x128xf32>
    %cst_363 = arith.constant dense<0.000000e+00> : vector<8xf32>
    %902 = vector.multi_reduction <add>, %901, %cst_363 [1] : vector<8x128xf32> to vector<8xf32>
    %903 = vector.shape_cast %902 : vector<8xf32> to vector<8x1xf32>
    %c16_364 = arith.constant 16 : index
    %c128_365 = arith.constant 128 : index
    %904 = vector.load %arg21[%c16_364, %c128_365] : memref<64x384xf32, #tpu.memory_space<vmem>>, vector<8x128xf32>
    %905 = arith.mulf %895, %904 : vector<8x128xf32>
    %cst_366 = arith.constant dense<0.000000e+00> : vector<8xf32>
    %906 = vector.multi_reduction <add>, %905, %cst_366 [1] : vector<8x128xf32> to vector<8xf32>
    %907 = vector.shape_cast %906 : vector<8xf32> to vector<8x1xf32>
    %c24_367 = arith.constant 24 : index
    %c128_368 = arith.constant 128 : index
    %908 = vector.load %arg21[%c24_367, %c128_368] : memref<64x384xf32, #tpu.memory_space<vmem>>, vector<8x128xf32>
    %909 = arith.mulf %895, %908 : vector<8x128xf32>
    %cst_369 = arith.constant dense<0.000000e+00> : vector<8xf32>
    %910 = vector.multi_reduction <add>, %909, %cst_369 [1] : vector<8x128xf32> to vector<8xf32>
    %911 = vector.shape_cast %910 : vector<8xf32> to vector<8x1xf32>
    %c32_370 = arith.constant 32 : index
    %c128_371 = arith.constant 128 : index
    %912 = vector.load %arg21[%c32_370, %c128_371] : memref<64x384xf32, #tpu.memory_space<vmem>>, vector<8x128xf32>
    %913 = arith.mulf %895, %912 : vector<8x128xf32>
    %cst_372 = arith.constant dense<0.000000e+00> : vector<8xf32>
    %914 = vector.multi_reduction <add>, %913, %cst_372 [1] : vector<8x128xf32> to vector<8xf32>
    %915 = vector.shape_cast %914 : vector<8xf32> to vector<8x1xf32>
    %c40_373 = arith.constant 40 : index
    %c128_374 = arith.constant 128 : index
    %916 = vector.load %arg21[%c40_373, %c128_374] : memref<64x384xf32, #tpu.memory_space<vmem>>, vector<8x128xf32>
    %917 = arith.mulf %895, %916 : vector<8x128xf32>
    %cst_375 = arith.constant dense<0.000000e+00> : vector<8xf32>
    %918 = vector.multi_reduction <add>, %917, %cst_375 [1] : vector<8x128xf32> to vector<8xf32>
    %919 = vector.shape_cast %918 : vector<8xf32> to vector<8x1xf32>
    %c48_376 = arith.constant 48 : index
    %c128_377 = arith.constant 128 : index
    %920 = vector.load %arg21[%c48_376, %c128_377] : memref<64x384xf32, #tpu.memory_space<vmem>>, vector<8x128xf32>
    %921 = arith.mulf %895, %920 : vector<8x128xf32>
    %cst_378 = arith.constant dense<0.000000e+00> : vector<8xf32>
    %922 = vector.multi_reduction <add>, %921, %cst_378 [1] : vector<8x128xf32> to vector<8xf32>
    %923 = vector.shape_cast %922 : vector<8xf32> to vector<8x1xf32>
    %c56_379 = arith.constant 56 : index
    %c128_380 = arith.constant 128 : index
    %924 = vector.load %arg21[%c56_379, %c128_380] : memref<64x384xf32, #tpu.memory_space<vmem>>, vector<8x128xf32>
    %925 = arith.mulf %895, %924 : vector<8x128xf32>
    %cst_381 = arith.constant dense<0.000000e+00> : vector<8xf32>
    %926 = vector.multi_reduction <add>, %925, %cst_381 [1] : vector<8x128xf32> to vector<8xf32>
    %927 = vector.shape_cast %926 : vector<8xf32> to vector<8x1xf32>
    %928 = tpu.concatenate %899, %903, %907, %911, %915, %919, %923, %927 in 1 : vector<8x1xf32>, vector<8x1xf32>, vector<8x1xf32>, vector<8x1xf32>, vector<8x1xf32>, vector<8x1xf32>, vector<8x1xf32>, vector<8x1xf32> -> vector<8x8xf32>
    %cst_382 = arith.constant dense<0xFF800000> : vector<8xf32>
    %929 = vector.multi_reduction <maximumf>, %928, %cst_382 [1] : vector<8x8xf32> to vector<8xf32>
    %930 = vector.shape_cast %929 : vector<8xf32> to vector<8x1xf32>
    %931 = vector.broadcast %930 : vector<8x1xf32> to vector<8x8xf32>
    %932 = arith.subf %928, %931 : vector<8x8xf32>
    %933 = math.exp %932 : vector<8x8xf32>
    %cst_383 = arith.constant dense<0.000000e+00> : vector<8xf32>
    %934 = vector.multi_reduction <add>, %933, %cst_383 [1] : vector<8x8xf32> to vector<8xf32>
    %935 = vector.shape_cast %934 : vector<8xf32> to vector<8x1xf32>
    %936 = tpu.reciprocal %935 {approx = true} : vector<8x1xf32> -> vector<8x1xf32>
    %937 = vector.broadcast %936 : vector<8x1xf32> to vector<8x8xf32>
    %938 = arith.mulf %933, %937 : vector<8x8xf32>
    %939 = arith.addf %894, %938 : vector<8x8xf32>
    %c32_384 = arith.constant 32 : index
    %c0_385 = arith.constant 0 : index
    %940 = vector.load %arg21[%c32_384, %c0_385] : memref<64x384xf32, #tpu.memory_space<vmem>>, vector<8x128xf32>
    %c0_386 = arith.constant 0 : index
    %c128_387 = arith.constant 128 : index
    %941 = vector.load %arg21[%c0_386, %c128_387] : memref<64x384xf32, #tpu.memory_space<vmem>>, vector<8x128xf32>
    %942 = arith.mulf %940, %941 : vector<8x128xf32>
    %cst_388 = arith.constant dense<0.000000e+00> : vector<8xf32>
    %943 = vector.multi_reduction <add>, %942, %cst_388 [1] : vector<8x128xf32> to vector<8xf32>
    %944 = vector.shape_cast %943 : vector<8xf32> to vector<8x1xf32>
    %c8_389 = arith.constant 8 : index
    %c128_390 = arith.constant 128 : index
    %945 = vector.load %arg21[%c8_389, %c128_390] : memref<64x384xf32, #tpu.memory_space<vmem>>, vector<8x128xf32>
    %946 = arith.mulf %940, %945 : vector<8x128xf32>
    %cst_391 = arith.constant dense<0.000000e+00> : vector<8xf32>
    %947 = vector.multi_reduction <add>, %946, %cst_391 [1] : vector<8x128xf32> to vector<8xf32>
    %948 = vector.shape_cast %947 : vector<8xf32> to vector<8x1xf32>
    %c16_392 = arith.constant 16 : index
    %c128_393 = arith.constant 128 : index
    %949 = vector.load %arg21[%c16_392, %c128_393] : memref<64x384xf32, #tpu.memory_space<vmem>>, vector<8x128xf32>
    %950 = arith.mulf %940, %949 : vector<8x128xf32>
    %cst_394 = arith.constant dense<0.000000e+00> : vector<8xf32>
    %951 = vector.multi_reduction <add>, %950, %cst_394 [1] : vector<8x128xf32> to vector<8xf32>
    %952 = vector.shape_cast %951 : vector<8xf32> to vector<8x1xf32>
    %c24_395 = arith.constant 24 : index
    %c128_396 = arith.constant 128 : index
    %953 = vector.load %arg21[%c24_395, %c128_396] : memref<64x384xf32, #tpu.memory_space<vmem>>, vector<8x128xf32>
    %954 = arith.mulf %940, %953 : vector<8x128xf32>
    %cst_397 = arith.constant dense<0.000000e+00> : vector<8xf32>
    %955 = vector.multi_reduction <add>, %954, %cst_397 [1] : vector<8x128xf32> to vector<8xf32>
    %956 = vector.shape_cast %955 : vector<8xf32> to vector<8x1xf32>
    %c32_398 = arith.constant 32 : index
    %c128_399 = arith.constant 128 : index
    %957 = vector.load %arg21[%c32_398, %c128_399] : memref<64x384xf32, #tpu.memory_space<vmem>>, vector<8x128xf32>
    %958 = arith.mulf %940, %957 : vector<8x128xf32>
    %cst_400 = arith.constant dense<0.000000e+00> : vector<8xf32>
    %959 = vector.multi_reduction <add>, %958, %cst_400 [1] : vector<8x128xf32> to vector<8xf32>
    %960 = vector.shape_cast %959 : vector<8xf32> to vector<8x1xf32>
    %c40_401 = arith.constant 40 : index
    %c128_402 = arith.constant 128 : index
    %961 = vector.load %arg21[%c40_401, %c128_402] : memref<64x384xf32, #tpu.memory_space<vmem>>, vector<8x128xf32>
    %962 = arith.mulf %940, %961 : vector<8x128xf32>
    %cst_403 = arith.constant dense<0.000000e+00> : vector<8xf32>
    %963 = vector.multi_reduction <add>, %962, %cst_403 [1] : vector<8x128xf32> to vector<8xf32>
    %964 = vector.shape_cast %963 : vector<8xf32> to vector<8x1xf32>
    %c48_404 = arith.constant 48 : index
    %c128_405 = arith.constant 128 : index
    %965 = vector.load %arg21[%c48_404, %c128_405] : memref<64x384xf32, #tpu.memory_space<vmem>>, vector<8x128xf32>
    %966 = arith.mulf %940, %965 : vector<8x128xf32>
    %cst_406 = arith.constant dense<0.000000e+00> : vector<8xf32>
    %967 = vector.multi_reduction <add>, %966, %cst_406 [1] : vector<8x128xf32> to vector<8xf32>
    %968 = vector.shape_cast %967 : vector<8xf32> to vector<8x1xf32>
    %c56_407 = arith.constant 56 : index
    %c128_408 = arith.constant 128 : index
    %969 = vector.load %arg21[%c56_407, %c128_408] : memref<64x384xf32, #tpu.memory_space<vmem>>, vector<8x128xf32>
    %970 = arith.mulf %940, %969 : vector<8x128xf32>
    %cst_409 = arith.constant dense<0.000000e+00> : vector<8xf32>
    %971 = vector.multi_reduction <add>, %970, %cst_409 [1] : vector<8x128xf32> to vector<8xf32>
    %972 = vector.shape_cast %971 : vector<8xf32> to vector<8x1xf32>
    %973 = tpu.concatenate %944, %948, %952, %956, %960, %964, %968, %972 in 1 : vector<8x1xf32>, vector<8x1xf32>, vector<8x1xf32>, vector<8x1xf32>, vector<8x1xf32>, vector<8x1xf32>, vector<8x1xf32>, vector<8x1xf32> -> vector<8x8xf32>
    %cst_410 = arith.constant dense<0xFF800000> : vector<8xf32>
    %974 = vector.multi_reduction <maximumf>, %973, %cst_410 [1] : vector<8x8xf32> to vector<8xf32>
    %975 = vector.shape_cast %974 : vector<8xf32> to vector<8x1xf32>
    %976 = vector.broadcast %975 : vector<8x1xf32> to vector<8x8xf32>
    %977 = arith.subf %973, %976 : vector<8x8xf32>
    %978 = math.exp %977 : vector<8x8xf32>
    %cst_411 = arith.constant dense<0.000000e+00> : vector<8xf32>
    %979 = vector.multi_reduction <add>, %978, %cst_411 [1] : vector<8x8xf32> to vector<8xf32>
    %980 = vector.shape_cast %979 : vector<8xf32> to vector<8x1xf32>
    %981 = tpu.reciprocal %980 {approx = true} : vector<8x1xf32> -> vector<8x1xf32>
    %982 = vector.broadcast %981 : vector<8x1xf32> to vector<8x8xf32>
    %983 = arith.mulf %978, %982 : vector<8x8xf32>
    %984 = arith.addf %939, %983 : vector<8x8xf32>
    %c40_412 = arith.constant 40 : index
    %c0_413 = arith.constant 0 : index
    %985 = vector.load %arg21[%c40_412, %c0_413] : memref<64x384xf32, #tpu.memory_space<vmem>>, vector<8x128xf32>
    %c0_414 = arith.constant 0 : index
    %c128_415 = arith.constant 128 : index
    %986 = vector.load %arg21[%c0_414, %c128_415] : memref<64x384xf32, #tpu.memory_space<vmem>>, vector<8x128xf32>
    %987 = arith.mulf %985, %986 : vector<8x128xf32>
    %cst_416 = arith.constant dense<0.000000e+00> : vector<8xf32>
    %988 = vector.multi_reduction <add>, %987, %cst_416 [1] : vector<8x128xf32> to vector<8xf32>
    %989 = vector.shape_cast %988 : vector<8xf32> to vector<8x1xf32>
    %c8_417 = arith.constant 8 : index
    %c128_418 = arith.constant 128 : index
    %990 = vector.load %arg21[%c8_417, %c128_418] : memref<64x384xf32, #tpu.memory_space<vmem>>, vector<8x128xf32>
    %991 = arith.mulf %985, %990 : vector<8x128xf32>
    %cst_419 = arith.constant dense<0.000000e+00> : vector<8xf32>
    %992 = vector.multi_reduction <add>, %991, %cst_419 [1] : vector<8x128xf32> to vector<8xf32>
    %993 = vector.shape_cast %992 : vector<8xf32> to vector<8x1xf32>
    %c16_420 = arith.constant 16 : index
    %c128_421 = arith.constant 128 : index
    %994 = vector.load %arg21[%c16_420, %c128_421] : memref<64x384xf32, #tpu.memory_space<vmem>>, vector<8x128xf32>
    %995 = arith.mulf %985, %994 : vector<8x128xf32>
    %cst_422 = arith.constant dense<0.000000e+00> : vector<8xf32>
    %996 = vector.multi_reduction <add>, %995, %cst_422 [1] : vector<8x128xf32> to vector<8xf32>
    %997 = vector.shape_cast %996 : vector<8xf32> to vector<8x1xf32>
    %c24_423 = arith.constant 24 : index
    %c128_424 = arith.constant 128 : index
    %998 = vector.load %arg21[%c24_423, %c128_424] : memref<64x384xf32, #tpu.memory_space<vmem>>, vector<8x128xf32>
    %999 = arith.mulf %985, %998 : vector<8x128xf32>
    %cst_425 = arith.constant dense<0.000000e+00> : vector<8xf32>
    %1000 = vector.multi_reduction <add>, %999, %cst_425 [1] : vector<8x128xf32> to vector<8xf32>
    %1001 = vector.shape_cast %1000 : vector<8xf32> to vector<8x1xf32>
    %c32_426 = arith.constant 32 : index
    %c128_427 = arith.constant 128 : index
    %1002 = vector.load %arg21[%c32_426, %c128_427] : memref<64x384xf32, #tpu.memory_space<vmem>>, vector<8x128xf32>
    %1003 = arith.mulf %985, %1002 : vector<8x128xf32>
    %cst_428 = arith.constant dense<0.000000e+00> : vector<8xf32>
    %1004 = vector.multi_reduction <add>, %1003, %cst_428 [1] : vector<8x128xf32> to vector<8xf32>
    %1005 = vector.shape_cast %1004 : vector<8xf32> to vector<8x1xf32>
    %c40_429 = arith.constant 40 : index
    %c128_430 = arith.constant 128 : index
    %1006 = vector.load %arg21[%c40_429, %c128_430] : memref<64x384xf32, #tpu.memory_space<vmem>>, vector<8x128xf32>
    %1007 = arith.mulf %985, %1006 : vector<8x128xf32>
    %cst_431 = arith.constant dense<0.000000e+00> : vector<8xf32>
    %1008 = vector.multi_reduction <add>, %1007, %cst_431 [1] : vector<8x128xf32> to vector<8xf32>
    %1009 = vector.shape_cast %1008 : vector<8xf32> to vector<8x1xf32>
    %c48_432 = arith.constant 48 : index
    %c128_433 = arith.constant 128 : index
    %1010 = vector.load %arg21[%c48_432, %c128_433] : memref<64x384xf32, #tpu.memory_space<vmem>>, vector<8x128xf32>
    %1011 = arith.mulf %985, %1010 : vector<8x128xf32>
    %cst_434 = arith.constant dense<0.000000e+00> : vector<8xf32>
    %1012 = vector.multi_reduction <add>, %1011, %cst_434 [1] : vector<8x128xf32> to vector<8xf32>
    %1013 = vector.shape_cast %1012 : vector<8xf32> to vector<8x1xf32>
    %c56_435 = arith.constant 56 : index
    %c128_436 = arith.constant 128 : index
    %1014 = vector.load %arg21[%c56_435, %c128_436] : memref<64x384xf32, #tpu.memory_space<vmem>>, vector<8x128xf32>
    %1015 = arith.mulf %985, %1014 : vector<8x128xf32>
    %cst_437 = arith.constant dense<0.000000e+00> : vector<8xf32>
    %1016 = vector.multi_reduction <add>, %1015, %cst_437 [1] : vector<8x128xf32> to vector<8xf32>
    %1017 = vector.shape_cast %1016 : vector<8xf32> to vector<8x1xf32>
    %1018 = tpu.concatenate %989, %993, %997, %1001, %1005, %1009, %1013, %1017 in 1 : vector<8x1xf32>, vector<8x1xf32>, vector<8x1xf32>, vector<8x1xf32>, vector<8x1xf32>, vector<8x1xf32>, vector<8x1xf32>, vector<8x1xf32> -> vector<8x8xf32>
    %cst_438 = arith.constant dense<0xFF800000> : vector<8xf32>
    %1019 = vector.multi_reduction <maximumf>, %1018, %cst_438 [1] : vector<8x8xf32> to vector<8xf32>
    %1020 = vector.shape_cast %1019 : vector<8xf32> to vector<8x1xf32>
    %1021 = vector.broadcast %1020 : vector<8x1xf32> to vector<8x8xf32>
    %1022 = arith.subf %1018, %1021 : vector<8x8xf32>
    %1023 = math.exp %1022 : vector<8x8xf32>
    %cst_439 = arith.constant dense<0.000000e+00> : vector<8xf32>
    %1024 = vector.multi_reduction <add>, %1023, %cst_439 [1] : vector<8x8xf32> to vector<8xf32>
    %1025 = vector.shape_cast %1024 : vector<8xf32> to vector<8x1xf32>
    %1026 = tpu.reciprocal %1025 {approx = true} : vector<8x1xf32> -> vector<8x1xf32>
    %1027 = vector.broadcast %1026 : vector<8x1xf32> to vector<8x8xf32>
    %1028 = arith.mulf %1023, %1027 : vector<8x8xf32>
    %1029 = arith.addf %984, %1028 : vector<8x8xf32>
    %c48_440 = arith.constant 48 : index
    %c0_441 = arith.constant 0 : index
    %1030 = vector.load %arg21[%c48_440, %c0_441] : memref<64x384xf32, #tpu.memory_space<vmem>>, vector<8x128xf32>
    %c0_442 = arith.constant 0 : index
    %c128_443 = arith.constant 128 : index
    %1031 = vector.load %arg21[%c0_442, %c128_443] : memref<64x384xf32, #tpu.memory_space<vmem>>, vector<8x128xf32>
    %1032 = arith.mulf %1030, %1031 : vector<8x128xf32>
    %cst_444 = arith.constant dense<0.000000e+00> : vector<8xf32>
    %1033 = vector.multi_reduction <add>, %1032, %cst_444 [1] : vector<8x128xf32> to vector<8xf32>
    %1034 = vector.shape_cast %1033 : vector<8xf32> to vector<8x1xf32>
    %c8_445 = arith.constant 8 : index
    %c128_446 = arith.constant 128 : index
    %1035 = vector.load %arg21[%c8_445, %c128_446] : memref<64x384xf32, #tpu.memory_space<vmem>>, vector<8x128xf32>
    %1036 = arith.mulf %1030, %1035 : vector<8x128xf32>
    %cst_447 = arith.constant dense<0.000000e+00> : vector<8xf32>
    %1037 = vector.multi_reduction <add>, %1036, %cst_447 [1] : vector<8x128xf32> to vector<8xf32>
    %1038 = vector.shape_cast %1037 : vector<8xf32> to vector<8x1xf32>
    %c16_448 = arith.constant 16 : index
    %c128_449 = arith.constant 128 : index
    %1039 = vector.load %arg21[%c16_448, %c128_449] : memref<64x384xf32, #tpu.memory_space<vmem>>, vector<8x128xf32>
    %1040 = arith.mulf %1030, %1039 : vector<8x128xf32>
    %cst_450 = arith.constant dense<0.000000e+00> : vector<8xf32>
    %1041 = vector.multi_reduction <add>, %1040, %cst_450 [1] : vector<8x128xf32> to vector<8xf32>
    %1042 = vector.shape_cast %1041 : vector<8xf32> to vector<8x1xf32>
    %c24_451 = arith.constant 24 : index
    %c128_452 = arith.constant 128 : index
    %1043 = vector.load %arg21[%c24_451, %c128_452] : memref<64x384xf32, #tpu.memory_space<vmem>>, vector<8x128xf32>
    %1044 = arith.mulf %1030, %1043 : vector<8x128xf32>
    %cst_453 = arith.constant dense<0.000000e+00> : vector<8xf32>
    %1045 = vector.multi_reduction <add>, %1044, %cst_453 [1] : vector<8x128xf32> to vector<8xf32>
    %1046 = vector.shape_cast %1045 : vector<8xf32> to vector<8x1xf32>
    %c32_454 = arith.constant 32 : index
    %c128_455 = arith.constant 128 : index
    %1047 = vector.load %arg21[%c32_454, %c128_455] : memref<64x384xf32, #tpu.memory_space<vmem>>, vector<8x128xf32>
    %1048 = arith.mulf %1030, %1047 : vector<8x128xf32>
    %cst_456 = arith.constant dense<0.000000e+00> : vector<8xf32>
    %1049 = vector.multi_reduction <add>, %1048, %cst_456 [1] : vector<8x128xf32> to vector<8xf32>
    %1050 = vector.shape_cast %1049 : vector<8xf32> to vector<8x1xf32>
    %c40_457 = arith.constant 40 : index
    %c128_458 = arith.constant 128 : index
    %1051 = vector.load %arg21[%c40_457, %c128_458] : memref<64x384xf32, #tpu.memory_space<vmem>>, vector<8x128xf32>
    %1052 = arith.mulf %1030, %1051 : vector<8x128xf32>
    %cst_459 = arith.constant dense<0.000000e+00> : vector<8xf32>
    %1053 = vector.multi_reduction <add>, %1052, %cst_459 [1] : vector<8x128xf32> to vector<8xf32>
    %1054 = vector.shape_cast %1053 : vector<8xf32> to vector<8x1xf32>
    %c48_460 = arith.constant 48 : index
    %c128_461 = arith.constant 128 : index
    %1055 = vector.load %arg21[%c48_460, %c128_461] : memref<64x384xf32, #tpu.memory_space<vmem>>, vector<8x128xf32>
    %1056 = arith.mulf %1030, %1055 : vector<8x128xf32>
    %cst_462 = arith.constant dense<0.000000e+00> : vector<8xf32>
    %1057 = vector.multi_reduction <add>, %1056, %cst_462 [1] : vector<8x128xf32> to vector<8xf32>
    %1058 = vector.shape_cast %1057 : vector<8xf32> to vector<8x1xf32>
    %c56_463 = arith.constant 56 : index
    %c128_464 = arith.constant 128 : index
    %1059 = vector.load %arg21[%c56_463, %c128_464] : memref<64x384xf32, #tpu.memory_space<vmem>>, vector<8x128xf32>
    %1060 = arith.mulf %1030, %1059 : vector<8x128xf32>
    %cst_465 = arith.constant dense<0.000000e+00> : vector<8xf32>
    %1061 = vector.multi_reduction <add>, %1060, %cst_465 [1] : vector<8x128xf32> to vector<8xf32>
    %1062 = vector.shape_cast %1061 : vector<8xf32> to vector<8x1xf32>
    %1063 = tpu.concatenate %1034, %1038, %1042, %1046, %1050, %1054, %1058, %1062 in 1 : vector<8x1xf32>, vector<8x1xf32>, vector<8x1xf32>, vector<8x1xf32>, vector<8x1xf32>, vector<8x1xf32>, vector<8x1xf32>, vector<8x1xf32> -> vector<8x8xf32>
    %cst_466 = arith.constant dense<0xFF800000> : vector<8xf32>
    %1064 = vector.multi_reduction <maximumf>, %1063, %cst_466 [1] : vector<8x8xf32> to vector<8xf32>
    %1065 = vector.shape_cast %1064 : vector<8xf32> to vector<8x1xf32>
    %1066 = vector.broadcast %1065 : vector<8x1xf32> to vector<8x8xf32>
    %1067 = arith.subf %1063, %1066 : vector<8x8xf32>
    %1068 = math.exp %1067 : vector<8x8xf32>
    %cst_467 = arith.constant dense<0.000000e+00> : vector<8xf32>
    %1069 = vector.multi_reduction <add>, %1068, %cst_467 [1] : vector<8x8xf32> to vector<8xf32>
    %1070 = vector.shape_cast %1069 : vector<8xf32> to vector<8x1xf32>
    %1071 = tpu.reciprocal %1070 {approx = true} : vector<8x1xf32> -> vector<8x1xf32>
    %1072 = vector.broadcast %1071 : vector<8x1xf32> to vector<8x8xf32>
    %1073 = arith.mulf %1068, %1072 : vector<8x8xf32>
    %1074 = arith.addf %1029, %1073 : vector<8x8xf32>
    %c56_468 = arith.constant 56 : index
    %c0_469 = arith.constant 0 : index
    %1075 = vector.load %arg21[%c56_468, %c0_469] : memref<64x384xf32, #tpu.memory_space<vmem>>, vector<8x128xf32>
    %c0_470 = arith.constant 0 : index
    %c128_471 = arith.constant 128 : index
    %1076 = vector.load %arg21[%c0_470, %c128_471] : memref<64x384xf32, #tpu.memory_space<vmem>>, vector<8x128xf32>
    %1077 = arith.mulf %1075, %1076 : vector<8x128xf32>
    %cst_472 = arith.constant dense<0.000000e+00> : vector<8xf32>
    %1078 = vector.multi_reduction <add>, %1077, %cst_472 [1] : vector<8x128xf32> to vector<8xf32>
    %1079 = vector.shape_cast %1078 : vector<8xf32> to vector<8x1xf32>
    %c8_473 = arith.constant 8 : index
    %c128_474 = arith.constant 128 : index
    %1080 = vector.load %arg21[%c8_473, %c128_474] : memref<64x384xf32, #tpu.memory_space<vmem>>, vector<8x128xf32>
    %1081 = arith.mulf %1075, %1080 : vector<8x128xf32>
    %cst_475 = arith.constant dense<0.000000e+00> : vector<8xf32>
    %1082 = vector.multi_reduction <add>, %1081, %cst_475 [1] : vector<8x128xf32> to vector<8xf32>
    %1083 = vector.shape_cast %1082 : vector<8xf32> to vector<8x1xf32>
    %c16_476 = arith.constant 16 : index
    %c128_477 = arith.constant 128 : index
    %1084 = vector.load %arg21[%c16_476, %c128_477] : memref<64x384xf32, #tpu.memory_space<vmem>>, vector<8x128xf32>
    %1085 = arith.mulf %1075, %1084 : vector<8x128xf32>
    %cst_478 = arith.constant dense<0.000000e+00> : vector<8xf32>
    %1086 = vector.multi_reduction <add>, %1085, %cst_478 [1] : vector<8x128xf32> to vector<8xf32>
    %1087 = vector.shape_cast %1086 : vector<8xf32> to vector<8x1xf32>
    %c24_479 = arith.constant 24 : index
    %c128_480 = arith.constant 128 : index
    %1088 = vector.load %arg21[%c24_479, %c128_480] : memref<64x384xf32, #tpu.memory_space<vmem>>, vector<8x128xf32>
    %1089 = arith.mulf %1075, %1088 : vector<8x128xf32>
    %cst_481 = arith.constant dense<0.000000e+00> : vector<8xf32>
    %1090 = vector.multi_reduction <add>, %1089, %cst_481 [1] : vector<8x128xf32> to vector<8xf32>
    %1091 = vector.shape_cast %1090 : vector<8xf32> to vector<8x1xf32>
    %c32_482 = arith.constant 32 : index
    %c128_483 = arith.constant 128 : index
    %1092 = vector.load %arg21[%c32_482, %c128_483] : memref<64x384xf32, #tpu.memory_space<vmem>>, vector<8x128xf32>
    %1093 = arith.mulf %1075, %1092 : vector<8x128xf32>
    %cst_484 = arith.constant dense<0.000000e+00> : vector<8xf32>
    %1094 = vector.multi_reduction <add>, %1093, %cst_484 [1] : vector<8x128xf32> to vector<8xf32>
    %1095 = vector.shape_cast %1094 : vector<8xf32> to vector<8x1xf32>
    %c40_485 = arith.constant 40 : index
    %c128_486 = arith.constant 128 : index
    %1096 = vector.load %arg21[%c40_485, %c128_486] : memref<64x384xf32, #tpu.memory_space<vmem>>, vector<8x128xf32>
    %1097 = arith.mulf %1075, %1096 : vector<8x128xf32>
    %cst_487 = arith.constant dense<0.000000e+00> : vector<8xf32>
    %1098 = vector.multi_reduction <add>, %1097, %cst_487 [1] : vector<8x128xf32> to vector<8xf32>
    %1099 = vector.shape_cast %1098 : vector<8xf32> to vector<8x1xf32>
    %c48_488 = arith.constant 48 : index
    %c128_489 = arith.constant 128 : index
    %1100 = vector.load %arg21[%c48_488, %c128_489] : memref<64x384xf32, #tpu.memory_space<vmem>>, vector<8x128xf32>
    %1101 = arith.mulf %1075, %1100 : vector<8x128xf32>
    %cst_490 = arith.constant dense<0.000000e+00> : vector<8xf32>
    %1102 = vector.multi_reduction <add>, %1101, %cst_490 [1] : vector<8x128xf32> to vector<8xf32>
    %1103 = vector.shape_cast %1102 : vector<8xf32> to vector<8x1xf32>
    %c56_491 = arith.constant 56 : index
    %c128_492 = arith.constant 128 : index
    %1104 = vector.load %arg21[%c56_491, %c128_492] : memref<64x384xf32, #tpu.memory_space<vmem>>, vector<8x128xf32>
    %1105 = arith.mulf %1075, %1104 : vector<8x128xf32>
    %cst_493 = arith.constant dense<0.000000e+00> : vector<8xf32>
    %1106 = vector.multi_reduction <add>, %1105, %cst_493 [1] : vector<8x128xf32> to vector<8xf32>
    %1107 = vector.shape_cast %1106 : vector<8xf32> to vector<8x1xf32>
    %1108 = tpu.concatenate %1079, %1083, %1087, %1091, %1095, %1099, %1103, %1107 in 1 : vector<8x1xf32>, vector<8x1xf32>, vector<8x1xf32>, vector<8x1xf32>, vector<8x1xf32>, vector<8x1xf32>, vector<8x1xf32>, vector<8x1xf32> -> vector<8x8xf32>
    %cst_494 = arith.constant dense<0xFF800000> : vector<8xf32>
    %1109 = vector.multi_reduction <maximumf>, %1108, %cst_494 [1] : vector<8x8xf32> to vector<8xf32>
    %1110 = vector.shape_cast %1109 : vector<8xf32> to vector<8x1xf32>
    %1111 = vector.broadcast %1110 : vector<8x1xf32> to vector<8x8xf32>
    %1112 = arith.subf %1108, %1111 : vector<8x8xf32>
    %1113 = math.exp %1112 : vector<8x8xf32>
    %cst_495 = arith.constant dense<0.000000e+00> : vector<8xf32>
    %1114 = vector.multi_reduction <add>, %1113, %cst_495 [1] : vector<8x8xf32> to vector<8xf32>
    %1115 = vector.shape_cast %1114 : vector<8xf32> to vector<8x1xf32>
    %1116 = tpu.reciprocal %1115 {approx = true} : vector<8x1xf32> -> vector<8x1xf32>
    %1117 = vector.broadcast %1116 : vector<8x1xf32> to vector<8x8xf32>
    %1118 = arith.mulf %1113, %1117 : vector<8x8xf32>
    %1119 = arith.addf %1074, %1118 : vector<8x8xf32>
    %cst_496 = arith.constant 0.000000e+00 : f32
    %1120 = vector.broadcast %cst_496 : f32 to vector<8x128xf32>
    %1121 = vector.extract_strided_slice %1119 {offsets = [0, 0], sizes = [8, 1], strides = [1, 1]} : vector<8x8xf32> to vector<8x1xf32>
    %c0_497 = arith.constant 0 : index
    %c256_498 = arith.constant 256 : index
    %1122 = vector.load %arg21[%c0_497, %c256_498] : memref<64x384xf32, #tpu.memory_space<vmem>>, vector<8x128xf32>
    %1123 = vector.broadcast %1121 : vector<8x1xf32> to vector<8x128xf32>
    %1124 = arith.mulf %1123, %1122 : vector<8x128xf32>
    %1125 = arith.addf %1120, %1124 : vector<8x128xf32>
    %1126 = vector.extract_strided_slice %1119 {offsets = [0, 1], sizes = [8, 1], strides = [1, 1]} : vector<8x8xf32> to vector<8x1xf32>
    %c8_499 = arith.constant 8 : index
    %c256_500 = arith.constant 256 : index
    %1127 = vector.load %arg21[%c8_499, %c256_500] : memref<64x384xf32, #tpu.memory_space<vmem>>, vector<8x128xf32>
    %1128 = vector.broadcast %1126 : vector<8x1xf32> to vector<8x128xf32>
    %1129 = arith.mulf %1128, %1127 : vector<8x128xf32>
    %1130 = arith.addf %1125, %1129 : vector<8x128xf32>
    %1131 = vector.extract_strided_slice %1119 {offsets = [0, 2], sizes = [8, 1], strides = [1, 1]} : vector<8x8xf32> to vector<8x1xf32>
    %c16_501 = arith.constant 16 : index
    %c256_502 = arith.constant 256 : index
    %1132 = vector.load %arg21[%c16_501, %c256_502] : memref<64x384xf32, #tpu.memory_space<vmem>>, vector<8x128xf32>
    %1133 = vector.broadcast %1131 : vector<8x1xf32> to vector<8x128xf32>
    %1134 = arith.mulf %1133, %1132 : vector<8x128xf32>
    %1135 = arith.addf %1130, %1134 : vector<8x128xf32>
    %1136 = vector.extract_strided_slice %1119 {offsets = [0, 3], sizes = [8, 1], strides = [1, 1]} : vector<8x8xf32> to vector<8x1xf32>
    %c24_503 = arith.constant 24 : index
    %c256_504 = arith.constant 256 : index
    %1137 = vector.load %arg21[%c24_503, %c256_504] : memref<64x384xf32, #tpu.memory_space<vmem>>, vector<8x128xf32>
    %1138 = vector.broadcast %1136 : vector<8x1xf32> to vector<8x128xf32>
    %1139 = arith.mulf %1138, %1137 : vector<8x128xf32>
    %1140 = arith.addf %1135, %1139 : vector<8x128xf32>
    %1141 = vector.extract_strided_slice %1119 {offsets = [0, 4], sizes = [8, 1], strides = [1, 1]} : vector<8x8xf32> to vector<8x1xf32>
    %c32_505 = arith.constant 32 : index
    %c256_506 = arith.constant 256 : index
    %1142 = vector.load %arg21[%c32_505, %c256_506] : memref<64x384xf32, #tpu.memory_space<vmem>>, vector<8x128xf32>
    %1143 = vector.broadcast %1141 : vector<8x1xf32> to vector<8x128xf32>
    %1144 = arith.mulf %1143, %1142 : vector<8x128xf32>
    %1145 = arith.addf %1140, %1144 : vector<8x128xf32>
    %1146 = vector.extract_strided_slice %1119 {offsets = [0, 5], sizes = [8, 1], strides = [1, 1]} : vector<8x8xf32> to vector<8x1xf32>
    %c40_507 = arith.constant 40 : index
    %c256_508 = arith.constant 256 : index
    %1147 = vector.load %arg21[%c40_507, %c256_508] : memref<64x384xf32, #tpu.memory_space<vmem>>, vector<8x128xf32>
    %1148 = vector.broadcast %1146 : vector<8x1xf32> to vector<8x128xf32>
    %1149 = arith.mulf %1148, %1147 : vector<8x128xf32>
    %1150 = arith.addf %1145, %1149 : vector<8x128xf32>
    %1151 = vector.extract_strided_slice %1119 {offsets = [0, 6], sizes = [8, 1], strides = [1, 1]} : vector<8x8xf32> to vector<8x1xf32>
    %c48_509 = arith.constant 48 : index
    %c256_510 = arith.constant 256 : index
    %1152 = vector.load %arg21[%c48_509, %c256_510] : memref<64x384xf32, #tpu.memory_space<vmem>>, vector<8x128xf32>
    %1153 = vector.broadcast %1151 : vector<8x1xf32> to vector<8x128xf32>
    %1154 = arith.mulf %1153, %1152 : vector<8x128xf32>
    %1155 = arith.addf %1150, %1154 : vector<8x128xf32>
    %1156 = vector.extract_strided_slice %1119 {offsets = [0, 7], sizes = [8, 1], strides = [1, 1]} : vector<8x8xf32> to vector<8x1xf32>
    %c56_511 = arith.constant 56 : index
    %c256_512 = arith.constant 256 : index
    %1157 = vector.load %arg21[%c56_511, %c256_512] : memref<64x384xf32, #tpu.memory_space<vmem>>, vector<8x128xf32>
    %1158 = vector.broadcast %1156 : vector<8x1xf32> to vector<8x128xf32>
    %1159 = arith.mulf %1158, %1157 : vector<8x128xf32>
    %1160 = arith.addf %1155, %1159 : vector<8x128xf32>
    %cst_513 = arith.constant 1.250000e-01 : f32
    %1161 = vector.broadcast %cst_513 : f32 to vector<8x128xf32>
    %1162 = arith.mulf %1160, %1161 : vector<8x128xf32>
    %c0_514 = arith.constant 0 : index
    %c0_515 = arith.constant 0 : index
    %1163 = vector.load %arg11[%c0_514, %c0_515] : memref<128x128xbf16, #tpu.memory_space<vmem>>, vector<128x128xbf16>
    %1164 = arith.truncf %1162 : vector<8x128xf32> to vector<8x128xbf16>
    %cst_516 = arith.constant dense<0.000000e+00> : vector<8x128xf32>
    %1165 = tpu.matmul %1164, %1163, %cst_516 {dimension_numbers = #tpu.dot_dimension_numbers<[1], [0], [0], [1], [0, 0, 1, 1], [], []>} : vector<8x128xbf16>, vector<128x128xbf16>, vector<8x128xf32> -> vector<8x128xf32>
    %c0_517 = arith.constant 0 : index
    %c0_518 = arith.constant 0 : index
    %1166 = vector.load %arg12[%c0_517, %c0_518] : memref<1x128xf32, #tpu.memory_space<vmem>>, vector<1x128xf32>
    %1167 = vector.broadcast %1166 : vector<1x128xf32> to vector<8x128xf32>
    %1168 = arith.addf %1165, %1167 : vector<8x128xf32>
    %cst_519 = arith.constant 0.000000e+00 : f32
    %1169 = vector.broadcast %cst_519 : f32 to vector<8x128xf32>
    %1170 = arith.maximumf %1168, %1169 : vector<8x128xf32>
    %c0_520 = arith.constant 0 : index
    %c0_521 = arith.constant 0 : index
    %1171 = vector.load %arg13[%c0_520, %c0_521] : memref<128x128xbf16, #tpu.memory_space<vmem>>, vector<128x128xbf16>
    %1172 = arith.truncf %1170 : vector<8x128xf32> to vector<8x128xbf16>
    %cst_522 = arith.constant dense<0.000000e+00> : vector<8x128xf32>
    %1173 = tpu.matmul %1172, %1171, %cst_522 {dimension_numbers = #tpu.dot_dimension_numbers<[1], [0], [0], [1], [0, 0, 1, 1], [], []>} : vector<8x128xbf16>, vector<128x128xbf16>, vector<8x128xf32> -> vector<8x128xf32>
    %c0_523 = arith.constant 0 : index
    %c0_524 = arith.constant 0 : index
    %1174 = vector.load %arg14[%c0_523, %c0_524] : memref<1x128xf32, #tpu.memory_space<vmem>>, vector<1x128xf32>
    %1175 = vector.broadcast %1174 : vector<1x128xf32> to vector<8x128xf32>
    %1176 = arith.addf %1173, %1175 : vector<8x128xf32>
    %cst_525 = arith.constant 0.000000e+00 : f32
    %1177 = vector.broadcast %cst_525 : f32 to vector<8x128xf32>
    %1178 = arith.maximumf %1176, %1177 : vector<8x128xf32>
    %c0_526 = arith.constant 0 : index
    %c0_527 = arith.constant 0 : index
    %1179 = vector.load %arg15[%c0_526, %c0_527] : memref<128x128xbf16, #tpu.memory_space<vmem>>, vector<128x128xbf16>
    %1180 = arith.truncf %1178 : vector<8x128xf32> to vector<8x128xbf16>
    %cst_528 = arith.constant dense<0.000000e+00> : vector<8x128xf32>
    %1181 = tpu.matmul %1180, %1179, %cst_528 {dimension_numbers = #tpu.dot_dimension_numbers<[1], [0], [0], [1], [0, 0, 1, 1], [], []>} : vector<8x128xbf16>, vector<128x128xbf16>, vector<8x128xf32> -> vector<8x128xf32>
    %c0_529 = arith.constant 0 : index
    %c0_530 = arith.constant 0 : index
    %1182 = vector.load %arg16[%c0_529, %c0_530] : memref<1x128xf32, #tpu.memory_space<vmem>>, vector<1x128xf32>
    %1183 = vector.broadcast %1182 : vector<1x128xf32> to vector<8x128xf32>
    %1184 = arith.addf %1181, %1183 : vector<8x128xf32>
    %c0_531 = arith.constant 0 : index
    %c0_532 = arith.constant 0 : index
    %1185 = vector.load %arg17[%c0_531, %c0_532] : memref<8x128xf32, #tpu.memory_space<vmem>>, vector<8x128xf32>
    tpu.vector_store %arg17[%c0_531, %c0_532], %1184 {strides = array<i32>} : memref<8x128xf32, #tpu.memory_space<vmem>>, vector<8x128xf32>,
    return
  }
  func.func @transform_0(%arg0: i32) -> (i32, i32, i32) {
    %c0_i32 = arith.constant 0 : i32
    %c0_i32_0 = arith.constant 0 : i32
    %c0_i32_1 = arith.constant 0 : i32
    return %c0_i32, %arg0, %c0_i32_0 : i32, i32, i32
  }
  func.func @transform_1(%arg0: i32) -> (i32, i32, i32) {
    %c0_i32 = arith.constant 0 : i32
    %c0_i32_0 = arith.constant 0 : i32
    %c0_i32_1 = arith.constant 0 : i32
    return %c0_i32, %arg0, %c0_i32_0 : i32, i32, i32
  }
  func.func @transform_2(%arg0: i32) -> (i32, i32) {
    %c0_i32 = arith.constant 0 : i32
    %c0_i32_0 = arith.constant 0 : i32
    %c0_i32_1 = arith.constant 0 : i32
    return %c0_i32, %c0_i32_0 : i32, i32
  }
  func.func @transform_3(%arg0: i32) -> (i32, i32) {
    %c0_i32 = arith.constant 0 : i32
    %c0_i32_0 = arith.constant 0 : i32
    %c0_i32_1 = arith.constant 0 : i32
    return %c0_i32, %c0_i32_0 : i32, i32
  }
  func.func @transform_4(%arg0: i32) -> (i32, i32) {
    %c0_i32 = arith.constant 0 : i32
    %c0_i32_0 = arith.constant 0 : i32
    %c0_i32_1 = arith.constant 0 : i32
    return %c0_i32, %c0_i32_0 : i32, i32
  }
  func.func @transform_5(%arg0: i32) -> (i32, i32) {
    %c0_i32 = arith.constant 0 : i32
    %c0_i32_0 = arith.constant 0 : i32
    %c0_i32_1 = arith.constant 0 : i32
    return %c0_i32, %c0_i32_0 : i32, i32
  }
  func.func @transform_6(%arg0: i32) -> (i32, i32) {
    %c0_i32 = arith.constant 0 : i32
    %c0_i32_0 = arith.constant 0 : i32
    %c0_i32_1 = arith.constant 0 : i32
    return %c0_i32, %c0_i32_0 : i32, i32
  }
  func.func @transform_7(%arg0: i32) -> (i32, i32) {
    %c0_i32 = arith.constant 0 : i32
    %c0_i32_0 = arith.constant 0 : i32
    %c0_i32_1 = arith.constant 0 : i32
    return %c0_i32, %c0_i32_0 : i32, i32
  }
  func.func @transform_8(%arg0: i32) -> (i32, i32) {
    %c0_i32 = arith.constant 0 : i32
    %c0_i32_0 = arith.constant 0 : i32
    %c0_i32_1 = arith.constant 0 : i32
    return %c0_i32, %c0_i32_0 : i32, i32
  }
  func.func @transform_9(%arg0: i32) -> (i32, i32) {
    %c0_i32 = arith.constant 0 : i32
    %c0_i32_0 = arith.constant 0 : i32
    %c0_i32_1 = arith.constant 0 : i32
    return %c0_i32, %c0_i32_0 : i32, i32
  }
  func.func @transform_10(%arg0: i32) -> (i32, i32) {
    %c0_i32 = arith.constant 0 : i32
    %c0_i32_0 = arith.constant 0 : i32
    %c0_i32_1 = arith.constant 0 : i32
    return %c0_i32, %c0_i32_0 : i32, i32
  }
  func.func @transform_11(%arg0: i32) -> (i32, i32) {
    %c0_i32 = arith.constant 0 : i32
    %c0_i32_0 = arith.constant 0 : i32
    %c0_i32_1 = arith.constant 0 : i32
    return %c0_i32, %c0_i32_0 : i32, i32
  }
  func.func @transform_12(%arg0: i32) -> (i32, i32) {
    %c0_i32 = arith.constant 0 : i32
    %c0_i32_0 = arith.constant 0 : i32
    %c0_i32_1 = arith.constant 0 : i32
    return %c0_i32, %c0_i32_0 : i32, i32
  }
  func.func @transform_13(%arg0: i32) -> (i32, i32) {
    %c0_i32 = arith.constant 0 : i32
    %c0_i32_0 = arith.constant 0 : i32
    %c0_i32_1 = arith.constant 0 : i32
    return %c0_i32, %c0_i32_0 : i32, i32
  }
  func.func @transform_14(%arg0: i32) -> (i32, i32) {
    %c0_i32 = arith.constant 0 : i32
    %c0_i32_0 = arith.constant 0 : i32
    %c0_i32_1 = arith.constant 0 : i32
    return %c0_i32, %c0_i32_0 : i32, i32
  }
  func.func @transform_15(%arg0: i32) -> (i32, i32) {
    %c0_i32 = arith.constant 0 : i32
    %c0_i32_0 = arith.constant 0 : i32
    %c0_i32_1 = arith.constant 0 : i32
    return %c0_i32, %c0_i32_0 : i32, i32
  }
  func.func @transform_16(%arg0: i32) -> (i32, i32) {
    %c0_i32 = arith.constant 0 : i32
    %c0_i32_0 = arith.constant 0 : i32
    return %arg0, %c0_i32 : i32, i32
  }
}

</mosaic_0001>

<bundles_post_ra>
// kernel: tpu_custom_call.1
= control target key start
LH: loop header
LB: loop body
LE: loop exit
PB: predicated region body
PF: predicated region fallthrough
CT: control target
= control target key end

     0   :  { %s7817_s0 = inlined_call_operand.vmem [shape: f32[8,8,7], index: 0, kind: input, shape index: {}]   ;;  %s7818_s1 = inlined_call_operand.vmem [shape: f32[8,8,1], index: 1, kind: input, shape index: {}]   ;;  %s7819_s2 = inlined_call_operand.vmem [shape: bf16[7,512], index: 2, kind: input, shape index: {}]   ;;  %s7820_s3 = inlined_call_operand.hbm [shape: bf16[128,512], index: 3, kind: input, shape index: {}]   ;;  %s7821_s4 = inlined_call_operand.vmem [shape: f32[1,512], index: 4, kind: input, shape index: {}]   ;;  %s7822_s5 = inlined_call_operand.hbm [shape: bf16[128,512], index: 5, kind: input, shape index: {}]   ;;  %s7823_s6 = inlined_call_operand.hbm [shape: bf16[128,512], index: 6, kind: input, shape index: {}]   ;;  %s7824_s7 = inlined_call_operand.vmem [shape: f32[1,512], index: 7, kind: input, shape index: {}]   ;;  %s7825_s8 = inlined_call_operand.vmem [shape: bf16[128,384], index: 8, kind: input, shape index: {}]   ;;  %s7826_s9 = inlined_call_operand.vmem [shape: f32[1,384], index: 9, kind: input, shape index: {}]   ;;  %s7827_s10 = inlined_call_operand.hbm [shape: bf16[128,128], index: 10, kind: input, shape index: {}]   ;;  %s7828_s11 = inlined_call_operand.vmem [shape: f32[1,128], index: 11, kind: input, shape index: {}]   ;;  %s7829_s12 = inlined_call_operand.hbm [shape: bf16[128,128], index: 12, kind: input, shape index: {}]   ;;  %s7830_s13 = inlined_call_operand.vmem [shape: f32[1,128], index: 13, kind: input, shape index: {}]   ;;  %s7831_s14 = inlined_call_operand.hbm [shape: bf16[128,128], index: 14, kind: input, shape index: {}]   ;;  %s7832_s15 = inlined_call_operand.vmem [shape: f32[1,128], index: 15, kind: input, shape index: {}]   ;;  %s7833_s16 = inlined_call_operand.hbm [shape: f32[8,128], index: 16, kind: output, shape index: {}]  }
   0x1   :  { %7851 = sst [smem:[#allocation48_spill]] %s7817_s0 }
   0x2   :  { %21 = vsyncpa [#allocation7], 0 }
   0x3   :  { %22 = vsyncpa [#allocation10], 0 }
   0x4   :  { %23 = vsyncpa [#allocation13], 0 }
   0x5   :  { %24 = vsyncpa [#allocation16], 0 }
   0x6   :  { %25 = vsyncpa [#allocation8], 0  ;;  %s5801_s21 = smov [#allocation9]   ;;  %s5802_s23 = smov [#allocation12]  }
   0x7   :  { %s51_s22 = sshll.u32 %s5801_s21, 4  ;;  %s81_s24 = sshll.u32 %s5802_s23, 4  ;;  %s52_s22 = int_to_ptr.vmem [resolvable:$true] %s51_s22  ;;  %s5909_s24 = int_to_ptr.vmem [resolvable:$true] %s81_s24 }
   0x8   :  { %s5637_s27 = scalar_lea.hbm %s7822_s5, 4096 }
   0x9   :  { %p5638_p0 = scmp.ne.s32.totalorder %s7822_s5, %s5637_s27  ;;  %p5641_p1 = scmp.lt.u32.totalorder %s5637_s27, %s7822_s5 }
   0xb   :  { %p5643_p2 = pnand %p5641_p1, %p5638_p0 }
   0xd   :  { %5646 = shalt.err (!%p5643_p2)
}
   0xe   :  { %s5647_s17 = scalar_lea.vmem %s52_s22, 4096  ;;  %p5652_p4 = scmp.lt.s32.totalorder %s52_s22, %s52_s22 }
   0xf   :  { %p5648_p3 = scmp.ne.s32.totalorder %s52_s22, %s5647_s17  ;;  %p5653_p5 = scmp.lt.s32.totalorder %s5647_s17, %s5647_s17 }
  0x11   :  { %p5654_p6 = por %p5653_p5, %p5652_p4 }
  0x13   :  { %p5655_p7 = pnand %p5654_p6, %p5648_p3 }
  0x15   :  { %5658 = shalt.err (!%p5655_p7)
}
  0x16   :  { %s7835_s18 = smov 256   ;;  %s7837_s19 = smov 16  }
  0x17   :  { %57 = dma.hbm_to_vmem [thread:$0]  %s7822_s5, 4096, %s52_s22, [#allocation10], %s7835_s18, %s7835_s18, %s7837_s19  }
  0x18   :  { %s5659_s26 = scalar_lea.hbm %s7827_s10, 1024 }
  0x19   :  { %p5660_p8 = scmp.ne.s32.totalorder %s7827_s10, %s5659_s26  ;;  %p5663_p9 = scmp.lt.u32.totalorder %s5659_s26, %s7827_s10 }
  0x1b   :  { %p5665_p10 = pnand %p5663_p9, %p5660_p8 }
  0x1d   :  { %5668 = shalt.err (!%p5665_p10)
}
  0x1e   :  { %s5669_s0 = scalar_lea.vmem %s5909_s24, 1024  ;;  %p5674_p12 = scmp.lt.s32.totalorder %s5909_s24, %s5909_s24 }
  0x1f   :  { %p5670_p11 = scmp.ne.s32.totalorder %s5909_s24, %s5669_s0  ;;  %p5675_p13 = scmp.lt.s32.totalorder %s5669_s0, %s5669_s0 }
  0x21   :  { %p5676_p0 = por %p5675_p13, %p5674_p12 }
  0x23   :  { %p5677_p1 = pnand %p5676_p0, %p5670_p11 }
  0x25   :  { %5680 = shalt.err (!%p5677_p1)
}
  0x26   :  { %s5805_s5 = smov 64   ;;  %s5806_s22 = smov 4  }
  0x27   :  { %87 = dma.hbm_to_vmem [thread:$0]  %s7827_s10, 1024, %s5909_s24, [#allocation13], %s5805_s5, %s5805_s5, %s5806_s22  }
  0x28   :  { %s5807_s21 = smov [#allocation6]   ;;  %s5808_s25 = smov [#allocation11]  }
  0x29   :  { %s37_s23 = sshll.u32 %s5807_s21, 4  ;;  %s63_s26 = sshll.u32 %s5808_s25, 4  ;;  %s38_s23 = int_to_ptr.vmem [resolvable:$true] %s37_s23  ;;  %s5946_s26 = int_to_ptr.vmem [resolvable:$true] %s63_s26 }
  0x2a   :  { %s5681_s29 = scalar_lea.hbm %s7820_s3, 4096 }
  0x2b   :  { %p5682_p2 = scmp.ne.s32.totalorder %s7820_s3, %s5681_s29  ;;  %p5685_p3 = scmp.lt.u32.totalorder %s5681_s29, %s7820_s3 }
  0x2d   :  { %p5687_p4 = pnand %p5685_p3, %p5682_p2 }
  0x2f   :  { %5690 = shalt.err (!%p5687_p4)
}
  0x30   :  { %s5691_s10 = scalar_lea.vmem %s38_s23, 4096  ;;  %p5696_p6 = scmp.lt.s32.totalorder %s38_s23, %s38_s23 }
  0x31   :  { %p5692_p5 = scmp.ne.s32.totalorder %s38_s23, %s5691_s10  ;;  %p5697_p7 = scmp.lt.s32.totalorder %s5691_s10, %s5691_s10 }
  0x33   :  { %p5698_p8 = por %p5697_p7, %p5696_p6 }
  0x35   :  { %p5699_p9 = pnand %p5698_p8, %p5692_p5 }
  0x37   :  { %5702 = shalt.err (!%p5699_p9)
}
  0x38   :  { %s7852_s24 = smov 16   ;;  %s7853_s17 = smov 256  }
  0x39   :  { %43 = dma.hbm_to_vmem [thread:$0]  %s7820_s3, 4096, %s38_s23, [#allocation7], %s7853_s17, %s7853_s17, %s7852_s24  }
  0x3a   :  { %s5703_s18 = scalar_lea.hbm %s7823_s6, 4096 }
  0x3b   :  { %p5704_p10 = scmp.ne.s32.totalorder %s7823_s6, %s5703_s18  ;;  %p5707_p11 = scmp.lt.u32.totalorder %s5703_s18, %s7823_s6 }
  0x3d   :  { %p5709_p12 = pnand %p5707_p11, %p5704_p10 }
  0x3f   :  { %5712 = shalt.err (!%p5709_p12)
}
  0x40   :  { %s5713_s0 = scalar_lea.vmem %s5946_s26, 4096  ;;  %p5718_p0 = scmp.lt.s32.totalorder %s5946_s26, %s5946_s26 }
  0x41   :  { %p5714_p13 = scmp.ne.s32.totalorder %s5946_s26, %s5713_s0  ;;  %p5719_p1 = scmp.lt.s32.totalorder %s5713_s0, %s5713_s0 }
  0x43   :  { %p5720_p2 = por %p5719_p1, %p5718_p0 }
  0x45   :  { %p5721_p3 = pnand %p5720_p2, %p5714_p13 }
  0x47   :  { %5724 = shalt.err (!%p5721_p3)
}
  0x48   :  { %69 = dma.hbm_to_vmem [thread:$0]  %s7823_s6, 4096, %s5946_s26, [#allocation10], %s7853_s17, %s7853_s17, %s7852_s24  }
  0x49   :  { %s5809_s10 = smov [#allocation14]   ;;  %s5810_s21 = smov [#allocation15]  }
  0x4a   :  { %s95_s20 = sshll.u32 %s5809_s10, 4  ;;  %s109_s25 = sshll.u32 %s5810_s21, 4  ;;  %s96_s20 = int_to_ptr.vmem [resolvable:$true] %s95_s20  ;;  %s5983_s25 = int_to_ptr.vmem [resolvable:$true] %s109_s25 }
  0x4b   :  { %s5725_s19 = scalar_lea.hbm %s7829_s12, 1024 }
  0x4c   :  { %p5726_p4 = scmp.ne.s32.totalorder %s7829_s12, %s5725_s19  ;;  %p5729_p5 = scmp.lt.u32.totalorder %s5725_s19, %s7829_s12 }
  0x4e   :  { %p5731_p6 = pnand %p5729_p5, %p5726_p4 }
  0x50   :  { %5734 = shalt.err (!%p5731_p6)
}
  0x51   :  { %s5735_s6 = scalar_lea.vmem %s96_s20, 1024  ;;  %p5740_p8 = scmp.lt.s32.totalorder %s96_s20, %s96_s20 }
  0x52   :  { %p5736_p7 = scmp.ne.s32.totalorder %s96_s20, %s5735_s6  ;;  %p5741_p9 = scmp.lt.s32.totalorder %s5735_s6, %s5735_s6 }
  0x54   :  { %p5742_p10 = por %p5741_p9, %p5740_p8 }
  0x56   :  { %p5743_p11 = pnand %p5742_p10, %p5736_p7 }
  0x58   :  { %5746 = shalt.err (!%p5743_p11)
}
  0x59   :  { %101 = dma.hbm_to_vmem [thread:$0]  %s7829_s12, 1024, %s96_s20, [#allocation13], %s5805_s5, %s5805_s5, %s5806_s22  }
  0x5a   :  { %s5747_s23 = scalar_lea.hbm %s7831_s14, 1024 }
  0x5b   :  { %p5748_p12 = scmp.ne.s32.totalorder %s7831_s14, %s5747_s23  ;;  %p5751_p13 = scmp.lt.u32.totalorder %s5747_s23, %s7831_s14 }
  0x5d   :  { %p5753_p0 = pnand %p5751_p13, %p5748_p12 }
  0x5f   :  { %5756 = shalt.err (!%p5753_p0)
}
  0x60   :  { %s5757_s19 = scalar_lea.vmem %s5983_s25, 1024  ;;  %p5762_p2 = scmp.lt.s32.totalorder %s5983_s25, %s5983_s25 }
  0x61   :  { %p5758_p1 = scmp.ne.s32.totalorder %s5983_s25, %s5757_s19  ;;  %p5763_p3 = scmp.lt.s32.totalorder %s5757_s19, %s5757_s19 }
  0x63   :  { %p5764_p4 = por %p5763_p3, %p5762_p2 }
  0x65   :  { %p5765_p5 = pnand %p5764_p4, %p5758_p1 }
  0x67   :  { %5768 = shalt.err (!%p5765_p5)
}
  0x68   :  { %115 = dma.hbm_to_vmem [thread:$0]  %s7831_s14, 1024, %s5983_s25, [#allocation16], %s5805_s5, %s5805_s5, %s5806_s22  }
  0x69   :  { %5791 = dma.done.wait [#allocation7], 4096  }
  0x6a   :  { %5792 = vsyncadd [#allocation7], 4294963200 }
  0x6b   :  { %5793 = dma.done.wait [#allocation10], 8192  }
  0x6c   :  { %5794 = vsyncadd [#allocation10], 4294959104 }
  0x6d   :  { %5795 = dma.done.wait [#allocation13], 2048  }
  0x6e   :  { %5796 = vsyncadd [#allocation13], 4294965248 }
  0x6f   :  { %5797 = dma.done.wait [#allocation16], 1024  }
  0x70   :  { %5798 = vsyncadd [#allocation16], 4294966272  ;;  %vm196_vm0 = vcmask 1042432   ;;  %v7842_v0 = vmov 0   ;;  %vm197_vm1 = vcmask 1043456   ;;  %v5812_v1 = vmov 65535  }
  0x71   :  { %317 = vmatprep.mubr.bf16.mxu1 %v7842_v0  ;;  %244 = vmatprep.mubr.bf16.mxu0 %v7842_v0  ;;  %v198_v2 = vsel %vm196_vm0, 4294967295, %v5812_v1  ;;  %v146_v3 = vld [vmem:[%s7819_s2 + $0x8] sm:$0xff]  ;;  %v145_v5 = vld [vmem:[%s7819_s2] sm:$0xff]  ;;  %s7854_s0 = sld [smem:[#allocation48_spill]]  ;;  %vm183_vm2 = vcmask 56320   ;;  %v7840_v58 = vmov 0.0|0.0   ;;  %v153_v59 = vlaneseq }
  0x72   :  { %5071 = vset.pattern.permute.xlu1 %v7842_v0  ;;  %5072 = vset.pattern.permute.xlu0 %v7842_v0  ;;  %v199_v4 = vsel %vm197_vm1, %v198_v2, 0  ;;  %v4769_v6 = vcombine.high %v146_v3, %v146_v3  ;;  %v4768_v7 = vcombine.low %v146_v3, %v146_v3  ;;  %v4767_v8 = vcombine.high %v145_v5, %v145_v5  ;;  %v6036_v12 = vld [vmem:[#allocation6 + $0xc] ss:$16 sps:$4 sm:$0xff]   ;;  %v6038_v17 = vld [vmem:[#allocation6 + $0x4] ss:$16 sps:$4 sm:$0xff]   ;;  %s5823_s14 = smov [#allocation17]  }
  0x73   :  { %v4766_v10 = vcombine.low %v145_v5, %v145_v5  ;;  %v6040_v19 = vld [vmem:[#allocation6 + $0x8] ss:$16 sps:$4 sm:$0xff]   ;;  %v6042_v20 = vld [vmem:[#allocation6] ss:$16 sps:$4 sm:$0xff]   ;;  %v6046_v21 = vld [vmem:[#allocation6 + $0x2c] ss:$16 sps:$4 sm:$0xff]  }
  0x74   :  { %v210_v13 = vand.u32 %v4769_v6, %v199_v4  ;;  %v207_v14 = vand.u32 %v4768_v7, %v199_v4  ;;  %v204_v15 = vand.u32 %v4767_v8, %v199_v4  ;;  %v6048_v22 = vld [vmem:[#allocation6 + $0x28] ss:$16 sps:$4 sm:$0xff]   ;;  %v6050_v23 = vld [vmem:[#allocation6 + $0x24] ss:$16 sps:$4 sm:$0xff]   ;;  %v6062_v26 = vld [vmem:[#allocation6 + $0x20] ss:$16 sps:$4 sm:$0xff]  }
  0x75   :  { %v201_v16 = vand.u32 %v4766_v10, %v199_v4  ;;  %v6066_v27 = vld [vmem:[#allocation6 + $0x4c] ss:$16 sps:$4 sm:$0xff]   ;;  %v6068_v28 = vld [vmem:[#allocation6 + $0x44] ss:$16 sps:$4 sm:$0xff]   ;;  %v6074_v30 = vld [vmem:[#allocation6 + $0x48] ss:$16 sps:$4 sm:$0xff]  }
  0x76   :  { %285 = vmatprep.subr.bf16.mxu1 %v210_v13  ;;  %212 = vmatprep.subr.bf16.mxu0 %v204_v15  ;;  %v6076_v31 = vld [vmem:[#allocation6 + $0x40] ss:$16 sps:$4 sm:$0xff]   ;;  %v6080_v32 = vld [vmem:[#allocation6 + $0x6c] ss:$16 sps:$4 sm:$0xff]   ;;  %v6082_v33 = vld [vmem:[#allocation6 + $0x68] ss:$16 sps:$4 sm:$0xff]  }
  0x77   :  { %v137_v9 = vld [vmem:[%s7854_s0] sm:$0xff]  ;;  %v138_v11 = vld [vmem:[%s7854_s0 + $0x8] sm:$0xff]  ;;  %286 = vmatpush1.bf16.msra.mxu1 %v207_v14  ;;  %213 = vmatpush1.bf16.msra.mxu0 %v201_v16  ;;  %v139_v24 = vld [vmem:[%s7854_s0 + $0x10] sm:$0xff]  ;;  %v6204_v60 = vshrl.u32 %v153_v59, 7  ;;  %vm725_vm3 = vcmask 523264   ;;  %vm731_vm4 = vcmask 1048064  }
  0x78   :  { %v147_v18 = vpack.c.bf16 %v138_v11, %v137_v9  ;;  %628 = vmatprep.subr.bf16.mxu1 %v6036_v12  ;;  %587 = vmatprep.subr.bf16.mxu0 %v6038_v17  ;;  %v140_v25 = vld [vmem:[%s7854_s0 + $0x18] sm:$0xff]  ;;  %v6084_v34 = vld [vmem:[#allocation6 + $0x64] ss:$16 sps:$4 sm:$0xff]   ;;  %v142_v36 = vld [vmem:[%s7854_s0 + $0x28] sm:$0xff]  ;;  %vm4017_vm5 = vcmask 7168   ;;  %vm4019_vm6 = vcmask 15360  }
  0x79   :  { %v148_v29 = vpack.c.bf16 %v140_v25, %v139_v24  ;;  %v141_v35 = vld [vmem:[%s7854_s0 + $0x20] sm:$0xff]  ;;  %v6094_v37 = vld [vmem:[#allocation6 + $0x8c] ss:$16 sps:$4 sm:$0xff]   ;;  %v6108_v41 = vld [vmem:[#allocation6 + $0x88] ss:$16 sps:$4 sm:$0xff]   ;;  %7855 = vst [vmem:[#allocation23_spill] sm:$0xff] %v6204_v60 }
  0x7a   :  { %4774 = vmatmul.mubr.msk.bf16.vlgmr.msra.gmra.mrb[0].mxu1 %vm183_vm2, %v147_v18  ;;  %4770 = vmatmul.mubr.msk.bf16.vlgmr.msra.gmra.mrb[0].mxu0 %vm183_vm2, %v147_v18  ;;  %v6098_v38 = vld [vmem:[#allocation6 + $0x60] ss:$16 sps:$4 sm:$0xff]   ;;  %v6102_v39 = vld [vmem:[#allocation6 + $0x84] ss:$16 sps:$4 sm:$0xff]   ;;  %v149_v40 = vpack.c.bf16 %v142_v36, %v141_v35  ;;  %v6114_v43 = vld [vmem:[#allocation6 + $0xac] ss:$16 sps:$4 sm:$0xff]  }
  0x7b   :  { %629 = vmatpush1.bf16.msra.mxu1 %v6040_v19  ;;  %588 = vmatpush1.bf16.msra.mxu0 %v6042_v20  ;;  %v6110_v42 = vld [vmem:[#allocation6 + $0x80] ss:$16 sps:$4 sm:$0xff]   ;;  %v6116_v44 = vld [vmem:[#allocation6 + $0xa8] ss:$16 sps:$4 sm:$0xff]   ;;  %v6124_v47 = vld [vmem:[#allocation6 + $0xa4] ss:$16 sps:$4 sm:$0xff]  }
  0x7c   :  { %630 = vmatprep.subr.bf16.mxu1 %v6046_v21  ;;  %327 = vmatprep.mubr.bf16.mxu1 %v7842_v0  ;;  %v143_v45 = vld [vmem:[%s7854_s0 + $0x30] sm:$0xff]  ;;  %v144_v46 = vld [vmem:[%s7854_s0 + $0x38] sm:$0xff]  ;;  %v6207_v61 = vsub.s32 2, %v6204_v60  ;;  %v151_v62 = vld [vmem:[%s7821_s4] sm:$0xf]  ;;  %v7839_v63 = vsub.s32 3, %v6204_v60 }
  0x7d   :  { %589 = vmatprep.subr.bf16.mxu0 %v6050_v23  ;;  %254 = vmatprep.mubr.bf16.mxu0 %v7842_v0  ;;  %v6126_v48 = vld [vmem:[#allocation6 + $0xa0] ss:$16 sps:$4 sm:$0xff]   ;;  %v6130_v49 = vld [vmem:[#allocation6 + $0xcc] ss:$16 sps:$4 sm:$0xff]   ;;  %v6132_v50 = vld [vmem:[#allocation6 + $0xc4] ss:$16 sps:$4 sm:$0xff]   ;;  %v150_v53 = vpack.c.bf16 %v144_v46, %v143_v45 }
  0x7e   :  { %v6139_v51 = vld [vmem:[#allocation6 + $0xc8] ss:$16 sps:$4 sm:$0xff]   ;;  %v6142_v52 = vld [vmem:[#allocation6 + $0xc0] ss:$16 sps:$4 sm:$0xff]   ;;  %v6144_v54 = vld [vmem:[#allocation6 + $0xec] ss:$16 sps:$4 sm:$0xff]   ;;  %v6217_v2 = vrot.slane %v151_v62, %v6207_v61  ;;  %v6221_v3 = vrot.slane %v151_v62, %v7839_v63 }
  0x7f   :  { %631 = vmatpush1.bf16.msra.mxu1 %v6048_v22  ;;  %590 = vmatpush1.bf16.msra.mxu0 %v6062_v26  ;;  %v6148_v55 = vld [vmem:[#allocation6 + $0xe4] ss:$16 sps:$4 sm:$0xff]   ;;  %v6152_v56 = vld [vmem:[#allocation6 + $0xe8] ss:$16 sps:$4 sm:$0xff]   ;;  %v6154_v57 = vld [vmem:[#allocation6 + $0xe0] ss:$16 sps:$4 sm:$0xff]  }
  0x80   :  { %632 = vmatprep.subr.bf16.mxu1 %v6066_v27  ;;  %591 = vmatprep.subr.bf16.mxu0 %v6068_v28  ;;  %7856 = vst [vmem:[#allocation24_spill] sm:$0xff] %v6207_v61  ;;  %v6214_v1 = vsub.s32 0, %v6204_v60  ;;  %v6224_v4 = vsub.s32 1, %v6204_v60  ;;  %vm4021_vm7 = vcmask 23552   ;;  %vm4023_vm8 = vcmask 31744   ;;  %s4754_s22 = sshll.u32 %s5823_s14, 4  ;;  %s4755_s22 = int_to_ptr.vmem [resolvable:$true] %s4754_s22 }
  0x81   :  { %vm4025_vm9 = vcmask 39936   ;;  %vm4027_vm10 = vcmask 48128   ;;  %vm4030_vm11 = vcmask 64512   ;;  %vm5822_vm12 = vmmov 0   ;;  %p5774_p7 = scmp.lt.s32.totalorder %s4755_s22, %s4755_s22 }
  0x82   :  { %4775 = vmatmul.mubr.msk.bf16.gmra.mrb[4].mxu1 %vm183_vm2, %v148_v29  ;;  %4771 = vmatmul.mubr.msk.bf16.gmra.mrb[4].mxu0 %vm183_vm2, %v148_v29  ;;  %7857 = vst [vmem:[#allocation25_spill] sm:$0xff] %v6214_v1  ;;  %7858 = vst [vmem:[#allocation26_spill] sm:$0xff] %v6224_v4  ;;  %v156_v5 = vrot.slane %v151_v62, %v6214_v1  ;;  %v160_v14 = vrot.slane %v151_v62, %v6224_v4 }
  0x83   :  { %633 = vmatpush1.bf16.msra.mxu1 %v6074_v30  ;;  %592 = vmatpush1.bf16.msra.mxu0 %v6076_v31 }
  0x84   :  { %634 = vmatprep.subr.bf16.mxu1 %v6080_v32  ;;  %337 = vmatprep.mubr.bf16.mxu1 %v7842_v0 }
  0x85   :  { %593 = vmatprep.subr.bf16.mxu0 %v6084_v34  ;;  %264 = vmatprep.mubr.bf16.mxu0 %v7842_v0 }
  0x87   :  { %635 = vmatpush1.bf16.msra.mxu1 %v6082_v33  ;;  %594 = vmatpush1.bf16.msra.mxu0 %v6098_v38 }
  0x88   :  { %636 = vmatprep.subr.bf16.mxu1 %v6094_v37  ;;  %595 = vmatprep.subr.bf16.mxu0 %v6102_v39 }
  0x8a   :  { %4776 = vmatmul.mubr.msk.bf16.gmra.mrb[8].mxu1 %vm183_vm2, %v149_v40  ;;  %4772 = vmatmul.mubr.msk.bf16.gmra.mrb[8].mxu0 %vm183_vm2, %v149_v40 }
  0x8b   :  { %637 = vmatpush1.bf16.msra.mxu1 %v6108_v41  ;;  %596 = vmatpush1.bf16.msra.mxu0 %v6110_v42 }
  0x8c   :  { %638 = vmatprep.subr.bf16.mxu1 %v6114_v43  ;;  %347 = vmatprep.mubr.bf16.mxu1 %v7842_v0 }
  0x8d   :  { %597 = vmatprep.subr.bf16.mxu0 %v6124_v47  ;;  %274 = vmatprep.mubr.bf16.mxu0 %v7842_v0 }
  0x8f   :  { %639 = vmatpush1.bf16.msra.mxu1 %v6116_v44  ;;  %598 = vmatpush1.bf16.msra.mxu0 %v6126_v48 }
  0x90   :  { %640 = vmatprep.subr.bf16.mxu1 %v6130_v49  ;;  %599 = vmatprep.subr.bf16.mxu0 %v6132_v50 }
  0x92   :  { %4777 = vmatmul.mubr.msk.bf16.gmra.mrb[12].mxu1 %vm183_vm2, %v150_v53  ;;  %4773 = vmatmul.mubr.msk.bf16.gmra.mrb[12].mxu0 %vm183_vm2, %v150_v53 }
  0x93   :  { %641 = vmatpush1.bf16.msra.mxu1 %v6139_v51  ;;  %600 = vmatpush1.bf16.msra.mxu0 %v6142_v52 }
  0x94   :  { %642 = vmatprep.subr.bf16.mxu1 %v6144_v54  ;;  %660 = vmatprep.mubr.bf16.mxu1 %v7842_v0 }
  0x95   :  { %601 = vmatprep.subr.bf16.mxu0 %v6148_v55  ;;  %619 = vmatprep.mubr.bf16.mxu0 %v7842_v0 }
  0x97   :  { %643 = vmatpush1.bf16.msra.mxu1 %v6152_v56  ;;  %602 = vmatpush1.bf16.msra.mxu0 %v6154_v57 }
  0x98   :  { %739 = vmatprep.subr.bf16.mxu0 %v6038_v17  ;;  %780 = vmatprep.subr.bf16.mxu1 %v6036_v12 }
  0x9a   :  { %661 = vmatmul.mubr.bf16.vlgmr.msra.gmra.mrb[16].mxu1 %v7840_v58  ;;  %620 = vmatmul.mubr.bf16.vlgmr.msra.gmra.mrb[16].mxu0 %v7840_v58 }
  0x9b   :  { %740 = vmatpush1.bf16.msra.mxu0 %v6042_v20  ;;  %781 = vmatpush1.bf16.msra.mxu1 %v6040_v19 }
  0x9c   :  { %741 = vmatprep.subr.bf16.mxu0 %v6050_v23  ;;  %782 = vmatprep.subr.bf16.mxu1 %v6046_v21 }
  0x9d   :  { %771 = vmatprep.mubr.bf16.mxu0 %v7842_v0  ;;  %812 = vmatprep.mubr.bf16.mxu1 %v7842_v0 }
  0x9f   :  { %742 = vmatpush1.bf16.msra.mxu0 %v6062_v26  ;;  %783 = vmatpush1.bf16.msra.mxu1 %v6048_v22 }
  0xa0   :  { %743 = vmatprep.subr.bf16.mxu0 %v6068_v28  ;;  %784 = vmatprep.subr.bf16.mxu1 %v6066_v27 }
  0xa3   :  { %744 = vmatpush1.bf16.msra.mxu0 %v6076_v31  ;;  %785 = vmatpush1.bf16.msra.mxu1 %v6074_v30 }
  0xa4   :  { %745 = vmatprep.subr.bf16.mxu0 %v6084_v34  ;;  %786 = vmatprep.subr.bf16.mxu1 %v6080_v32 }
  0xa7   :  { %746 = vmatpush1.bf16.msra.mxu0 %v6098_v38  ;;  %787 = vmatpush1.bf16.msra.mxu1 %v6082_v33 }
  0xa8   :  { %747 = vmatprep.subr.bf16.mxu0 %v6102_v39  ;;  %788 = vmatprep.subr.bf16.mxu1 %v6094_v37 }
  0xab   :  { %748 = vmatpush1.bf16.msra.mxu0 %v6110_v42  ;;  %789 = vmatpush1.bf16.msra.mxu1 %v6108_v41 }
  0xac   :  { %749 = vmatprep.subr.bf16.mxu0 %v6124_v47  ;;  %790 = vmatprep.subr.bf16.mxu1 %v6114_v43 }
  0xaf   :  { %750 = vmatpush1.bf16.msra.mxu0 %v6126_v48  ;;  %791 = vmatpush1.bf16.msra.mxu1 %v6116_v44 }
  0xb0   :  { %751 = vmatprep.subr.bf16.mxu0 %v6132_v50  ;;  %792 = vmatprep.subr.bf16.mxu1 %v6130_v49 }
  0xb3   :  { %752 = vmatpush1.bf16.msra.mxu0 %v6142_v52  ;;  %793 = vmatpush1.bf16.msra.mxu1 %v6139_v51 }
  0xb4   :  { %753 = vmatprep.subr.bf16.mxu0 %v6148_v55  ;;  %794 = vmatprep.subr.bf16.mxu1 %v6144_v54 }
  0xb7   :  { %754 = vmatpush1.bf16.msra.mxu0 %v6154_v57  ;;  %795 = vmatpush1.bf16.msra.mxu1 %v6152_v56 }
  0xb8   :  { %889 = vmatprep.subr.bf16.mxu0 %v6038_v17  ;;  %930 = vmatprep.subr.bf16.mxu1 %v6036_v12 }
 0x14d   :  { %v319_v6 = vpop.f32.mrb[0].mxu1  ;;  %v246_v7 = vpop.f32.mrb[0].mxu0 }
 0x14e   :  { %v6228_v8 = vadd.f32 %v319_v6, %v6217_v2  ;;  %v321_v9 = vpop.f32.mrb[1].mxu1  ;;  %v248_v10 = vpop.f32.mrb[1].mxu0 }
 0x14f   :  { %v6231_v11 = vadd.f32 %v321_v9, %v6221_v3  ;;  %v323_v13 = vpop.f32.mrb[2].mxu1  ;;  %v250_v15 = vpop.f32.mrb[2].mxu0 }
 0x150   :  { %7859 = vst [vmem:[#allocation27_spill] sm:$0xff] %v6228_v8  ;;  %v6235_v16 = vadd.f32 %v323_v13, %v6217_v2  ;;  %v325_v18 = vpop.f32.mrb[3].mxu1  ;;  %v6237_v24 = vadd.f32 %v250_v15, %v156_v5  ;;  %v252_v25 = vpop.f32.mrb[3].mxu0 }
 0x151   :  { %7860 = vst [vmem:[#allocation28_spill] sm:$0xff] %v6231_v11  ;;  %v6240_v29 = vadd.f32 %v325_v18, %v6221_v3  ;;  %v6242_v35 = vadd.f32 %v252_v25, %v160_v14 }
 0x152   :  { %7861 = vst [vmem:[#allocation29_spill] sm:$0xff] %v6235_v16 }
 0x153   :  { %7862 = vst [vmem:[#allocation30_spill] sm:$0xff] %v6240_v29 }
 0x155   :  { %v329_v36 = vpop.f32.mrb[4].mxu1  ;;  %v256_v40 = vpop.f32.mrb[4].mxu0 }
 0x156   :  { %v6245_v45 = vadd.f32 %v329_v36, %v6217_v2  ;;  %v331_v46 = vpop.f32.mrb[5].mxu1  ;;  %v6247_v53 = vadd.f32 %v256_v40, %v156_v5  ;;  %v258_v59 = vpop.f32.mrb[5].mxu0 }
 0x157   :  { %v6250_v62 = vadd.f32 %v331_v46, %v6221_v3  ;;  %v333_v6 = vpop.f32.mrb[6].mxu1  ;;  %v6252_v9 = vadd.f32 %v258_v59, %v160_v14  ;;  %v260_v13 = vpop.f32.mrb[6].mxu0 }
 0x158   :  { %7863 = vst [vmem:[#allocation31_spill] sm:$0xff] %v6245_v45  ;;  %v6255_v15 = vadd.f32 %v333_v6, %v6217_v2  ;;  %v335_v18 = vpop.f32.mrb[7].mxu1  ;;  %v6257_v25 = vadd.f32 %v260_v13, %v156_v5  ;;  %v262_v63 = vpop.f32.mrb[7].mxu0 }
 0x159   :  { %7864 = vst [vmem:[#allocation32_spill] sm:$0xff] %v6250_v62  ;;  %7865 = vst [vmem:[#allocation33_spill] sm:$0xff] %v6252_v9  ;;  %v6260_v36 = vadd.f32 %v335_v18, %v6221_v3  ;;  %v6262_v40 = vadd.f32 %v262_v63, %v160_v14 }
 0x15a   :  { %7866 = vst [vmem:[#allocation34_spill] sm:$0xff] %v6255_v15  ;;  %7867 = vst [vmem:[#allocation35_spill] sm:$0xff] %v6257_v25  ;;  %v247_v15 = vadd.f32 %v246_v7, %v156_v5 }
 0x15b   :  { %7868 = vst [vmem:[#allocation36_spill] sm:$0xff] %v6260_v36  ;;  %7869 = vst [vmem:[#allocation37_spill] sm:$0xff] %v6262_v40 }
 0x15d   :  { %v339_v58 = vpop.f32.mrb[8].mxu1  ;;  %v266_v0 = vpop.f32.mrb[8].mxu0 }
 0x15e   :  { %v6265_v46 = vadd.f32 %v339_v58, %v6217_v2  ;;  %v341_v59 = vpop.f32.mrb[9].mxu1  ;;  %v6267_v4 = vadd.f32 %v266_v0, %v156_v5  ;;  %v268_v1 = vpop.f32.mrb[9].mxu0 }
 0x15f   :  { %v6270_v6 = vadd.f32 %v341_v59, %v6221_v3  ;;  %v343_v13 = vpop.f32.mrb[10].mxu1  ;;  %v6272_v60 = vadd.f32 %v268_v1, %v160_v14  ;;  %v270_v61 = vpop.f32.mrb[10].mxu0 }
 0x160   :  { %7870 = vst [vmem:[#allocation38_spill] sm:$0xff] %v6265_v46  ;;  %7871 = vst [vmem:[#allocation39_spill] sm:$0xff] %v6267_v4  ;;  %v6275_v18 = vadd.f32 %v343_v13, %v6217_v2  ;;  %v345_v63 = vpop.f32.mrb[11].mxu1  ;;  %v6277_v11 = vadd.f32 %v270_v61, %v156_v5  ;;  %v272_v8 = vpop.f32.mrb[11].mxu0 }
 0x161   :  { %7872 = vst [vmem:[#allocation40_spill] sm:$0xff] %v6270_v6  ;;  %7873 = vst [vmem:[#allocation41_spill] sm:$0xff] %v6272_v60  ;;  %v6280_v58 = vadd.f32 %v345_v63, %v6221_v3  ;;  %v6282_v0 = vadd.f32 %v272_v8, %v160_v14 }
 0x162   :  { %7874 = vst [vmem:[#allocation42_spill] sm:$0xff] %v6277_v11 }
 0x163   :  { %7875 = vst [vmem:[#allocation43_spill] sm:$0xff] %v6280_v58  ;;  %7876 = vst [vmem:[#allocation44_spill] sm:$0xff] %v6282_v0 }
 0x165   :  { %v349_v29 = vpop.f32.mrb[12].mxu1  ;;  %v276_v16 = vpop.f32.mrb[12].mxu0 }
 0x166   :  { %v6285_v59 = vadd.f32 %v349_v29, %v6217_v2  ;;  %v351_v1 = vpop.f32.mrb[13].mxu1  ;;  %v6287_v62 = vadd.f32 %v276_v16, %v156_v5  ;;  %v278_v45 = vpop.f32.mrb[13].mxu0  ;;  %v249_v29 = vadd.f32 %v248_v10, %v160_v14 }
 0x167   :  { %v6290_v13 = vadd.f32 %v351_v1, %v6221_v3  ;;  %v353_v61 = vpop.f32.mrb[14].mxu1  ;;  %v6292_v11 = vadd.f32 %v278_v45, %v160_v14  ;;  %v280_v36 = vpop.f32.mrb[14].mxu0 }
 0x168   :  { %7877 = vst [vmem:[#allocation45_spill] sm:$0xff] %v6287_v62  ;;  %v355_v63 = vpop.f32.mrb[15].mxu1  ;;  %v6294_v60 = vadd.f32 %v280_v36, %v156_v5  ;;  %v282_v8 = vpop.f32.mrb[15].mxu0  ;;  %v354_v4 = vadd.f32 %v353_v61, %v6217_v2 }
 0x169   :  { %7878 = vst [vmem:[#allocation46_spill] sm:$0xff] %v6292_v11  ;;  %v6296_v0 = vadd.f32 %v282_v8, %v160_v14  ;;  %v356_v16 = vadd.f32 %v355_v63, %v6221_v3 }
 0x16a   :  { %7879 = vst [vmem:[#allocation47_spill] sm:$0xff] %v6294_v60 }
 0x16d   :  { %v662_v62 = vpop.f32.mrb[16].mxu1  ;;  %v621_v6 = vpop.f32.mrb[16].mxu0 }
 0x16e   :  { %v671_v1 = vadd.f32 %v662_v62, %v354_v4  ;;  %v664_v40 = vpop.f32.mrb[17].mxu1  ;;  %v669_v46 = vadd.f32 %v621_v6, %v247_v15  ;;  %v623_v45 = vpop.f32.mrb[17].mxu0 }
 0x16f   :  { %v672_v11 = vadd.f32 %v664_v40, %v356_v16  ;;  %v666_v25 = vpop.f32.mrb[18].mxu1  ;;  %v670_v58 = vadd.f32 %v623_v45, %v249_v29  ;;  %v625_v36 = vpop.f32.mrb[18].mxu0 }
 0x170   :  { %v667_v60 = vpop.f32.mrb[19].mxu1  ;;  %v626_v9 = vpop.f32.mrb[19].mxu0  ;;  %v682_v3 = vmul.f32 0.5, %v671_v1  ;;  %v673_v4 = vmul.f32 0.5, %v669_v46 }
 0x171   :  { %5285 = vtanh.f32 %v672_v11  ;;  %v683_v36 = vmul.f32 0.5, %v672_v11 }
 0x172   :  { %5287 = vtanh.f32 %v670_v58 }
 0x173   :  { %5289 = vtanh.f32 %v682_v3 }
 0x174   :  { %5291 = vtanh.f32 %v673_v4 }
 0x17b   :  { %v5286_v5 = vpop.eup %5285 }
 0x17c   :  { %710 = vrot.lane.b32.xlu0 %v5286_v5, %s5805_s5  ;;  %v5288_v2 = vpop.eup %5287  ;;  %v674_v5 = vmul.f32 0.5, %v670_v58 }
 0x17d   :  { %v5290_v7 = vpop.eup %5289 }
 0x17e   :  { %v686_v10 = vmul.f32 0.5, %v5290_v7  ;;  %v5292_v14 = vpop.eup %5291 }
 0x17f   :  { %v677_v15 = vmul.f32 0.5, %v5292_v14 }
 0x180   :  { %693 = vrot.lane.b32.xlu0 %v5288_v2, %s5805_s5  ;;  %v688_v62 = vadd.f32 0.5, %v686_v10 }
 0x181   :  { %v679_v9 = vadd.f32 0.5, %v677_v15 }
 0x182   :  { %v708_v61 = vmul.f32 0.0, %v688_v62 }
 0x183   :  { %v691_v46 = vmul.f32 0.0, %v679_v9 }
 0x1ee   :  { %v711_v25 = vpop.permute.xlu0 %710 }
 0x1ef   :  { %v713_v60 = vmul.f32 %v711_v25, %v688_v62 }
 0x1f1   :  { %715 = vrot.lane.b32.xlu1 %v713_v60, %s5805_s5 }
 0x1f2   :  { %v694_v40 = vpop.permute.xlu0 %693 }
 0x1f3   :  { %v696_v6 = vmul.f32 %v694_v40, %v679_v9  ;;  %v7880_v40 = vmov 0  }
 0x1f5   :  { %698 = vrot.lane.b32.xlu1 %v696_v6, %s5805_s5 }
 0x263   :  { %v716_v63 = vpop.permute.xlu1 %715 }
 0x264   :  { %v6304_v8 = vadd.f32 %v716_v63, %v708_v61 }
 0x266   :  { %5293 = vtanh.f32 %v6304_v8 }
 0x267   :  { %v699_v29 = vpop.permute.xlu1 %698 }
 0x268   :  { %v6307_v16 = vadd.f32 %v699_v29, %v691_v46 }
 0x26a   :  { %5295 = vtanh.f32 %v6307_v16 }
 0x26b   :  { %5297 = vtanh.f32 %v683_v36 }
 0x26c   :  { %5299 = vtanh.f32 %v674_v5 }
 0x270   :  { %v5294_v1 = vpop.eup %5293 }
 0x271   :  { %721 = vrot.lane.b32.xlu0 %v5294_v1, %s5805_s5 }
 0x274   :  { %v5296_v45 = vpop.eup %5295 }
 0x275   :  { %704 = vrot.lane.b32.xlu1 %v5296_v45, %s5805_s5  ;;  %v5298_v2 = vpop.eup %5297 }
 0x276   :  { %v687_v3 = vmul.f32 0.5, %v5298_v2  ;;  %v5300_v4 = vpop.eup %5299 }
 0x277   :  { %v678_v10 = vmul.f32 0.5, %v5300_v4 }
 0x278   :  { %v689_v7 = vadd.f32 0.5, %v687_v3 }
 0x279   :  { %v680_v15 = vadd.f32 0.5, %v678_v10 }
 0x2e3   :  { %v722_v14 = vpop.permute.xlu0 %721 }
 0x2e4   :  { %v724_v62 = vmul.f32 %v722_v14, %v689_v7 }
 0x2e6   :  { %728 = vrot.lane.b32.xlu0 %v724_v62, %s5805_s5 }
 0x2e7   :  { %v705_v25 = vpop.permute.xlu1 %704 }
 0x2e8   :  { %v707_v60 = vmul.f32 %v705_v25, %v680_v15 }
 0x2ea   :  { %726 = vst.msk [vmem:[#allocation3] sm:$0xff] %vm725_vm3, %v707_v60 }
 0x358   :  { %v729_v11 = vpop.permute.xlu0 %728 }
 0x359   :  { %732 = vst.msk [vmem:[#allocation3 + $0x38] sm:$0xff] %vm731_vm4, %v729_v11  ;;  %v737_v58 = vsel %vm725_vm3, %v707_v60, %v729_v11 }
 0x35a   :  { %v738_v9 = vpack.c.bf16 %v737_v58, %v737_v58 }
 0x35c   :  { %772 = vmatmul.mubr.bf16.vlgmr.msra.gmra.mrb[20].mxu0 %v738_v9  ;;  %813 = vmatmul.mubr.bf16.vlgmr.msra.gmra.mrb[20].mxu1 %v738_v9 }
 0x35d   :  { %890 = vmatpush1.bf16.msra.mxu0 %v6042_v20  ;;  %931 = vmatpush1.bf16.msra.mxu1 %v6040_v19 }
 0x35e   :  { %891 = vmatprep.subr.bf16.mxu0 %v6050_v23  ;;  %932 = vmatprep.subr.bf16.mxu1 %v6046_v21 }
 0x35f   :  { %921 = vmatprep.mubr.bf16.mxu0 %v7880_v40  ;;  %962 = vmatprep.mubr.bf16.mxu1 %v7880_v40 }
 0x361   :  { %892 = vmatpush1.bf16.msra.mxu0 %v6062_v26  ;;  %933 = vmatpush1.bf16.msra.mxu1 %v6048_v22 }
 0x362   :  { %893 = vmatprep.subr.bf16.mxu0 %v6068_v28  ;;  %934 = vmatprep.subr.bf16.mxu1 %v6066_v27 }
 0x365   :  { %894 = vmatpush1.bf16.msra.mxu0 %v6076_v31  ;;  %935 = vmatpush1.bf16.msra.mxu1 %v6074_v30 }
 0x366   :  { %895 = vmatprep.subr.bf16.mxu0 %v6084_v34  ;;  %936 = vmatprep.subr.bf16.mxu1 %v6080_v32 }
 0x369   :  { %896 = vmatpush1.bf16.msra.mxu0 %v6098_v38  ;;  %937 = vmatpush1.bf16.msra.mxu1 %v6082_v33 }
 0x36a   :  { %897 = vmatprep.subr.bf16.mxu0 %v6102_v39  ;;  %938 = vmatprep.subr.bf16.mxu1 %v6094_v37 }
 0x36d   :  { %898 = vmatpush1.bf16.msra.mxu0 %v6110_v42  ;;  %939 = vmatpush1.bf16.msra.mxu1 %v6108_v41 }
 0x36e   :  { %899 = vmatprep.subr.bf16.mxu0 %v6124_v47  ;;  %940 = vmatprep.subr.bf16.mxu1 %v6114_v43 }
 0x371   :  { %900 = vmatpush1.bf16.msra.mxu0 %v6126_v48  ;;  %941 = vmatpush1.bf16.msra.mxu1 %v6116_v44 }
 0x372   :  { %901 = vmatprep.subr.bf16.mxu0 %v6132_v50  ;;  %942 = vmatprep.subr.bf16.mxu1 %v6130_v49 }
 0x375   :  { %902 = vmatpush1.bf16.msra.mxu0 %v6142_v52  ;;  %943 = vmatpush1.bf16.msra.mxu1 %v6139_v51 }
 0x376   :  { %944 = vmatprep.subr.bf16.mxu1 %v6144_v54  ;;  %903 = vmatprep.subr.bf16.mxu0 %v6148_v55 }
 0x379   :  { %904 = vmatpush1.bf16.msra.mxu0 %v6154_v57  ;;  %945 = vmatpush1.bf16.msra.mxu1 %v6152_v56 }
 0x37a   :  { %1039 = vmatprep.subr.bf16.mxu0 %v6038_v17  ;;  %1080 = vmatprep.subr.bf16.mxu1 %v6036_v12 }
 0x42f   :  { %v773_v19 = vpop.f32.mrb[20].mxu0  ;;  %v814_v20 = vpop.f32.mrb[20].mxu1 }
 0x430   :  { %v821_v21 = vadd.f32 %v773_v19, %v6237_v24  ;;  %v823_v22 = vadd.f32 %v814_v20, %v6285_v59  ;;  %v775_v23 = vpop.f32.mrb[21].mxu0  ;;  %v816_v26 = vpop.f32.mrb[21].mxu1 }
 0x431   :  { %v822_v27 = vadd.f32 %v775_v23, %v6242_v35  ;;  %v824_v28 = vadd.f32 %v816_v26, %v6290_v13  ;;  %v777_v30 = vpop.f32.mrb[22].mxu0  ;;  %v818_v31 = vpop.f32.mrb[22].mxu1 }
 0x432   :  { %v778_v32 = vpop.f32.mrb[23].mxu0  ;;  %v819_v33 = vpop.f32.mrb[23].mxu1  ;;  %v825_v24 = vmul.f32 0.5, %v821_v21  ;;  %v834_v59 = vmul.f32 0.5, %v823_v22  ;;  %v6375_v30 = vld [vmem:[#allocation6 + $0x8] ss:$16 sps:$4 sm:$0xff]  }
 0x433   :  { %5301 = vtanh.f32 %v822_v27  ;;  %v826_v15 = vmul.f32 0.5, %v822_v27  ;;  %v6378_v31 = vld [vmem:[#allocation6 + $0x24] ss:$16 sps:$4 sm:$0xff]   ;;  %v6381_v32 = vld [vmem:[#allocation6 + $0x2c] ss:$16 sps:$4 sm:$0xff]  }
 0x434   :  { %5303 = vtanh.f32 %v824_v28  ;;  %v6386_v33 = vld [vmem:[#allocation6 + $0x20] ss:$16 sps:$4 sm:$0xff]  }
 0x435   :  { %5305 = vtanh.f32 %v825_v24  ;;  %v6395_v24 = vld [vmem:[#allocation6 + $0x4c] ss:$16 sps:$4 sm:$0xff]  }
 0x436   :  { %5307 = vtanh.f32 %v834_v59  ;;  %v6398_v59 = vld [vmem:[#allocation6 + $0x40] ss:$16 sps:$4 sm:$0xff]  }
 0x43d   :  { %v5302_v17 = vpop.eup %5301 }
 0x43e   :  { %845 = vrot.lane.b32.xlu0 %v5302_v17, %s5805_s5  ;;  %v5304_v12 = vpop.eup %5303  ;;  %v6389_v17 = vld [vmem:[#allocation6 + $0x28] ss:$16 sps:$4 sm:$0xff]  }
 0x43f   :  { %862 = vrot.lane.b32.xlu1 %v5304_v12, %s5805_s5  ;;  %v5306_v6 = vpop.eup %5305  ;;  %v6392_v12 = vld [vmem:[#allocation6 + $0x44] ss:$16 sps:$4 sm:$0xff]  }
 0x440   :  { %v829_v35 = vmul.f32 0.5, %v5306_v6  ;;  %v5308_v61 = vpop.eup %5307  ;;  %v6401_v6 = vld [vmem:[#allocation6 + $0x48] ss:$16 sps:$4 sm:$0xff]  }
 0x441   :  { %v838_v46 = vmul.f32 0.5, %v5308_v61  ;;  %v6409_v61 = vld [vmem:[#allocation6 + $0x68] ss:$16 sps:$4 sm:$0xff]  }
 0x442   :  { %v831_v13 = vadd.f32 0.5, %v829_v35  ;;  %v6405_v35 = vld [vmem:[#allocation6 + $0x6c] ss:$16 sps:$4 sm:$0xff]  }
 0x443   :  { %v840_v1 = vadd.f32 0.5, %v838_v46 }
 0x444   :  { %v843_v5 = vmul.f32 %v831_v13, %v6307_v16  ;;  %v835_v16 = vmul.f32 0.5, %v824_v28  ;;  %v6372_v28 = vld [vmem:[#allocation6] ss:$16 sps:$4 sm:$0xff]  }
 0x445   :  { %v860_v4 = vmul.f32 %v840_v1, %v6304_v8 }
 0x4b0   :  { %v846_v63 = vpop.permute.xlu0 %845 }
 0x4b1   :  { %v848_v29 = vmul.f32 %v846_v63, %v831_v13  ;;  %v863_v45 = vpop.permute.xlu1 %862 }
 0x4b2   :  { %v865_v36 = vmul.f32 %v863_v45, %v840_v1 }
 0x4b3   :  { %850 = vrot.lane.b32.xlu0 %v848_v29, %s5805_s5 }
 0x4b4   :  { %867 = vrot.lane.b32.xlu1 %v865_v36, %s5805_s5 }
 0x525   :  { %v851_v2 = vpop.permute.xlu0 %850 }
 0x526   :  { %v6359_v3 = vadd.f32 %v851_v2, %v843_v5  ;;  %v868_v7 = vpop.permute.xlu1 %867 }
 0x527   :  { %v6363_v10 = vadd.f32 %v868_v7, %v860_v4 }
 0x528   :  { %5309 = vtanh.f32 %v6359_v3 }
 0x529   :  { %5311 = vtanh.f32 %v6363_v10 }
 0x52a   :  { %5313 = vtanh.f32 %v826_v15 }
 0x52b   :  { %5315 = vtanh.f32 %v835_v16 }
 0x532   :  { %v5310_v14 = vpop.eup %5309 }
 0x533   :  { %856 = vrot.lane.b32.xlu0 %v5310_v14, %s5805_s5  ;;  %v5312_v62 = vpop.eup %5311 }
 0x534   :  { %873 = vrot.lane.b32.xlu1 %v5312_v62, %s5805_s5  ;;  %v5314_v25 = vpop.eup %5313 }
 0x535   :  { %v830_v60 = vmul.f32 0.5, %v5314_v25  ;;  %v5316_v11 = vpop.eup %5315 }
 0x536   :  { %v839_v9 = vmul.f32 0.5, %v5316_v11 }
 0x537   :  { %v832_v58 = vadd.f32 0.5, %v830_v60 }
 0x538   :  { %v841_v20 = vadd.f32 0.5, %v839_v9 }
 0x5a5   :  { %v857_v8 = vpop.permute.xlu0 %856 }
 0x5a6   :  { %v859_v19 = vmul.f32 %v857_v8, %v832_v58  ;;  %v874_v21 = vpop.permute.xlu1 %873 }
 0x5a7   :  { %v876_v22 = vmul.f32 %v874_v21, %v841_v20 }
 0x5a8   :  { %877 = vst.msk [vmem:[#allocation3 + $0x8] sm:$0xff] %vm725_vm3, %v859_v19 }
 0x5a9   :  { %879 = vrot.lane.b32.xlu1 %v876_v22, %s5805_s5 }
 0x61b   :  { %v880_v23 = vpop.permute.xlu1 %879 }
 0x61c   :  { %882 = vst.msk [vmem:[#allocation3 + $0x30] sm:$0xff] %vm731_vm4, %v880_v23  ;;  %v887_v26 = vsel %vm725_vm3, %v859_v19, %v880_v23 }
 0x61d   :  { %v888_v27 = vpack.c.bf16 %v887_v26, %v887_v26 }
 0x61f   :  { %922 = vmatmul.mubr.bf16.vlgmr.msra.gmra.mrb[24].mxu0 %v888_v27  ;;  %963 = vmatmul.mubr.bf16.vlgmr.msra.gmra.mrb[24].mxu1 %v888_v27 }
 0x620   :  { %1040 = vmatpush1.bf16.msra.mxu0 %v6372_v28  ;;  %1081 = vmatpush1.bf16.msra.mxu1 %v6375_v30 }
 0x621   :  { %1041 = vmatprep.subr.bf16.mxu0 %v6378_v31  ;;  %1082 = vmatprep.subr.bf16.mxu1 %v6381_v32 }
 0x622   :  { %1071 = vmatprep.mubr.bf16.mxu0 %v7880_v40  ;;  %1112 = vmatprep.mubr.bf16.mxu1 %v7880_v40 }
 0x624   :  { %1042 = vmatpush1.bf16.msra.mxu0 %v6386_v33  ;;  %1083 = vmatpush1.bf16.msra.mxu1 %v6389_v17 }
 0x625   :  { %1043 = vmatprep.subr.bf16.mxu0 %v6392_v12  ;;  %1084 = vmatprep.subr.bf16.mxu1 %v6395_v24 }
 0x628   :  { %1044 = vmatpush1.bf16.msra.mxu0 %v6398_v59  ;;  %1085 = vmatpush1.bf16.msra.mxu1 %v6401_v6 }
 0x629   :  { %1045 = vmatprep.subr.bf16.mxu0 %v6084_v34  ;;  %1086 = vmatprep.subr.bf16.mxu1 %v6405_v35  ;;  %v6428_v34 = vld [vmem:[#allocation6 + $0x4] ss:$16 sps:$4 sm:$0xff]  }
 0x62c   :  { %1046 = vmatpush1.bf16.msra.mxu0 %v6098_v38  ;;  %1087 = vmatpush1.bf16.msra.mxu1 %v6409_v61 }
 0x62d   :  { %1047 = vmatprep.subr.bf16.mxu0 %v6102_v39  ;;  %1088 = vmatprep.subr.bf16.mxu1 %v6094_v37  ;;  %v6431_v37 = vld [vmem:[#allocation6 + $0xc] ss:$16 sps:$4 sm:$0xff]  }
 0x630   :  { %1048 = vmatpush1.bf16.msra.mxu0 %v6110_v42  ;;  %1089 = vmatpush1.bf16.msra.mxu1 %v6108_v41 }
 0x631   :  { %1049 = vmatprep.subr.bf16.mxu0 %v6124_v47  ;;  %1090 = vmatprep.subr.bf16.mxu1 %v6114_v43  ;;  %v7881_v47 = vld [vmem:[#allocation33_spill] sm:$0xff] }
 0x634   :  { %1050 = vmatpush1.bf16.msra.mxu0 %v6126_v48  ;;  %1091 = vmatpush1.bf16.msra.mxu1 %v6116_v44 }
 0x635   :  { %1051 = vmatprep.subr.bf16.mxu0 %v6132_v50  ;;  %1092 = vmatprep.subr.bf16.mxu1 %v6130_v49  ;;  %v7882_v49 = vld [vmem:[#allocation43_spill] sm:$0xff] }
 0x638   :  { %1052 = vmatpush1.bf16.msra.mxu0 %v6142_v52  ;;  %1093 = vmatpush1.bf16.msra.mxu1 %v6139_v51 }
 0x639   :  { %1094 = vmatprep.subr.bf16.mxu1 %v6144_v54  ;;  %1053 = vmatprep.subr.bf16.mxu0 %v6148_v55 }
 0x63c   :  { %1054 = vmatpush1.bf16.msra.mxu0 %v6154_v57  ;;  %1095 = vmatpush1.bf16.msra.mxu1 %v6152_v56 }
 0x63d   :  { %1189 = vmatprep.subr.bf16.mxu0 %v6428_v34  ;;  %1230 = vmatprep.subr.bf16.mxu1 %v6431_v37 }
 0x6f2   :  { %v923_v38 = vpop.f32.mrb[24].mxu0  ;;  %v964_v39 = vpop.f32.mrb[24].mxu1 }
 0x6f3   :  { %v971_v41 = vadd.f32 %v923_v38, %v6247_v53  ;;  %v973_v42 = vadd.f32 %v964_v39, %v6275_v18  ;;  %v925_v43 = vpop.f32.mrb[25].mxu0  ;;  %v966_v44 = vpop.f32.mrb[25].mxu1 }
 0x6f4   :  { %v972_v48 = vadd.f32 %v925_v43, %v7881_v47  ;;  %v974_v50 = vadd.f32 %v966_v44, %v7882_v49  ;;  %v927_v51 = vpop.f32.mrb[26].mxu0  ;;  %v968_v52 = vpop.f32.mrb[26].mxu1  ;;  %v6472_v43 = vld [vmem:[#allocation6 + $0x60] ss:$16 sps:$4 sm:$0xff]   ;;  %v6476_v44 = vld [vmem:[#allocation6 + $0x84] ss:$16 sps:$4 sm:$0xff]  }
 0x6f5   :  { %v928_v54 = vpop.f32.mrb[27].mxu0  ;;  %v969_v55 = vpop.f32.mrb[27].mxu1  ;;  %v975_v53 = vmul.f32 0.5, %v971_v41  ;;  %v984_v18 = vmul.f32 0.5, %v973_v42  ;;  %v6468_v42 = vld [vmem:[#allocation6 + $0x64] ss:$16 sps:$4 sm:$0xff]  }
 0x6f6   :  { %5317 = vtanh.f32 %v972_v48  ;;  %v976_v58 = vmul.f32 0.5, %v972_v48  ;;  %v6479_v47 = vld [vmem:[#allocation6 + $0x8c] ss:$16 sps:$4 sm:$0xff]   ;;  %v6482_v48 = vld [vmem:[#allocation6 + $0x80] ss:$16 sps:$4 sm:$0xff]  }
 0x6f7   :  { %5319 = vtanh.f32 %v974_v50  ;;  %v6485_v49 = vld [vmem:[#allocation6 + $0x88] ss:$16 sps:$4 sm:$0xff]   ;;  %v6491_v51 = vld [vmem:[#allocation6 + $0xac] ss:$16 sps:$4 sm:$0xff]   ;;  %v6494_v52 = vld [vmem:[#allocation6 + $0xa0] ss:$16 sps:$4 sm:$0xff]  }
 0x6f8   :  { %5321 = vtanh.f32 %v975_v53  ;;  %v6497_v54 = vld [vmem:[#allocation6 + $0xa8] ss:$16 sps:$4 sm:$0xff]   ;;  %v6500_v55 = vld [vmem:[#allocation6 + $0xc4] ss:$16 sps:$4 sm:$0xff]  }
 0x6f9   :  { %5323 = vtanh.f32 %v984_v18  ;;  %v6509_v53 = vld [vmem:[#allocation6 + $0xc8] ss:$16 sps:$4 sm:$0xff]   ;;  %v6512_v18 = vld [vmem:[#allocation6 + $0xec] ss:$16 sps:$4 sm:$0xff]  }
 0x700   :  { %v5318_v56 = vpop.eup %5317 }
 0x701   :  { %995 = vrot.lane.b32.xlu1 %v5318_v56, %s5805_s5  ;;  %v5320_v57 = vpop.eup %5319  ;;  %v6503_v56 = vld [vmem:[#allocation6 + $0xcc] ss:$16 sps:$4 sm:$0xff]  }
 0x702   :  { %1012 = vrot.lane.b32.xlu0 %v5320_v57, %s5805_s5  ;;  %v5322_v13 = vpop.eup %5321  ;;  %v6506_v57 = vld [vmem:[#allocation6 + $0xc0] ss:$16 sps:$4 sm:$0xff]  }
 0x703   :  { %v979_v63 = vmul.f32 0.5, %v5322_v13  ;;  %v5324_v46 = vpop.eup %5323  ;;  %v6515_v13 = vld [vmem:[#allocation6 + $0xe4] ss:$16 sps:$4 sm:$0xff]  }
 0x704   :  { %v988_v45 = vmul.f32 0.5, %v5324_v46  ;;  %v6521_v46 = vld [vmem:[#allocation6 + $0xe8] ss:$16 sps:$4 sm:$0xff]  }
 0x705   :  { %v981_v29 = vadd.f32 0.5, %v979_v63  ;;  %v6518_v63 = vld [vmem:[#allocation6 + $0xe0] ss:$16 sps:$4 sm:$0xff]  }
 0x706   :  { %v990_v5 = vadd.f32 0.5, %v988_v45  ;;  %v7883_v45 = vld [vmem:[#allocation35_spill] sm:$0xff] }
 0x707   :  { %v993_v7 = vmul.f32 %v981_v29, %v6359_v3  ;;  %v985_v3 = vmul.f32 0.5, %v974_v50  ;;  %v6488_v50 = vld [vmem:[#allocation6 + $0xa4] ss:$16 sps:$4 sm:$0xff]  }
 0x708   :  { %v1010_v15 = vmul.f32 %v990_v5, %v6363_v10 }
 0x773   :  { %v996_v1 = vpop.permute.xlu1 %995 }
 0x774   :  { %v998_v36 = vmul.f32 %v996_v1, %v981_v29  ;;  %v1013_v2 = vpop.permute.xlu0 %1012 }
 0x775   :  { %v1015_v4 = vmul.f32 %v1013_v2, %v990_v5  ;;  %v7884_v5 = vld [vmem:[#allocation38_spill] sm:$0xff] }
 0x776   :  { %1000 = vrot.lane.b32.xlu1 %v998_v36, %s5805_s5 }
 0x777   :  { %1017 = vrot.lane.b32.xlu0 %v1015_v4, %s5805_s5 }
 0x7e8   :  { %v1001_v14 = vpop.permute.xlu1 %1000 }
 0x7e9   :  { %v6443_v62 = vadd.f32 %v1001_v14, %v993_v7  ;;  %v1018_v16 = vpop.permute.xlu0 %1017  ;;  %v7885_v14 = vld [vmem:[#allocation37_spill] sm:$0xff] }
 0x7ea   :  { %v6447_v25 = vadd.f32 %v1018_v16, %v1010_v15  ;;  %v7886_v16 = vld [vmem:[#allocation40_spill] sm:$0xff] }
 0x7eb   :  { %5325 = vtanh.f32 %v6443_v62 }
 0x7ec   :  { %5327 = vtanh.f32 %v6447_v25 }
 0x7ed   :  { %5329 = vtanh.f32 %v976_v58 }
 0x7ee   :  { %5331 = vtanh.f32 %v985_v3 }
 0x7f5   :  { %v5326_v60 = vpop.eup %5325 }
 0x7f6   :  { %1006 = vrot.lane.b32.xlu1 %v5326_v60, %s5805_s5  ;;  %v5328_v11 = vpop.eup %5327 }
 0x7f7   :  { %1023 = vrot.lane.b32.xlu0 %v5328_v11, %s5805_s5  ;;  %v5330_v8 = vpop.eup %5329 }
 0x7f8   :  { %v980_v9 = vmul.f32 0.5, %v5330_v8  ;;  %v5332_v19 = vpop.eup %5331 }
 0x7f9   :  { %v989_v21 = vmul.f32 0.5, %v5332_v19 }
 0x7fa   :  { %v982_v20 = vadd.f32 0.5, %v980_v9 }
 0x7fb   :  { %v991_v23 = vadd.f32 0.5, %v989_v21 }
 0x868   :  { %v1007_v10 = vpop.permute.xlu1 %1006 }
 0x869   :  { %v1009_v22 = vmul.f32 %v1007_v10, %v982_v20  ;;  %v1024_v26 = vpop.permute.xlu0 %1023 }
 0x86a   :  { %v1026_v27 = vmul.f32 %v1024_v26, %v991_v23 }
 0x86b   :  { %1027 = vst.msk [vmem:[#allocation3 + $0x10] sm:$0xff] %vm725_vm3, %v1009_v22 }
 0x86c   :  { %1029 = vrot.lane.b32.xlu0 %v1026_v27, %s5805_s5 }
 0x8de   :  { %v1030_v38 = vpop.permute.xlu0 %1029 }
 0x8df   :  { %1032 = vst.msk [vmem:[#allocation3 + $0x28] sm:$0xff] %vm731_vm4, %v1030_v38  ;;  %v1037_v39 = vsel %vm725_vm3, %v1009_v22, %v1030_v38 }
 0x8e0   :  { %v1038_v41 = vpack.c.bf16 %v1037_v39, %v1037_v39 }
 0x8e2   :  { %1072 = vmatmul.mubr.bf16.vlgmr.msra.gmra.mrb[28].mxu0 %v1038_v41  ;;  %1113 = vmatmul.mubr.bf16.vlgmr.msra.gmra.mrb[28].mxu1 %v1038_v41 }
 0x8e3   :  { %1190 = vmatpush1.bf16.msra.mxu0 %v6372_v28  ;;  %1231 = vmatpush1.bf16.msra.mxu1 %v6375_v30 }
 0x8e4   :  { %1191 = vmatprep.subr.bf16.mxu0 %v6378_v31  ;;  %1232 = vmatprep.subr.bf16.mxu1 %v6381_v32 }
 0x8e5   :  { %1221 = vmatprep.mubr.bf16.mxu0 %v7880_v40  ;;  %1262 = vmatprep.mubr.bf16.mxu1 %v7880_v40 }
 0x8e7   :  { %1192 = vmatpush1.bf16.msra.mxu0 %v6386_v33  ;;  %1233 = vmatpush1.bf16.msra.mxu1 %v6389_v17 }
 0x8e8   :  { %1193 = vmatprep.subr.bf16.mxu0 %v6392_v12  ;;  %1234 = vmatprep.subr.bf16.mxu1 %v6395_v24 }
 0x8eb   :  { %1194 = vmatpush1.bf16.msra.mxu0 %v6398_v59  ;;  %1235 = vmatpush1.bf16.msra.mxu1 %v6401_v6 }
 0x8ec   :  { %1195 = vmatprep.subr.bf16.mxu0 %v6468_v42  ;;  %1236 = vmatprep.subr.bf16.mxu1 %v6405_v35 }
 0x8ef   :  { %1196 = vmatpush1.bf16.msra.mxu0 %v6472_v43  ;;  %1237 = vmatpush1.bf16.msra.mxu1 %v6409_v61 }
 0x8f0   :  { %1197 = vmatprep.subr.bf16.mxu0 %v6476_v44  ;;  %1238 = vmatprep.subr.bf16.mxu1 %v6479_v47 }
 0x8f3   :  { %1198 = vmatpush1.bf16.msra.mxu0 %v6482_v48  ;;  %1239 = vmatpush1.bf16.msra.mxu1 %v6485_v49 }
 0x8f4   :  { %1199 = vmatprep.subr.bf16.mxu0 %v6488_v50  ;;  %1240 = vmatprep.subr.bf16.mxu1 %v6491_v51 }
 0x8f7   :  { %1200 = vmatpush1.bf16.msra.mxu0 %v6494_v52  ;;  %1241 = vmatpush1.bf16.msra.mxu1 %v6497_v54 }
 0x8f8   :  { %1201 = vmatprep.subr.bf16.mxu0 %v6500_v55  ;;  %1242 = vmatprep.subr.bf16.mxu1 %v6503_v56 }
 0x8fb   :  { %1202 = vmatpush1.bf16.msra.mxu0 %v6506_v57  ;;  %1243 = vmatpush1.bf16.msra.mxu1 %v6509_v53 }
 0x8fc   :  { %1244 = vmatprep.subr.bf16.mxu1 %v6512_v18  ;;  %1203 = vmatprep.subr.bf16.mxu0 %v6515_v13 }
 0x8ff   :  { %1204 = vmatpush1.bf16.msra.mxu0 %v6518_v63  ;;  %1245 = vmatpush1.bf16.msra.mxu1 %v6521_v46 }
 0x900   :  { %1339 = vmatprep.subr.bf16.mxu0 %v6428_v34  ;;  %1380 = vmatprep.subr.bf16.mxu1 %v6431_v37 }
 0x9b5   :  { %v1073_v29 = vpop.f32.mrb[28].mxu0  ;;  %v1114_v1 = vpop.f32.mrb[28].mxu1 }
 0x9b6   :  { %v1121_v36 = vadd.f32 %v1073_v29, %v7883_v45  ;;  %v1123_v2 = vadd.f32 %v1114_v1, %v7884_v5  ;;  %v1075_v4 = vpop.f32.mrb[29].mxu0  ;;  %v1116_v7 = vpop.f32.mrb[29].mxu1 }
 0x9b7   :  { %v1122_v15 = vadd.f32 %v1075_v4, %v7885_v14  ;;  %v1124_v60 = vadd.f32 %v1116_v7, %v7886_v16  ;;  %v1077_v11 = vpop.f32.mrb[30].mxu0  ;;  %v1118_v58 = vpop.f32.mrb[30].mxu1 }
 0x9b8   :  { %v1078_v3 = vpop.f32.mrb[31].mxu0  ;;  %v1119_v8 = vpop.f32.mrb[31].mxu1  ;;  %v1125_v20 = vmul.f32 0.5, %v1121_v36  ;;  %v1134_v10 = vmul.f32 0.5, %v1123_v2 }
 0x9b9   :  { %5333 = vtanh.f32 %v1122_v15  ;;  %v1126_v11 = vmul.f32 0.5, %v1122_v15 }
 0x9ba   :  { %5335 = vtanh.f32 %v1124_v60 }
 0x9bb   :  { %5337 = vtanh.f32 %v1125_v20 }
 0x9bc   :  { %5339 = vtanh.f32 %v1134_v10 }
 0x9c3   :  { %v5334_v9 = vpop.eup %5333 }
 0x9c4   :  { %1145 = vrot.lane.b32.xlu0 %v5334_v9, %s5805_s5  ;;  %v5336_v19 = vpop.eup %5335 }
 0x9c5   :  { %1162 = vrot.lane.b32.xlu1 %v5336_v19, %s5805_s5  ;;  %v5338_v21 = vpop.eup %5337 }
 0x9c6   :  { %v1129_v22 = vmul.f32 0.5, %v5338_v21  ;;  %v5340_v23 = vpop.eup %5339 }
 0x9c7   :  { %v1138_v38 = vmul.f32 0.5, %v5340_v23 }
 0x9c8   :  { %v1131_v26 = vadd.f32 0.5, %v1129_v22 }
 0x9c9   :  { %v1140_v41 = vadd.f32 0.5, %v1138_v38  ;;  %v7887_v38 = vld [vmem:[#allocation39_spill] sm:$0xff] }
 0x9ca   :  { %v1143_v45 = vmul.f32 %v1131_v26, %v6443_v62  ;;  %v1135_v62 = vmul.f32 0.5, %v1124_v60 }
 0x9cb   :  { %v1160_v2 = vmul.f32 %v1140_v41, %v6447_v25 }
 0xa36   :  { %v1146_v27 = vpop.permute.xlu0 %1145 }
 0xa37   :  { %v1148_v39 = vmul.f32 %v1146_v27, %v1131_v26  ;;  %v1163_v29 = vpop.permute.xlu1 %1162 }
 0xa38   :  { %v1165_v1 = vmul.f32 %v1163_v29, %v1140_v41  ;;  %v7888_v41 = vld [vmem:[#allocation34_spill] sm:$0xff] }
 0xa39   :  { %1150 = vrot.lane.b32.xlu0 %v1148_v39, %s5805_s5 }
 0xa3a   :  { %1167 = vrot.lane.b32.xlu1 %v1165_v1, %s5805_s5 }
 0xaab   :  { %v1151_v36 = vpop.permute.xlu0 %1150 }
 0xaac   :  { %v6535_v5 = vadd.f32 %v1151_v36, %v1143_v45  ;;  %v1168_v4 = vpop.permute.xlu1 %1167  ;;  %v7889_v36 = vld [vmem:[#allocation41_spill] sm:$0xff] }
 0xaad   :  { %v6539_v7 = vadd.f32 %v1168_v4, %v1160_v2  ;;  %v7890_v4 = vld [vmem:[#allocation36_spill] sm:$0xff] }
 0xaae   :  { %5341 = vtanh.f32 %v6535_v5 }
 0xaaf   :  { %5343 = vtanh.f32 %v6539_v7 }
 0xab0   :  { %5345 = vtanh.f32 %v1126_v11 }
 0xab1   :  { %5347 = vtanh.f32 %v1135_v62 }
 0xab8   :  { %v5342_v14 = vpop.eup %5341 }
 0xab9   :  { %1156 = vrot.lane.b32.xlu0 %v5342_v14, %s5805_s5  ;;  %v5344_v16 = vpop.eup %5343 }
 0xaba   :  { %1173 = vrot.lane.b32.xlu1 %v5344_v16, %s5805_s5  ;;  %v5346_v58 = vpop.eup %5345 }
 0xabb   :  { %v1130_v3 = vmul.f32 0.5, %v5346_v58  ;;  %v5348_v8 = vpop.eup %5347 }
 0xabc   :  { %v1139_v19 = vmul.f32 0.5, %v5348_v8 }
 0xabd   :  { %v1132_v9 = vadd.f32 0.5, %v1130_v3 }
 0xabe   :  { %v1141_v10 = vadd.f32 0.5, %v1139_v19 }
 0xb2b   :  { %v1157_v25 = vpop.permute.xlu0 %1156 }
 0xb2c   :  { %v1159_v20 = vmul.f32 %v1157_v25, %v1132_v9  ;;  %v1174_v21 = vpop.permute.xlu1 %1173 }
 0xb2d   :  { %v1176_v22 = vmul.f32 %v1174_v21, %v1141_v10 }
 0xb2e   :  { %1177 = vst.msk [vmem:[#allocation3 + $0x18] sm:$0xff] %vm725_vm3, %v1159_v20 }
 0xb2f   :  { %1179 = vrot.lane.b32.xlu1 %v1176_v22, %s5805_s5 }
 0xba1   :  { %v1180_v23 = vpop.permute.xlu1 %1179 }
 0xba2   :  { %1182 = vst.msk [vmem:[#allocation3 + $0x20] sm:$0xff] %vm731_vm4, %v1180_v23  ;;  %v1187_v15 = vsel %vm725_vm3, %v1159_v20, %v1180_v23 }
 0xba3   :  { %v1188_v60 = vpack.c.bf16 %v1187_v15, %v1187_v15 }
 0xba5   :  { %1222 = vmatmul.mubr.bf16.vlgmr.msra.gmra.mrb[32].mxu0 %v1188_v60  ;;  %1263 = vmatmul.mubr.bf16.vlgmr.msra.gmra.mrb[32].mxu1 %v1188_v60 }
 0xba6   :  { %1340 = vmatpush1.bf16.msra.mxu0 %v6372_v28  ;;  %1381 = vmatpush1.bf16.msra.mxu1 %v6375_v30 }
 0xba7   :  { %1341 = vmatprep.subr.bf16.mxu0 %v6378_v31  ;;  %1382 = vmatprep.subr.bf16.mxu1 %v6381_v32 }
 0xba8   :  { %1371 = vmatprep.mubr.bf16.mxu0 %v7880_v40  ;;  %1412 = vmatprep.mubr.bf16.mxu1 %v7880_v40 }
 0xbaa   :  { %1342 = vmatpush1.bf16.msra.mxu0 %v6386_v33  ;;  %1383 = vmatpush1.bf16.msra.mxu1 %v6389_v17 }
 0xbab   :  { %1343 = vmatprep.subr.bf16.mxu0 %v6392_v12  ;;  %1384 = vmatprep.subr.bf16.mxu1 %v6395_v24 }
 0xbae   :  { %1344 = vmatpush1.bf16.msra.mxu0 %v6398_v59  ;;  %1385 = vmatpush1.bf16.msra.mxu1 %v6401_v6 }
 0xbaf   :  { %1345 = vmatprep.subr.bf16.mxu0 %v6468_v42  ;;  %1386 = vmatprep.subr.bf16.mxu1 %v6405_v35 }
 0xbb2   :  { %1346 = vmatpush1.bf16.msra.mxu0 %v6472_v43  ;;  %1387 = vmatpush1.bf16.msra.mxu1 %v6409_v61 }
 0xbb3   :  { %1347 = vmatprep.subr.bf16.mxu0 %v6476_v44  ;;  %1388 = vmatprep.subr.bf16.mxu1 %v6479_v47 }
 0xbb6   :  { %1348 = vmatpush1.bf16.msra.mxu0 %v6482_v48  ;;  %1389 = vmatpush1.bf16.msra.mxu1 %v6485_v49 }
 0xbb7   :  { %1349 = vmatprep.subr.bf16.mxu0 %v6488_v50  ;;  %1390 = vmatprep.subr.bf16.mxu1 %v6491_v51 }
 0xbba   :  { %1350 = vmatpush1.bf16.msra.mxu0 %v6494_v52  ;;  %1391 = vmatpush1.bf16.msra.mxu1 %v6497_v54 }
 0xbbb   :  { %1351 = vmatprep.subr.bf16.mxu0 %v6500_v55  ;;  %1392 = vmatprep.subr.bf16.mxu1 %v6503_v56 }
 0xbbe   :  { %1352 = vmatpush1.bf16.msra.mxu0 %v6506_v57  ;;  %1393 = vmatpush1.bf16.msra.mxu1 %v6509_v53 }
 0xbbf   :  { %1394 = vmatprep.subr.bf16.mxu1 %v6512_v18  ;;  %1353 = vmatprep.subr.bf16.mxu0 %v6515_v13 }
 0xbc2   :  { %1354 = vmatpush1.bf16.msra.mxu0 %v6518_v63  ;;  %1395 = vmatpush1.bf16.msra.mxu1 %v6521_v46 }
 0xbc3   :  { %1489 = vmatprep.subr.bf16.mxu0 %v6428_v34  ;;  %1530 = vmatprep.subr.bf16.mxu1 %v6431_v37 }
 0xc78   :  { %v1223_v26 = vpop.f32.mrb[32].mxu0  ;;  %v1264_v27 = vpop.f32.mrb[32].mxu1 }
 0xc79   :  { %v1271_v39 = vadd.f32 %v1223_v26, %v7887_v38  ;;  %v1273_v29 = vadd.f32 %v1264_v27, %v7888_v41  ;;  %v1225_v1 = vpop.f32.mrb[33].mxu0  ;;  %v1266_v45 = vpop.f32.mrb[33].mxu1 }
 0xc7a   :  { %v1272_v2 = vadd.f32 %v1225_v1, %v7889_v36  ;;  %v1274_v14 = vadd.f32 %v1266_v45, %v7890_v4  ;;  %v1227_v16 = vpop.f32.mrb[34].mxu0  ;;  %v1268_v11 = vpop.f32.mrb[34].mxu1 }
 0xc7b   :  { %v1228_v62 = vpop.f32.mrb[35].mxu0  ;;  %v1269_v58 = vpop.f32.mrb[35].mxu1  ;;  %v1275_v9 = vmul.f32 0.5, %v1271_v39  ;;  %v1284_v25 = vmul.f32 0.5, %v1273_v29 }
 0xc7c   :  { %5349 = vtanh.f32 %v1272_v2  ;;  %v1276_v16 = vmul.f32 0.5, %v1272_v2 }
 0xc7d   :  { %5351 = vtanh.f32 %v1274_v14 }
 0xc7e   :  { %5353 = vtanh.f32 %v1275_v9 }
 0xc7f   :  { %5355 = vtanh.f32 %v1284_v25 }
 0xc86   :  { %v5350_v3 = vpop.eup %5349 }
 0xc87   :  { %1295 = vrot.lane.b32.xlu1 %v5350_v3, %s5805_s5  ;;  %v5352_v8 = vpop.eup %5351 }
 0xc88   :  { %1312 = vrot.lane.b32.xlu0 %v5352_v8, %s5805_s5  ;;  %v5354_v19 = vpop.eup %5353 }
 0xc89   :  { %v1279_v20 = vmul.f32 0.5, %v5354_v19  ;;  %v5356_v10 = vpop.eup %5355 }
 0xc8a   :  { %v1288_v23 = vmul.f32 0.5, %v5356_v10 }
 0xc8b   :  { %v1281_v21 = vadd.f32 0.5, %v1279_v20 }
 0xc8c   :  { %v1290_v60 = vadd.f32 0.5, %v1288_v23  ;;  %v7891_v23 = vld [vmem:[#allocation42_spill] sm:$0xff] }
 0xc8d   :  { %v1293_v38 = vmul.f32 %v1281_v21, %v6535_v5  ;;  %v1285_v5 = vmul.f32 0.5, %v1274_v14 }
 0xc8e   :  { %v1310_v29 = vmul.f32 %v1290_v60, %v6539_v7 }
 0xcf9   :  { %v1296_v22 = vpop.permute.xlu1 %1295 }
 0xcfa   :  { %v1298_v15 = vmul.f32 %v1296_v22, %v1281_v21  ;;  %v1313_v26 = vpop.permute.xlu0 %1312 }
 0xcfb   :  { %v1315_v27 = vmul.f32 %v1313_v26, %v1290_v60  ;;  %v7892_v60 = vld [vmem:[#allocation31_spill] sm:$0xff] }
 0xcfc   :  { %1300 = vrot.lane.b32.xlu1 %v1298_v15, %s5805_s5 }
 0xcfd   :  { %1317 = vrot.lane.b32.xlu0 %v1315_v27, %s5805_s5 }
 0xd6e   :  { %v1301_v39 = vpop.permute.xlu1 %1300 }
 0xd6f   :  { %v6591_v41 = vadd.f32 %v1301_v39, %v1293_v38  ;;  %v1318_v1 = vpop.permute.xlu0 %1317  ;;  %v7893_v39 = vld [vmem:[#allocation44_spill] sm:$0xff] }
 0xd70   :  { %v6595_v45 = vadd.f32 %v1318_v1, %v1310_v29  ;;  %v7894_v1 = vld [vmem:[#allocation32_spill] sm:$0xff] }
 0xd71   :  { %5357 = vtanh.f32 %v6591_v41 }
 0xd72   :  { %5359 = vtanh.f32 %v6595_v45 }
 0xd73   :  { %5361 = vtanh.f32 %v1276_v16 }
 0xd74   :  { %5363 = vtanh.f32 %v1285_v5 }
 0xd7b   :  { %v5358_v36 = vpop.eup %5357 }
 0xd7c   :  { %1306 = vrot.lane.b32.xlu1 %v5358_v36, %s5805_s5  ;;  %v5360_v4 = vpop.eup %5359 }
 0xd7d   :  { %1323 = vrot.lane.b32.xlu0 %v5360_v4, %s5805_s5  ;;  %v5362_v11 = vpop.eup %5361 }
 0xd7e   :  { %v1280_v62 = vmul.f32 0.5, %v5362_v11  ;;  %v5364_v58 = vpop.eup %5363 }
 0xd7f   :  { %v1289_v8 = vmul.f32 0.5, %v5364_v58 }
 0xd80   :  { %v1282_v3 = vadd.f32 0.5, %v1280_v62 }
 0xd81   :  { %v1291_v25 = vadd.f32 0.5, %v1289_v8 }
 0xdee   :  { %v1307_v7 = vpop.permute.xlu1 %1306 }
 0xdef   :  { %v1309_v9 = vmul.f32 %v1307_v7, %v1282_v3  ;;  %v1324_v19 = vpop.permute.xlu0 %1323 }
 0xdf0   :  { %v1326_v20 = vmul.f32 %v1324_v19, %v1291_v25 }
 0xdf1   :  { %1327 = vst.msk [vmem:[#allocation3 + $0x20] sm:$0xff] %vm725_vm3, %v1309_v9 }
 0xdf2   :  { %1329 = vrot.lane.b32.xlu0 %v1326_v20, %s5805_s5 }
 0xe64   :  { %v1330_v10 = vpop.permute.xlu0 %1329 }
 0xe65   :  { %1332 = vst.msk [vmem:[#allocation3 + $0x18] sm:$0xff] %vm731_vm4, %v1330_v10  ;;  %v1337_v2 = vsel %vm725_vm3, %v1309_v9, %v1330_v10 }
 0xe66   :  { %v1338_v14 = vpack.c.bf16 %v1337_v2, %v1337_v2 }
 0xe68   :  { %1372 = vmatmul.mubr.bf16.vlgmr.msra.gmra.mrb[36].mxu0 %v1338_v14  ;;  %1413 = vmatmul.mubr.bf16.vlgmr.msra.gmra.mrb[36].mxu1 %v1338_v14 }
 0xe69   :  { %1490 = vmatpush1.bf16.msra.mxu0 %v6372_v28  ;;  %1531 = vmatpush1.bf16.msra.mxu1 %v6375_v30 }
 0xe6a   :  { %1491 = vmatprep.subr.bf16.mxu0 %v6378_v31  ;;  %1532 = vmatprep.subr.bf16.mxu1 %v6381_v32 }
 0xe6b   :  { %1521 = vmatprep.mubr.bf16.mxu0 %v7880_v40  ;;  %1562 = vmatprep.mubr.bf16.mxu1 %v7880_v40 }
 0xe6d   :  { %1492 = vmatpush1.bf16.msra.mxu0 %v6386_v33  ;;  %1533 = vmatpush1.bf16.msra.mxu1 %v6389_v17 }
 0xe6e   :  { %1493 = vmatprep.subr.bf16.mxu0 %v6392_v12  ;;  %1534 = vmatprep.subr.bf16.mxu1 %v6395_v24 }
 0xe71   :  { %1494 = vmatpush1.bf16.msra.mxu0 %v6398_v59  ;;  %1535 = vmatpush1.bf16.msra.mxu1 %v6401_v6 }
 0xe72   :  { %1495 = vmatprep.subr.bf16.mxu0 %v6468_v42  ;;  %1536 = vmatprep.subr.bf16.mxu1 %v6405_v35 }
 0xe75   :  { %1496 = vmatpush1.bf16.msra.mxu0 %v6472_v43  ;;  %1537 = vmatpush1.bf16.msra.mxu1 %v6409_v61 }
 0xe76   :  { %1497 = vmatprep.subr.bf16.mxu0 %v6476_v44  ;;  %1538 = vmatprep.subr.bf16.mxu1 %v6479_v47 }
 0xe79   :  { %1498 = vmatpush1.bf16.msra.mxu0 %v6482_v48  ;;  %1539 = vmatpush1.bf16.msra.mxu1 %v6485_v49 }
 0xe7a   :  { %1499 = vmatprep.subr.bf16.mxu0 %v6488_v50  ;;  %1540 = vmatprep.subr.bf16.mxu1 %v6491_v51 }
 0xe7d   :  { %1500 = vmatpush1.bf16.msra.mxu0 %v6494_v52  ;;  %1541 = vmatpush1.bf16.msra.mxu1 %v6497_v54 }
 0xe7e   :  { %1501 = vmatprep.subr.bf16.mxu0 %v6500_v55  ;;  %1542 = vmatprep.subr.bf16.mxu1 %v6503_v56 }
 0xe81   :  { %1502 = vmatpush1.bf16.msra.mxu0 %v6506_v57  ;;  %1543 = vmatpush1.bf16.msra.mxu1 %v6509_v53 }
 0xe82   :  { %1544 = vmatprep.subr.bf16.mxu1 %v6512_v18  ;;  %1503 = vmatprep.subr.bf16.mxu0 %v6515_v13 }
 0xe85   :  { %1504 = vmatpush1.bf16.msra.mxu0 %v6518_v63  ;;  %1545 = vmatpush1.bf16.msra.mxu1 %v6521_v46 }
 0xe86   :  { %1639 = vmatprep.subr.bf16.mxu0 %v6428_v34  ;;  %1680 = vmatprep.subr.bf16.mxu1 %v6431_v37 }
 0xf3b   :  { %v1373_v21 = vpop.f32.mrb[36].mxu0  ;;  %v1414_v22 = vpop.f32.mrb[36].mxu1 }
 0xf3c   :  { %v1421_v15 = vadd.f32 %v1373_v21, %v7891_v23  ;;  %v1423_v26 = vadd.f32 %v1414_v22, %v7892_v60  ;;  %v1375_v27 = vpop.f32.mrb[37].mxu0  ;;  %v1416_v38 = vpop.f32.mrb[37].mxu1 }
 0xf3d   :  { %v1422_v29 = vadd.f32 %v1375_v27, %v7893_v39  ;;  %v1424_v36 = vadd.f32 %v1416_v38, %v7894_v1  ;;  %v1377_v4 = vpop.f32.mrb[38].mxu0  ;;  %v1418_v16 = vpop.f32.mrb[38].mxu1 }
 0xf3e   :  { %v1378_v5 = vpop.f32.mrb[39].mxu0  ;;  %v1419_v11 = vpop.f32.mrb[39].mxu1  ;;  %v1425_v62 = vmul.f32 0.5, %v1421_v15  ;;  %v1434_v58 = vmul.f32 0.5, %v1423_v26 }
 0xf3f   :  { %5365 = vtanh.f32 %v1422_v29  ;;  %v1426_v39 = vmul.f32 0.5, %v1422_v29 }
 0xf40   :  { %5367 = vtanh.f32 %v1424_v36 }
 0xf41   :  { %5369 = vtanh.f32 %v1425_v62 }
 0xf42   :  { %5371 = vtanh.f32 %v1434_v58 }
 0xf49   :  { %v5366_v34 = vpop.eup %5365 }
 0xf4a   :  { %1445 = vrot.lane.b32.xlu0 %v5366_v34, %s5805_s5  ;;  %v5368_v37 = vpop.eup %5367 }
 0xf4b   :  { %1462 = vrot.lane.b32.xlu1 %v5368_v37, %s5805_s5  ;;  %v5370_v3 = vpop.eup %5369 }
 0xf4c   :  { %v1429_v7 = vmul.f32 0.5, %v5370_v3  ;;  %v5372_v8 = vpop.eup %5371 }
 0xf4d   :  { %v1438_v19 = vmul.f32 0.5, %v5372_v8 }
 0xf4e   :  { %v1431_v9 = vadd.f32 0.5, %v1429_v7 }
 0xf4f   :  { %v1440_v10 = vadd.f32 0.5, %v1438_v19 }
 0xf50   :  { %v1443_v21 = vmul.f32 %v1431_v9, %v6591_v41  ;;  %v1435_v41 = vmul.f32 0.5, %v1424_v36 }
 0xf51   :  { %v1460_v15 = vmul.f32 %v1440_v10, %v6595_v45 }
 0xfbc   :  { %v1446_v25 = vpop.permute.xlu0 %1445 }
 0xfbd   :  { %v1448_v20 = vmul.f32 %v1446_v25, %v1431_v9  ;;  %v1463_v2 = vpop.permute.xlu1 %1462 }
 0xfbe   :  { %v1465_v14 = vmul.f32 %v1463_v2, %v1440_v10 }
 0xfbf   :  { %1450 = vrot.lane.b32.xlu0 %v1448_v20, %s5805_s5 }
 0xfc0   :  { %1467 = vrot.lane.b32.xlu1 %v1465_v14, %s5805_s5 }
0x1031   :  { %v1451_v22 = vpop.permute.xlu0 %1450 }
0x1032   :  { %v6647_v23 = vadd.f32 %v1451_v22, %v1443_v21  ;;  %v1468_v60 = vpop.permute.xlu1 %1467 }
0x1033   :  { %v6651_v26 = vadd.f32 %v1468_v60, %v1460_v15 }
0x1034   :  { %5373 = vtanh.f32 %v6647_v23 }
0x1035   :  { %5375 = vtanh.f32 %v6651_v26 }
0x1036   :  { %5377 = vtanh.f32 %v1426_v39 }
0x1037   :  { %5379 = vtanh.f32 %v1435_v41 }
0x103e   :  { %v5374_v27 = vpop.eup %5373 }
0x103f   :  { %1456 = vrot.lane.b32.xlu0 %v5374_v27, %s5805_s5  ;;  %v5376_v38 = vpop.eup %5375 }
0x1040   :  { %1473 = vrot.lane.b32.xlu1 %v5376_v38, %s5805_s5  ;;  %v5378_v1 = vpop.eup %5377 }
0x1041   :  { %v1430_v4 = vmul.f32 0.5, %v5378_v1  ;;  %v5380_v16 = vpop.eup %5379 }
0x1042   :  { %v1439_v11 = vmul.f32 0.5, %v5380_v16 }
0x1043   :  { %v1432_v5 = vadd.f32 0.5, %v1430_v4 }
0x1044   :  { %v1441_v37 = vadd.f32 0.5, %v1439_v11 }
0x10b1   :  { %v1457_v45 = vpop.permute.xlu0 %1456 }
0x10b2   :  { %v1459_v34 = vmul.f32 %v1457_v45, %v1432_v5  ;;  %v1474_v62 = vpop.permute.xlu1 %1473 }
0x10b3   :  { %v1476_v58 = vmul.f32 %v1474_v62, %v1441_v37  ;;  %v7900_v62 = vld [vmem:[#allocation27_spill] sm:$0xff] }
0x10b4   :  { %1477 = vst.msk [vmem:[#allocation3 + $0x28] sm:$0xff] %vm725_vm3, %v1459_v34 }
0x10b5   :  { %1479 = vrot.lane.b32.xlu1 %v1476_v58, %s5805_s5 }
0x1127   :  { %v1480_v3 = vpop.permute.xlu1 %1479 }
0x1128   :  { %1482 = vst.msk [vmem:[#allocation3 + $0x10] sm:$0xff] %vm731_vm4, %v1480_v3  ;;  %v1487_v29 = vsel %vm725_vm3, %v1459_v34, %v1480_v3  ;;  %v7899_v34 = vld [vmem:[#allocation47_spill] sm:$0xff] }
0x1129   :  { %v1488_v36 = vpack.c.bf16 %v1487_v29, %v1487_v29 }
0x112b   :  { %1522 = vmatmul.mubr.bf16.vlgmr.msra.gmra.mrb[40].mxu0 %v1488_v36  ;;  %1563 = vmatmul.mubr.bf16.vlgmr.msra.gmra.mrb[40].mxu1 %v1488_v36 }
0x112c   :  { %1640 = vmatpush1.bf16.msra.mxu0 %v6372_v28  ;;  %1681 = vmatpush1.bf16.msra.mxu1 %v6375_v30 }
0x112d   :  { %1641 = vmatprep.subr.bf16.mxu0 %v6378_v31  ;;  %1682 = vmatprep.subr.bf16.mxu1 %v6381_v32  ;;  %v7895_v31 = vld [vmem:[#allocation45_spill] sm:$0xff] }
0x112e   :  { %1671 = vmatprep.mubr.bf16.mxu0 %v7880_v40  ;;  %1712 = vmatprep.mubr.bf16.mxu1 %v7880_v40 }
0x1130   :  { %1642 = vmatpush1.bf16.msra.mxu0 %v6386_v33  ;;  %1683 = vmatpush1.bf16.msra.mxu1 %v6389_v17  ;;  %v7896_v33 = vld [vmem:[#allocation29_spill] sm:$0xff] }
0x1131   :  { %1643 = vmatprep.subr.bf16.mxu0 %v6392_v12  ;;  %1684 = vmatprep.subr.bf16.mxu1 %v6395_v24 }
0x1134   :  { %1644 = vmatpush1.bf16.msra.mxu0 %v6398_v59  ;;  %1685 = vmatpush1.bf16.msra.mxu1 %v6401_v6  ;;  %v7897_v59 = vld [vmem:[#allocation46_spill] sm:$0xff] }
0x1135   :  { %1645 = vmatprep.subr.bf16.mxu0 %v6468_v42  ;;  %1686 = vmatprep.subr.bf16.mxu1 %v6405_v35  ;;  %v7898_v35 = vld [vmem:[#allocation30_spill] sm:$0xff] }
0x1138   :  { %1646 = vmatpush1.bf16.msra.mxu0 %v6472_v43  ;;  %1687 = vmatpush1.bf16.msra.mxu1 %v6409_v61 }
0x1139   :  { %1647 = vmatprep.subr.bf16.mxu0 %v6476_v44  ;;  %1688 = vmatprep.subr.bf16.mxu1 %v6479_v47 }
0x113c   :  { %1648 = vmatpush1.bf16.msra.mxu0 %v6482_v48  ;;  %1689 = vmatpush1.bf16.msra.mxu1 %v6485_v49 }
0x113d   :  { %1649 = vmatprep.subr.bf16.mxu0 %v6488_v50  ;;  %1690 = vmatprep.subr.bf16.mxu1 %v6491_v51 }
0x1140   :  { %1650 = vmatpush1.bf16.msra.mxu0 %v6494_v52  ;;  %1691 = vmatpush1.bf16.msra.mxu1 %v6497_v54 }
0x1141   :  { %1651 = vmatprep.subr.bf16.mxu0 %v6500_v55  ;;  %1692 = vmatprep.subr.bf16.mxu1 %v6503_v56 }
0x1144   :  { %1652 = vmatpush1.bf16.msra.mxu0 %v6506_v57  ;;  %1693 = vmatpush1.bf16.msra.mxu1 %v6509_v53 }
0x1145   :  { %1694 = vmatprep.subr.bf16.mxu1 %v6512_v18  ;;  %1653 = vmatprep.subr.bf16.mxu0 %v6515_v13 }
0x1148   :  { %1654 = vmatpush1.bf16.msra.mxu0 %v6518_v63  ;;  %1695 = vmatpush1.bf16.msra.mxu1 %v6521_v46 }
0x11fe   :  { %v1523_v28 = vpop.f32.mrb[40].mxu0  ;;  %v1564_v30 = vpop.f32.mrb[40].mxu1 }
0x11ff   :  { %v1571_v32 = vadd.f32 %v1523_v28, %v7895_v31  ;;  %v1573_v17 = vadd.f32 %v1564_v30, %v7896_v33  ;;  %v1525_v12 = vpop.f32.mrb[41].mxu0  ;;  %v1566_v24 = vpop.f32.mrb[41].mxu1  ;;  %v7901_v28 = vld [vmem:[#allocation28_spill] sm:$0xff] }
0x1200   :  { %v1572_v6 = vadd.f32 %v1525_v12, %v7897_v59  ;;  %v1574_v61 = vadd.f32 %v1566_v24, %v7898_v35  ;;  %v1527_v42 = vpop.f32.mrb[42].mxu0  ;;  %v1568_v43 = vpop.f32.mrb[42].mxu1 }
0x1201   :  { %v1528_v44 = vpop.f32.mrb[43].mxu0  ;;  %v1569_v47 = vpop.f32.mrb[43].mxu1  ;;  %v1575_v50 = vmul.f32 0.5, %v1571_v32  ;;  %v1584_v51 = vmul.f32 0.5, %v1573_v17 }
0x1202   :  { %5381 = vtanh.f32 %v1572_v6  ;;  %v1576_v14 = vmul.f32 0.5, %v1572_v6  ;;  %v1585_v21 = vmul.f32 0.5, %v1574_v61 }
0x1203   :  { %5383 = vtanh.f32 %v1574_v61 }
0x1204   :  { %5385 = vtanh.f32 %v1575_v50 }
0x1205   :  { %5387 = vtanh.f32 %v1584_v51  ;;  %v1791_v51 = vld [vmem:[%s7818_s1] sm:$0xff] }
0x120c   :  { %v5382_v48 = vpop.eup %5381 }
0x120d   :  { %1595 = vrot.lane.b32.xlu1 %v5382_v48, %s5805_s5  ;;  %v5384_v49 = vpop.eup %5383 }
0x120e   :  { %1612 = vrot.lane.b32.xlu0 %v5384_v49, %s5805_s5  ;;  %v5386_v52 = vpop.eup %5385 }
0x120f   :  { %v1579_v54 = vmul.f32 0.5, %v5386_v52  ;;  %v5388_v55 = vpop.eup %5387  ;;  %v1793_v52 = vld [vmem:[%s7818_s1 + $0x10] sm:$0xff] }
0x1210   :  { %v1588_v53 = vmul.f32 0.5, %v5388_v55  ;;  %v1796_v55 = vld [vmem:[%s7818_s1 + $0x28] sm:$0xff] }
0x1211   :  { %v1581_v56 = vadd.f32 0.5, %v1579_v54  ;;  %v1794_v54 = vld [vmem:[%s7818_s1 + $0x18] sm:$0xff] }
0x1212   :  { %v1590_v13 = vadd.f32 0.5, %v1588_v53 }
0x1213   :  { %v1593_v7 = vmul.f32 %v1581_v56, %v6647_v23 }
0x1214   :  { %v1610_v25 = vmul.f32 %v1590_v13, %v6651_v26 }
0x127f   :  { %v1596_v57 = vpop.permute.xlu1 %1595 }
0x1280   :  { %v1598_v18 = vmul.f32 %v1596_v57, %v1581_v56  ;;  %v1613_v63 = vpop.permute.xlu0 %1612  ;;  %v1797_v56 = vld [vmem:[%s7818_s1 + $0x30] sm:$0xff] }
0x1281   :  { %v1615_v46 = vmul.f32 %v1613_v63, %v1590_v13  ;;  %v5133_v63 = vld [vmem:[#allocation9] ss:$16 sps:$4 sm:$0xff]  }
0x1282   :  { %1600 = vrot.lane.b32.xlu1 %v1598_v18, %s5805_s5 }
0x1283   :  { %1617 = vrot.lane.b32.xlu0 %v1615_v46, %s5805_s5  ;;  %v5135_v46 = vld [vmem:[#allocation9 + $0x4] ss:$16 sps:$4 sm:$0xff]  }
0x1284   :  { %2065 = vmatprep.subr.bf16.mxu0 %v5135_v46 }
0x12f4   :  { %v1601_v8 = vpop.permute.xlu1 %1600 }
0x12f5   :  { %v6701_v9 = vadd.f32 %v1601_v8, %v1593_v7  ;;  %v1618_v19 = vpop.permute.xlu0 %1617  ;;  %v5136_v7 = vld [vmem:[#allocation9 + $0x8] ss:$16 sps:$4 sm:$0xff]   ;;  %v5138_v8 = vld [vmem:[#allocation9 + $0xc] ss:$16 sps:$4 sm:$0xff]  }
0x12f6   :  { %v6705_v20 = vadd.f32 %v1618_v19, %v1610_v25  ;;  %v5141_v25 = vld [vmem:[#allocation9 + $0x24] ss:$16 sps:$4 sm:$0xff]   ;;  %v5144_v19 = vld [vmem:[#allocation9 + $0x2c] ss:$16 sps:$4 sm:$0xff]   ;;  %2138 = vmatprep.subr.bf16.mxu1 %v5138_v8  ;;  %v6782_v8 = vld [vmem:[#allocation11 + $0x20] ss:$16 sps:$4 sm:$0xff]  }
0x12f7   :  { %5389 = vtanh.f32 %v6701_v9 }
0x12f8   :  { %5391 = vtanh.f32 %v6705_v20 }
0x12f9   :  { %5393 = vtanh.f32 %v1576_v14  ;;  %v5150_v14 = vld [vmem:[#allocation9 + $0x4c] ss:$16 sps:$4 sm:$0xff]  }
0x12fa   :  { %5395 = vtanh.f32 %v1585_v21  ;;  %v5145_v21 = vld [vmem:[#allocation9 + $0x40] ss:$16 sps:$4 sm:$0xff]  }
0x1301   :  { %v5390_v10 = vpop.eup %5389 }
0x1302   :  { %1606 = vrot.lane.b32.xlu1 %v5390_v10, %s5805_s5  ;;  %v5392_v2 = vpop.eup %5391  ;;  %v5139_v10 = vld [vmem:[#allocation9 + $0x20] ss:$16 sps:$4 sm:$0xff]  }
0x1303   :  { %1623 = vrot.lane.b32.xlu0 %v5392_v2, %s5805_s5  ;;  %v5394_v22 = vpop.eup %5393  ;;  %v5142_v2 = vld [vmem:[#allocation9 + $0x28] ss:$16 sps:$4 sm:$0xff]  }
0x1304   :  { %v1580_v23 = vmul.f32 0.5, %v5394_v22  ;;  %v5396_v15 = vpop.eup %5395  ;;  %v5148_v22 = vld [vmem:[#allocation9 + $0x48] ss:$16 sps:$4 sm:$0xff]  }
0x1305   :  { %v1589_v27 = vmul.f32 0.5, %v5396_v15  ;;  %v5153_v15 = vld [vmem:[#allocation9 + $0x64] ss:$16 sps:$4 sm:$0xff]  }
0x1306   :  { %v1582_v60 = vadd.f32 0.5, %v1580_v23 }
0x1307   :  { %v1591_v39 = vadd.f32 0.5, %v1589_v27  ;;  %v5154_v27 = vld [vmem:[#allocation9 + $0x68] ss:$16 sps:$4 sm:$0xff]  }
0x1374   :  { %v1607_v26 = vpop.permute.xlu1 %1606 }
0x1375   :  { %v1609_v38 = vmul.f32 %v1607_v26, %v1582_v60  ;;  %v1624_v41 = vpop.permute.xlu0 %1623  ;;  %v5156_v60 = vld [vmem:[#allocation9 + $0x6c] ss:$16 sps:$4 sm:$0xff]   ;;  %v5151_v26 = vld [vmem:[#allocation9 + $0x60] ss:$16 sps:$4 sm:$0xff]  }
0x1376   :  { %v1626_v1 = vmul.f32 %v1624_v41, %v1591_v39  ;;  %v5162_v39 = vld [vmem:[#allocation9 + $0x8c] ss:$16 sps:$4 sm:$0xff]  }
0x1377   :  { %1627 = vst.msk [vmem:[#allocation3 + $0x30] sm:$0xff] %vm725_vm3, %v1609_v38 }
0x1378   :  { %1629 = vrot.lane.b32.xlu0 %v1626_v1, %s5805_s5  ;;  %v5157_v1 = vld [vmem:[#allocation9 + $0x80] ss:$16 sps:$4 sm:$0xff]  }
0x13ea   :  { %v1630_v4 = vpop.permute.xlu0 %1629 }
0x13eb   :  { %1632 = vst.msk [vmem:[#allocation3 + $0x8] sm:$0xff] %vm731_vm4, %v1630_v4  ;;  %v1637_v16 = vsel %vm725_vm3, %v1609_v38, %v1630_v4  ;;  %v5159_v38 = vld [vmem:[#allocation9 + $0x84] ss:$16 sps:$4 sm:$0xff]   ;;  %v5160_v4 = vld [vmem:[#allocation9 + $0x88] ss:$16 sps:$4 sm:$0xff]  }
0x13ec   :  { %v1638_v5 = vpack.c.bf16 %v1637_v16, %v1637_v16  ;;  %v5165_v16 = vld [vmem:[#allocation9 + $0xa4] ss:$16 sps:$4 sm:$0xff]  }
0x13ee   :  { %1672 = vmatmul.mubr.bf16.vlgmr.msra.gmra.mrb[44].mxu0 %v1638_v5  ;;  %1713 = vmatmul.mubr.bf16.vlgmr.msra.gmra.mrb[44].mxu1 %v1638_v5  ;;  %v5168_v5 = vld [vmem:[#allocation9 + $0xac] ss:$16 sps:$4 sm:$0xff]  }
0x13ef   :  { %2170 = vmatprep.mubr.bf16.mxu1 %v7880_v40  ;;  %2097 = vmatprep.mubr.bf16.mxu0 %v7880_v40 }
0x13f0   :  { %2066 = vmatpush1.bf16.msra.mxu0 %v5133_v63  ;;  %2139 = vmatpush1.bf16.msra.mxu1 %v5136_v7  ;;  %v6778_v63 = vld [vmem:[#allocation11 + $0x2c] ss:$16 sps:$4 sm:$0xff]  }
0x13f1   :  { %2067 = vmatprep.subr.bf16.mxu0 %v5141_v25  ;;  %2140 = vmatprep.subr.bf16.mxu1 %v5144_v19  ;;  %v1786_v7 = vld [vmem:[#allocation3 + $0x18] sm:$0xff] }
0x13f2   :  { %v6784_v25 = vld [vmem:[#allocation11 + $0x28] ss:$16 sps:$4 sm:$0xff]  }
0x13f4   :  { %2068 = vmatpush1.bf16.msra.mxu0 %v5139_v10  ;;  %2141 = vmatpush1.bf16.msra.mxu1 %v5142_v2  ;;  %v6788_v2 = vld [vmem:[#allocation11 + $0x44] ss:$16 sps:$4 sm:$0xff]  }
0x13f5   :  { %2142 = vmatprep.subr.bf16.mxu1 %v5150_v14  ;;  %v1785_v14 = vld [vmem:[#allocation3 + $0x10] sm:$0xff] }
0x13f8   :  { %2143 = vmatpush1.bf16.msra.mxu1 %v5148_v22 }
0x13f9   :  { %2144 = vmatprep.subr.bf16.mxu1 %v5156_v60  ;;  %v6798_v60 = vld [vmem:[#allocation11 + $0x48] ss:$16 sps:$4 sm:$0xff]  }
0x13fc   :  { %2145 = vmatpush1.bf16.msra.mxu1 %v5154_v27  ;;  %v6803_v27 = vld [vmem:[#allocation11 + $0x64] ss:$16 sps:$4 sm:$0xff]  }
0x13fd   :  { %2146 = vmatprep.subr.bf16.mxu1 %v5162_v39 }
0x1400   :  { %2147 = vmatpush1.bf16.msra.mxu1 %v5160_v4  ;;  %v6811_v4 = vld [vmem:[#allocation11 + $0x68] ss:$16 sps:$4 sm:$0xff]  }
0x1401   :  { %2148 = vmatprep.subr.bf16.mxu1 %v5168_v5  ;;  %v6815_v5 = vld [vmem:[#allocation11 + $0x84] ss:$16 sps:$4 sm:$0xff]  }
0x14c1   :  { %v1673_v45 = vpop.f32.mrb[44].mxu0  ;;  %v1714_v11 = vpop.f32.mrb[44].mxu1 }
0x14c2   :  { %v1721_v37 = vadd.f32 %v1673_v45, %v7899_v34  ;;  %v1723_v58 = vadd.f32 %v1714_v11, %v7900_v62  ;;  %v1675_v3 = vpop.f32.mrb[45].mxu0  ;;  %v1716_v29 = vpop.f32.mrb[45].mxu1  ;;  %v5163_v11 = vld [vmem:[#allocation9 + $0xa0] ss:$16 sps:$4 sm:$0xff]   ;;  %v5166_v34 = vld [vmem:[#allocation9 + $0xa8] ss:$16 sps:$4 sm:$0xff]  }
0x14c3   :  { %v6719_v36 = vadd.f32 %v1675_v3, %v6296_v0  ;;  %v6722_v30 = vadd.f32 %v1716_v29, %v7901_v28  ;;  %v1677_v31 = vpop.f32.mrb[46].mxu0  ;;  %v1718_v32 = vpop.f32.mrb[46].mxu1  ;;  %v5171_v62 = vld [vmem:[#allocation9 + $0xc4] ss:$16 sps:$4 sm:$0xff]   ;;  %2149 = vmatpush1.bf16.msra.mxu1 %v5166_v34 }
0x14c4   :  { %v1678_v33 = vpop.f32.mrb[47].mxu0  ;;  %v1719_v17 = vpop.f32.mrb[47].mxu1  ;;  %v1734_v59 = vmul.f32 0.5, %v1723_v58  ;;  %v1725_v0 = vmul.f32 0.5, %v1721_v37  ;;  %v5174_v58 = vld [vmem:[#allocation9 + $0xcc] ss:$16 sps:$4 sm:$0xff]  }
0x14c5   :  { %5397 = vtanh.f32 %v6722_v30  ;;  %v1735_v23 = vmul.f32 0.5, %v6722_v30  ;;  %v5169_v31 = vld [vmem:[#allocation9 + $0xc0] ss:$16 sps:$4 sm:$0xff]   ;;  %v5172_v32 = vld [vmem:[#allocation9 + $0xc8] ss:$16 sps:$4 sm:$0xff]   ;;  %2150 = vmatprep.subr.bf16.mxu1 %v5174_v58 }
0x14c6   :  { %5399 = vtanh.f32 %v6719_v36  ;;  %v1792_v17 = vld [vmem:[%s7818_s1 + $0x8] sm:$0xff] }
0x14c7   :  { %5401 = vtanh.f32 %v1734_v59  ;;  %2151 = vmatpush1.bf16.msra.mxu1 %v5172_v32  ;;  %v5178_v59 = vld [vmem:[#allocation9 + $0xe8] ss:$16 sps:$4 sm:$0xff]   ;;  %v6835_v32 = vld [vmem:[#allocation11 + $0xa0] ss:$16 sps:$4 sm:$0xff]  }
0x14c8   :  { %5403 = vtanh.f32 %v1725_v0  ;;  %v1795_v0 = vld [vmem:[%s7818_s1 + $0x20] sm:$0xff] }
0x14cf   :  { %v5398_v12 = vpop.eup %5397 }
0x14d0   :  { %1762 = vrot.lane.b32.xlu1 %v5398_v12, %s5805_s5  ;;  %v5400_v24 = vpop.eup %5399  ;;  %v5180_v12 = vld [vmem:[#allocation9 + $0xec] ss:$16 sps:$4 sm:$0xff]  }
0x14d1   :  { %v5402_v6 = vpop.eup %5401  ;;  %2152 = vmatprep.subr.bf16.mxu1 %v5180_v12  ;;  %v6843_v12 = vld [vmem:[#allocation11 + $0xcc] ss:$16 sps:$4 sm:$0xff]  }
0x14d2   :  { %v1738_v35 = vmul.f32 0.5, %v5402_v6  ;;  %v5404_v61 = vpop.eup %5403  ;;  %2153 = vmatpush1.bf16.msra.mxu1 %v5178_v59  ;;  %v6760_v6 = vld [vmem:[#allocation11 + $0x4] ss:$16 sps:$4 sm:$0xff]  }
0x14d3   :  { %v1729_v43 = vmul.f32 0.5, %v5404_v61 }
0x14d4   :  { %1745 = vrot.lane.b32.xlu1 %v5400_v24, %s5805_s5  ;;  %v1740_v42 = vadd.f32 0.5, %v1738_v35  ;;  %v5175_v24 = vld [vmem:[#allocation9 + $0xe0] ss:$16 sps:$4 sm:$0xff]   ;;  %v6762_v35 = vld [vmem:[#allocation11 + $0xc] ss:$16 sps:$4 sm:$0xff]  }
0x14d5   :  { %v6729_v48 = vadd.f32 0.5, %v1729_v43  ;;  %2480 = vmatprep.subr.bf16.mxu1 %v6762_v35 }
0x14d6   :  { %v1760_v57 = vmul.f32 %v1740_v42, %v6705_v20  ;;  %v5147_v20 = vld [vmem:[#allocation9 + $0x44] ss:$16 sps:$4 sm:$0xff]  }
0x14d7   :  { %2069 = vmatprep.subr.bf16.mxu0 %v5147_v20  ;;  %v1743_v3 = vmul.f32 %v6729_v48, %v6701_v9  ;;  %v5177_v9 = vld [vmem:[#allocation9 + $0xe4] ss:$16 sps:$4 sm:$0xff]   ;;  %v6790_v20 = vld [vmem:[#allocation11 + $0x4c] ss:$16 sps:$4 sm:$0xff]  }
0x14d8   :  { %2070 = vmatpush1.bf16.msra.mxu0 %v5145_v21 }
0x14d9   :  { %2071 = vmatprep.subr.bf16.mxu0 %v5153_v15  ;;  %v6796_v15 = vld [vmem:[#allocation11 + $0x40] ss:$16 sps:$4 sm:$0xff]  }
0x14dc   :  { %2072 = vmatpush1.bf16.msra.mxu0 %v5151_v26 }
0x14dd   :  { %2073 = vmatprep.subr.bf16.mxu0 %v5159_v38  ;;  %v6805_v38 = vld [vmem:[#allocation11 + $0x6c] ss:$16 sps:$4 sm:$0xff]  }
0x14e0   :  { %2074 = vmatpush1.bf16.msra.mxu0 %v5157_v1  ;;  %v6809_v1 = vld [vmem:[#allocation11 + $0x60] ss:$16 sps:$4 sm:$0xff]  }
0x14e1   :  { %2075 = vmatprep.subr.bf16.mxu0 %v5165_v16 }
0x14e4   :  { %2076 = vmatpush1.bf16.msra.mxu0 %v5163_v11  ;;  %v1788_v11 = vld [vmem:[#allocation3 + $0x28] sm:$0xff] }
0x14e5   :  { %2077 = vmatprep.subr.bf16.mxu0 %v5171_v62  ;;  %v6825_v62 = vld [vmem:[#allocation11 + $0x88] ss:$16 sps:$4 sm:$0xff]  }
0x14e8   :  { %2078 = vmatpush1.bf16.msra.mxu0 %v5169_v31 }
0x14e9   :  { %2079 = vmatprep.subr.bf16.mxu0 %v5177_v9  ;;  %v6841_v9 = vld [vmem:[#allocation11 + $0xc4] ss:$16 sps:$4 sm:$0xff]  }
0x14ec   :  { %2080 = vmatpush1.bf16.msra.mxu0 %v5175_v24  ;;  %v1789_v24 = vld [vmem:[#allocation3 + $0x30] sm:$0xff] }
0x14ed   :  { %2439 = vmatprep.subr.bf16.mxu0 %v6760_v6 }
0x1542   :  { %v1763_v44 = vpop.permute.xlu1 %1762 }
0x1543   :  { %v1765_v47 = vmul.f32 %v1763_v44, %v1740_v42  ;;  %v1798_v42 = vld [vmem:[%s7818_s1 + $0x38] sm:$0xff]  ;;  %v1726_v44 = vmul.f32 0.5, %v6719_v36 }
0x1545   :  { %1767 = vrot.lane.b32.xlu0 %v1765_v47, %s5805_s5 }
0x1546   :  { %v1746_v49 = vpop.permute.xlu1 %1745 }
0x1547   :  { %v1748_v50 = vmul.f32 %v1746_v49, %v6729_v48 }
0x1549   :  { %1750 = vrot.lane.b32.xlu1 %v1748_v50, %s5805_s5 }
0x154d   :  { %1801 = vperm.xlu1 %5071, %v1791_v51   ;;  %v1784_v51 = vld [vmem:[#allocation3 + $0x8] sm:$0xff] }
0x1551   :  { %1811 = vperm.xlu1 %5071, %v1793_v52  }
0x1555   :  { %1816 = vperm.xlu1 %5071, %v1794_v54  }
0x1559   :  { %1826 = vperm.xlu1 %5071, %v1796_v55  }
0x155d   :  { %1831 = vperm.xlu1 %5071, %v1797_v56   ;;  %v6772_v56 = vld [vmem:[#allocation11] ss:$16 sps:$4 sm:$0xff]  }
0x15b7   :  { %v1768_v53 = vpop.permute.xlu0 %1767 }
0x15b8   :  { %v1770_v18 = vadd.f32 %v1768_v53, %v1760_v57  ;;  %v6774_v57 = vld [vmem:[#allocation11 + $0x8] ss:$16 sps:$4 sm:$0xff]  }
0x15ba   :  { %5405 = vtanh.f32 %v1770_v18 }
0x15bb   :  { %5407 = vtanh.f32 %v1735_v23  ;;  %v1751_v37 = vpop.permute.xlu1 %1750 }
0x15bc   :  { %v1753_v28 = vadd.f32 %v1751_v37, %v1743_v3  ;;  %v6823_v37 = vld [vmem:[#allocation11 + $0x80] ss:$16 sps:$4 sm:$0xff]   ;;  %v6829_v3 = vld [vmem:[#allocation11 + $0xa4] ss:$16 sps:$4 sm:$0xff]  }
0x15be   :  { %5409 = vtanh.f32 %v1753_v28 }
0x15bf   :  { %5411 = vtanh.f32 %v1726_v44  ;;  %v6857_v44 = vld [vmem:[#allocation11 + $0xec] ss:$16 sps:$4 sm:$0xff]  }
0x15c4   :  { %v5406_v13 = vpop.eup %5405 }
0x15c5   :  { %1773 = vrot.lane.b32.xlu0 %v5406_v13, %s5805_s5  ;;  %v5408_v41 = vpop.eup %5407  ;;  %v6776_v13 = vld [vmem:[#allocation11 + $0x24] ss:$16 sps:$4 sm:$0xff]  }
0x15c6   :  { %v1739_v45 = vmul.f32 0.5, %v5408_v41  ;;  %v1787_v41 = vld [vmem:[#allocation3 + $0x20] sm:$0xff] }
0x15c8   :  { %v1741_v29 = vadd.f32 0.5, %v1739_v45  ;;  %v5410_v61 = vpop.eup %5409  ;;  %v6817_v45 = vld [vmem:[#allocation11 + $0x8c] ss:$16 sps:$4 sm:$0xff]  }
0x15c9   :  { %v5412_v50 = vpop.eup %5411 }
0x15ca   :  { %v1730_v18 = vmul.f32 0.5, %v5412_v50  ;;  %v1883_v50 = vld [vmem:[%s7824_s7] sm:$0xf] }
0x15cc   :  { %v1802_v47 = vpop.permute.xlu1 %1801  ;;  %v1732_v10 = vadd.f32 0.5, %v1730_v18 }
0x15d0   :  { %v1812_v48 = vpop.permute.xlu1 %1811 }
0x15d1   :  { %v1841_v22 = vmul.f32 %v1812_v48, %v1785_v14  ;;  %v6863_v48 = vld [vmem:[#allocation11 + $0xe8] ss:$16 sps:$4 sm:$0xff]  }
0x15d4   :  { %v1817_v36 = vpop.permute.xlu1 %1816 }
0x15d5   :  { %v1842_v19 = vmul.f32 %v1817_v36, %v1786_v7 }
0x15d7   :  { %v1880_v26 = vpack.c.bf16 %v1842_v19, %v1841_v22 }
0x15d8   :  { %v1827_v39 = vpop.permute.xlu1 %1826 }
0x15d9   :  { %v1844_v34 = vmul.f32 %v1827_v39, %v1788_v11 }
0x1637   :  { %v1774_v30 = vpop.permute.xlu0 %1773 }
0x1638   :  { %v1776_v33 = vmul.f32 %v1774_v30, %v1741_v29  ;;  %v6831_v29 = vld [vmem:[#allocation11 + $0xac] ss:$16 sps:$4 sm:$0xff]   ;;  %v1832_v30 = vpop.permute.xlu1 %1831 }
0x1639   :  { %v1845_v59 = vmul.f32 %v1832_v30, %v1789_v24 }
0x163a   :  { %1779 = vrot.lane.b32.xlu0 %v1776_v33, %s5805_s5  ;;  %v6837_v33 = vld [vmem:[#allocation11 + $0xa8] ss:$16 sps:$4 sm:$0xff]  }
0x163e   :  { %1806 = vperm.xlu0 %5072, %v1792_v17  }
0x1642   :  { %1821 = vperm.xlu0 %5072, %v1795_v0   ;;  %v6849_v0 = vld [vmem:[#allocation11 + $0xc0] ss:$16 sps:$4 sm:$0xff]  }
0x1646   :  { %1756 = vrot.lane.b32.xlu0 %v5410_v61, %s5805_s5  ;;  %v6851_v61 = vld [vmem:[#allocation11 + $0xc8] ss:$16 sps:$4 sm:$0xff]  }
0x164a   :  { %1836 = vperm.xlu0 %5072, %v1798_v42  }
0x16ac   :  { %v1780_v43 = vpop.permute.xlu0 %1779 }
0x16ad   :  { %1782 = vst.msk [vmem:[#allocation3] sm:$0xff] %vm731_vm4, %v1780_v43  ;;  %v6855_v43 = vld [vmem:[#allocation11 + $0xe4] ss:$16 sps:$4 sm:$0xff]  }
0x16b4   :  { %v1783_v49 = vld [vmem:[#allocation3] sm:$0xff] }
0x16b5   :  { %v1839_v54 = vmul.f32 %v1802_v47, %v1783_v49  ;;  %v6861_v47 = vld [vmem:[#allocation11 + $0xe0] ss:$16 sps:$4 sm:$0xff]   ;;  %v7902_v49 = vmov 0.0|0.0  }
0x16bd   :  { %v1807_v52 = vpop.permute.xlu0 %1806 }
0x16be   :  { %v1840_v55 = vmul.f32 %v1807_v52, %v1784_v51  ;;  %v7903_v51 = vld [vmem:[#allocation24_spill] sm:$0xff] }
0x16bf   :  { %v6913_v52 = vrot.slane %v1883_v50, %v7903_v51 }
0x16c0   :  { %v1879_v53 = vpack.c.bf16 %v1840_v55, %v1839_v54  ;;  %v7904_v54 = vld [vmem:[#allocation23_spill] sm:$0xff] }
0x16c1   :  { %v1822_v46 = vpop.permute.xlu0 %1821  ;;  %v7905_v55 = vsub.s32 3, %v7904_v54 }
0x16c2   :  { %2098 = vmatmul.mubr.bf16.vlgmr.msra.gmra.mrb[48].mxu0 %v1879_v53  ;;  %2171 = vmatmul.mubr.bf16.vlgmr.msra.gmra.mrb[48].mxu1 %v1879_v53  ;;  %v1843_v16 = vmul.f32 %v1822_v46, %v1787_v41  ;;  %v7906_v46 = vld [vmem:[#allocation25_spill] sm:$0xff] }
0x16c3   :  { %2440 = vmatpush1.bf16.msra.mxu0 %v6772_v56  ;;  %2481 = vmatpush1.bf16.msra.mxu1 %v6774_v57  ;;  %v6917_v53 = vrot.slane %v1883_v50, %v7905_v55  ;;  %v1888_v7 = vrot.slane %v1883_v50, %v7906_v46 }
0x16c4   :  { %2441 = vmatprep.subr.bf16.mxu0 %v6776_v13  ;;  %2482 = vmatprep.subr.bf16.mxu1 %v6778_v63  ;;  %v1881_v58 = vpack.c.bf16 %v1844_v34, %v1843_v16 }
0x16c5   :  { %v1757_v21 = vpop.permute.xlu0 %1756  ;;  %2107 = vmatprep.mubr.bf16.mxu0 %v7880_v40  ;;  %2180 = vmatprep.mubr.bf16.mxu1 %v7880_v40 }
0x16c6   :  { %v1759_v23 = vmul.f32 %v1757_v21, %v1732_v10  ;;  %v7908_v21 = vld [vmem:[#allocation26_spill] sm:$0xff] }
0x16c7   :  { %2442 = vmatpush1.bf16.msra.mxu0 %v6782_v8  ;;  %2483 = vmatpush1.bf16.msra.mxu1 %v6784_v25  ;;  %v1892_v22 = vrot.slane %v1883_v50, %v7908_v21 }
0x16c8   :  { %1777 = vst.msk [vmem:[#allocation3 + $0x38] sm:$0xff] %vm725_vm3, %v1759_v23  ;;  %2443 = vmatprep.subr.bf16.mxu0 %v6788_v2  ;;  %2484 = vmatprep.subr.bf16.mxu1 %v6790_v20 }
0x16c9   :  { %v1837_v31 = vpop.permute.xlu0 %1836 }
0x16ca   :  { %2108 = vmatmul.mubr.bf16.gmra.mrb[52].mxu0 %v1880_v26  ;;  %2181 = vmatmul.mubr.bf16.gmra.mrb[52].mxu1 %v1880_v26 }
0x16cb   :  { %2444 = vmatpush1.bf16.msra.mxu0 %v6796_v15  ;;  %2485 = vmatpush1.bf16.msra.mxu1 %v6798_v60 }
0x16cc   :  { %2445 = vmatprep.subr.bf16.mxu0 %v6803_v27  ;;  %2486 = vmatprep.subr.bf16.mxu1 %v6805_v38 }
0x16cd   :  { %2117 = vmatprep.mubr.bf16.mxu0 %v7880_v40  ;;  %2190 = vmatprep.mubr.bf16.mxu1 %v7880_v40 }
0x16cf   :  { %2446 = vmatpush1.bf16.msra.mxu0 %v6809_v1  ;;  %2487 = vmatpush1.bf16.msra.mxu1 %v6811_v4  ;;  %v1790_v28 = vld [vmem:[#allocation3 + $0x38] sm:$0xff] }
0x16d0   :  { %2447 = vmatprep.subr.bf16.mxu0 %v6815_v5  ;;  %2488 = vmatprep.subr.bf16.mxu1 %v6817_v45  ;;  %v1846_v17 = vmul.f32 %v1837_v31, %v1790_v28 }
0x16d2   :  { %2118 = vmatmul.mubr.bf16.gmra.mrb[56].mxu0 %v1881_v58  ;;  %2191 = vmatmul.mubr.bf16.gmra.mrb[56].mxu1 %v1881_v58  ;;  %v1882_v42 = vpack.c.bf16 %v1846_v17, %v1845_v59 }
0x16d3   :  { %2448 = vmatpush1.bf16.msra.mxu0 %v6823_v37  ;;  %2489 = vmatpush1.bf16.msra.mxu1 %v6825_v62 }
0x16d4   :  { %2449 = vmatprep.subr.bf16.mxu0 %v6829_v3  ;;  %2490 = vmatprep.subr.bf16.mxu1 %v6831_v29 }
0x16d5   :  { %2127 = vmatprep.mubr.bf16.mxu0 %v7880_v40  ;;  %2200 = vmatprep.mubr.bf16.mxu1 %v7880_v40 }
0x16d7   :  { %2450 = vmatpush1.bf16.msra.mxu0 %v6835_v32  ;;  %2491 = vmatpush1.bf16.msra.mxu1 %v6837_v33 }
0x16d8   :  { %2451 = vmatprep.subr.bf16.mxu0 %v6841_v9  ;;  %2492 = vmatprep.subr.bf16.mxu1 %v6843_v12 }
0x16da   :  { %2128 = vmatmul.mubr.bf16.gmra.mrb[60].mxu0 %v1882_v42  ;;  %2201 = vmatmul.mubr.bf16.gmra.mrb[60].mxu1 %v1882_v42 }
0x16db   :  { %2452 = vmatpush1.bf16.msra.mxu0 %v6849_v0  ;;  %2493 = vmatpush1.bf16.msra.mxu1 %v6851_v61 }
0x16dc   :  { %2453 = vmatprep.subr.bf16.mxu0 %v6855_v43  ;;  %2494 = vmatprep.subr.bf16.mxu1 %v6857_v44 }
0x16dd   :  { %2471 = vmatprep.mubr.bf16.mxu0 %v7880_v40  ;;  %2512 = vmatprep.mubr.bf16.mxu1 %v7880_v40 }
0x16df   :  { %2454 = vmatpush1.bf16.msra.mxu0 %v6861_v47  ;;  %2495 = vmatpush1.bf16.msra.mxu1 %v6863_v48 }
0x16e0   :  { %2589 = vmatprep.subr.bf16.mxu0 %v6760_v6  ;;  %2630 = vmatprep.subr.bf16.mxu1 %v6762_v35 }
0x16e2   :  { %2472 = vmatmul.mubr.bf16.vlgmr.msra.gmra.mrb[64].mxu0 %v7902_v49  ;;  %2513 = vmatmul.mubr.bf16.vlgmr.msra.gmra.mrb[64].mxu1 %v7902_v49 }
0x16e3   :  { %2590 = vmatpush1.bf16.msra.mxu0 %v6772_v56  ;;  %2631 = vmatpush1.bf16.msra.mxu1 %v6774_v57 }
0x16e4   :  { %2591 = vmatprep.subr.bf16.mxu0 %v6776_v13  ;;  %2632 = vmatprep.subr.bf16.mxu1 %v6778_v63 }
0x16e5   :  { %2621 = vmatprep.mubr.bf16.mxu0 %v7880_v40  ;;  %2662 = vmatprep.mubr.bf16.mxu1 %v7880_v40 }
0x16e7   :  { %2592 = vmatpush1.bf16.msra.mxu0 %v6782_v8  ;;  %2633 = vmatpush1.bf16.msra.mxu1 %v6784_v25 }
0x16e8   :  { %2593 = vmatprep.subr.bf16.mxu0 %v6788_v2  ;;  %2634 = vmatprep.subr.bf16.mxu1 %v6790_v20 }
0x16eb   :  { %2594 = vmatpush1.bf16.msra.mxu0 %v6796_v15  ;;  %2635 = vmatpush1.bf16.msra.mxu1 %v6798_v60 }
0x16ec   :  { %2595 = vmatprep.subr.bf16.mxu0 %v6803_v27  ;;  %2636 = vmatprep.subr.bf16.mxu1 %v6805_v38 }
0x16ef   :  { %2596 = vmatpush1.bf16.msra.mxu0 %v6809_v1  ;;  %2637 = vmatpush1.bf16.msra.mxu1 %v6811_v4 }
0x16f0   :  { %2597 = vmatprep.subr.bf16.mxu0 %v6815_v5  ;;  %2638 = vmatprep.subr.bf16.mxu1 %v6817_v45 }
0x16f3   :  { %2598 = vmatpush1.bf16.msra.mxu0 %v6823_v37  ;;  %2639 = vmatpush1.bf16.msra.mxu1 %v6825_v62 }
0x16f4   :  { %2599 = vmatprep.subr.bf16.mxu0 %v6829_v3  ;;  %2640 = vmatprep.subr.bf16.mxu1 %v6831_v29 }
0x16f7   :  { %2600 = vmatpush1.bf16.msra.mxu0 %v6835_v32  ;;  %2641 = vmatpush1.bf16.msra.mxu1 %v6837_v33 }
0x16f8   :  { %2601 = vmatprep.subr.bf16.mxu0 %v6841_v9  ;;  %2642 = vmatprep.subr.bf16.mxu1 %v6843_v12 }
0x16fb   :  { %2602 = vmatpush1.bf16.msra.mxu0 %v6849_v0  ;;  %2643 = vmatpush1.bf16.msra.mxu1 %v6851_v61 }
0x16fc   :  { %2644 = vmatprep.subr.bf16.mxu1 %v6857_v44  ;;  %2603 = vmatprep.subr.bf16.mxu0 %v6855_v43 }
0x16ff   :  { %2604 = vmatpush1.bf16.msra.mxu0 %v6861_v47  ;;  %2645 = vmatpush1.bf16.msra.mxu1 %v6863_v48 }
0x1700   :  { %2739 = vmatprep.subr.bf16.mxu0 %v6760_v6  ;;  %2780 = vmatprep.subr.bf16.mxu1 %v6762_v35 }
0x1795   :  { %v2099_v18 = vpop.f32.mrb[48].mxu0  ;;  %v2172_v36 = vpop.f32.mrb[48].mxu1 }
0x1796   :  { %v6921_v19 = vadd.f32 %v2172_v36, %v6913_v52  ;;  %v2101_v10 = vpop.f32.mrb[49].mxu0  ;;  %v2174_v14 = vpop.f32.mrb[49].mxu1 }
0x1797   :  { %v6925_v23 = vadd.f32 %v2174_v14, %v6917_v53  ;;  %v2103_v26 = vpop.f32.mrb[50].mxu0  ;;  %v2176_v39 = vpop.f32.mrb[50].mxu1 }
0x1798   :  { %7907 = vst [vmem:[#allocation33_spill] sm:$0xff] %v6921_v19  ;;  %v6927_v41 = vadd.f32 %v2103_v26, %v1888_v7  ;;  %v6930_v16 = vadd.f32 %v2176_v39, %v6913_v52  ;;  %v2105_v11 = vpop.f32.mrb[51].mxu0  ;;  %v2178_v34 = vpop.f32.mrb[51].mxu1 }
0x1799   :  { %7909 = vst [vmem:[#allocation43_spill] sm:$0xff] %v6925_v23  ;;  %v6932_v58 = vadd.f32 %v2105_v11, %v1892_v22  ;;  %v6935_v28 = vadd.f32 %v2178_v34, %v6917_v53 }
0x179a   :  { %7910 = vst [vmem:[#allocation35_spill] sm:$0xff] %v6930_v16 }
0x179b   :  { %7911 = vst [vmem:[#allocation38_spill] sm:$0xff] %v6935_v28 }
0x179d   :  { %v2109_v30 = vpop.f32.mrb[52].mxu0  ;;  %v2182_v31 = vpop.f32.mrb[52].mxu1 }
0x179e   :  { %v6937_v17 = vadd.f32 %v2109_v30, %v1888_v7  ;;  %v6940_v24 = vadd.f32 %v2182_v31, %v6913_v52  ;;  %v2111_v59 = vpop.f32.mrb[53].mxu0  ;;  %v2184_v42 = vpop.f32.mrb[53].mxu1 }
0x179f   :  { %v6942_v49 = vadd.f32 %v2111_v59, %v1892_v22  ;;  %v6945_v50 = vadd.f32 %v2184_v42, %v6917_v53  ;;  %v2113_v54 = vpop.f32.mrb[54].mxu0  ;;  %v2186_v55 = vpop.f32.mrb[54].mxu1 }
0x17a0   :  { %7912 = vst [vmem:[#allocation37_spill] sm:$0xff] %v6940_v24  ;;  %v6947_v36 = vadd.f32 %v2113_v54, %v1888_v7  ;;  %v6950_v14 = vadd.f32 %v2186_v55, %v6913_v52  ;;  %v2115_v26 = vpop.f32.mrb[55].mxu0  ;;  %v2188_v39 = vpop.f32.mrb[55].mxu1 }
0x17a1   :  { %7913 = vst [vmem:[#allocation40_spill] sm:$0xff] %v6942_v49  ;;  %7914 = vst [vmem:[#allocation39_spill] sm:$0xff] %v6945_v50  ;;  %v6952_v11 = vadd.f32 %v2115_v26, %v1892_v22  ;;  %v6955_v34 = vadd.f32 %v2188_v39, %v6917_v53 }
0x17a2   :  { %7915 = vst [vmem:[#allocation34_spill] sm:$0xff] %v6947_v36  ;;  %7916 = vst [vmem:[#allocation41_spill] sm:$0xff] %v6950_v14 }
0x17a3   :  { %7917 = vst [vmem:[#allocation36_spill] sm:$0xff] %v6952_v11  ;;  %7918 = vst [vmem:[#allocation42_spill] sm:$0xff] %v6955_v34 }
0x17a5   :  { %v2119_v30 = vpop.f32.mrb[56].mxu0  ;;  %v2192_v31 = vpop.f32.mrb[56].mxu1 }
0x17a6   :  { %v6957_v59 = vadd.f32 %v2119_v30, %v1888_v7  ;;  %v6960_v42 = vadd.f32 %v2192_v31, %v6913_v52  ;;  %v2121_v51 = vpop.f32.mrb[57].mxu0  ;;  %v2194_v54 = vpop.f32.mrb[57].mxu1 }
0x17a7   :  { %v6962_v21 = vadd.f32 %v2121_v51, %v1892_v22  ;;  %v6965_v55 = vadd.f32 %v2194_v54, %v6917_v53  ;;  %v2123_v46 = vpop.f32.mrb[58].mxu0  ;;  %v2196_v26 = vpop.f32.mrb[58].mxu1 }
0x17a8   :  { %7919 = vst [vmem:[#allocation31_spill] sm:$0xff] %v6957_v59  ;;  %7920 = vst [vmem:[#allocation44_spill] sm:$0xff] %v6960_v42  ;;  %v6967_v23 = vadd.f32 %v2123_v46, %v1888_v7  ;;  %v6970_v39 = vadd.f32 %v2196_v26, %v6913_v52  ;;  %v2125_v19 = vpop.f32.mrb[59].mxu0  ;;  %v2198_v30 = vpop.f32.mrb[59].mxu1 }
0x17a9   :  { %7921 = vst [vmem:[#allocation32_spill] sm:$0xff] %v6962_v21  ;;  %7922 = vst [vmem:[#allocation45_spill] sm:$0xff] %v6965_v55  ;;  %v6972_v28 = vadd.f32 %v2125_v19, %v1892_v22  ;;  %v6975_v31 = vadd.f32 %v2198_v30, %v6917_v53 }
0x17aa   :  { %7923 = vst [vmem:[#allocation29_spill] sm:$0xff] %v6967_v23  ;;  %7924 = vst [vmem:[#allocation46_spill] sm:$0xff] %v6970_v39 }
0x17ab   :  { %7925 = vst [vmem:[#allocation30_spill] sm:$0xff] %v6972_v28  ;;  %7926 = vst [vmem:[#allocation47_spill] sm:$0xff] %v6975_v31 }
0x17ad   :  { %v2129_v16 = vpop.f32.mrb[60].mxu0  ;;  %v2202_v51 = vpop.f32.mrb[60].mxu1 }
0x17ae   :  { %v6977_v50 = vadd.f32 %v2129_v16, %v1888_v7  ;;  %v6980_v54 = vadd.f32 %v2202_v51, %v6913_v52  ;;  %v2131_v24 = vpop.f32.mrb[61].mxu0  ;;  %v2204_v46 = vpop.f32.mrb[61].mxu1  ;;  %v2100_v16 = vadd.f32 %v2099_v18, %v1888_v7  ;;  %v2102_v51 = vadd.f32 %v2101_v10, %v1892_v22 }
0x17af   :  { %v6982_v23 = vadd.f32 %v2131_v24, %v1892_v22  ;;  %v6985_v26 = vadd.f32 %v2204_v46, %v6917_v53  ;;  %v2133_v34 = vpop.f32.mrb[62].mxu0  ;;  %v2206_v19 = vpop.f32.mrb[62].mxu1 }
0x17b0   :  { %7927 = vst [vmem:[#allocation27_spill] sm:$0xff] %v6977_v50  ;;  %v6987_v28 = vadd.f32 %v2133_v34, %v1888_v7  ;;  %v2135_v30 = vpop.f32.mrb[63].mxu0  ;;  %v2208_v21 = vpop.f32.mrb[63].mxu1  ;;  %v2207_v50 = vadd.f32 %v2206_v19, %v6913_v52 }
0x17b1   :  { %7928 = vst [vmem:[#allocation28_spill] sm:$0xff] %v6982_v23  ;;  %v6989_v14 = vadd.f32 %v2135_v30, %v1892_v22  ;;  %v2209_v59 = vadd.f32 %v2208_v21, %v6917_v53 }
0x17b2   :  { %7929 = vst [vmem:[#allocation23_spill] sm:$0xff] %v6987_v28 }
0x17b5   :  { %v2473_v55 = vpop.f32.mrb[64].mxu0  ;;  %v2514_v24 = vpop.f32.mrb[64].mxu1 }
0x17b6   :  { %v2521_v23 = vadd.f32 %v2473_v55, %v2100_v16  ;;  %v2523_v11 = vadd.f32 %v2514_v24, %v2207_v50  ;;  %v2475_v46 = vpop.f32.mrb[65].mxu0  ;;  %v2516_v42 = vpop.f32.mrb[65].mxu1 }
0x17b7   :  { %v2522_v36 = vadd.f32 %v2475_v46, %v2102_v51  ;;  %v2524_v31 = vadd.f32 %v2516_v42, %v2209_v59  ;;  %v2518_v34 = vpop.f32.mrb[66].mxu1  ;;  %v2477_v28 = vpop.f32.mrb[66].mxu0 }
0x17b8   :  { %v2519_v49 = vpop.f32.mrb[67].mxu1  ;;  %v2478_v39 = vpop.f32.mrb[67].mxu0  ;;  %v2525_v53 = vmul.f32 0.5, %v2521_v23  ;;  %v2534_v7 = vmul.f32 0.5, %v2523_v11 }
0x17b9   :  { %5413 = vtanh.f32 %v2522_v36  ;;  %v2526_v34 = vmul.f32 0.5, %v2522_v36 }
0x17ba   :  { %5415 = vtanh.f32 %v2524_v31 }
0x17bb   :  { %5417 = vtanh.f32 %v2525_v53 }
0x17bc   :  { %5419 = vtanh.f32 %v2534_v7 }
0x17c3   :  { %v5414_v18 = vpop.eup %5413 }
0x17c4   :  { %2545 = vrot.lane.b32.xlu0 %v5414_v18, %s5805_s5  ;;  %v5416_v52 = vpop.eup %5415  ;;  %v2535_v18 = vmul.f32 0.5, %v2524_v31 }
0x17c5   :  { %2562 = vrot.lane.b32.xlu1 %v5416_v52, %s5805_s5  ;;  %v5418_v10 = vpop.eup %5417 }
0x17c6   :  { %v2529_v21 = vmul.f32 0.5, %v5418_v10  ;;  %v5420_v22 = vpop.eup %5419 }
0x17c7   :  { %v2538_v28 = vmul.f32 0.5, %v5420_v22 }
0x17c8   :  { %v2531_v50 = vadd.f32 0.5, %v2529_v21 }
0x17c9   :  { %v2540_v42 = vadd.f32 0.5, %v2538_v28 }
0x17ca   :  { %v2543_v19 = vmul.f32 0.0, %v2531_v50 }
0x17cb   :  { %v2560_v11 = vmul.f32 0.0, %v2540_v42 }
0x1836   :  { %v2546_v59 = vpop.permute.xlu0 %2545 }
0x1837   :  { %v2548_v49 = vmul.f32 %v2546_v59, %v2531_v50  ;;  %v2563_v55 = vpop.permute.xlu1 %2562 }
0x1838   :  { %v2565_v39 = vmul.f32 %v2563_v55, %v2540_v42 }
0x1839   :  { %2550 = vrot.lane.b32.xlu0 %v2548_v49, %s5805_s5 }
0x183a   :  { %2567 = vrot.lane.b32.xlu1 %v2565_v39, %s5805_s5 }
0x18ab   :  { %v2551_v30 = vpop.permute.xlu0 %2550 }
0x18ac   :  { %v6997_v23 = vadd.f32 %v2551_v30, %v2543_v19  ;;  %v2568_v16 = vpop.permute.xlu1 %2567 }
0x18ad   :  { %v7000_v51 = vadd.f32 %v2568_v16, %v2560_v11 }
0x18ae   :  { %5421 = vtanh.f32 %v6997_v23 }
0x18af   :  { %5423 = vtanh.f32 %v7000_v51 }
0x18b0   :  { %5425 = vtanh.f32 %v2526_v34 }
0x18b1   :  { %5427 = vtanh.f32 %v2535_v18 }
0x18b8   :  { %v5422_v24 = vpop.eup %5421 }
0x18b9   :  { %2556 = vrot.lane.b32.xlu0 %v5422_v24, %s5805_s5  ;;  %v5424_v46 = vpop.eup %5423 }
0x18ba   :  { %2573 = vrot.lane.b32.xlu1 %v5424_v46, %s5805_s5  ;;  %v5426_v52 = vpop.eup %5425 }
0x18bb   :  { %v2530_v53 = vmul.f32 0.5, %v5426_v52  ;;  %v5428_v7 = vpop.eup %5427 }
0x18bc   :  { %v2539_v22 = vmul.f32 0.5, %v5428_v7 }
0x18bd   :  { %v2532_v10 = vadd.f32 0.5, %v2530_v53 }
0x18be   :  { %v2541_v59 = vadd.f32 0.5, %v2539_v22 }
0x192b   :  { %v2557_v21 = vpop.permute.xlu0 %2556 }
0x192c   :  { %v2559_v50 = vmul.f32 %v2557_v21, %v2532_v10  ;;  %v2574_v28 = vpop.permute.xlu1 %2573 }
0x192d   :  { %v2576_v49 = vmul.f32 %v2574_v28, %v2541_v59 }
0x192e   :  { %2577 = vst.msk [vmem:[#allocation4] sm:$0xff] %vm725_vm3, %v2559_v50 }
0x192f   :  { %2579 = vrot.lane.b32.xlu1 %v2576_v49, %s5805_s5 }
0x19a1   :  { %v2580_v42 = vpop.permute.xlu1 %2579 }
0x19a2   :  { %2582 = vst.msk [vmem:[#allocation4 + $0x38] sm:$0xff] %vm731_vm4, %v2580_v42  ;;  %v2587_v36 = vsel %vm725_vm3, %v2559_v50, %v2580_v42 }
0x19a3   :  { %v2588_v31 = vpack.c.bf16 %v2587_v36, %v2587_v36 }
0x19a5   :  { %2622 = vmatmul.mubr.bf16.vlgmr.msra.gmra.mrb[68].mxu0 %v2588_v31  ;;  %2663 = vmatmul.mubr.bf16.vlgmr.msra.gmra.mrb[68].mxu1 %v2588_v31 }
0x19a6   :  { %2740 = vmatpush1.bf16.msra.mxu0 %v6772_v56  ;;  %2781 = vmatpush1.bf16.msra.mxu1 %v6774_v57 }
0x19a7   :  { %2741 = vmatprep.subr.bf16.mxu0 %v6776_v13  ;;  %2782 = vmatprep.subr.bf16.mxu1 %v6778_v63 }
0x19a8   :  { %2771 = vmatprep.mubr.bf16.mxu0 %v7880_v40  ;;  %2812 = vmatprep.mubr.bf16.mxu1 %v7880_v40 }
0x19aa   :  { %2742 = vmatpush1.bf16.msra.mxu0 %v6782_v8  ;;  %2783 = vmatpush1.bf16.msra.mxu1 %v6784_v25 }
0x19ab   :  { %2743 = vmatprep.subr.bf16.mxu0 %v6788_v2  ;;  %2784 = vmatprep.subr.bf16.mxu1 %v6790_v20 }
0x19ae   :  { %2744 = vmatpush1.bf16.msra.mxu0 %v6796_v15  ;;  %2785 = vmatpush1.bf16.msra.mxu1 %v6798_v60 }
0x19af   :  { %2745 = vmatprep.subr.bf16.mxu0 %v6803_v27  ;;  %2786 = vmatprep.subr.bf16.mxu1 %v6805_v38 }
0x19b2   :  { %2746 = vmatpush1.bf16.msra.mxu0 %v6809_v1  ;;  %2787 = vmatpush1.bf16.msra.mxu1 %v6811_v4 }
0x19b3   :  { %2747 = vmatprep.subr.bf16.mxu0 %v6815_v5  ;;  %2788 = vmatprep.subr.bf16.mxu1 %v6817_v45 }
0x19b6   :  { %2748 = vmatpush1.bf16.msra.mxu0 %v6823_v37  ;;  %2789 = vmatpush1.bf16.msra.mxu1 %v6825_v62 }
0x19b7   :  { %2749 = vmatprep.subr.bf16.mxu0 %v6829_v3  ;;  %2790 = vmatprep.subr.bf16.mxu1 %v6831_v29 }
0x19ba   :  { %2750 = vmatpush1.bf16.msra.mxu0 %v6835_v32  ;;  %2791 = vmatpush1.bf16.msra.mxu1 %v6837_v33 }
0x19bb   :  { %2751 = vmatprep.subr.bf16.mxu0 %v6841_v9  ;;  %2792 = vmatprep.subr.bf16.mxu1 %v6843_v12 }
0x19be   :  { %2752 = vmatpush1.bf16.msra.mxu0 %v6849_v0  ;;  %2793 = vmatpush1.bf16.msra.mxu1 %v6851_v61 }
0x19bf   :  { %2794 = vmatprep.subr.bf16.mxu1 %v6857_v44  ;;  %2753 = vmatprep.subr.bf16.mxu0 %v6855_v43 }
0x19c2   :  { %2754 = vmatpush1.bf16.msra.mxu0 %v6861_v47  ;;  %2795 = vmatpush1.bf16.msra.mxu1 %v6863_v48 }
0x19c3   :  { %2889 = vmatprep.subr.bf16.mxu0 %v6760_v6  ;;  %2930 = vmatprep.subr.bf16.mxu1 %v6762_v35 }
0x1a78   :  { %v2623_v55 = vpop.f32.mrb[68].mxu0  ;;  %v2664_v39 = vpop.f32.mrb[68].mxu1 }
0x1a79   :  { %v2671_v19 = vadd.f32 %v2623_v55, %v6927_v41  ;;  %v2673_v30 = vadd.f32 %v2664_v39, %v6980_v54  ;;  %v2625_v11 = vpop.f32.mrb[69].mxu0  ;;  %v2666_v16 = vpop.f32.mrb[69].mxu1 }
0x1a7a   :  { %v2672_v24 = vadd.f32 %v2625_v11, %v6932_v58  ;;  %v2674_v46 = vadd.f32 %v2666_v16, %v6985_v26  ;;  %v2627_v34 = vpop.f32.mrb[70].mxu0  ;;  %v2668_v18 = vpop.f32.mrb[70].mxu1 }
0x1a7b   :  { %v2628_v52 = vpop.f32.mrb[71].mxu0  ;;  %v2669_v53 = vpop.f32.mrb[71].mxu1  ;;  %v2675_v41 = vmul.f32 0.5, %v2671_v19  ;;  %v2684_v54 = vmul.f32 0.5, %v2673_v30 }
0x1a7c   :  { %5429 = vtanh.f32 %v2672_v24  ;;  %v2676_v18 = vmul.f32 0.5, %v2672_v24 }
0x1a7d   :  { %5431 = vtanh.f32 %v2674_v46 }
0x1a7e   :  { %5433 = vtanh.f32 %v2675_v41 }
0x1a7f   :  { %5435 = vtanh.f32 %v2684_v54 }
0x1a86   :  { %v5430_v7 = vpop.eup %5429 }
0x1a87   :  { %2695 = vrot.lane.b32.xlu1 %v5430_v7, %s5805_s5  ;;  %v5432_v10 = vpop.eup %5431 }
0x1a88   :  { %2712 = vrot.lane.b32.xlu0 %v5432_v10, %s5805_s5  ;;  %v5434_v21 = vpop.eup %5433 }
0x1a89   :  { %v2679_v58 = vmul.f32 0.5, %v5434_v21  ;;  %v5436_v22 = vpop.eup %5435 }
0x1a8a   :  { %v2688_v59 = vmul.f32 0.5, %v5436_v22 }
0x1a8b   :  { %v2681_v26 = vadd.f32 0.5, %v2679_v58 }
0x1a8c   :  { %v2690_v49 = vadd.f32 0.5, %v2688_v59 }
0x1a8d   :  { %v2693_v31 = vmul.f32 %v2681_v26, %v6997_v23  ;;  %v2685_v23 = vmul.f32 0.5, %v2674_v46 }
0x1a8e   :  { %v2710_v19 = vmul.f32 %v2690_v49, %v7000_v51 }
0x1af9   :  { %v2696_v50 = vpop.permute.xlu1 %2695 }
0x1afa   :  { %v2698_v28 = vmul.f32 %v2696_v50, %v2681_v26  ;;  %v2713_v42 = vpop.permute.xlu0 %2712 }
0x1afb   :  { %v2715_v36 = vmul.f32 %v2713_v42, %v2690_v49  ;;  %v7930_v49 = vld [vmem:[#allocation46_spill] sm:$0xff] }
0x1afc   :  { %2700 = vrot.lane.b32.xlu1 %v2698_v28, %s5805_s5 }
0x1afd   :  { %2717 = vrot.lane.b32.xlu0 %v2715_v36, %s5805_s5 }
0x1b6e   :  { %v2701_v55 = vpop.permute.xlu1 %2700 }
0x1b6f   :  { %v7052_v39 = vadd.f32 %v2701_v55, %v2693_v31  ;;  %v2718_v30 = vpop.permute.xlu0 %2717  ;;  %v7931_v55 = vld [vmem:[#allocation40_spill] sm:$0xff] }
0x1b70   :  { %v7056_v11 = vadd.f32 %v2718_v30, %v2710_v19  ;;  %v7932_v30 = vld [vmem:[#allocation47_spill] sm:$0xff] }
0x1b71   :  { %5437 = vtanh.f32 %v7052_v39 }
0x1b72   :  { %5439 = vtanh.f32 %v7056_v11 }
0x1b73   :  { %5441 = vtanh.f32 %v2676_v18 }
0x1b74   :  { %5443 = vtanh.f32 %v2685_v23 }
0x1b7b   :  { %v5438_v16 = vpop.eup %5437 }
0x1b7c   :  { %2706 = vrot.lane.b32.xlu1 %v5438_v16, %s5805_s5  ;;  %v5440_v34 = vpop.eup %5439 }
0x1b7d   :  { %2723 = vrot.lane.b32.xlu0 %v5440_v34, %s5805_s5  ;;  %v5442_v52 = vpop.eup %5441 }
0x1b7e   :  { %v2680_v53 = vmul.f32 0.5, %v5442_v52  ;;  %v5444_v7 = vpop.eup %5443 }
0x1b7f   :  { %v2689_v41 = vmul.f32 0.5, %v5444_v7 }
0x1b80   :  { %v2682_v10 = vadd.f32 0.5, %v2680_v53 }
0x1b81   :  { %v2691_v21 = vadd.f32 0.5, %v2689_v41 }
0x1bee   :  { %v2707_v51 = vpop.permute.xlu1 %2706 }
0x1bef   :  { %v2709_v54 = vmul.f32 %v2707_v51, %v2682_v10  ;;  %v2724_v58 = vpop.permute.xlu0 %2723 }
0x1bf0   :  { %v2726_v22 = vmul.f32 %v2724_v58, %v2691_v21 }
0x1bf1   :  { %2727 = vst.msk [vmem:[#allocation4 + $0x8] sm:$0xff] %vm725_vm3, %v2709_v54 }
0x1bf2   :  { %2729 = vrot.lane.b32.xlu0 %v2726_v22, %s5805_s5 }
0x1c64   :  { %v2730_v26 = vpop.permute.xlu0 %2729 }
0x1c65   :  { %2732 = vst.msk [vmem:[#allocation4 + $0x30] sm:$0xff] %vm731_vm4, %v2730_v26  ;;  %v2737_v24 = vsel %vm725_vm3, %v2709_v54, %v2730_v26 }
0x1c66   :  { %v2738_v46 = vpack.c.bf16 %v2737_v24, %v2737_v24 }
0x1c68   :  { %2772 = vmatmul.mubr.bf16.vlgmr.msra.gmra.mrb[72].mxu0 %v2738_v46  ;;  %2813 = vmatmul.mubr.bf16.vlgmr.msra.gmra.mrb[72].mxu1 %v2738_v46 }
0x1c69   :  { %2890 = vmatpush1.bf16.msra.mxu0 %v6772_v56  ;;  %2931 = vmatpush1.bf16.msra.mxu1 %v6774_v57 }
0x1c6a   :  { %2891 = vmatprep.subr.bf16.mxu0 %v6776_v13  ;;  %2932 = vmatprep.subr.bf16.mxu1 %v6778_v63 }
0x1c6b   :  { %2921 = vmatprep.mubr.bf16.mxu0 %v7880_v40  ;;  %2962 = vmatprep.mubr.bf16.mxu1 %v7880_v40 }
0x1c6d   :  { %2892 = vmatpush1.bf16.msra.mxu0 %v6782_v8  ;;  %2933 = vmatpush1.bf16.msra.mxu1 %v6784_v25 }
0x1c6e   :  { %2893 = vmatprep.subr.bf16.mxu0 %v6788_v2  ;;  %2934 = vmatprep.subr.bf16.mxu1 %v6790_v20 }
0x1c71   :  { %2894 = vmatpush1.bf16.msra.mxu0 %v6796_v15  ;;  %2935 = vmatpush1.bf16.msra.mxu1 %v6798_v60 }
0x1c72   :  { %2895 = vmatprep.subr.bf16.mxu0 %v6803_v27  ;;  %2936 = vmatprep.subr.bf16.mxu1 %v6805_v38 }
0x1c75   :  { %2896 = vmatpush1.bf16.msra.mxu0 %v6809_v1  ;;  %2937 = vmatpush1.bf16.msra.mxu1 %v6811_v4 }
0x1c76   :  { %2897 = vmatprep.subr.bf16.mxu0 %v6815_v5  ;;  %2938 = vmatprep.subr.bf16.mxu1 %v6817_v45 }
0x1c79   :  { %2898 = vmatpush1.bf16.msra.mxu0 %v6823_v37  ;;  %2939 = vmatpush1.bf16.msra.mxu1 %v6825_v62 }
0x1c7a   :  { %2899 = vmatprep.subr.bf16.mxu0 %v6829_v3  ;;  %2940 = vmatprep.subr.bf16.mxu1 %v6831_v29 }
0x1c7d   :  { %2900 = vmatpush1.bf16.msra.mxu0 %v6835_v32  ;;  %2941 = vmatpush1.bf16.msra.mxu1 %v6837_v33 }
0x1c7e   :  { %2901 = vmatprep.subr.bf16.mxu0 %v6841_v9  ;;  %2942 = vmatprep.subr.bf16.mxu1 %v6843_v12 }
0x1c81   :  { %2902 = vmatpush1.bf16.msra.mxu0 %v6849_v0  ;;  %2943 = vmatpush1.bf16.msra.mxu1 %v6851_v61 }
0x1c82   :  { %2944 = vmatprep.subr.bf16.mxu1 %v6857_v44  ;;  %2903 = vmatprep.subr.bf16.mxu0 %v6855_v43 }
0x1c85   :  { %2904 = vmatpush1.bf16.msra.mxu0 %v6861_v47  ;;  %2945 = vmatpush1.bf16.msra.mxu1 %v6863_v48 }
0x1c86   :  { %3039 = vmatprep.subr.bf16.mxu0 %v6760_v6  ;;  %3080 = vmatprep.subr.bf16.mxu1 %v6762_v35 }
0x1d3b   :  { %v2773_v50 = vpop.f32.mrb[72].mxu0  ;;  %v2814_v59 = vpop.f32.mrb[72].mxu1 }
0x1d3c   :  { %v2821_v28 = vadd.f32 %v2773_v50, %v6937_v17  ;;  %v2823_v42 = vadd.f32 %v2814_v59, %v7930_v49  ;;  %v2775_v36 = vpop.f32.mrb[73].mxu0  ;;  %v2816_v31 = vpop.f32.mrb[73].mxu1 }
0x1d3d   :  { %v2822_v19 = vadd.f32 %v2775_v36, %v7931_v55  ;;  %v2824_v16 = vadd.f32 %v2816_v31, %v7932_v30  ;;  %v2777_v34 = vpop.f32.mrb[74].mxu0  ;;  %v2818_v18 = vpop.f32.mrb[74].mxu1 }
0x1d3e   :  { %v2778_v23 = vpop.f32.mrb[75].mxu0  ;;  %v2819_v52 = vpop.f32.mrb[75].mxu1  ;;  %v2825_v17 = vmul.f32 0.5, %v2821_v28  ;;  %v2834_v53 = vmul.f32 0.5, %v2823_v42 }
0x1d3f   :  { %5445 = vtanh.f32 %v2822_v19  ;;  %v2826_v55 = vmul.f32 0.5, %v2822_v19 }
0x1d40   :  { %5447 = vtanh.f32 %v2824_v16 }
0x1d41   :  { %5449 = vtanh.f32 %v2825_v17 }
0x1d42   :  { %5451 = vtanh.f32 %v2834_v53 }
0x1d49   :  { %v5446_v6 = vpop.eup %5445 }
0x1d4a   :  { %2845 = vrot.lane.b32.xlu0 %v5446_v6, %s5805_s5  ;;  %v5448_v35 = vpop.eup %5447 }
0x1d4b   :  { %2862 = vrot.lane.b32.xlu1 %v5448_v35, %s5805_s5  ;;  %v5450_v7 = vpop.eup %5449 }
0x1d4c   :  { %v2829_v10 = vmul.f32 0.5, %v5450_v7  ;;  %v5452_v51 = vpop.eup %5451 }
0x1d4d   :  { %v2838_v21 = vmul.f32 0.5, %v5452_v51 }
0x1d4e   :  { %v2831_v41 = vadd.f32 0.5, %v2829_v10 }
0x1d4f   :  { %v2840_v22 = vadd.f32 0.5, %v2838_v21 }
0x1d50   :  { %v2843_v46 = vmul.f32 %v2831_v41, %v7052_v39  ;;  %v2835_v39 = vmul.f32 0.5, %v2824_v16 }
0x1d51   :  { %v2860_v28 = vmul.f32 %v2840_v22, %v7056_v11 }
0x1dbc   :  { %v2846_v54 = vpop.permute.xlu0 %2845 }
0x1dbd   :  { %v2848_v58 = vmul.f32 %v2846_v54, %v2831_v41  ;;  %v2863_v26 = vpop.permute.xlu1 %2862 }
0x1dbe   :  { %v2865_v24 = vmul.f32 %v2863_v26, %v2840_v22 }
0x1dbf   :  { %2850 = vrot.lane.b32.xlu0 %v2848_v58, %s5805_s5 }
0x1dc0   :  { %2867 = vrot.lane.b32.xlu1 %v2865_v24, %s5805_s5 }
0x1e31   :  { %v2851_v50 = vpop.permute.xlu0 %2850 }
0x1e32   :  { %v7108_v59 = vadd.f32 %v2851_v50, %v2843_v46  ;;  %v2868_v49 = vpop.permute.xlu1 %2867 }
0x1e33   :  { %v7112_v42 = vadd.f32 %v2868_v49, %v2860_v28 }
0x1e34   :  { %5453 = vtanh.f32 %v7108_v59 }
0x1e35   :  { %5455 = vtanh.f32 %v7112_v42 }
0x1e36   :  { %5457 = vtanh.f32 %v2826_v55 }
0x1e37   :  { %5459 = vtanh.f32 %v2835_v39 }
0x1e3e   :  { %v5454_v36 = vpop.eup %5453 }
0x1e3f   :  { %2856 = vrot.lane.b32.xlu0 %v5454_v36, %s5805_s5  ;;  %v5456_v31 = vpop.eup %5455 }
0x1e40   :  { %2873 = vrot.lane.b32.xlu1 %v5456_v31, %s5805_s5  ;;  %v5458_v30 = vpop.eup %5457 }
0x1e41   :  { %v2830_v34 = vmul.f32 0.5, %v5458_v30  ;;  %v5460_v18 = vpop.eup %5459 }
0x1e42   :  { %v2839_v52 = vmul.f32 0.5, %v5460_v18 }
0x1e43   :  { %v2832_v23 = vadd.f32 0.5, %v2830_v34 }
0x1e44   :  { %v2841_v35 = vadd.f32 0.5, %v2839_v52 }
0x1eb1   :  { %v2857_v11 = vpop.permute.xlu0 %2856 }
0x1eb2   :  { %v2859_v6 = vmul.f32 %v2857_v11, %v2832_v23  ;;  %v2874_v17 = vpop.permute.xlu1 %2873 }
0x1eb3   :  { %v2876_v53 = vmul.f32 %v2874_v17, %v2841_v35  ;;  %v7184_v35 = vld [vmem:[#allocation11 + $0x8] ss:$16 sps:$4 sm:$0xff]   ;;  %v7187_v17 = vld [vmem:[#allocation11 + $0x24] ss:$16 sps:$4 sm:$0xff]  }
0x1eb4   :  { %2877 = vst.msk [vmem:[#allocation4 + $0x10] sm:$0xff] %vm725_vm3, %v2859_v6 }
0x1eb5   :  { %2879 = vrot.lane.b32.xlu1 %v2876_v53, %s5805_s5  ;;  %v7190_v53 = vld [vmem:[#allocation11 + $0x2c] ss:$16 sps:$4 sm:$0xff]  }
0x1f27   :  { %v2880_v7 = vpop.permute.xlu1 %2879 }
0x1f28   :  { %2882 = vst.msk [vmem:[#allocation4 + $0x28] sm:$0xff] %vm731_vm4, %v2880_v7  ;;  %v2887_v19 = vsel %vm725_vm3, %v2859_v6, %v2880_v7  ;;  %v7181_v6 = vld [vmem:[#allocation11] ss:$16 sps:$4 sm:$0xff]  }
0x1f29   :  { %v2888_v16 = vpack.c.bf16 %v2887_v19, %v2887_v19  ;;  %v7195_v7 = vld [vmem:[#allocation11 + $0x20] ss:$16 sps:$4 sm:$0xff]   ;;  %v7198_v19 = vld [vmem:[#allocation11 + $0x28] ss:$16 sps:$4 sm:$0xff]  }
0x1f2b   :  { %2922 = vmatmul.mubr.bf16.vlgmr.msra.gmra.mrb[76].mxu0 %v2888_v16  ;;  %2963 = vmatmul.mubr.bf16.vlgmr.msra.gmra.mrb[76].mxu1 %v2888_v16  ;;  %v7201_v16 = vld [vmem:[#allocation11 + $0x44] ss:$16 sps:$4 sm:$0xff]  }
0x1f2c   :  { %3040 = vmatpush1.bf16.msra.mxu0 %v6772_v56  ;;  %3081 = vmatpush1.bf16.msra.mxu1 %v6774_v57  ;;  %v7153_v56 = vld [vmem:[#allocation11 + $0x4] ss:$16 sps:$4 sm:$0xff]   ;;  %v7156_v57 = vld [vmem:[#allocation11 + $0xc] ss:$16 sps:$4 sm:$0xff]  }
0x1f2d   :  { %3041 = vmatprep.subr.bf16.mxu0 %v6776_v13  ;;  %3082 = vmatprep.subr.bf16.mxu1 %v6778_v63 }
0x1f2e   :  { %3071 = vmatprep.mubr.bf16.mxu0 %v7880_v40  ;;  %3112 = vmatprep.mubr.bf16.mxu1 %v7880_v40 }
0x1f30   :  { %3042 = vmatpush1.bf16.msra.mxu0 %v6782_v8  ;;  %3083 = vmatpush1.bf16.msra.mxu1 %v6784_v25  ;;  %v7933_v8 = vld [vmem:[#allocation34_spill] sm:$0xff] }
0x1f31   :  { %3043 = vmatprep.subr.bf16.mxu0 %v6788_v2  ;;  %3084 = vmatprep.subr.bf16.mxu1 %v6790_v20  ;;  %v7934_v2 = vld [vmem:[#allocation44_spill] sm:$0xff] }
0x1f34   :  { %3044 = vmatpush1.bf16.msra.mxu0 %v6796_v15  ;;  %3085 = vmatpush1.bf16.msra.mxu1 %v6798_v60 }
0x1f35   :  { %3045 = vmatprep.subr.bf16.mxu0 %v6803_v27  ;;  %3086 = vmatprep.subr.bf16.mxu1 %v6805_v38  ;;  %v7935_v27 = vld [vmem:[#allocation36_spill] sm:$0xff] }
0x1f38   :  { %3046 = vmatpush1.bf16.msra.mxu0 %v6809_v1  ;;  %3087 = vmatpush1.bf16.msra.mxu1 %v6811_v4  ;;  %v7936_v1 = vld [vmem:[#allocation45_spill] sm:$0xff] }
0x1f39   :  { %3047 = vmatprep.subr.bf16.mxu0 %v6815_v5  ;;  %3088 = vmatprep.subr.bf16.mxu1 %v6817_v45 }
0x1f3c   :  { %3048 = vmatpush1.bf16.msra.mxu0 %v6823_v37  ;;  %3089 = vmatpush1.bf16.msra.mxu1 %v6825_v62 }
0x1f3d   :  { %3049 = vmatprep.subr.bf16.mxu0 %v6829_v3  ;;  %3090 = vmatprep.subr.bf16.mxu1 %v6831_v29 }
0x1f40   :  { %3050 = vmatpush1.bf16.msra.mxu0 %v6835_v32  ;;  %3091 = vmatpush1.bf16.msra.mxu1 %v6837_v33 }
0x1f41   :  { %3051 = vmatprep.subr.bf16.mxu0 %v6841_v9  ;;  %3092 = vmatprep.subr.bf16.mxu1 %v6843_v12 }
0x1f44   :  { %3052 = vmatpush1.bf16.msra.mxu0 %v6849_v0  ;;  %3093 = vmatpush1.bf16.msra.mxu1 %v6851_v61 }
0x1f45   :  { %3094 = vmatprep.subr.bf16.mxu1 %v6857_v44  ;;  %3053 = vmatprep.subr.bf16.mxu0 %v6855_v43 }
0x1f48   :  { %3054 = vmatpush1.bf16.msra.mxu0 %v6861_v47  ;;  %3095 = vmatpush1.bf16.msra.mxu1 %v6863_v48 }
0x1f49   :  { %3189 = vmatprep.subr.bf16.mxu0 %v7153_v56  ;;  %3230 = vmatprep.subr.bf16.mxu1 %v7156_v57 }
0x1ffe   :  { %v2923_v13 = vpop.f32.mrb[76].mxu0  ;;  %v2964_v63 = vpop.f32.mrb[76].mxu1 }
0x1fff   :  { %v2971_v25 = vadd.f32 %v2923_v13, %v7933_v8  ;;  %v2973_v20 = vadd.f32 %v2964_v63, %v7934_v2  ;;  %v2925_v15 = vpop.f32.mrb[77].mxu0  ;;  %v2966_v60 = vpop.f32.mrb[77].mxu1  ;;  %v7204_v13 = vld [vmem:[#allocation11 + $0x4c] ss:$16 sps:$4 sm:$0xff]   ;;  %v7207_v63 = vld [vmem:[#allocation11 + $0x40] ss:$16 sps:$4 sm:$0xff]  }
0x2000   :  { %v2972_v38 = vadd.f32 %v2925_v15, %v7935_v27  ;;  %v2974_v4 = vadd.f32 %v2966_v60, %v7936_v1  ;;  %v2927_v5 = vpop.f32.mrb[78].mxu0  ;;  %v2968_v45 = vpop.f32.mrb[78].mxu1  ;;  %v7210_v8 = vld [vmem:[#allocation11 + $0x48] ss:$16 sps:$4 sm:$0xff]   ;;  %v7216_v2 = vld [vmem:[#allocation11 + $0x6c] ss:$16 sps:$4 sm:$0xff]  }
0x2001   :  { %v2928_v37 = vpop.f32.mrb[79].mxu0  ;;  %v2969_v62 = vpop.f32.mrb[79].mxu1  ;;  %v2975_v32 = vmul.f32 0.5, %v2971_v25  ;;  %v2984_v33 = vmul.f32 0.5, %v2973_v20  ;;  %v7213_v25 = vld [vmem:[#allocation11 + $0x64] ss:$16 sps:$4 sm:$0xff]  }
0x2002   :  { %5461 = vtanh.f32 %v2972_v38  ;;  %v2976_v50 = vmul.f32 0.5, %v2972_v38  ;;  %v7219_v20 = vld [vmem:[#allocation11 + $0x60] ss:$16 sps:$4 sm:$0xff]   ;;  %v7222_v15 = vld [vmem:[#allocation11 + $0x68] ss:$16 sps:$4 sm:$0xff]  }
0x2003   :  { %5463 = vtanh.f32 %v2974_v4  ;;  %v7225_v60 = vld [vmem:[#allocation11 + $0x84] ss:$16 sps:$4 sm:$0xff]   ;;  %v7228_v27 = vld [vmem:[#allocation11 + $0x8c] ss:$16 sps:$4 sm:$0xff]   ;;  %v7231_v38 = vld [vmem:[#allocation11 + $0x80] ss:$16 sps:$4 sm:$0xff]  }
0x2004   :  { %5465 = vtanh.f32 %v2975_v32  ;;  %v7234_v1 = vld [vmem:[#allocation11 + $0x88] ss:$16 sps:$4 sm:$0xff]   ;;  %v7240_v5 = vld [vmem:[#allocation11 + $0xac] ss:$16 sps:$4 sm:$0xff]   ;;  %v7243_v45 = vld [vmem:[#allocation11 + $0xa0] ss:$16 sps:$4 sm:$0xff]  }
0x2005   :  { %5467 = vtanh.f32 %v2984_v33  ;;  %v7246_v37 = vld [vmem:[#allocation11 + $0xa8] ss:$16 sps:$4 sm:$0xff]   ;;  %v7249_v62 = vld [vmem:[#allocation11 + $0xc4] ss:$16 sps:$4 sm:$0xff]   ;;  %v7261_v33 = vld [vmem:[#allocation11 + $0xec] ss:$16 sps:$4 sm:$0xff]  }
0x2006   :  { %v7258_v32 = vld [vmem:[#allocation11 + $0xc8] ss:$16 sps:$4 sm:$0xff]  }
0x200c   :  { %v5462_v3 = vpop.eup %5461 }
0x200d   :  { %2995 = vrot.lane.b32.xlu1 %v5462_v3, %s5805_s5  ;;  %v5464_v29 = vpop.eup %5463  ;;  %v7252_v3 = vld [vmem:[#allocation11 + $0xcc] ss:$16 sps:$4 sm:$0xff]  }
0x200e   :  { %3012 = vrot.lane.b32.xlu0 %v5464_v29, %s5805_s5  ;;  %v5466_v9 = vpop.eup %5465  ;;  %v7255_v29 = vld [vmem:[#allocation11 + $0xc0] ss:$16 sps:$4 sm:$0xff]  }
0x200f   :  { %v2979_v12 = vmul.f32 0.5, %v5466_v9  ;;  %v5468_v0 = vpop.eup %5467  ;;  %v7264_v9 = vld [vmem:[#allocation11 + $0xe4] ss:$16 sps:$4 sm:$0xff]  }
0x2010   :  { %v2988_v44 = vmul.f32 0.5, %v5468_v0  ;;  %v7270_v0 = vld [vmem:[#allocation11 + $0xe8] ss:$16 sps:$4 sm:$0xff]  }
0x2011   :  { %v2981_v61 = vadd.f32 0.5, %v2979_v12  ;;  %v7267_v12 = vld [vmem:[#allocation11 + $0xe0] ss:$16 sps:$4 sm:$0xff]  }
0x2012   :  { %v2990_v48 = vadd.f32 0.5, %v2988_v44  ;;  %v7937_v44 = vld [vmem:[#allocation31_spill] sm:$0xff] }
0x2013   :  { %v2993_v41 = vmul.f32 %v2981_v61, %v7108_v59  ;;  %v2985_v59 = vmul.f32 0.5, %v2974_v4  ;;  %v7237_v4 = vld [vmem:[#allocation11 + $0xa4] ss:$16 sps:$4 sm:$0xff]  }
0x2014   :  { %v3010_v58 = vmul.f32 %v2990_v48, %v7112_v42 }
0x207f   :  { %v2996_v43 = vpop.permute.xlu1 %2995 }
0x2080   :  { %v2998_v47 = vmul.f32 %v2996_v43, %v2981_v61  ;;  %v3013_v10 = vpop.permute.xlu0 %3012 }
0x2081   :  { %v3015_v51 = vmul.f32 %v3013_v10, %v2990_v48  ;;  %v7938_v48 = vld [vmem:[#allocation41_spill] sm:$0xff] }
0x2082   :  { %3000 = vrot.lane.b32.xlu1 %v2998_v47, %s5805_s5 }
0x2083   :  { %3017 = vrot.lane.b32.xlu0 %v3015_v51, %s5805_s5 }
0x20f4   :  { %v3001_v54 = vpop.permute.xlu1 %3000 }
0x20f5   :  { %v7168_v21 = vadd.f32 %v3001_v54, %v2993_v41  ;;  %v3018_v22 = vpop.permute.xlu0 %3017  ;;  %v7939_v54 = vld [vmem:[#allocation32_spill] sm:$0xff] }
0x20f6   :  { %v7172_v26 = vadd.f32 %v3018_v22, %v3010_v58  ;;  %v7940_v22 = vld [vmem:[#allocation42_spill] sm:$0xff] }
0x20f7   :  { %5469 = vtanh.f32 %v7168_v21 }
0x20f8   :  { %5471 = vtanh.f32 %v7172_v26 }
0x20f9   :  { %5473 = vtanh.f32 %v2976_v50 }
0x20fa   :  { %5475 = vtanh.f32 %v2985_v59 }
0x2101   :  { %v5470_v24 = vpop.eup %5469 }
0x2102   :  { %3006 = vrot.lane.b32.xlu1 %v5470_v24, %s5805_s5  ;;  %v5472_v46 = vpop.eup %5471 }
0x2103   :  { %3023 = vrot.lane.b32.xlu0 %v5472_v46, %s5805_s5  ;;  %v5474_v28 = vpop.eup %5473 }
0x2104   :  { %v2980_v49 = vmul.f32 0.5, %v5474_v28  ;;  %v5476_v36 = vpop.eup %5475 }
0x2105   :  { %v2989_v55 = vmul.f32 0.5, %v5476_v36 }
0x2106   :  { %v2982_v31 = vadd.f32 0.5, %v2980_v49 }
0x2107   :  { %v2991_v30 = vadd.f32 0.5, %v2989_v55 }
0x2174   :  { %v3007_v42 = vpop.permute.xlu1 %3006 }
0x2175   :  { %v3009_v39 = vmul.f32 %v3007_v42, %v2982_v31  ;;  %v3024_v34 = vpop.permute.xlu0 %3023 }
0x2176   :  { %v3026_v18 = vmul.f32 %v3024_v34, %v2991_v30 }
0x2177   :  { %3027 = vst.msk [vmem:[#allocation4 + $0x18] sm:$0xff] %vm725_vm3, %v3009_v39 }
0x2178   :  { %3029 = vrot.lane.b32.xlu0 %v3026_v18, %s5805_s5 }
0x21ea   :  { %v3030_v23 = vpop.permute.xlu0 %3029 }
0x21eb   :  { %3032 = vst.msk [vmem:[#allocation4 + $0x20] sm:$0xff] %vm731_vm4, %v3030_v23  ;;  %v3037_v11 = vsel %vm725_vm3, %v3009_v39, %v3030_v23 }
0x21ec   :  { %v3038_v52 = vpack.c.bf16 %v3037_v11, %v3037_v11 }
0x21ee   :  { %3072 = vmatmul.mubr.bf16.vlgmr.msra.gmra.mrb[80].mxu0 %v3038_v52  ;;  %3113 = vmatmul.mubr.bf16.vlgmr.msra.gmra.mrb[80].mxu1 %v3038_v52 }
0x21ef   :  { %3190 = vmatpush1.bf16.msra.mxu0 %v7181_v6  ;;  %3231 = vmatpush1.bf16.msra.mxu1 %v7184_v35 }
0x21f0   :  { %3191 = vmatprep.subr.bf16.mxu0 %v7187_v17  ;;  %3232 = vmatprep.subr.bf16.mxu1 %v7190_v53 }
0x21f1   :  { %3221 = vmatprep.mubr.bf16.mxu0 %v7880_v40  ;;  %3262 = vmatprep.mubr.bf16.mxu1 %v7880_v40 }
0x21f3   :  { %3192 = vmatpush1.bf16.msra.mxu0 %v7195_v7  ;;  %3233 = vmatpush1.bf16.msra.mxu1 %v7198_v19 }
0x21f4   :  { %3193 = vmatprep.subr.bf16.mxu0 %v7201_v16  ;;  %3234 = vmatprep.subr.bf16.mxu1 %v7204_v13 }
0x21f7   :  { %3194 = vmatpush1.bf16.msra.mxu0 %v7207_v63  ;;  %3235 = vmatpush1.bf16.msra.mxu1 %v7210_v8 }
0x21f8   :  { %3195 = vmatprep.subr.bf16.mxu0 %v7213_v25  ;;  %3236 = vmatprep.subr.bf16.mxu1 %v7216_v2 }
0x21fb   :  { %3196 = vmatpush1.bf16.msra.mxu0 %v7219_v20  ;;  %3237 = vmatpush1.bf16.msra.mxu1 %v7222_v15 }
0x21fc   :  { %3197 = vmatprep.subr.bf16.mxu0 %v7225_v60  ;;  %3238 = vmatprep.subr.bf16.mxu1 %v7228_v27 }
0x21ff   :  { %3198 = vmatpush1.bf16.msra.mxu0 %v7231_v38  ;;  %3239 = vmatpush1.bf16.msra.mxu1 %v7234_v1 }
0x2200   :  { %3199 = vmatprep.subr.bf16.mxu0 %v7237_v4  ;;  %3240 = vmatprep.subr.bf16.mxu1 %v7240_v5 }
0x2203   :  { %3200 = vmatpush1.bf16.msra.mxu0 %v7243_v45  ;;  %3241 = vmatpush1.bf16.msra.mxu1 %v7246_v37 }
0x2204   :  { %3201 = vmatprep.subr.bf16.mxu0 %v7249_v62  ;;  %3242 = vmatprep.subr.bf16.mxu1 %v7252_v3 }
0x2207   :  { %3202 = vmatpush1.bf16.msra.mxu0 %v7255_v29  ;;  %3243 = vmatpush1.bf16.msra.mxu1 %v7258_v32 }
0x2208   :  { %3244 = vmatprep.subr.bf16.mxu1 %v7261_v33  ;;  %3203 = vmatprep.subr.bf16.mxu0 %v7264_v9 }
0x220b   :  { %3204 = vmatpush1.bf16.msra.mxu0 %v7267_v12  ;;  %3245 = vmatpush1.bf16.msra.mxu1 %v7270_v0 }
0x220c   :  { %3339 = vmatprep.subr.bf16.mxu0 %v7153_v56  ;;  %3380 = vmatprep.subr.bf16.mxu1 %v7156_v57 }
0x22c1   :  { %v3073_v61 = vpop.f32.mrb[80].mxu0  ;;  %v3114_v43 = vpop.f32.mrb[80].mxu1 }
0x22c2   :  { %v3121_v47 = vadd.f32 %v3073_v61, %v7937_v44  ;;  %v3123_v10 = vadd.f32 %v3114_v43, %v7938_v48  ;;  %v3075_v51 = vpop.f32.mrb[81].mxu0  ;;  %v3116_v41 = vpop.f32.mrb[81].mxu1 }
0x22c3   :  { %v3122_v58 = vadd.f32 %v3075_v51, %v7939_v54  ;;  %v3124_v24 = vadd.f32 %v3116_v41, %v7940_v22  ;;  %v3077_v46 = vpop.f32.mrb[82].mxu0  ;;  %v3118_v50 = vpop.f32.mrb[82].mxu1 }
0x22c4   :  { %v3078_v59 = vpop.f32.mrb[83].mxu0  ;;  %v3119_v28 = vpop.f32.mrb[83].mxu1  ;;  %v3125_v31 = vmul.f32 0.5, %v3121_v47  ;;  %v3134_v42 = vmul.f32 0.5, %v3123_v10 }
0x22c5   :  { %5477 = vtanh.f32 %v3122_v58  ;;  %v3126_v46 = vmul.f32 0.5, %v3122_v58 }
0x22c6   :  { %5479 = vtanh.f32 %v3124_v24 }
0x22c7   :  { %5481 = vtanh.f32 %v3125_v31 }
0x22c8   :  { %5483 = vtanh.f32 %v3134_v42 }
0x22cf   :  { %v5478_v49 = vpop.eup %5477 }
0x22d0   :  { %3145 = vrot.lane.b32.xlu0 %v5478_v49, %s5805_s5  ;;  %v5480_v36 = vpop.eup %5479 }
0x22d1   :  { %3162 = vrot.lane.b32.xlu1 %v5480_v36, %s5805_s5  ;;  %v5482_v55 = vpop.eup %5481 }
0x22d2   :  { %v3129_v39 = vmul.f32 0.5, %v5482_v55  ;;  %v5484_v30 = vpop.eup %5483 }
0x22d3   :  { %v3138_v23 = vmul.f32 0.5, %v5484_v30 }
0x22d4   :  { %v3131_v34 = vadd.f32 0.5, %v3129_v39 }
0x22d5   :  { %v3140_v52 = vadd.f32 0.5, %v3138_v23  ;;  %v7941_v23 = vld [vmem:[#allocation29_spill] sm:$0xff] }
0x22d6   :  { %v3143_v44 = vmul.f32 %v3131_v34, %v7168_v21  ;;  %v3135_v21 = vmul.f32 0.5, %v3124_v24 }
0x22d7   :  { %v3160_v10 = vmul.f32 %v3140_v52, %v7172_v26 }
0x2342   :  { %v3146_v18 = vpop.permute.xlu0 %3145 }
0x2343   :  { %v3148_v11 = vmul.f32 %v3146_v18, %v3131_v34  ;;  %v3163_v61 = vpop.permute.xlu1 %3162 }
0x2344   :  { %v3165_v43 = vmul.f32 %v3163_v61, %v3140_v52  ;;  %v7942_v52 = vld [vmem:[#allocation37_spill] sm:$0xff] }
0x2345   :  { %3150 = vrot.lane.b32.xlu0 %v3148_v11, %s5805_s5 }
0x2346   :  { %3167 = vrot.lane.b32.xlu1 %v3165_v43, %s5805_s5 }
0x23b7   :  { %v3151_v47 = vpop.permute.xlu0 %3150 }
0x23b8   :  { %v7284_v48 = vadd.f32 %v3151_v47, %v3143_v44  ;;  %v3168_v51 = vpop.permute.xlu1 %3167  ;;  %v7943_v47 = vld [vmem:[#allocation30_spill] sm:$0xff] }
0x23b9   :  { %v7288_v41 = vadd.f32 %v3168_v51, %v3160_v10  ;;  %v7944_v51 = vld [vmem:[#allocation39_spill] sm:$0xff] }
0x23ba   :  { %5485 = vtanh.f32 %v7284_v48 }
0x23bb   :  { %5487 = vtanh.f32 %v7288_v41 }
0x23bc   :  { %5489 = vtanh.f32 %v3126_v46 }
0x23bd   :  { %5491 = vtanh.f32 %v3135_v21 }
0x23c4   :  { %v5486_v54 = vpop.eup %5485 }
0x23c5   :  { %3156 = vrot.lane.b32.xlu0 %v5486_v54, %s5805_s5  ;;  %v5488_v22 = vpop.eup %5487 }
0x23c6   :  { %3173 = vrot.lane.b32.xlu1 %v5488_v22, %s5805_s5  ;;  %v5490_v50 = vpop.eup %5489 }
0x23c7   :  { %v3130_v59 = vmul.f32 0.5, %v5490_v50  ;;  %v5492_v28 = vpop.eup %5491 }
0x23c8   :  { %v3139_v26 = vmul.f32 0.5, %v5492_v28 }
0x23c9   :  { %v3132_v49 = vadd.f32 0.5, %v3130_v59 }
0x23ca   :  { %v3141_v42 = vadd.f32 0.5, %v3139_v26 }
0x2437   :  { %v3157_v36 = vpop.permute.xlu0 %3156 }
0x2438   :  { %v3159_v31 = vmul.f32 %v3157_v36, %v3132_v49  ;;  %v3174_v55 = vpop.permute.xlu1 %3173 }
0x2439   :  { %v3176_v39 = vmul.f32 %v3174_v55, %v3141_v42 }
0x243a   :  { %3177 = vst.msk [vmem:[#allocation4 + $0x20] sm:$0xff] %vm725_vm3, %v3159_v31 }
0x243b   :  { %3179 = vrot.lane.b32.xlu1 %v3176_v39, %s5805_s5 }
0x24ad   :  { %v3180_v30 = vpop.permute.xlu1 %3179 }
0x24ae   :  { %3182 = vst.msk [vmem:[#allocation4 + $0x18] sm:$0xff] %vm731_vm4, %v3180_v30  ;;  %v3187_v58 = vsel %vm725_vm3, %v3159_v31, %v3180_v30 }
0x24af   :  { %v3188_v24 = vpack.c.bf16 %v3187_v58, %v3187_v58 }
0x24b1   :  { %3222 = vmatmul.mubr.bf16.vlgmr.msra.gmra.mrb[84].mxu0 %v3188_v24  ;;  %3263 = vmatmul.mubr.bf16.vlgmr.msra.gmra.mrb[84].mxu1 %v3188_v24 }
0x24b2   :  { %3340 = vmatpush1.bf16.msra.mxu0 %v7181_v6  ;;  %3381 = vmatpush1.bf16.msra.mxu1 %v7184_v35 }
0x24b3   :  { %3341 = vmatprep.subr.bf16.mxu0 %v7187_v17  ;;  %3382 = vmatprep.subr.bf16.mxu1 %v7190_v53 }
0x24b4   :  { %3371 = vmatprep.mubr.bf16.mxu0 %v7880_v40  ;;  %3412 = vmatprep.mubr.bf16.mxu1 %v7880_v40 }
0x24b6   :  { %3342 = vmatpush1.bf16.msra.mxu0 %v7195_v7  ;;  %3383 = vmatpush1.bf16.msra.mxu1 %v7198_v19 }
0x24b7   :  { %3343 = vmatprep.subr.bf16.mxu0 %v7201_v16  ;;  %3384 = vmatprep.subr.bf16.mxu1 %v7204_v13 }
0x24ba   :  { %3344 = vmatpush1.bf16.msra.mxu0 %v7207_v63  ;;  %3385 = vmatpush1.bf16.msra.mxu1 %v7210_v8 }
0x24bb   :  { %3345 = vmatprep.subr.bf16.mxu0 %v7213_v25  ;;  %3386 = vmatprep.subr.bf16.mxu1 %v7216_v2 }
0x24be   :  { %3346 = vmatpush1.bf16.msra.mxu0 %v7219_v20  ;;  %3387 = vmatpush1.bf16.msra.mxu1 %v7222_v15 }
0x24bf   :  { %3347 = vmatprep.subr.bf16.mxu0 %v7225_v60  ;;  %3388 = vmatprep.subr.bf16.mxu1 %v7228_v27 }
0x24c2   :  { %3348 = vmatpush1.bf16.msra.mxu0 %v7231_v38  ;;  %3389 = vmatpush1.bf16.msra.mxu1 %v7234_v1 }
0x24c3   :  { %3349 = vmatprep.subr.bf16.mxu0 %v7237_v4  ;;  %3390 = vmatprep.subr.bf16.mxu1 %v7240_v5 }
0x24c6   :  { %3350 = vmatpush1.bf16.msra.mxu0 %v7243_v45  ;;  %3391 = vmatpush1.bf16.msra.mxu1 %v7246_v37 }
0x24c7   :  { %3351 = vmatprep.subr.bf16.mxu0 %v7249_v62  ;;  %3392 = vmatprep.subr.bf16.mxu1 %v7252_v3 }
0x24ca   :  { %3352 = vmatpush1.bf16.msra.mxu0 %v7255_v29  ;;  %3393 = vmatpush1.bf16.msra.mxu1 %v7258_v32 }
0x24cb   :  { %3394 = vmatprep.subr.bf16.mxu1 %v7261_v33  ;;  %3353 = vmatprep.subr.bf16.mxu0 %v7264_v9 }
0x24ce   :  { %3354 = vmatpush1.bf16.msra.mxu0 %v7267_v12  ;;  %3395 = vmatpush1.bf16.msra.mxu1 %v7270_v0 }
0x24cf   :  { %3489 = vmatprep.subr.bf16.mxu0 %v7153_v56  ;;  %3530 = vmatprep.subr.bf16.mxu1 %v7156_v57 }
0x2584   :  { %v3223_v34 = vpop.f32.mrb[84].mxu0  ;;  %v3264_v18 = vpop.f32.mrb[84].mxu1 }
0x2585   :  { %v3271_v11 = vadd.f32 %v3223_v34, %v7941_v23  ;;  %v3273_v61 = vadd.f32 %v3264_v18, %v7942_v52  ;;  %v3225_v43 = vpop.f32.mrb[85].mxu0  ;;  %v3266_v44 = vpop.f32.mrb[85].mxu1 }
0x2586   :  { %v3272_v10 = vadd.f32 %v3225_v43, %v7943_v47  ;;  %v3274_v54 = vadd.f32 %v3266_v44, %v7944_v51  ;;  %v3227_v22 = vpop.f32.mrb[86].mxu0  ;;  %v3268_v46 = vpop.f32.mrb[86].mxu1 }
0x2587   :  { %v3228_v21 = vpop.f32.mrb[87].mxu0  ;;  %v3269_v50 = vpop.f32.mrb[87].mxu1  ;;  %v3275_v59 = vmul.f32 0.5, %v3271_v11  ;;  %v3284_v28 = vmul.f32 0.5, %v3273_v61 }
0x2588   :  { %5493 = vtanh.f32 %v3272_v10  ;;  %v3276_v47 = vmul.f32 0.5, %v3272_v10 }
0x2589   :  { %5495 = vtanh.f32 %v3274_v54 }
0x258a   :  { %5497 = vtanh.f32 %v3275_v59 }
0x258b   :  { %5499 = vtanh.f32 %v3284_v28 }
0x2592   :  { %v5494_v56 = vpop.eup %5493 }
0x2593   :  { %3295 = vrot.lane.b32.xlu1 %v5494_v56, %s5805_s5  ;;  %v5496_v57 = vpop.eup %5495 }
0x2594   :  { %3312 = vrot.lane.b32.xlu0 %v5496_v57, %s5805_s5  ;;  %v5498_v49 = vpop.eup %5497 }
0x2595   :  { %v3279_v26 = vmul.f32 0.5, %v5498_v49  ;;  %v5500_v36 = vpop.eup %5499 }
0x2596   :  { %v3288_v42 = vmul.f32 0.5, %v5500_v36 }
0x2597   :  { %v3281_v31 = vadd.f32 0.5, %v3279_v26 }
0x2598   :  { %v3290_v30 = vadd.f32 0.5, %v3288_v42 }
0x2599   :  { %v3293_v34 = vmul.f32 %v3281_v31, %v7284_v48  ;;  %v3285_v48 = vmul.f32 0.5, %v3274_v54 }
0x259a   :  { %v3310_v11 = vmul.f32 %v3290_v30, %v7288_v41 }
0x2605   :  { %v3296_v55 = vpop.permute.xlu1 %3295 }
0x2606   :  { %v3298_v39 = vmul.f32 %v3296_v55, %v3281_v31  ;;  %v3313_v58 = vpop.permute.xlu0 %3312 }
0x2607   :  { %v3315_v24 = vmul.f32 %v3313_v58, %v3290_v30 }
0x2608   :  { %3300 = vrot.lane.b32.xlu1 %v3298_v39, %s5805_s5 }
0x2609   :  { %3317 = vrot.lane.b32.xlu0 %v3315_v24, %s5805_s5 }
0x267a   :  { %v3301_v18 = vpop.permute.xlu1 %3300 }
0x267b   :  { %v7340_v23 = vadd.f32 %v3301_v18, %v3293_v34  ;;  %v3318_v52 = vpop.permute.xlu0 %3317 }
0x267c   :  { %v7344_v61 = vadd.f32 %v3318_v52, %v3310_v11 }
0x267d   :  { %5501 = vtanh.f32 %v7340_v23 }
0x267e   :  { %5503 = vtanh.f32 %v7344_v61 }
0x267f   :  { %5505 = vtanh.f32 %v3276_v47 }
0x2680   :  { %5507 = vtanh.f32 %v3285_v48 }
0x2687   :  { %v5502_v43 = vpop.eup %5501 }
0x2688   :  { %3306 = vrot.lane.b32.xlu1 %v5502_v43, %s5805_s5  ;;  %v5504_v44 = vpop.eup %5503 }
0x2689   :  { %3323 = vrot.lane.b32.xlu0 %v5504_v44, %s5805_s5  ;;  %v5506_v51 = vpop.eup %5505 }
0x268a   :  { %v3280_v22 = vmul.f32 0.5, %v5506_v51  ;;  %v5508_v46 = vpop.eup %5507 }
0x268b   :  { %v3289_v41 = vmul.f32 0.5, %v5508_v46 }
0x268c   :  { %v3282_v21 = vadd.f32 0.5, %v3280_v22 }
0x268d   :  { %v3291_v57 = vadd.f32 0.5, %v3289_v41 }
0x26fa   :  { %v3307_v50 = vpop.permute.xlu1 %3306 }
0x26fb   :  { %v3309_v56 = vmul.f32 %v3307_v50, %v3282_v21  ;;  %v3324_v59 = vpop.permute.xlu0 %3323 }
0x26fc   :  { %v3326_v28 = vmul.f32 %v3324_v59, %v3291_v57  ;;  %v7950_v59 = vld [vmem:[#allocation33_spill] sm:$0xff] }
0x26fd   :  { %3327 = vst.msk [vmem:[#allocation4 + $0x28] sm:$0xff] %vm725_vm3, %v3309_v56 }
0x26fe   :  { %3329 = vrot.lane.b32.xlu0 %v3326_v28, %s5805_s5 }
0x2770   :  { %v3330_v49 = vpop.permute.xlu0 %3329 }
0x2771   :  { %3332 = vst.msk [vmem:[#allocation4 + $0x10] sm:$0xff] %vm731_vm4, %v3330_v49  ;;  %v3337_v10 = vsel %vm725_vm3, %v3309_v56, %v3330_v49  ;;  %v7949_v56 = vld [vmem:[#allocation23_spill] sm:$0xff] }
0x2772   :  { %v3338_v54 = vpack.c.bf16 %v3337_v10, %v3337_v10 }
0x2774   :  { %3372 = vmatmul.mubr.bf16.vlgmr.msra.gmra.mrb[88].mxu0 %v3338_v54  ;;  %3413 = vmatmul.mubr.bf16.vlgmr.msra.gmra.mrb[88].mxu1 %v3338_v54 }
0x2775   :  { %3490 = vmatpush1.bf16.msra.mxu0 %v7181_v6  ;;  %3531 = vmatpush1.bf16.msra.mxu1 %v7184_v35 }
0x2776   :  { %3491 = vmatprep.subr.bf16.mxu0 %v7187_v17  ;;  %3532 = vmatprep.subr.bf16.mxu1 %v7190_v53  ;;  %v7945_v17 = vld [vmem:[#allocation27_spill] sm:$0xff] }
0x2777   :  { %3521 = vmatprep.mubr.bf16.mxu0 %v7880_v40  ;;  %3562 = vmatprep.mubr.bf16.mxu1 %v7880_v40 }
0x2779   :  { %3492 = vmatpush1.bf16.msra.mxu0 %v7195_v7  ;;  %3533 = vmatpush1.bf16.msra.mxu1 %v7198_v19  ;;  %v7946_v7 = vld [vmem:[#allocation35_spill] sm:$0xff] }
0x277a   :  { %3493 = vmatprep.subr.bf16.mxu0 %v7201_v16  ;;  %3534 = vmatprep.subr.bf16.mxu1 %v7204_v13 }
0x277d   :  { %3494 = vmatpush1.bf16.msra.mxu0 %v7207_v63  ;;  %3535 = vmatpush1.bf16.msra.mxu1 %v7210_v8  ;;  %v7947_v63 = vld [vmem:[#allocation28_spill] sm:$0xff] }
0x277e   :  { %3495 = vmatprep.subr.bf16.mxu0 %v7213_v25  ;;  %3536 = vmatprep.subr.bf16.mxu1 %v7216_v2  ;;  %v7948_v25 = vld [vmem:[#allocation38_spill] sm:$0xff] }
0x2781   :  { %3496 = vmatpush1.bf16.msra.mxu0 %v7219_v20  ;;  %3537 = vmatpush1.bf16.msra.mxu1 %v7222_v15 }
0x2782   :  { %3497 = vmatprep.subr.bf16.mxu0 %v7225_v60  ;;  %3538 = vmatprep.subr.bf16.mxu1 %v7228_v27 }
0x2785   :  { %3498 = vmatpush1.bf16.msra.mxu0 %v7231_v38  ;;  %3539 = vmatpush1.bf16.msra.mxu1 %v7234_v1 }
0x2786   :  { %3499 = vmatprep.subr.bf16.mxu0 %v7237_v4  ;;  %3540 = vmatprep.subr.bf16.mxu1 %v7240_v5 }
0x2789   :  { %3500 = vmatpush1.bf16.msra.mxu0 %v7243_v45  ;;  %3541 = vmatpush1.bf16.msra.mxu1 %v7246_v37 }
0x278a   :  { %3501 = vmatprep.subr.bf16.mxu0 %v7249_v62  ;;  %3542 = vmatprep.subr.bf16.mxu1 %v7252_v3 }
0x278d   :  { %3502 = vmatpush1.bf16.msra.mxu0 %v7255_v29  ;;  %3543 = vmatpush1.bf16.msra.mxu1 %v7258_v32 }
0x278e   :  { %3544 = vmatprep.subr.bf16.mxu1 %v7261_v33  ;;  %3503 = vmatprep.subr.bf16.mxu0 %v7264_v9 }
0x2791   :  { %3504 = vmatpush1.bf16.msra.mxu0 %v7267_v12  ;;  %3545 = vmatpush1.bf16.msra.mxu1 %v7270_v0 }
0x2847   :  { %v3373_v6 = vpop.f32.mrb[88].mxu0  ;;  %v3414_v35 = vpop.f32.mrb[88].mxu1 }
0x2848   :  { %v3421_v53 = vadd.f32 %v3373_v6, %v7945_v17  ;;  %v3423_v19 = vadd.f32 %v3414_v35, %v7946_v7  ;;  %v3375_v16 = vpop.f32.mrb[89].mxu0  ;;  %v3416_v13 = vpop.f32.mrb[89].mxu1  ;;  %v7951_v6 = vld [vmem:[#allocation43_spill] sm:$0xff] }
0x2849   :  { %v3422_v8 = vadd.f32 %v3375_v16, %v7947_v63  ;;  %v3424_v2 = vadd.f32 %v3416_v13, %v7948_v25  ;;  %v3377_v20 = vpop.f32.mrb[90].mxu0  ;;  %v3418_v15 = vpop.f32.mrb[90].mxu1 }
0x284a   :  { %v3378_v60 = vpop.f32.mrb[91].mxu0  ;;  %v3419_v27 = vpop.f32.mrb[91].mxu1  ;;  %v3425_v4 = vmul.f32 0.5, %v3421_v53  ;;  %v3434_v5 = vmul.f32 0.5, %v3423_v19 }
0x284b   :  { %5509 = vtanh.f32 %v3422_v8  ;;  %v3426_v24 = vmul.f32 0.5, %v3422_v8  ;;  %v3435_v34 = vmul.f32 0.5, %v3424_v2 }
0x284c   :  { %5511 = vtanh.f32 %v3424_v2 }
0x284d   :  { %5513 = vtanh.f32 %v3425_v4 }
0x284e   :  { %5515 = vtanh.f32 %v3434_v5 }
0x2855   :  { %v5510_v38 = vpop.eup %5509 }
0x2856   :  { %3445 = vrot.lane.b32.xlu0 %v5510_v38, %s5805_s5  ;;  %v5512_v1 = vpop.eup %5511 }
0x2857   :  { %3462 = vrot.lane.b32.xlu1 %v5512_v1, %s5805_s5  ;;  %v5514_v45 = vpop.eup %5513 }
0x2858   :  { %v3429_v37 = vmul.f32 0.5, %v5514_v45  ;;  %v5516_v62 = vpop.eup %5515 }
0x2859   :  { %v3438_v29 = vmul.f32 0.5, %v5516_v62 }
0x285a   :  { %v3431_v3 = vadd.f32 0.5, %v3429_v37 }
0x285b   :  { %v3440_v9 = vadd.f32 0.5, %v3438_v29 }
0x285c   :  { %v3443_v26 = vmul.f32 %v3431_v3, %v7340_v23 }
0x285d   :  { %v3460_v42 = vmul.f32 %v3440_v9, %v7344_v61 }
0x28c8   :  { %v3446_v32 = vpop.permute.xlu0 %3445 }
0x28c9   :  { %v3448_v33 = vmul.f32 %v3446_v32, %v3431_v3  ;;  %v3463_v12 = vpop.permute.xlu1 %3462  ;;  %v5229_v32 = vld [vmem:[%s7825_s8] ss:$12 sps:$4 sm:$0xff]  }
0x28ca   :  { %v3465_v0 = vmul.f32 %v3463_v12, %v3440_v9  ;;  %v5232_v9 = vld [vmem:[%s7825_s8 + $0x8] ss:$12 sps:$4 sm:$0xff]  }
0x28cb   :  { %3450 = vrot.lane.b32.xlu0 %v3448_v33, %s5805_s5  ;;  %v5231_v33 = vld [vmem:[%s7825_s8 + $0x4] ss:$12 sps:$4 sm:$0xff]   ;;  %v5235_v12 = vld [vmem:[%s7825_s8 + $0x1c] ss:$12 sps:$4 sm:$0xff]   ;;  %4964 = vmatprep.subr.bf16.mxu1 %v5232_v9 }
0x28cc   :  { %3467 = vrot.lane.b32.xlu1 %v3465_v0, %s5805_s5  ;;  %v5236_v0 = vld [vmem:[%s7825_s8 + $0x20] ss:$12 sps:$4 sm:$0xff]   ;;  %3822 = vmatprep.subr.bf16.mxu0 %v5231_v33 }
0x293d   :  { %v3451_v36 = vpop.permute.xlu0 %3450 }
0x293e   :  { %v7394_v31 = vadd.f32 %v3451_v36, %v3443_v26  ;;  %v3468_v55 = vpop.permute.xlu1 %3467  ;;  %v5233_v26 = vld [vmem:[%s7825_s8 + $0x18] ss:$12 sps:$4 sm:$0xff]   ;;  %v5239_v36 = vld [vmem:[%s7825_s8 + $0x34] ss:$12 sps:$4 sm:$0xff]  }
0x293f   :  { %v7398_v39 = vadd.f32 %v3468_v55, %v3460_v42  ;;  %v5237_v55 = vld [vmem:[%s7825_s8 + $0x30] ss:$12 sps:$4 sm:$0xff]  }
0x2940   :  { %5517 = vtanh.f32 %v7394_v31 }
0x2941   :  { %5519 = vtanh.f32 %v7398_v39 }
0x2942   :  { %5521 = vtanh.f32 %v3426_v24  ;;  %v5241_v24 = vld [vmem:[%s7825_s8 + $0x48] ss:$12 sps:$4 sm:$0xff]  }
0x2943   :  { %5523 = vtanh.f32 %v3435_v34  ;;  %v5247_v34 = vld [vmem:[%s7825_s8 + $0x64] ss:$12 sps:$4 sm:$0xff]  }
0x294a   :  { %v5518_v30 = vpop.eup %5517 }
0x294b   :  { %3456 = vrot.lane.b32.xlu0 %v5518_v30, %s5805_s5  ;;  %v5520_v58 = vpop.eup %5519  ;;  %v5244_v30 = vld [vmem:[%s7825_s8 + $0x50] ss:$12 sps:$4 sm:$0xff]  }
0x294c   :  { %3473 = vrot.lane.b32.xlu1 %v5520_v58, %s5805_s5  ;;  %v5522_v18 = vpop.eup %5521 }
0x294d   :  { %v3430_v23 = vmul.f32 0.5, %v5522_v18  ;;  %v5524_v11 = vpop.eup %5523  ;;  %v5248_v18 = vld [vmem:[%s7825_s8 + $0x68] ss:$12 sps:$4 sm:$0xff]  }
0x294e   :  { %v3439_v61 = vmul.f32 0.5, %v5524_v11  ;;  %v5251_v11 = vld [vmem:[%s7825_s8 + $0x7c] ss:$12 sps:$4 sm:$0xff]  }
0x294f   :  { %v3432_v52 = vadd.f32 0.5, %v3430_v23  ;;  %v5245_v23 = vld [vmem:[%s7825_s8 + $0x60] ss:$12 sps:$4 sm:$0xff]  }
0x2950   :  { %v3441_v47 = vadd.f32 0.5, %v3439_v61  ;;  %v5249_v61 = vld [vmem:[%s7825_s8 + $0x78] ss:$12 sps:$4 sm:$0xff]  }
0x29bd   :  { %v3457_v43 = vpop.permute.xlu0 %3456 }
0x29be   :  { %v3459_v44 = vmul.f32 %v3457_v43, %v3432_v52  ;;  %v3474_v48 = vpop.permute.xlu1 %3473  ;;  %v5252_v52 = vld [vmem:[%s7825_s8 + $0x80] ss:$12 sps:$4 sm:$0xff]  }
0x29bf   :  { %v3476_v51 = vmul.f32 %v3474_v48, %v3441_v47  ;;  %v5253_v47 = vld [vmem:[%s7825_s8 + $0x90] ss:$12 sps:$4 sm:$0xff]   ;;  %v5255_v48 = vld [vmem:[%s7825_s8 + $0x94] ss:$12 sps:$4 sm:$0xff]  }
0x29c0   :  { %3477 = vst.msk [vmem:[#allocation4 + $0x30] sm:$0xff] %vm725_vm3, %v3459_v44 }
0x29c1   :  { %3479 = vrot.lane.b32.xlu1 %v3476_v51, %s5805_s5  ;;  %v5256_v51 = vld [vmem:[%s7825_s8 + $0x98] ss:$12 sps:$4 sm:$0xff]  }
0x2a33   :  { %v3480_v22 = vpop.permute.xlu1 %3479 }
0x2a34   :  { %3482 = vst.msk [vmem:[#allocation4 + $0x8] sm:$0xff] %vm731_vm4, %v3480_v22  ;;  %v3487_v46 = vsel %vm725_vm3, %v3459_v44, %v3480_v22  ;;  %v5259_v22 = vld [vmem:[%s7825_s8 + $0xac] ss:$12 sps:$4 sm:$0xff]  }
0x2a35   :  { %v3488_v21 = vpack.c.bf16 %v3487_v46, %v3487_v46  ;;  %v5260_v46 = vld [vmem:[%s7825_s8 + $0xb0] ss:$12 sps:$4 sm:$0xff]  }
0x2a37   :  { %3522 = vmatmul.mubr.bf16.vlgmr.msra.gmra.mrb[92].mxu0 %v3488_v21  ;;  %3563 = vmatmul.mubr.bf16.vlgmr.msra.gmra.mrb[92].mxu1 %v3488_v21 }
0x2a38   :  { %3854 = vmatprep.mubr.bf16.mxu0 %v7880_v40  ;;  %3823 = vmatpush1.bf16.msra.mxu0 %v5229_v32 }
0x2a39   :  { %4965 = vmatpush3.bf16.msra.mxu1 %v5232_v9  ;;  %3824 = vmatprep.subr.bf16.mxu0 %v5235_v12 }
0x2a3a   :  { %4966 = vmatprep.subr.bf16.mxu1 %v5236_v0 }
0x2a3c   :  { %3825 = vmatpush1.bf16.msra.mxu0 %v5233_v26 }
0x2a3d   :  { %4967 = vmatpush3.bf16.msra.mxu1 %v5236_v0  ;;  %3826 = vmatprep.subr.bf16.mxu0 %v5239_v36 }
0x2a40   :  { %3827 = vmatpush1.bf16.msra.mxu0 %v5237_v55 }
0x2b0a   :  { %v3523_v41 = vpop.f32.mrb[92].mxu0  ;;  %v3564_v50 = vpop.f32.mrb[92].mxu1 }
0x2b0b   :  { %v3571_v57 = vadd.f32 %v3523_v41, %v7949_v56  ;;  %v3573_v28 = vadd.f32 %v3564_v50, %v7950_v59  ;;  %v3525_v49 = vpop.f32.mrb[93].mxu0  ;;  %v3566_v10 = vpop.f32.mrb[93].mxu1  ;;  %v5257_v41 = vld [vmem:[%s7825_s8 + $0xa8] ss:$12 sps:$4 sm:$0xff]  }
0x2b0c   :  { %v7411_v54 = vadd.f32 %v3525_v49, %v6989_v14  ;;  %v7414_v35 = vadd.f32 %v3566_v10, %v7951_v6  ;;  %v3527_v17 = vpop.f32.mrb[94].mxu0  ;;  %v3568_v53 = vpop.f32.mrb[94].mxu1 }
0x2b0d   :  { %v3528_v7 = vpop.f32.mrb[95].mxu0  ;;  %v3569_v19 = vpop.f32.mrb[95].mxu1  ;;  %v3584_v63 = vmul.f32 0.5, %v3573_v28  ;;  %v3575_v14 = vmul.f32 0.5, %v3571_v57  ;;  %v3635_v17 = vld [vmem:[#allocation4 + $0x10] sm:$0xff] }
0x2b0e   :  { %5525 = vtanh.f32 %v7414_v35  ;;  %v3585_v43 = vmul.f32 0.5, %v7414_v35  ;;  %v3576_v44 = vmul.f32 0.5, %v7411_v54  ;;  %v3634_v7 = vld [vmem:[#allocation4 + $0x8] sm:$0xff] }
0x2b0f   :  { %5527 = vtanh.f32 %v7411_v54  ;;  %v3638_v19 = vld [vmem:[#allocation4 + $0x28] sm:$0xff] }
0x2b10   :  { %5529 = vtanh.f32 %v3584_v63 }
0x2b11   :  { %5531 = vtanh.f32 %v3575_v14  ;;  %v3637_v14 = vld [vmem:[#allocation4 + $0x20] sm:$0xff] }
0x2b18   :  { %v5526_v16 = vpop.eup %5525 }
0x2b19   :  { %3612 = vrot.lane.b32.xlu0 %v5526_v16, %s5805_s5  ;;  %v5528_v13 = vpop.eup %5527 }
0x2b1a   :  { %v5530_v8 = vpop.eup %5529 }
0x2b1b   :  { %v3588_v25 = vmul.f32 0.5, %v5530_v8  ;;  %v5532_v2 = vpop.eup %5531  ;;  %v3675_v8 = vpack.c.bf16 %v3638_v19, %v3637_v14 }
0x2b1c   :  { %v3579_v15 = vmul.f32 0.5, %v5532_v2  ;;  %v3639_v2 = vld [vmem:[#allocation4 + $0x30] sm:$0xff] }
0x2b1d   :  { %3595 = vrot.lane.b32.xlu0 %v5528_v13, %s5805_s5  ;;  %v3590_v20 = vadd.f32 0.5, %v3588_v25  ;;  %v3636_v13 = vld [vmem:[#allocation4 + $0x18] sm:$0xff] }
0x2b1e   :  { %v3581_v38 = vadd.f32 0.5, %v3579_v15  ;;  %v3674_v63 = vpack.c.bf16 %v3636_v13, %v3635_v17  ;;  %v7509_v15 = vld [vmem:[%s7826_s9] sm:$0x7] }
0x2b1f   :  { %v3610_v5 = vmul.f32 %v3590_v20, %v7398_v39  ;;  %v5243_v39 = vld [vmem:[%s7825_s8 + $0x4c] ss:$12 sps:$4 sm:$0xff]  }
0x2b20   :  { %v3593_v62 = vmul.f32 %v3581_v38, %v7394_v31  ;;  %v5240_v31 = vld [vmem:[%s7825_s8 + $0x38] ss:$12 sps:$4 sm:$0xff]   ;;  %3828 = vmatprep.subr.bf16.mxu0 %v5243_v39 }
0x2b21   :  { %4968 = vmatprep.subr.bf16.mxu1 %v5240_v31  ;;  %3829 = vmatpush1.bf16.msra.mxu0 %v5241_v24 }
0x2b22   :  { %4969 = vmatpush3.bf16.msra.mxu1 %v5240_v31  ;;  %3830 = vmatprep.subr.bf16.mxu0 %v5247_v34 }
0x2b23   :  { %4970 = vmatprep.subr.bf16.mxu1 %v5244_v30 }
0x2b25   :  { %3831 = vmatpush1.bf16.msra.mxu0 %v5245_v23 }
0x2b26   :  { %4971 = vmatpush3.bf16.msra.mxu1 %v5244_v30  ;;  %3832 = vmatprep.subr.bf16.mxu0 %v5251_v11 }
0x2b27   :  { %4972 = vmatprep.subr.bf16.mxu1 %v5248_v18 }
0x2b29   :  { %3833 = vmatpush1.bf16.msra.mxu0 %v5249_v61 }
0x2b2a   :  { %4973 = vmatpush3.bf16.msra.mxu1 %v5248_v18  ;;  %3834 = vmatprep.subr.bf16.mxu0 %v5255_v48 }
0x2b2b   :  { %4974 = vmatprep.subr.bf16.mxu1 %v5252_v52 }
0x2b2d   :  { %3835 = vmatpush1.bf16.msra.mxu0 %v5253_v47 }
0x2b2e   :  { %4975 = vmatpush3.bf16.msra.mxu1 %v5252_v52  ;;  %3836 = vmatprep.subr.bf16.mxu0 %v5259_v22 }
0x2b2f   :  { %4976 = vmatprep.subr.bf16.mxu1 %v5256_v51 }
0x2b31   :  { %3837 = vmatpush1.bf16.msra.mxu0 %v5257_v41 }
0x2b32   :  { %4977 = vmatpush3.bf16.msra.mxu1 %v5256_v51 }
0x2b33   :  { %4978 = vmatprep.subr.bf16.mxu1 %v5260_v46 }
0x2b36   :  { %4979 = vmatpush3.bf16.msra.mxu1 %v5260_v46 }
0x2b8b   :  { %v3613_v60 = vpop.permute.xlu0 %3612 }
0x2b8c   :  { %v3615_v27 = vmul.f32 %v3613_v60, %v3590_v20  ;;  %v7952_v60 = vld [vmem:[#allocation25_spill] sm:$0xff] }
0x2b8e   :  { %3617 = vrot.lane.b32.xlu1 %v3615_v27, %s5805_s5  ;;  %v7513_v27 = vrot.slane %v7509_v15, %v7952_v60 }
0x2b8f   :  { %v3596_v1 = vpop.permute.xlu0 %3595 }
0x2b90   :  { %v3598_v4 = vmul.f32 %v3596_v1, %v3581_v38  ;;  %v7953_v38 = vld [vmem:[#allocation26_spill] sm:$0xff] }
0x2b91   :  { %v7517_v1 = vrot.slane %v7509_v15, %v7953_v38 }
0x2b92   :  { %3600 = vrot.lane.b32.xlu0 %v3598_v4, %s5805_s5 }
0x2c00   :  { %v3618_v45 = vpop.permute.xlu1 %3617 }
0x2c01   :  { %v3620_v37 = vadd.f32 %v3618_v45, %v3610_v5 }
0x2c03   :  { %5533 = vtanh.f32 %v3620_v37 }
0x2c04   :  { %v3601_v3 = vpop.permute.xlu0 %3600 }
0x2c05   :  { %v3603_v29 = vadd.f32 %v3601_v3, %v3593_v62 }
0x2c07   :  { %5535 = vtanh.f32 %v3603_v29 }
0x2c08   :  { %5537 = vtanh.f32 %v3585_v43 }
0x2c09   :  { %5539 = vtanh.f32 %v3576_v44 }
0x2c0d   :  { %v5534_v42 = vpop.eup %5533 }
0x2c0e   :  { %3623 = vrot.lane.b32.xlu1 %v5534_v42, %s5805_s5 }
0x2c11   :  { %v5536_v58 = vpop.eup %5535 }
0x2c12   :  { %3606 = vrot.lane.b32.xlu0 %v5536_v58, %s5805_s5  ;;  %v5538_v21 = vpop.eup %5537 }
0x2c13   :  { %v3589_v50 = vmul.f32 0.5, %v5538_v21  ;;  %v5540_v56 = vpop.eup %5539 }
0x2c14   :  { %v3580_v59 = vmul.f32 0.5, %v5540_v56 }
0x2c15   :  { %v3591_v57 = vadd.f32 0.5, %v3589_v50 }
0x2c16   :  { %v3582_v10 = vadd.f32 0.5, %v3580_v59 }
0x2c80   :  { %v3624_v28 = vpop.permute.xlu1 %3623 }
0x2c81   :  { %v3626_v49 = vmul.f32 %v3624_v28, %v3591_v57 }
0x2c83   :  { %3629 = vrot.lane.b32.xlu1 %v3626_v49, %s5805_s5 }
0x2c84   :  { %v3607_v54 = vpop.permute.xlu0 %3606 }
0x2c85   :  { %v3609_v6 = vmul.f32 %v3607_v54, %v3582_v10 }
0x2c87   :  { %3627 = vst.msk [vmem:[#allocation4 + $0x38] sm:$0xff] %vm725_vm3, %v3609_v6 }
0x2c8e   :  { %v3640_v25 = vld [vmem:[#allocation4 + $0x38] sm:$0xff] }
0x2c8f   :  { %v3676_v20 = vpack.c.bf16 %v3640_v25, %v3639_v2 }
0x2cf5   :  { %v3630_v35 = vpop.permute.xlu1 %3629 }
0x2cf6   :  { %3632 = vst.msk [vmem:[#allocation4] sm:$0xff] %vm731_vm4, %v3630_v35 }
0x2cfd   :  { %v3633_v53 = vld [vmem:[#allocation4] sm:$0xff] }
0x2cfe   :  { %v3673_v16 = vpack.c.bf16 %v3634_v7, %v3633_v53 }
0x2d00   :  { %3855 = vmatmul.mubr.bf16.vlgmr.msra.gmra.mrb[96].mxu0 %v3673_v16  ;;  %4980 = vmatprep.mubr.bf16.mxu1 %v3673_v16 }
0x2d01   :  { %4981 = vmatmul.mubr.bf16.vlgmr.msra.gmra.mrb[96].mxu1 %v3674_v63  ;;  %3864 = vmatprep.mubr.bf16.mxu0 %v7880_v40 }
0x2d02   :  { %4984 = vmatprep.mubr.bf16.mxu1 %v3675_v8 }
0x2d08   :  { %3865 = vmatmul.mubr.bf16.gmra.mrb[100].mxu0 %v3674_v63 }
0x2d09   :  { %4985 = vmatmul.mubr.bf16.gmra.mrb[100].mxu1 %v3676_v20  ;;  %3874 = vmatprep.mubr.bf16.mxu0 %v7880_v40 }
0x2d10   :  { %3875 = vmatmul.mubr.bf16.gmra.mrb[104].mxu0 %v3675_v8 }
0x2d11   :  { %3884 = vmatprep.mubr.bf16.mxu0 %v7880_v40 }
0x2d18   :  { %3885 = vmatmul.mubr.bf16.gmra.mrb[108].mxu0 %v3676_v20 }
0x2dd3   :  { %v3856_v4 = vpop.f32.mrb[96].mxu0 }
0x2dd4   :  { %v7520_v5 = vadd.f32 %v3856_v4, %v7513_v27  ;;  %v3858_v45 = vpop.f32.mrb[97].mxu0  ;;  %v7522_v40 = vpop.f32.mrb[96].mxu1 }
0x2dd5   :  { %7954 = vst [vmem:[#allocation46_spill] sm:$0xff] %v7522_v40  ;;  %v7525_v37 = vadd.f32 %v3858_v45, %v7517_v1  ;;  %v3860_v62 = vpop.f32.mrb[98].mxu0  ;;  %v7527_v3 = vpop.f32.mrb[97].mxu1 }
0x2dd6   :  { %v7530_v29 = vadd.f32 %v3860_v62, %v7513_v27  ;;  %v3862_v32 = vpop.f32.mrb[99].mxu0  ;;  %v7532_v33 = vpop.f32.mrb[98].mxu1 }
0x2dd7   :  { %7955 = vst [vmem:[#allocation40_spill] sm:$0xff] %v7532_v33  ;;  %v7535_v9 = vadd.f32 %v3862_v32, %v7517_v1  ;;  %v7537_v12 = vpop.f32.mrb[99].mxu1  ;;  %v3986_v0 = vmul.f32 %v7525_v37, %v7520_v5 }
0x2dd8   :  { %7956 = vst [vmem:[#allocation47_spill] sm:$0xff] %v7537_v12  ;;  %v4044_v26 = vmul.f32 %v7530_v29, %v7525_v37 }
0x2dd9   :  { %3987 = vadd.xlane.f32.xlu1 %v3986_v0  ;;  %v4047_v36 = vmul.f32 %v7535_v9, %v7530_v29  ;;  %v3990_v31 = vmul.f32 %v7535_v9, %v7520_v5 }
0x2dda   :  { %4045 = vadd.xlane.f32.xlu0 %v4044_v26 }
0x2ddb   :  { %v3866_v42 = vpop.f32.mrb[100].mxu0 }
0x2ddc   :  { %v7548_v55 = vadd.f32 %v3866_v42, %v7513_v27  ;;  %v3868_v39 = vpop.f32.mrb[101].mxu0  ;;  %v7550_v30 = vpop.f32.mrb[100].mxu1 }
0x2ddd   :  { %7957 = vst [vmem:[#allocation34_spill] sm:$0xff] %v7550_v30  ;;  %v7553_v58 = vadd.f32 %v3868_v39, %v7517_v1  ;;  %v3870_v24 = vpop.f32.mrb[102].mxu0  ;;  %v7555_v34 = vpop.f32.mrb[101].mxu1  ;;  %4048 = vadd.xlane.f32.xlu1 %v4047_v36 }
0x2dde   :  { %7958 = vst [vmem:[#allocation44_spill] sm:$0xff] %v7555_v34  ;;  %v7558_v18 = vadd.f32 %v3870_v24, %v7513_v27  ;;  %v3872_v23 = vpop.f32.mrb[103].mxu0  ;;  %v7560_v11 = vpop.f32.mrb[102].mxu1  ;;  %3991 = vadd.xlane.f32.xlu0 %v3990_v31  ;;  %v4091_v52 = vmul.f32 %v7548_v55, %v7535_v9  ;;  %v4088_v61 = vmul.f32 %v7548_v55, %v7525_v37 }
0x2ddf   :  { %7959 = vst [vmem:[#allocation36_spill] sm:$0xff] %v7560_v11  ;;  %v7567_v43 = vadd.f32 %v3872_v23, %v7517_v1  ;;  %v7569_v44 = vpop.f32.mrb[103].mxu1  ;;  %v4050_v47 = vmul.f32 %v7553_v58, %v7530_v29  ;;  %v3994_v48 = vmul.f32 %v7553_v58, %v7520_v5  ;;  %v4094_v22 = vmul.f32 %v7553_v58, %v7548_v55 }
0x2de0   :  { %7960 = vst [vmem:[#allocation45_spill] sm:$0xff] %v7569_v44  ;;  %v4135_v51 = vmul.f32 %v7558_v18, %v7535_v9  ;;  %v4138_v46 = vmul.f32 %v7558_v18, %v7553_v58  ;;  %v4132_v21 = vmul.f32 %v7558_v18, %v7525_v37 }
0x2de1   :  { %4092 = vadd.xlane.f32.xlu1 %v4091_v52  ;;  %v4053_v41 = vmul.f32 %v7567_v43, %v7530_v29  ;;  %v3998_v50 = vmul.f32 %v7567_v43, %v7520_v5  ;;  %v7589_v56 = vmul.f32 %v7567_v43, %v7548_v55  ;;  %v7593_v57 = vmul.f32 %v7567_v43, %v7558_v18 }
0x2de2   :  { %4089 = vadd.xlane.f32.xlu0 %v4088_v61 }
0x2de3   :  { %v3876_v59 = vpop.f32.mrb[104].mxu0 }
0x2de4   :  { %v7596_v28 = vadd.f32 %v3876_v59, %v7513_v27  ;;  %v3878_v49 = vpop.f32.mrb[105].mxu0 }
0x2de5   :  { %v3879_v10 = vadd.f32 %v3878_v49, %v7517_v1  ;;  %v3880_v54 = vpop.f32.mrb[106].mxu0  ;;  %4051 = vadd.xlane.f32.xlu1 %v4050_v47 }
0x2de6   :  { %v3881_v6 = vadd.f32 %v3880_v54, %v7513_v27  ;;  %v3882_v35 = vpop.f32.mrb[107].mxu0  ;;  %3995 = vadd.xlane.f32.xlu0 %v3994_v48  ;;  %v7602_v17 = vmul.f32 %v7596_v28, %v7525_v37  ;;  %v7606_v53 = vmul.f32 %v7596_v28, %v7553_v58  ;;  %v7610_v7 = vmul.f32 %v7596_v28, %v7535_v9 }
0x2de7   :  { %v3883_v19 = vadd.f32 %v3882_v35, %v7517_v1  ;;  %v7614_v16 = vmul.f32 %v3879_v10, %v7520_v5  ;;  %v7618_v13 = vmul.f32 %v7596_v28, %v7567_v43  ;;  %v7621_v63 = vmul.f32 %v3879_v10, %v7548_v55 }
0x2de8   :  { %v7624_v14 = vmul.f32 %v3879_v10, %v7530_v29  ;;  %v7627_v8 = vmul.f32 %v3881_v6, %v7525_v37  ;;  %v7630_v25 = vmul.f32 %v3879_v10, %v7558_v18  ;;  %v7633_v2 = vmul.f32 %v3881_v6, %v7553_v58 }
0x2de9   :  { %4136 = vadd.xlane.f32.xlu1 %v4135_v51  ;;  %v4188_v20 = vmul.f32 %v3879_v10, %v7596_v28  ;;  %v4059_v60 = vmul.f32 %v3883_v19, %v7530_v29  ;;  %v4223_v38 = vmul.f32 %v3881_v6, %v7535_v9  ;;  %v4103_v4 = vmul.f32 %v3883_v19, %v7548_v55 }
0x2dea   :  { %4095 = vadd.xlane.f32.xlu0 %v4094_v22  ;;  %v4229_v45 = vmul.f32 %v3881_v6, %v7567_v43  ;;  %v4147_v62 = vmul.f32 %v3883_v19, %v7558_v18  ;;  %v4232_v32 = vmul.f32 %v3881_v6, %v3879_v10  ;;  %v4191_v0 = vmul.f32 %v3883_v19, %v7596_v28 }
0x2deb   :  { %v3886_v26 = vpop.f32.mrb[108].mxu0  ;;  %v4006_v36 = vmul.f32 %v3883_v19, %v7520_v5  ;;  %v4235_v31 = vmul.f32 %v3883_v19, %v3881_v6 }
0x2dec   :  { %v3887_v42 = vadd.f32 %v3886_v26, %v7513_v27  ;;  %v3888_v39 = vpop.f32.mrb[109].mxu0 }
0x2ded   :  { %v3889_v24 = vadd.f32 %v3888_v39, %v7517_v1  ;;  %v3890_v23 = vpop.f32.mrb[110].mxu0  ;;  %4139 = vadd.xlane.f32.xlu1 %v4138_v46 }
0x2dee   :  { %v3891_v52 = vadd.f32 %v3890_v23, %v7513_v27  ;;  %v3892_v61 = vpop.f32.mrb[111].mxu0  ;;  %4133 = vadd.xlane.f32.xlu0 %v4132_v21  ;;  %v4267_v47 = vmul.f32 %v3887_v42, %v7535_v9  ;;  %v4264_v48 = vmul.f32 %v3887_v42, %v7525_v37  ;;  %v4273_v51 = vmul.f32 %v3887_v42, %v7567_v43 }
0x2def   :  { %v3893_v22 = vadd.f32 %v3892_v61, %v7517_v1  ;;  %v4270_v59 = vmul.f32 %v3887_v42, %v7553_v58  ;;  %v4276_v49 = vmul.f32 %v3887_v42, %v3879_v10  ;;  %v4279_v54 = vmul.f32 %v3887_v42, %v3883_v19 }
0x2df0   :  { %v4062_v35 = vmul.f32 %v3889_v24, %v7530_v29  ;;  %v4010_v46 = vmul.f32 %v3889_v24, %v7520_v5  ;;  %v4311_v27 = vmul.f32 %v3891_v52, %v7535_v9  ;;  %v4106_v21 = vmul.f32 %v3889_v24, %v7548_v55 }
0x2df1   :  { %4054 = vadd.xlane.f32.xlu1 %v4053_v41  ;;  %v4317_v26 = vmul.f32 %v3891_v52, %v7567_v43  ;;  %v4150_v39 = vmul.f32 %v3889_v24, %v7558_v18  ;;  %v4320_v23 = vmul.f32 %v3891_v52, %v3879_v10  ;;  %v4194_v1 = vmul.f32 %v3889_v24, %v7596_v28 }
0x2df2   :  { %3999 = vadd.xlane.f32.xlu0 %v3998_v50  ;;  %v4323_v61 = vmul.f32 %v3891_v52, %v3883_v19  ;;  %v4238_v11 = vmul.f32 %v3889_v24, %v3881_v6  ;;  %v4065_v30 = vmul.f32 %v3893_v22, %v7530_v29  ;;  %v4308_v44 = vmul.f32 %v3891_v52, %v7525_v37 }
0x2df3   :  { %v4109_v34 = vmul.f32 %v3893_v22, %v7548_v55  ;;  %v4314_v9 = vmul.f32 %v3891_v52, %v7553_v58  ;;  %v4153_v41 = vmul.f32 %v3893_v22, %v7558_v18  ;;  %v4014_v43 = vmul.f32 %v3893_v22, %v7520_v5 }
0x2df4   :  { %v4197_v33 = vmul.f32 %v3893_v22, %v7596_v28  ;;  %v4282_v10 = vmul.f32 %v3889_v24, %v3887_v42  ;;  %v4241_v40 = vmul.f32 %v3893_v22, %v3881_v6  ;;  %v4285_v12 = vmul.f32 %v3893_v22, %v3887_v42 }
0x2df5   :  { %4098 = vadd.xlane.f32.xlu1 %v7589_v56  ;;  %v4329_v50 = vmul.f32 %v3893_v22, %v3891_v52  ;;  %v4326_v19 = vmul.f32 %v3891_v52, %v3889_v24 }
0x2df6   :  { %4177 = vadd.xlane.f32.xlu0 %v7602_v17 }
0x2df9   :  { %4142 = vadd.xlane.f32.xlu1 %v7593_v57 }
0x2dfa   :  { %4183 = vadd.xlane.f32.xlu0 %v7606_v53 }
0x2dfd   :  { %4180 = vadd.xlane.f32.xlu1 %v7610_v7 }
0x2dfe   :  { %4003 = vadd.xlane.f32.xlu0 %v7614_v16 }
0x2e01   :  { %4186 = vadd.xlane.f32.xlu1 %v7618_v13 }
0x2e02   :  { %4101 = vadd.xlane.f32.xlu0 %v7621_v63 }
0x2e05   :  { %4057 = vadd.xlane.f32.xlu1 %v7624_v14 }
0x2e06   :  { %4221 = vadd.xlane.f32.xlu0 %v7627_v8 }
0x2e09   :  { %4145 = vadd.xlane.f32.xlu1 %v7630_v25 }
0x2e0a   :  { %4227 = vadd.xlane.f32.xlu0 %v7633_v2 }
0x2e0d   :  { %4189 = vadd.xlane.f32.xlu1 %v4188_v20 }
0x2e0e   :  { %4060 = vadd.xlane.f32.xlu0 %v4059_v60 }
0x2e11   :  { %4224 = vadd.xlane.f32.xlu1 %v4223_v38 }
0x2e12   :  { %4104 = vadd.xlane.f32.xlu0 %v4103_v4 }
0x2e15   :  { %4230 = vadd.xlane.f32.xlu1 %v4229_v45 }
0x2e16   :  { %4148 = vadd.xlane.f32.xlu0 %v4147_v62 }
0x2e19   :  { %4233 = vadd.xlane.f32.xlu1 %v4232_v32 }
0x2e1a   :  { %4192 = vadd.xlane.f32.xlu0 %v4191_v0 }
0x2e1d   :  { %4007 = vadd.xlane.f32.xlu1 %v4006_v36 }
0x2e1e   :  { %4236 = vadd.xlane.f32.xlu0 %v4235_v31 }
0x2e21   :  { %4268 = vadd.xlane.f32.xlu1 %v4267_v47 }
0x2e22   :  { %4265 = vadd.xlane.f32.xlu0 %v4264_v48 }
0x2e25   :  { %4274 = vadd.xlane.f32.xlu1 %v4273_v51 }
0x2e26   :  { %4271 = vadd.xlane.f32.xlu0 %v4270_v59 }
0x2e29   :  { %4277 = vadd.xlane.f32.xlu1 %v4276_v49 }
0x2e2a   :  { %4280 = vadd.xlane.f32.xlu0 %v4279_v54 }
0x2e2d   :  { %4063 = vadd.xlane.f32.xlu1 %v4062_v35 }
0x2e2e   :  { %4011 = vadd.xlane.f32.xlu0 %v4010_v46 }
0x2e31   :  { %4312 = vadd.xlane.f32.xlu1 %v4311_v27 }
0x2e32   :  { %4107 = vadd.xlane.f32.xlu0 %v4106_v21 }
0x2e35   :  { %4318 = vadd.xlane.f32.xlu1 %v4317_v26 }
0x2e36   :  { %4151 = vadd.xlane.f32.xlu0 %v4150_v39 }
0x2e39   :  { %4321 = vadd.xlane.f32.xlu1 %v4320_v23 }
0x2e3a   :  { %4195 = vadd.xlane.f32.xlu0 %v4194_v1 }
0x2e3d   :  { %4324 = vadd.xlane.f32.xlu1 %v4323_v61 }
0x2e3e   :  { %4239 = vadd.xlane.f32.xlu0 %v4238_v11 }
0x2e41   :  { %4066 = vadd.xlane.f32.xlu1 %v4065_v30 }
0x2e42   :  { %4309 = vadd.xlane.f32.xlu0 %v4308_v44 }
0x2e45   :  { %4110 = vadd.xlane.f32.xlu1 %v4109_v34 }
0x2e46   :  { %4315 = vadd.xlane.f32.xlu0 %v4314_v9 }
0x2e49   :  { %4154 = vadd.xlane.f32.xlu1 %v4153_v41 }
0x2e4a   :  { %4015 = vadd.xlane.f32.xlu0 %v4014_v43 }
0x2e4d   :  { %4198 = vadd.xlane.f32.xlu1 %v4197_v33 }
0x2e4e   :  { %4283 = vadd.xlane.f32.xlu0 %v4282_v10 }
0x2e51   :  { %4242 = vadd.xlane.f32.xlu1 %v4241_v40 }
0x2e52   :  { %4286 = vadd.xlane.f32.xlu0 %v4285_v12 }
0x2e55   :  { %4330 = vadd.xlane.f32.xlu1 %v4329_v50 }
0x2e56   :  { %4327 = vadd.xlane.f32.xlu0 %v4326_v19 }
0x2e66   :  { %v3988_v5 = vpop.xlane.xlu1 %3987 }
0x2e67   :  { %v4046_v37 = vpop.xlane.xlu0 %4045 }
0x2e6a   :  { %v4049_v29 = vpop.xlane.xlu1 %4048 }
0x2e6b   :  { %v4068_v55 = vsel %vm4017_vm5, %v4046_v37, %v4049_v29  ;;  %v3992_v58 = vpop.xlane.xlu0 %3991 }
0x2e6c   :  { %v4018_v30 = vsel %vm4017_vm5, %v3988_v5, %v3992_v58 }
0x2e6e   :  { %v4093_v18 = vpop.xlane.xlu1 %4092 }
0x2e6f   :  { %v4090_v34 = vpop.xlane.xlu0 %4089 }
0x2e70   :  { %v4112_v11 = vsel %vm4017_vm5, %v4090_v34, %v4093_v18 }
0x2e72   :  { %v4052_v33 = vpop.xlane.xlu1 %4051 }
0x2e73   :  { %v4069_v40 = vsel %vm4019_vm6, %v4068_v55, %v4052_v33  ;;  %v3996_v12 = vpop.xlane.xlu0 %3995 }
0x2e74   :  { %v4020_v44 = vsel %vm4019_vm6, %v4018_v30, %v3996_v12 }
0x2e76   :  { %v4137_v56 = vpop.xlane.xlu1 %4136 }
0x2e77   :  { %v4096_v57 = vpop.xlane.xlu0 %4095 }
0x2e78   :  { %v4113_v28 = vsel %vm4019_vm6, %v4112_v11, %v4096_v57 }
0x2e7a   :  { %v4140_v6 = vpop.xlane.xlu1 %4139 }
0x2e7b   :  { %v4134_v17 = vpop.xlane.xlu0 %4133 }
0x2e7c   :  { %v4156_v53 = vsel %vm4017_vm5, %v4134_v17, %v4137_v56 }
0x2e7d   :  { %v4157_v7 = vsel %vm4019_vm6, %v4156_v53, %v4140_v6 }
0x2e7e   :  { %v4055_v16 = vpop.xlane.xlu1 %4054 }
0x2e7f   :  { %v4070_v13 = vsel %vm4021_vm7, %v4069_v40, %v4055_v16  ;;  %v4000_v63 = vpop.xlane.xlu0 %3999 }
0x2e80   :  { %v4022_v14 = vsel %vm4021_vm7, %v4020_v44, %v4000_v63 }
0x2e82   :  { %v4099_v8 = vpop.xlane.xlu1 %4098 }
0x2e83   :  { %v4114_v25 = vsel %vm4021_vm7, %v4113_v28, %v4099_v8  ;;  %v4178_v2 = vpop.xlane.xlu0 %4177 }
0x2e86   :  { %v4143_v20 = vpop.xlane.xlu1 %4142 }
0x2e87   :  { %v4158_v60 = vsel %vm4021_vm7, %v4157_v7, %v4143_v20  ;;  %v4184_v38 = vpop.xlane.xlu0 %4183 }
0x2e8a   :  { %v4181_v4 = vpop.xlane.xlu1 %4180 }
0x2e8b   :  { %v4200_v45 = vsel %vm4017_vm5, %v4178_v2, %v4181_v4  ;;  %v4004_v62 = vpop.xlane.xlu0 %4003 }
0x2e8c   :  { %v4024_v32 = vsel %vm4023_vm8, %v4022_v14, %v4004_v62  ;;  %v4201_v0 = vsel %vm4019_vm6, %v4200_v45, %v4184_v38 }
0x2e8e   :  { %v4187_v36 = vpop.xlane.xlu1 %4186 }
0x2e8f   :  { %v4202_v31 = vsel %vm4021_vm7, %v4201_v0, %v4187_v36  ;;  %v4102_v42 = vpop.xlane.xlu0 %4101 }
0x2e90   :  { %v4115_v24 = vsel %vm4023_vm8, %v4114_v25, %v4102_v42 }
0x2e92   :  { %v4058_v52 = vpop.xlane.xlu1 %4057 }
0x2e93   :  { %v4222_v47 = vpop.xlane.xlu0 %4221  ;;  %v4071_v40 = vsel %vm4023_vm8, %v4070_v13, %v4058_v52 }
0x2e96   :  { %v4146_v48 = vpop.xlane.xlu1 %4145 }
0x2e97   :  { %v4228_v51 = vpop.xlane.xlu0 %4227  ;;  %v4159_v7 = vsel %vm4023_vm8, %v4158_v60, %v4146_v48 }
0x2e9a   :  { %v4190_v22 = vpop.xlane.xlu1 %4189 }
0x2e9b   :  { %v7695_v59 = vsel %vm4023_vm8, %v4202_v31, %v4190_v22  ;;  %v4061_v49 = vpop.xlane.xlu0 %4060 }
0x2e9c   :  { %v4072_v12 = vsel %vm4025_vm9, %v4071_v40, %v4061_v49 }
0x2e9e   :  { %v4225_v54 = vpop.xlane.xlu1 %4224 }
0x2e9f   :  { %v4244_v35 = vsel %vm4017_vm5, %v4222_v47, %v4225_v54  ;;  %v4105_v46 = vpop.xlane.xlu0 %4104 }
0x2ea0   :  { %v4245_v27 = vsel %vm4019_vm6, %v4244_v35, %v4228_v51  ;;  %v4116_v4 = vsel %vm4025_vm9, %v4115_v24, %v4105_v46 }
0x2ea2   :  { %v4231_v21 = vpop.xlane.xlu1 %4230 }
0x2ea3   :  { %v4149_v26 = vpop.xlane.xlu0 %4148  ;;  %v4246_v36 = vsel %vm4021_vm7, %v4245_v27, %v4231_v21 }
0x2ea4   :  { %v4160_v16 = vsel %vm4025_vm9, %v4159_v7, %v4149_v26 }
0x2ea6   :  { %v4234_v39 = vpop.xlane.xlu1 %4233 }
0x2ea7   :  { %v4193_v23 = vpop.xlane.xlu0 %4192  ;;  %v4247_v47 = vsel %vm4023_vm8, %v4246_v36, %v4234_v39 }
0x2ea8   :  { %v4204_v51 = vsel %vm4025_vm9, %v7695_v59, %v4193_v23 }
0x2eaa   :  { %v4008_v1 = vpop.xlane.xlu1 %4007 }
0x2eab   :  { %v4237_v61 = vpop.xlane.xlu0 %4236  ;;  %v4026_v13 = vsel %vm4025_vm9, %v4024_v32, %v4008_v1 }
0x2eac   :  { %v4248_v22 = vsel %vm4025_vm9, %v4247_v47, %v4237_v61 }
0x2eae   :  { %v4269_v9 = vpop.xlane.xlu1 %4268 }
0x2eaf   :  { %v4266_v41 = vpop.xlane.xlu0 %4265 }
0x2eb0   :  { %v4288_v63 = vsel %vm4017_vm5, %v4266_v41, %v4269_v9 }
0x2eb2   :  { %v4275_v43 = vpop.xlane.xlu1 %4274 }
0x2eb3   :  { %v4272_v10 = vpop.xlane.xlu0 %4271 }
0x2eb4   :  { %v4289_v25 = vsel %vm4019_vm6, %v4288_v63, %v4272_v10 }
0x2eb5   :  { %v4290_v31 = vsel %vm4021_vm7, %v4289_v25, %v4275_v43 }
0x2eb6   :  { %v4278_v50 = vpop.xlane.xlu1 %4277 }
0x2eb7   :  { %v4281_v19 = vpop.xlane.xlu0 %4280  ;;  %v4291_v49 = vsel %vm4023_vm8, %v4290_v31, %v4278_v50 }
0x2eb8   :  { %v4292_v59 = vsel %vm4025_vm9, %v4291_v49, %v4281_v19  ;;  %v5814_v49 = vmov 1  }
0x2eb9   :  { %5073 = vset.pattern.permute.xlu1 %v5814_v49 }
0x2eba   :  { %v4064_v5 = vpop.xlane.xlu1 %4063 }
0x2ebb   :  { %v4012_v37 = vpop.xlane.xlu0 %4011  ;;  %v4073_v44 = vsel %vm4027_vm10, %v4072_v12, %v4064_v5 }
0x2ebc   :  { %v4028_v2 = vsel %vm4027_vm10, %v4026_v13, %v4012_v37 }
0x2ebe   :  { %v4313_v29 = vpop.xlane.xlu1 %4312 }
0x2ebf   :  { %v4108_v55 = vpop.xlane.xlu0 %4107 }
0x2ec0   :  { %v4117_v62 = vsel %vm4027_vm10, %v4116_v4, %v4108_v55 }
0x2ec2   :  { %v4319_v58 = vpop.xlane.xlu1 %4318 }
0x2ec3   :  { %v4152_v30 = vpop.xlane.xlu0 %4151 }
0x2ec4   :  { %v4161_v14 = vsel %vm4027_vm10, %v4160_v16, %v4152_v30 }
0x2ec6   :  { %v4322_v18 = vpop.xlane.xlu1 %4321 }
0x2ec7   :  { %v4196_v34 = vpop.xlane.xlu0 %4195 }
0x2ec8   :  { %v4205_v54 = vsel %vm4027_vm10, %v4204_v51, %v4196_v34 }
0x2eca   :  { %v4325_v11 = vpop.xlane.xlu1 %4324 }
0x2ecb   :  { %v4240_v33 = vpop.xlane.xlu0 %4239 }
0x2ecc   :  { %v4249_v27 = vsel %vm4027_vm10, %v4248_v22, %v4240_v33 }
0x2ece   :  { %v4067_v56 = vpop.xlane.xlu1 %4066 }
0x2ecf   :  { %v4074_v57 = vsel %vm183_vm2, %v4073_v44, %v4067_v56  ;;  %v4310_v28 = vpop.xlane.xlu0 %4309 }
0x2ed0   :  { %v4075_v6 = vsel %vm4030_vm11, %v4074_v57, -inf  ;;  %v4332_v32 = vsel %vm4017_vm5, %v4310_v28, %v4313_v29 }
0x2ed1   :  { %4076 = vmax.xlane.f32.xlu1 %v4075_v6 }
0x2ed2   :  { %v4111_v17 = vpop.xlane.xlu1 %4110 }
0x2ed3   :  { %v4316_v53 = vpop.xlane.xlu0 %4315  ;;  %v4118_v42 = vsel %vm183_vm2, %v4117_v62, %v4111_v17 }
0x2ed4   :  { %v4333_v52 = vsel %vm4019_vm6, %v4332_v32, %v4316_v53  ;;  %v4119_v46 = vsel %vm4030_vm11, %v4118_v42, -inf }
0x2ed5   :  { %v4334_v35 = vsel %vm4021_vm7, %v4333_v52, %v4319_v58 }
0x2ed6   :  { %v4155_v8 = vpop.xlane.xlu1 %4154  ;;  %v4335_v61 = vsel %vm4023_vm8, %v4334_v35, %v4322_v18  ;;  %v5815_v35 = vmov 0.0  }
0x2ed7   :  { %v4162_v20 = vsel %vm183_vm2, %v4161_v14, %v4155_v8  ;;  %v4016_v38 = vpop.xlane.xlu0 %4015  ;;  %v4336_v50 = vsel %vm4025_vm9, %v4335_v61, %v4325_v11  ;;  %4988 = vmatprep.subr.bf16.mxu0 %v5815_v35  ;;  %5008 = vmatprep.subr.bf16.mxu1 %v5815_v35 }
0x2ed8   :  { %v4029_v60 = vsel %vm183_vm2, %v4028_v2, %v4016_v38  ;;  %v4163_v45 = vsel %vm4030_vm11, %v4162_v20, -inf  ;;  %5004 = vmatprep.mubr.msk.bf16.mxu0 %vm5822_vm12, %v5815_v35  ;;  %5024 = vmatprep.mubr.msk.bf16.mxu1 %vm5822_vm12, %v5815_v35 }
0x2ed9   :  { %4164 = vmax.xlane.f32.xlu1 %v4163_v45  ;;  %v4031_v0 = vsel %vm4030_vm11, %v4029_v60, -inf }
0x2eda   :  { %4032 = vmax.xlane.f32.xlu0 %v4031_v0  ;;  %v4199_v24 = vpop.xlane.xlu1 %4198 }
0x2edb   :  { %v4284_v48 = vpop.xlane.xlu0 %4283  ;;  %v4206_v21 = vsel %vm183_vm2, %v4205_v54, %v4199_v24  ;;  %v5261_v54 = vld [vmem:[#allocation12] sm:$0xff]  }
0x2edc   :  { %v4293_v9 = vsel %vm4027_vm10, %v4292_v59, %v4284_v48  ;;  %v4207_v41 = vsel %vm4030_vm11, %v4206_v21, -inf  ;;  %4989 = vmatpush3.bf16.msra.mxu0 %v5261_v54  ;;  %v7963_v54 = vld [vmem:[#allocation46_spill] sm:$0xff] }
0x2edd   :  { %4990 = vmatprep.subr.bf16.mxu0 %v5815_v35 }
0x2ede   :  { %4120 = vmax.xlane.f32.xlu0 %v4119_v46  ;;  %v4243_v26 = vpop.xlane.xlu1 %4242 }
0x2edf   :  { %v4250_v39 = vsel %vm183_vm2, %v4249_v27, %v4243_v26  ;;  %v4287_v1 = vpop.xlane.xlu0 %4286 }
0x2ee0   :  { %v4251_v23 = vsel %vm4030_vm11, %v4250_v39, -inf  ;;  %v4294_v43 = vsel %vm183_vm2, %v4293_v9, %v4287_v1 }
0x2ee1   :  { %4252 = vmax.xlane.f32.xlu1 %v4251_v23  ;;  %v4295_v19 = vsel %vm4030_vm11, %v4294_v43, -inf }
0x2ee2   :  { %4208 = vmax.xlane.f32.xlu0 %v4207_v41  ;;  %v4331_v5 = vpop.xlane.xlu1 %4330 }
0x2ee3   :  { %v4328_v10 = vpop.xlane.xlu0 %4327 }
0x2ee4   :  { %v4337_v37 = vsel %vm4027_vm10, %v4336_v50, %v4328_v10 }
0x2ee5   :  { %v4338_v29 = vsel %vm183_vm2, %v4337_v37, %v4331_v5 }
0x2ee6   :  { %4296 = vmax.xlane.f32.xlu0 %v4295_v19  ;;  %v4339_v55 = vsel %vm4030_vm11, %v4338_v29, -inf }
0x2ee7   :  { %4340 = vmax.xlane.f32.xlu1 %v4339_v55 }
0x2f5e   :  { %v4077_v58 = vpop.xlane.xlu1 %4076 }
0x2f5f   :  { %v4078_v30 = vsub.f32 %v4074_v57, %v4077_v58 }
0x2f61   :  { %v4079_v18 = vmul.f32 1.442695, %v4078_v30 }
0x2f63   :  { %5541 = vpow2.f32 %v4079_v18 }
0x2f66   :  { %v4165_v34 = vpop.xlane.xlu1 %4164 }
0x2f67   :  { %v4166_v33 = vsub.f32 %v4162_v20, %v4165_v34  ;;  %v4033_v40 = vpop.xlane.xlu0 %4032 }
0x2f68   :  { %v4034_v12 = vsub.f32 %v4029_v60, %v4033_v40 }
0x2f69   :  { %v4167_v11 = vmul.f32 1.442695, %v4166_v33 }
0x2f6a   :  { %v4035_v44 = vmul.f32 1.442695, %v4034_v12 }
0x2f6b   :  { %5543 = vpow2.f32 %v4167_v11  ;;  %v4121_v56 = vpop.xlane.xlu0 %4120 }
0x2f6c   :  { %5545 = vpow2.f32 %v4035_v44  ;;  %v4122_v28 = vsub.f32 %v4118_v42, %v4121_v56 }
0x2f6d   :  { %v7744_v6 = vpop.eup %5541 }
0x2f6e   :  { %v4123_v17 = vmul.f32 1.442695, %v4122_v28  ;;  %v4253_v53 = vpop.xlane.xlu1 %4252  ;;  %v4081_v7 = vsel %vm4030_vm11, %v7744_v6, 0.0 }
0x2f6f   :  { %v4254_v57 = vsub.f32 %v4250_v39, %v4253_v53  ;;  %v4209_v16 = vpop.xlane.xlu0 %4208  ;;  %4082 = vadd.xlane.f32.xlu1 %v4081_v7  ;;  %v5816_v53 = vmov 2   ;;  %v5817_v7 = vmov 3  }
0x2f70   :  { %5547 = vpow2.f32 %v4123_v17  ;;  %v4210_v13 = vsub.f32 %v4206_v21, %v4209_v16  ;;  %v5818_v16 = vmov 4  }
0x2f71   :  { %v4255_v63 = vmul.f32 1.442695, %v4254_v57  ;;  %v5263_v57 = vld [vmem:[#allocation12 + $0x10] sm:$0xff]  }
0x2f72   :  { %v4211_v14 = vmul.f32 1.442695, %v4210_v13  ;;  %v5819_v13 = vmov 6  }
0x2f73   :  { %5549 = vpow2.f32 %v4255_v63  ;;  %v4297_v8 = vpop.xlane.xlu0 %4296  ;;  %v5264_v63 = vld [vmem:[#allocation12 + $0x18] sm:$0xff]  }
0x2f74   :  { %5551 = vpow2.f32 %v4211_v14  ;;  %v4298_v25 = vsub.f32 %v4294_v43, %v4297_v8  ;;  %v4341_v2 = vpop.xlane.xlu1 %4340  ;;  %v5820_v14 = vmov 5   ;;  %v5821_v8 = vmov 7  }
0x2f75   :  { %v5544_v20 = vpop.eup %5543  ;;  %v4342_v38 = vsub.f32 %v4338_v29, %v4341_v2  ;;  %v5266_v2 = vld [vmem:[#allocation12 + $0x28] sm:$0xff]  }
0x2f76   :  { %v5546_v4 = vpop.eup %5545  ;;  %v4299_v60 = vmul.f32 1.442695, %v4298_v25  ;;  %v4169_v45 = vsel %vm4030_vm11, %v5544_v20, 0.0  ;;  %v5265_v25 = vld [vmem:[#allocation12 + $0x20] sm:$0xff]  }
0x2f77   :  { %v4343_v62 = vmul.f32 1.442695, %v4342_v38  ;;  %4170 = vadd.xlane.f32.xlu1 %v4169_v45  ;;  %v4037_v32 = vsel %vm4030_vm11, %v5546_v4, 0.0  ;;  %v5268_v38 = vld [vmem:[#allocation12 + $0x38] sm:$0xff]   ;;  %v5271_v45 = vld [vmem:[#allocation14 + $0x10] sm:$0xff]  }
0x2f78   :  { %5553 = vpow2.f32 %v4299_v60  ;;  %4038 = vadd.xlane.f32.xlu0 %v4037_v32  ;;  %v5270_v60 = vld [vmem:[#allocation14 + $0x8] sm:$0xff]   ;;  %v5273_v32 = vld [vmem:[#allocation14 + $0x20] sm:$0xff]  }
0x2f79   :  { %5555 = vpow2.f32 %v4343_v62  ;;  %v5272_v62 = vld [vmem:[#allocation14 + $0x18] sm:$0xff]  }
0x2f7a   :  { %v5548_v0 = vpop.eup %5547 }
0x2f7b   :  { %v4125_v36 = vsel %vm4030_vm11, %v5548_v0, 0.0 }
0x2f7c   :  { %4126 = vadd.xlane.f32.xlu0 %v4125_v36  ;;  %v7961_v36 = vld [vmem:[#allocation24_spill] sm:$0xff] }
0x2f7d   :  { %v5550_v31 = vpop.eup %5549 }
0x2f7e   :  { %v5552_v42 = vpop.eup %5551  ;;  %v4257_v52 = vsel %vm4030_vm11, %v5550_v31, 0.0 }
0x2f7f   :  { %4258 = vadd.xlane.f32.xlu1 %v4257_v52  ;;  %v4213_v24 = vsel %vm4030_vm11, %v5552_v42, 0.0  ;;  %v7962_v52 = vld [vmem:[#allocation47_spill] sm:$0xff] }
0x2f80   :  { %4214 = vadd.xlane.f32.xlu0 %v4213_v24 }
0x2f82   :  { %v5554_v47 = vpop.eup %5553 }
0x2f83   :  { %v5556_v48 = vpop.eup %5555  ;;  %v4301_v51 = vsel %vm4030_vm11, %v5554_v47, 0.0 }
0x2f84   :  { %4302 = vadd.xlane.f32.xlu0 %v4301_v51  ;;  %v4345_v22 = vsel %vm4030_vm11, %v5556_v48, 0.0 }
0x2f85   :  { %4346 = vadd.xlane.f32.xlu1 %v4345_v22 }
0x2ffc   :  { %v4083_v46 = vpop.xlane.xlu1 %4082 }
0x2ffd   :  { %5557 = vrcp.f32 %v4083_v46 }
0x3004   :  { %v4171_v21 = vpop.xlane.xlu1 %4170 }
0x3005   :  { %v4039_v27 = vpop.xlane.xlu0 %4038 }
0x3006   :  { %5559 = vrcp.f32 %v4039_v27 }
0x3007   :  { %5561 = vrcp.f32 %v4171_v21  ;;  %v5558_v59 = vpop.eup %5557 }
0x3008   :  { %v4085_v10 = vmul.f32 %v5558_v59, %v7744_v6  ;;  %v5262_v6 = vld [vmem:[#allocation12 + $0x8] sm:$0xff]  }
0x3009   :  { %v4127_v26 = vpop.xlane.xlu0 %4126  ;;  %4991 = vmatpush3.bf16.msra.mxu0 %v5262_v6  ;;  %v5277_v6 = vld [vmem:[#allocation15] sm:$0xff]  }
0x300a   :  { %5563 = vrcp.f32 %v4127_v26  ;;  %4992 = vmatprep.subr.bf16.mxu0 %v5815_v35  ;;  %v7964_v26 = vld [vmem:[#allocation40_spill] sm:$0xff] }
0x300c   :  { %v4259_v39 = vpop.xlane.xlu1 %4258 }
0x300d   :  { %5565 = vrcp.f32 %v4259_v39  ;;  %v4215_v1 = vpop.xlane.xlu0 %4214  ;;  %4993 = vmatpush3.bf16.msra.mxu0 %v5263_v57  ;;  %v5280_v57 = vld [vmem:[#allocation15 + $0x18] sm:$0xff]  }
0x300e   :  { %5567 = vrcp.f32 %v4215_v1  ;;  %4994 = vmatprep.subr.bf16.mxu0 %v5815_v35 }
0x3010   :  { %v5560_v23 = vpop.eup %5559 }
0x3011   :  { %v4041_v61 = vmul.f32 %v5560_v23, %v5546_v4  ;;  %v4303_v9 = vpop.xlane.xlu0 %4302  ;;  %v5562_v43 = vpop.eup %5561  ;;  %4995 = vmatpush3.bf16.msra.mxu0 %v5264_v63  ;;  %v5269_v4 = vld [vmem:[#allocation14] sm:$0xff]  }
0x3012   :  { %5569 = vrcp.f32 %v4303_v9  ;;  %v4347_v41 = vpop.xlane.xlu1 %4346  ;;  %v4173_v29 = vmul.f32 %v5562_v43, %v5544_v20  ;;  %4996 = vmatprep.subr.bf16.mxu0 %v5815_v35  ;;  %v5267_v20 = vld [vmem:[#allocation12 + $0x30] sm:$0xff]   ;;  %5009 = vmatpush3.bf16.msra.mxu1 %v5269_v4  ;;  %v4898_v63 = vld [vmem:[%s7828_s11] ss:$0 sm:$0xff] }
0x3013   :  { %5571 = vrcp.f32 %v4347_v41  ;;  %v4086_v5 = vadd.f32 %v4085_v10, %v4041_v61  ;;  %5010 = vmatprep.subr.bf16.mxu1 %v5815_v35  ;;  %v7965_v61 = vld [vmem:[#allocation44_spill] sm:$0xff]  ;;  %v7966_v10 = vld [vmem:[#allocation45_spill] sm:$0xff] }
0x3014   :  { %v5564_v50 = vpop.eup %5563 }
0x3015   :  { %v4129_v37 = vmul.f32 %v5564_v50, %v5548_v0  ;;  %4997 = vmatpush3.bf16.msra.mxu0 %v5265_v25  ;;  %v5274_v0 = vld [vmem:[#allocation14 + $0x28] sm:$0xff]  }
0x3016   :  { %4998 = vmatprep.subr.bf16.mxu0 %v5815_v35  ;;  %5011 = vmatpush3.bf16.msra.mxu1 %v5270_v60  ;;  %v5283_v60 = vld [vmem:[#allocation15 + $0x30] sm:$0xff]  }
0x3017   :  { %v5566_v19 = vpop.eup %5565  ;;  %v4130_v55 = vadd.f32 %v4129_v37, %v4086_v5  ;;  %5012 = vmatprep.subr.bf16.mxu1 %v5815_v35 }
0x3018   :  { %v5568_v58 = vpop.eup %5567  ;;  %v4261_v34 = vmul.f32 %v5566_v19, %v5550_v31  ;;  %v3690_v31 = vrot.slane %v7509_v15, %v7961_v36  ;;  %v7967_v19 = vld [vmem:[#allocation34_spill] sm:$0xff] }
0x3019   :  { %v4174_v30 = vadd.f32 %v4173_v29, %v4130_v55  ;;  %v4217_v18 = vmul.f32 %v5568_v58, %v5552_v42  ;;  %4999 = vmatpush3.bf16.msra.mxu0 %v5266_v2 }
0x301a   :  { %5000 = vmatprep.subr.bf16.mxu0 %v5815_v35  ;;  %5013 = vmatpush3.bf16.msra.mxu1 %v5271_v45  ;;  %v3930_v42 = vadd.f32 %v7527_v3, %v3690_v31  ;;  %v3933_v24 = vadd.f32 %v7962_v52, %v3690_v31  ;;  %v3938_v46 = vadd.f32 %v7963_v54, %v3690_v31  ;;  %v5284_v45 = vld [vmem:[#allocation15 + $0x38] sm:$0xff]  }
0x301b   :  { %v4218_v33 = vadd.f32 %v4217_v18, %v4174_v30  ;;  %5014 = vmatprep.subr.bf16.mxu1 %v5815_v35  ;;  %v3941_v39 = vadd.f32 %v7964_v26, %v3690_v31  ;;  %v3946_v15 = vadd.f32 %v7965_v61, %v3690_v31  ;;  %v3949_v50 = vadd.f32 %v7966_v10, %v3690_v31  ;;  %v7968_v18 = vld [vmem:[#allocation36_spill] sm:$0xff] }
0x301c   :  { %v5570_v40 = vpop.eup %5569  ;;  %v3954_v29 = vadd.f32 %v7967_v19, %v3690_v31 }
0x301d   :  { %v5572_v12 = vpop.eup %5571  ;;  %v4262_v11 = vadd.f32 %v4261_v34, %v4218_v33  ;;  %v4305_v44 = vmul.f32 %v5570_v40, %v5554_v47  ;;  %5001 = vmatpush3.bf16.msra.mxu0 %v5267_v20  ;;  %v3957_v34 = vadd.f32 %v7968_v18, %v3690_v31 }
0x301e   :  { %v4349_v56 = vmul.f32 %v5572_v12, %v5556_v48  ;;  %5002 = vmatprep.subr.bf16.mxu0 %v5815_v35  ;;  %5015 = vmatpush3.bf16.msra.mxu1 %v5272_v62  ;;  %v4907_v62 = vld [vmem:[%s7830_s13] ss:$0 sm:$0xff]  ;;  %s5769_s13 = scalar_lea.vmem %s4755_s22, 128 }
0x301f   :  { %v4306_v28 = vadd.f32 %v4305_v44, %v4262_v11  ;;  %5016 = vmatprep.subr.bf16.mxu1 %v5815_v35  ;;  %p5770_p6 = scmp.ne.s32.totalorder %s4755_s22, %s5769_s13  ;;  %p5775_p8 = scmp.lt.s32.totalorder %s5769_s13, %s5769_s13 }
0x3021   :  { %v4350_v17 = vadd.f32 %v4349_v56, %v4306_v28  ;;  %5003 = vmatpush3.bf16.msra.mxu0 %v5268_v38  ;;  %v5275_v28 = vld [vmem:[#allocation14 + $0x30] sm:$0xff]   ;;  %p5776_p9 = por %p5775_p8, %p5774_p7 }
0x3022   :  { %5028 = vmatprep.subr.bf16.mxu0 %v5815_v35  ;;  %5017 = vmatpush3.bf16.msra.mxu1 %v5273_v32 }
0x3023   :  { %4361 = vperm.xlu1 %5073, %v4350_v17   ;;  %4354 = vperm.xlu0 %5072, %v4350_v17   ;;  %p5777_p10 = pnand %p5776_p9, %p5770_p6 }
0x3024   :  { %5018 = vmatprep.subr.bf16.mxu1 %v5815_v35 }
0x3026   :  { %5019 = vmatpush3.bf16.msra.mxu1 %v5274_v0 }
0x3027   :  { %5074 = vset.pattern.permute.xlu1 %v5816_v53  ;;  %5075 = vset.pattern.permute.xlu0 %v5817_v7  ;;  %v5278_v53 = vld [vmem:[#allocation15 + $0x8] sm:$0xff]   ;;  %v5279_v7 = vld [vmem:[#allocation15 + $0x10] sm:$0xff]  }
0x3028   :  { %4368 = vperm.xlu1 %5074, %v4350_v17   ;;  %4375 = vperm.xlu0 %5075, %v4350_v17  }
0x3029   :  { %5020 = vmatprep.subr.bf16.mxu1 %v5815_v35 }
0x302a   :  { %5021 = vmatpush3.bf16.msra.mxu1 %v5275_v28 }
0x302b   :  { %5022 = vmatprep.subr.bf16.mxu1 %v5815_v35 }
0x302c   :  { %5076 = vset.pattern.permute.xlu1 %v5818_v16  ;;  %5078 = vset.pattern.permute.xlu0 %v5819_v13  ;;  %v5281_v16 = vld [vmem:[#allocation15 + $0x20] sm:$0xff]   ;;  %v5282_v13 = vld [vmem:[#allocation15 + $0x28] sm:$0xff]  }
0x302d   :  { %4382 = vperm.xlu1 %5076, %v4350_v17   ;;  %4396 = vperm.xlu0 %5078, %v4350_v17  }
0x3031   :  { %5077 = vset.pattern.permute.xlu1 %v5820_v14  ;;  %5080 = vset.pattern.permute.xlu0 %v5821_v8 }
0x3032   :  { %4389 = vperm.xlu1 %5077, %v4350_v17  }
0x3036   :  { %5079 = vset.pattern.permute.xlu1 %v5821_v8 }
0x3037   :  { %4403 = vperm.xlu1 %5079, %v4350_v17   ;;  %v5276_v17 = vld [vmem:[#allocation14 + $0x38] sm:$0xff]  }
0x3038   :  { %5023 = vmatpush3.bf16.msra.mxu1 %v5276_v17 }
0x30a2   :  { %v4362_v47 = vpop.permute.xlu1 %4361  ;;  %v4355_v48 = vpop.permute.xlu0 %4354 }
0x30a3   :  { %v4364_v51 = vmul.f32 %v4362_v47, %v3933_v24  ;;  %v4357_v22 = vmul.f32 %v4355_v48, %v3930_v42  ;;  %v4916_v47 = vld [vmem:[%s7832_s15] ss:$0 sm:$0xff] }
0x30a5   :  { %v4365_v49 = vadd.f32 %v4364_v51, %v4357_v22 }
0x30a7   :  { %v4369_v27 = vpop.permute.xlu1 %4368  ;;  %v4376_v21 = vpop.permute.xlu0 %4375 }
0x30a8   :  { %v4371_v1 = vmul.f32 %v4369_v27, %v3938_v46  ;;  %v4378_v23 = vmul.f32 %v4376_v21, %v3941_v39 }
0x30aa   :  { %v4372_v59 = vadd.f32 %v4371_v1, %v4365_v49 }
0x30ac   :  { %v4379_v9 = vadd.f32 %v4378_v23, %v4372_v59  ;;  %v4383_v3 = vpop.permute.xlu1 %4382  ;;  %v4397_v5 = vpop.permute.xlu0 %4396 }
0x30ad   :  { %v4385_v41 = vmul.f32 %v4383_v3, %v3946_v15  ;;  %v4399_v58 = vmul.f32 %v4397_v5, %v3954_v29 }
0x30af   :  { %v4386_v43 = vadd.f32 %v4385_v41, %v4379_v9 }
0x30b1   :  { %v4390_v37 = vpop.permute.xlu1 %4389 }
0x30b2   :  { %v4392_v55 = vmul.f32 %v4390_v37, %v3949_v50 }
0x30b4   :  { %v4393_v30 = vadd.f32 %v4392_v55, %v4386_v43 }
0x30b6   :  { %v4404_v33 = vpop.permute.xlu1 %4403  ;;  %v4400_v40 = vadd.f32 %v4399_v58, %v4393_v30 }
0x30b7   :  { %v4406_v12 = vmul.f32 %v4404_v33, %v3957_v34 }
0x30b9   :  { %v4407_v11 = vadd.f32 %v4406_v12, %v4400_v40 }
0x30bb   :  { %v4408_v44 = vmul.f32 0.125, %v4407_v11 }
0x30bd   :  { %v4425_v56 = vpack.c.bf16 %v4408_v44, %v4408_v44 }
0x30bf   :  { %5005 = vmatmul.mubr.bf16.vlgmr.msra.gmra.mrb[112].mxu0 %v4425_v56 }
0x30c0   :  { %5044 = vmatprep.mubr.msk.bf16.mxu0 %vm5822_vm12, %v5815_v35  ;;  %5029 = vmatpush3.bf16.msra.mxu0 %v5277_v6 }
0x30c1   :  { %5030 = vmatprep.subr.bf16.mxu0 %v5815_v35 }
0x30c4   :  { %5031 = vmatpush3.bf16.msra.mxu0 %v5278_v53 }
0x30c5   :  { %5032 = vmatprep.subr.bf16.mxu0 %v5815_v35 }
0x30c8   :  { %5033 = vmatpush3.bf16.msra.mxu0 %v5279_v7 }
0x30c9   :  { %5034 = vmatprep.subr.bf16.mxu0 %v5815_v35 }
0x30cc   :  { %5035 = vmatpush3.bf16.msra.mxu0 %v5280_v57 }
0x30cd   :  { %5036 = vmatprep.subr.bf16.mxu0 %v5815_v35 }
0x30d0   :  { %5037 = vmatpush3.bf16.msra.mxu0 %v5281_v16 }
0x30d1   :  { %5038 = vmatprep.subr.bf16.mxu0 %v5815_v35 }
0x30d4   :  { %5039 = vmatpush3.bf16.msra.mxu0 %v5282_v13 }
0x30d5   :  { %5040 = vmatprep.subr.bf16.mxu0 %v5815_v35 }
0x30d8   :  { %5041 = vmatpush3.bf16.msra.mxu0 %v5283_v60 }
0x30d9   :  { %5042 = vmatprep.subr.bf16.mxu0 %v5815_v35 }
0x30dc   :  { %5043 = vmatpush3.bf16.msra.mxu0 %v5284_v45 }
0x3192   :  { %v4515_v14 = vpop.f32.mrb[112].mxu0 }
0x3193   :  { %v4516_v8 = vadd.f32 %v4898_v63, %v4515_v14  ;;  %v5006_v25 = vpop.f32.mrb[113].mxu0 }
0x3194   :  { %v4518_v2 = vpop.f32.mrb[114].mxu0 }
0x3195   :  { %v4521_v20 = vmax.f32 %v4516_v8, 0.0  ;;  %v5007_v38 = vpop.f32.mrb[115].mxu0 }
0x3197   :  { %v4538_v4 = vpack.c.bf16 %v4521_v20, %v4521_v20 }
0x3199   :  { %5025 = vmatmul.mubr.bf16.vlgmr.msra.gmra.mrb[104].mxu1 %v4538_v4 }
0x326c   :  { %v4628_v32 = vpop.f32.mrb[104].mxu1 }
0x326d   :  { %v4629_v0 = vadd.f32 %v4907_v62, %v4628_v32  ;;  %v5026_v36 = vpop.f32.mrb[105].mxu1 }
0x326e   :  { %v4631_v31 = vpop.f32.mrb[106].mxu1 }
0x326f   :  { %v4634_v42 = vmax.f32 %v4629_v0, 0.0  ;;  %v5027_v52 = vpop.f32.mrb[107].mxu1 }
0x3271   :  { %v4651_v24 = vpack.c.bf16 %v4634_v42, %v4634_v42 }
0x3273   :  { %5045 = vmatmul.mubr.bf16.vlgmr.msra.gmra.mrb[116].mxu0 %v4651_v24 }
0x3346   :  { %v4741_v35 = vpop.f32.mrb[116].mxu0 }
0x3347   :  { %v4742_v48 = vadd.f32 %v4916_v47, %v4741_v35  ;;  %v5046_v51 = vpop.f32.mrb[117].mxu0 }
0x3348   :  { %v4744_v22 = vpop.f32.mrb[118].mxu0 }
0x3349   :  { %4747 = vst [vmem:[#allocation17] sm:$0xff] %v4742_v48  ;;  %v5047_v49 = vpop.f32.mrb[119].mxu0 }
0x334a   :  { %5780 = shalt.err (!%p5777_p10)
}
0x334b   :  { %s5781_s15 = scalar_lea.hbm %s7833_s16, 128 }
0x334c   :  { %p5782_p11 = scmp.ne.s32.totalorder %s7833_s16, %s5781_s15  ;;  %p5785_p12 = scmp.lt.u32.totalorder %s5781_s15, %s7833_s16 }
0x334e   :  { %p5787_p13 = pnand %p5785_p12, %p5782_p11 }
0x3350   :  { %5790 = shalt.err (!%p5787_p13)
}
0x3351   :  { %4757 = dma.vmem_to_hbm [thread:$0]  %s4755_s22, 128, %s7833_s16, [#allocation8]  }
0x3352   :  { %5799 = dma.done.wait [#allocation8], 128  }
0x3353   :  { %5800 = vsyncadd [#allocation8], 4294967168 }
0x3354   :  { %4761 = vsyncpa [#allocation7], 1 }
0x3355   :  { %4762 = vsyncpa [#allocation10], 1 }
0x3356   :  { %4763 = vsyncpa [#allocation13], 1 }
0x3357   :  { %4764 = vsyncpa [#allocation16], 1 }
0x3358   :  { %4765 = vsyncpa [#allocation8], 1 }

</bundles_post_ra>
